<compile_context>
chip_gen: v5e
topology: v5e:2x2
jax: 0.10.0
libtpu: 0.0.40
codegen_flags: <defaults>
</compile_context>

<pallas_src>
import functools

import jax
import jax.numpy as jnp
from jax.experimental import pallas as pl
from jax.experimental.pallas import tpu as pltpu


# ----------------------------------------------------------------------------
# in-kernel building blocks (traced inline inside the fused kernel)
# ----------------------------------------------------------------------------
def _mm(x, w):
    """f32 matmul on the MXU.  Degenerate K==1 contractions become a VPU
    broadcast-multiply; >2-D inputs are folded to 2-D so Mosaic always sees a
    rank-2 dot."""
    if x.shape[-1] == 1:                       # (..., 1) @ (1, K) == broadcast
        return x * w
    if x.ndim == 2:
        return jnp.dot(x, w, preferred_element_type=jnp.float32)
    y = jnp.dot(x.reshape(-1, x.shape[-1]), w,
                preferred_element_type=jnp.float32)
    return y.reshape(*x.shape[:-1], w.shape[-1])


def _layernorm(y, g, b):
    mu = jnp.mean(y, axis=-1, keepdims=True)
    var = jnp.mean((y - mu) ** 2, axis=-1, keepdims=True)
    return (y - mu) * jax.lax.rsqrt(var + 1e-5) * g + b


def _grn(p, x):
    """Gated residual network (dropout is identity in eval mode)."""
    skip = x if "w_skip" not in p else _mm(x, p["w_skip"]) + p["b_skip"]
    h = jnp.maximum(_mm(x, p["w_in"]) + p["b_in"], 0.0)       # relu
    h = _mm(h, p["w_hid"]) + p["b_hid"]
    g = jax.nn.sigmoid(_mm(h, p["w_gate"]) + p["b_gate"])
    y = _mm(h * g, p["w_out"]) + p["b_out"] + skip
    return _layernorm(y, p["ln_g"], p["ln_b"])


def _softmax_last(x):
    m = jnp.max(x, axis=-1, keepdims=True)
    e = jnp.exp(x - m)
    # divide -> EUP reciprocal (frees VALU slots); ~1e-3 rel. error accepted.
    return e * pl.reciprocal(jnp.sum(e, axis=-1, keepdims=True), approx=True)


# ----------------------------------------------------------------------------
# the single fused kernel
# ----------------------------------------------------------------------------
def make_tft_kernel(treedef, n_leaves, batch, seq_len, horizon, hidden,
                    num_heads):
    B, H, NH = batch, hidden, num_heads
    HD = H // NH
    T = seq_len + horizon

    def kernel(xs_ref, xp_ref, xf_ref, *refs):
        param_refs = refs[:n_leaves]
        out_ref = refs[n_leaves]                              # (B, Hor*nq)
        p = jax.tree_util.tree_unflatten(
            treedef, [r[...] for r in param_refs])

        xs = xs_ref[...]                                      # (B, Ns)
        xp = xp_ref[...]                                      # (B, S, Np)
        xf = xf_ref[...]                                      # (B, Hor, Nf)

        # ---- variable selection (GRN logits -> softmax -> weighted sum) ----
        st_w = _softmax_last(_grn(p["static_vsn"], xs))            # (B, Ns)
        static_emb = jnp.sum(xs * st_w, axis=-1, keepdims=True)    # (B, 1)

        pw = _softmax_last(_grn(p["past_vsn"], xp.reshape(B, -1)))  # (B, Np)
        past_emb = jnp.sum(xp * pw[:, None, :], axis=-1,
                           keepdims=True)                           # (B, S, 1)

        fw = _softmax_last(_grn(p["future_vsn"], xf.reshape(B, -1)))  # (B, Nf)
        fut_emb = jnp.sum(xf * fw[:, None, :], axis=-1,
                          keepdims=True)                            # (B, Hor, 1)

        # ---- static enrichment, broadcast onto the temporal axis ------------
        static_ctx = _grn(p["static_enrichment"], static_emb)      # (B, H)
        temporal = jnp.concatenate([past_emb, fut_emb], axis=1)    # (B, T, 1)
        enr = temporal + static_ctx[:, None, :]                    # (B, T, H)

        # ---- LSTM encoder ----------------------------------------------------
        lstm = p["lstm"]
        # input->hidden matmul hoisted out of the serial loop; all four gates
        # packed into one lane-dense (T, B, 4H) value (4H == 128 lanes).
        zx = _mm(enr, lstm["w_ih"]) + lstm["b"]                    # (B, T, 4H)
        zx = jnp.transpose(zx, (1, 0, 2))                          # (T, B, 4H)
        w_hh = lstm["w_hh"]                                        # (H, 4H)

        h = jnp.zeros((B, H), jnp.float32)
        c = jnp.zeros((B, H), jnp.float32)
        hs = []
        for t in range(T):        # short fixed trip count -> fully unrolled
            z = zx[t] + jnp.dot(h, w_hh,
                                preferred_element_type=jnp.float32)  # (B, 4H)
            i = jax.nn.sigmoid(z[:, 0 * H:1 * H])
            f = jax.nn.sigmoid(z[:, 1 * H:2 * H])
            g = jnp.tanh(z[:, 2 * H:3 * H])
            o = jax.nn.sigmoid(z[:, 3 * H:4 * H])
            c = f * c + i * g
            h = o * jnp.tanh(c)
            hs.append(h)
        lstm_out = jnp.stack(hs, axis=1)                           # (B, T, H)

        # ---- multi-head self-attention (eval mode, no mask — as reference) --
        a = p["attn"]
        qkv = _mm(lstm_out, a["w_qkv"]) + a["b_qkv"]               # (B, T, 3H)

        def to_heads(z):                     # (B, T, H) -> (B*NH, T, HD)
            z = z.reshape(B, T, NH, HD)
            z = jnp.transpose(z, (0, 2, 1, 3))                     # (B,NH,T,HD)
            return z.reshape(B * NH, T, HD)

        scale = 1.0 / (HD ** 0.5)
        qh = to_heads(qkv[:, :, 0 * H:1 * H]) * scale
        kh = to_heads(qkv[:, :, 1 * H:2 * H])
        vh = to_heads(qkv[:, :, 2 * H:3 * H])

        s = jnp.einsum("hqd,hkd->hqk", qh, kh,
                       preferred_element_type=jnp.float32)         # (B*NH,T,T)
        pr = _softmax_last(s)
        ctx = jnp.einsum("hqk,hkd->hqd", pr, vh,
                         preferred_element_type=jnp.float32)       # (B*NH,T,HD)
        ctx = jnp.transpose(ctx.reshape(B, NH, T, HD),
                            (0, 2, 1, 3)).reshape(B, T, H)         # (B, T, H)
        attn = _mm(ctx, a["w_out"]) + a["b_out"]                   # (B, T, H)

        # ---- gate GRN + residual layer norm ----------------------------------
        attn_g = _grn(p["attn_gate"], attn)
        attn_out = _layernorm(attn_g + lstm_out,
                              p["attn_norm"]["g"], p["attn_norm"]["b"])

        # ---- decoder GRN over the horizon + quantile head ---------------------
        dec = _grn(p["decoder_grn"], attn_out[:, seq_len:, :])     # (B, Hor, H)
        dec_flat = dec.reshape(B, horizon * H)                     # (B, 128)
        op = p["out_proj"]
        out_ref[...] = _mm(dec_flat, op["w"]) + op["b"]            # (B, Hor*nq)

    return kernel


# ----------------------------------------------------------------------------
# pallas_call plumbing (whole problem resident in VMEM, trivial 1-step grid)
# ----------------------------------------------------------------------------
def _full_specs(arrays):
    return [pl.BlockSpec(a.shape, lambda i, n=a.ndim: (0,) * n) for a in arrays]


def tft_forward(params, x_static, x_past, x_future, *, seq_len, horizon,
                hidden_dim, num_heads, num_quantiles):
    B = x_static.shape[0]
    leaves, treedef = jax.tree_util.tree_flatten(params)
    kern = make_tft_kernel(treedef, len(leaves), B, seq_len, horizon,
                           hidden_dim, num_heads)
    args = (x_static, x_past, x_future, *leaves)
    out = pl.pallas_call(
        kern,
        out_shape=jax.ShapeDtypeStruct((B, horizon * num_quantiles),
                                       jnp.float32),
        grid=(1,),
        in_specs=_full_specs(args),
        out_specs=pl.BlockSpec((B, horizon * num_quantiles), lambda i: (0, 0)),
        compiler_params=pltpu.CompilerParams(
            dimension_semantics=("arbitrary",),
            # explicit budget: total footprint is <1 MiB, far inside every
            # generation's VMEM (64 MiB v7x / 128 MiB v5e,v6e).
            vmem_limit_bytes=32 * 1024 * 1024),
    )(*args)
    return out.reshape(B, horizon, num_quantiles)


# ----------------------------------------------------------------------------
# parameter initialization (deterministic, PyTorch-style uniform fan-in)
# ----------------------------------------------------------------------------
def _uniform(key, shape, bound):
    return jax.random.uniform(key, shape, jnp.float32, -bound, bound)


def linear_init(key, din, dout):
    k1, k2 = jax.random.split(key)
    bound = 1.0 / (din ** 0.5)
    return _uniform(k1, (din, dout), bound), _uniform(k2, (1, dout), bound)


def grn_init(key, din, hidden, dout):
    ks = jax.random.split(key, 5)
    p = {}
    p["w_in"], p["b_in"] = linear_init(ks[0], din, hidden)
    p["w_hid"], p["b_hid"] = linear_init(ks[1], hidden, hidden)
    p["w_gate"], p["b_gate"] = linear_init(ks[2], hidden, hidden)
    p["w_out"], p["b_out"] = linear_init(ks[3], hidden, dout)
    p["ln_g"] = jnp.ones((1, dout), jnp.float32)
    p["ln_b"] = jnp.zeros((1, dout), jnp.float32)
    if din != dout:
        p["w_skip"], p["b_skip"] = linear_init(ks[4], din, dout)
    return p


def init_tft_params(key, ns, np_, nf, seq, hor, hdim, nheads, nq):
    ks = jax.random.split(key, 9)
    bound = 1.0 / (hdim ** 0.5)
    return {
        "static_vsn": grn_init(ks[0], ns, hdim, ns),
        # TODO(synk): VSN GRN input dims patched to the flattened sizes
        # (seq*num_vars); the reference layer sizes cannot execute as written.
        "past_vsn": grn_init(ks[1], seq * np_, hdim, np_),
        "future_vsn": grn_init(ks[2], hor * nf, hdim, nf),
        # TODO(synk): static embedding collapses to a scalar in the reference
        # math; enrichment GRN input dim patched to 1.
        "static_enrichment": grn_init(ks[3], 1, hdim, hdim),
        "lstm": {
            # i|f|g|o gates packed along the last (lane) axis.
            "w_ih": _uniform(jax.random.fold_in(ks[4], 0), (hdim, 4 * hdim), bound),
            "w_hh": _uniform(jax.random.fold_in(ks[4], 1), (hdim, 4 * hdim), bound),
            # TODO(synk): single bias == b_ih + b_hh of the PyTorch LSTM.
            "b": _uniform(jax.random.fold_in(ks[4], 2), (1, 4 * hdim), bound),
        },
        "attn": {
            # q|k|v packed along the last (lane) axis.
            "w_qkv": _uniform(jax.random.fold_in(ks[5], 0), (hdim, 3 * hdim), bound),
            "b_qkv": jnp.zeros((1, 3 * hdim), jnp.float32),
            "w_out": _uniform(jax.random.fold_in(ks[5], 1), (hdim, hdim), bound),
            "b_out": jnp.zeros((1, hdim), jnp.float32),
        },
        "attn_gate": grn_init(ks[6], hdim, hdim, hdim),
        "attn_norm": {"g": jnp.ones((1, hdim), jnp.float32),
                      "b": jnp.zeros((1, hdim), jnp.float32)},
        "decoder_grn": grn_init(ks[7], hdim, hdim, hdim),
        "out_proj": dict(zip(("w", "b"),
                             linear_init(ks[8], hdim * hor, hor * nq))),
    }


# ----------------------------------------------------------------------------
if __name__ == "__main__":
    B = 2
    NUM_STATIC, NUM_PAST, NUM_FUTURE = 3, 4, 2
    SEQ_LEN, HORIZON = 8, 4
    HIDDEN, NUM_HEADS = 32, 4
    QUANTILES = (0.1, 0.5, 0.9)

    root = jax.random.PRNGKey(0)
    k_params, k_data = jax.random.split(root)
    params = init_tft_params(k_params, NUM_STATIC, NUM_PAST, NUM_FUTURE,
                             SEQ_LEN, HORIZON, HIDDEN, NUM_HEADS,
                             len(QUANTILES))

    k1, k2, k3 = jax.random.split(k_data, 3)
    x_static = jax.random.normal(k1, (B, NUM_STATIC), jnp.float32)
    x_past = jax.random.normal(k2, (B, SEQ_LEN, NUM_PAST), jnp.float32)
    x_future = jax.random.normal(k3, (B, HORIZON, NUM_FUTURE), jnp.float32)

    fwd = jax.jit(functools.partial(
        tft_forward, seq_len=SEQ_LEN, horizon=HORIZON, hidden_dim=HIDDEN,
        num_heads=NUM_HEADS, num_quantiles=len(QUANTILES)))

    out = fwd(params, x_static, x_past, x_future)
    out = jax.block_until_ready(out)

    assert out.shape == (B, HORIZON, len(QUANTILES)), out.shape
    assert bool(jnp.all(jnp.isfinite(out)))
    print("KERNEL_OK")
</pallas_src>

<mosaic_0001>
module attributes {stable_mosaic.version = 11 : i64} {
  func.func @kernel(%arg0: i32, %arg1: memref<2x3xf32, #tpu.memory_space<vmem>>, %arg2: memref<2x8x4xf32, #tpu.memory_space<vmem>>, %arg3: memref<2x4x2xf32, #tpu.memory_space<vmem>>, %arg4: memref<1x32xf32, #tpu.memory_space<vmem>>, %arg5: memref<1x96xf32, #tpu.memory_space<vmem>>, %arg6: memref<32x32xf32, #tpu.memory_space<vmem>>, %arg7: memref<32x96xf32, #tpu.memory_space<vmem>>, %arg8: memref<1x32xf32, #tpu.memory_space<vmem>>, %arg9: memref<1x32xf32, #tpu.memory_space<vmem>>, %arg10: memref<1x32xf32, #tpu.memory_space<vmem>>, %arg11: memref<1x32xf32, #tpu.memory_space<vmem>>, %arg12: memref<1x32xf32, #tpu.memory_space<vmem>>, %arg13: memref<1x32xf32, #tpu.memory_space<vmem>>, %arg14: memref<32x32xf32, #tpu.memory_space<vmem>>, %arg15: memref<32x32xf32, #tpu.memory_space<vmem>>, %arg16: memref<32x32xf32, #tpu.memory_space<vmem>>, %arg17: memref<32x32xf32, #tpu.memory_space<vmem>>, %arg18: memref<1x32xf32, #tpu.memory_space<vmem>>, %arg19: memref<1x32xf32, #tpu.memory_space<vmem>>, %arg20: memref<1x32xf32, #tpu.memory_space<vmem>>, %arg21: memref<1x32xf32, #tpu.memory_space<vmem>>, %arg22: memref<1x32xf32, #tpu.memory_space<vmem>>, %arg23: memref<1x32xf32, #tpu.memory_space<vmem>>, %arg24: memref<1x32xf32, #tpu.memory_space<vmem>>, %arg25: memref<1x32xf32, #tpu.memory_space<vmem>>, %arg26: memref<32x32xf32, #tpu.memory_space<vmem>>, %arg27: memref<32x32xf32, #tpu.memory_space<vmem>>, %arg28: memref<32x32xf32, #tpu.memory_space<vmem>>, %arg29: memref<32x32xf32, #tpu.memory_space<vmem>>, %arg30: memref<1x32xf32, #tpu.memory_space<vmem>>, %arg31: memref<1x32xf32, #tpu.memory_space<vmem>>, %arg32: memref<1x32xf32, #tpu.memory_space<vmem>>, %arg33: memref<1x2xf32, #tpu.memory_space<vmem>>, %arg34: memref<1x2xf32, #tpu.memory_space<vmem>>, %arg35: memref<1x2xf32, #tpu.memory_space<vmem>>, %arg36: memref<1x2xf32, #tpu.memory_space<vmem>>, %arg37: memref<32x32xf32, #tpu.memory_space<vmem>>, %arg38: memref<32x32xf32, #tpu.memory_space<vmem>>, %arg39: memref<8x32xf32, #tpu.memory_space<vmem>>, %arg40: memref<32x2xf32, #tpu.memory_space<vmem>>, %arg41: memref<8x2xf32, #tpu.memory_space<vmem>>, %arg42: memref<1x128xf32, #tpu.memory_space<vmem>>, %arg43: memref<32x128xf32, #tpu.memory_space<vmem>>, %arg44: memref<32x128xf32, #tpu.memory_space<vmem>>, %arg45: memref<1x12xf32, #tpu.memory_space<vmem>>, %arg46: memref<128x12xf32, #tpu.memory_space<vmem>>, %arg47: memref<1x32xf32, #tpu.memory_space<vmem>>, %arg48: memref<1x32xf32, #tpu.memory_space<vmem>>, %arg49: memref<1x32xf32, #tpu.memory_space<vmem>>, %arg50: memref<1x4xf32, #tpu.memory_space<vmem>>, %arg51: memref<1x4xf32, #tpu.memory_space<vmem>>, %arg52: memref<1x4xf32, #tpu.memory_space<vmem>>, %arg53: memref<1x4xf32, #tpu.memory_space<vmem>>, %arg54: memref<32x32xf32, #tpu.memory_space<vmem>>, %arg55: memref<32x32xf32, #tpu.memory_space<vmem>>, %arg56: memref<32x32xf32, #tpu.memory_space<vmem>>, %arg57: memref<32x4xf32, #tpu.memory_space<vmem>>, %arg58: memref<32x4xf32, #tpu.memory_space<vmem>>, %arg59: memref<1x32xf32, #tpu.memory_space<vmem>>, %arg60: memref<1x32xf32, #tpu.memory_space<vmem>>, %arg61: memref<1x32xf32, #tpu.memory_space<vmem>>, %arg62: memref<1x32xf32, #tpu.memory_space<vmem>>, %arg63: memref<1x32xf32, #tpu.memory_space<vmem>>, %arg64: memref<1x32xf32, #tpu.memory_space<vmem>>, %arg65: memref<1x32xf32, #tpu.memory_space<vmem>>, %arg66: memref<32x32xf32, #tpu.memory_space<vmem>>, %arg67: memref<32x32xf32, #tpu.memory_space<vmem>>, %arg68: memref<1x32xf32, #tpu.memory_space<vmem>>, %arg69: memref<32x32xf32, #tpu.memory_space<vmem>>, %arg70: memref<1x32xf32, #tpu.memory_space<vmem>>, %arg71: memref<1x32xf32, #tpu.memory_space<vmem>>, %arg72: memref<1x32xf32, #tpu.memory_space<vmem>>, %arg73: memref<1x32xf32, #tpu.memory_space<vmem>>, %arg74: memref<1x3xf32, #tpu.memory_space<vmem>>, %arg75: memref<1x3xf32, #tpu.memory_space<vmem>>, %arg76: memref<1x3xf32, #tpu.memory_space<vmem>>, %arg77: memref<32x32xf32, #tpu.memory_space<vmem>>, %arg78: memref<32x32xf32, #tpu.memory_space<vmem>>, %arg79: memref<3x32xf32, #tpu.memory_space<vmem>>, %arg80: memref<32x3xf32, #tpu.memory_space<vmem>>, %arg81: memref<2x12xf32, #tpu.memory_space<vmem>>) attributes {dimension_semantics = [#tpu.dimension_semantics<arbitrary>], iteration_bounds = array<i64: 1>, scalar_prefetch = 0 : i64, scratch_operands = 0 : i64, tpu.core_type = #tpu.core_type<tc>, window_params = [{pipeline_mode = #tpu.pipeline_mode<synchronous>, transform_indices = @transform_0, window_bounds = array<i64: 2, 3>}, {pipeline_mode = #tpu.pipeline_mode<synchronous>, transform_indices = @transform_1, window_bounds = array<i64: 2, 8, 4>}, {pipeline_mode = #tpu.pipeline_mode<synchronous>, transform_indices = @transform_2, window_bounds = array<i64: 2, 4, 2>}, {pipeline_mode = #tpu.pipeline_mode<synchronous>, transform_indices = @transform_3, window_bounds = array<i64: 1, 32>}, {pipeline_mode = #tpu.pipeline_mode<synchronous>, transform_indices = @transform_4, window_bounds = array<i64: 1, 96>}, {pipeline_mode = #tpu.pipeline_mode<synchronous>, transform_indices = @transform_5, window_bounds = array<i64: 32, 32>}, {pipeline_mode = #tpu.pipeline_mode<synchronous>, transform_indices = @transform_6, window_bounds = array<i64: 32, 96>}, {pipeline_mode = #tpu.pipeline_mode<synchronous>, transform_indices = @transform_7, window_bounds = array<i64: 1, 32>}, {pipeline_mode = #tpu.pipeline_mode<synchronous>, transform_indices = @transform_8, window_bounds = array<i64: 1, 32>}, {pipeline_mode = #tpu.pipeline_mode<synchronous>, transform_indices = @transform_9, window_bounds = array<i64: 1, 32>}, {pipeline_mode = #tpu.pipeline_mode<synchronous>, transform_indices = @transform_10, window_bounds = array<i64: 1, 32>}, {pipeline_mode = #tpu.pipeline_mode<synchronous>, transform_indices = @transform_11, window_bounds = array<i64: 1, 32>}, {pipeline_mode = #tpu.pipeline_mode<synchronous>, transform_indices = @transform_12, window_bounds = array<i64: 1, 32>}, {pipeline_mode = #tpu.pipeline_mode<synchronous>, transform_indices = @transform_13, window_bounds = array<i64: 32, 32>}, {pipeline_mode = #tpu.pipeline_mode<synchronous>, transform_indices = @transform_14, window_bounds = array<i64: 32, 32>}, {pipeline_mode = #tpu.pipeline_mode<synchronous>, transform_indices = @transform_15, window_bounds = array<i64: 32, 32>}, {pipeline_mode = #tpu.pipeline_mode<synchronous>, transform_indices = @transform_16, window_bounds = array<i64: 32, 32>}, {pipeline_mode = #tpu.pipeline_mode<synchronous>, transform_indices = @transform_17, window_bounds = array<i64: 1, 32>}, {pipeline_mode = #tpu.pipeline_mode<synchronous>, transform_indices = @transform_18, window_bounds = array<i64: 1, 32>}, {pipeline_mode = #tpu.pipeline_mode<synchronous>, transform_indices = @transform_19, window_bounds = array<i64: 1, 32>}, {pipeline_mode = #tpu.pipeline_mode<synchronous>, transform_indices = @transform_20, window_bounds = array<i64: 1, 32>}, {pipeline_mode = #tpu.pipeline_mode<synchronous>, transform_indices = @transform_21, window_bounds = array<i64: 1, 32>}, {pipeline_mode = #tpu.pipeline_mode<synchronous>, transform_indices = @transform_22, window_bounds = array<i64: 1, 32>}, {pipeline_mode = #tpu.pipeline_mode<synchronous>, transform_indices = @transform_23, window_bounds = array<i64: 1, 32>}, {pipeline_mode = #tpu.pipeline_mode<synchronous>, transform_indices = @transform_24, window_bounds = array<i64: 1, 32>}, {pipeline_mode = #tpu.pipeline_mode<synchronous>, transform_indices = @transform_25, window_bounds = array<i64: 32, 32>}, {pipeline_mode = #tpu.pipeline_mode<synchronous>, transform_indices = @transform_26, window_bounds = array<i64: 32, 32>}, {pipeline_mode = #tpu.pipeline_mode<synchronous>, transform_indices = @transform_27, window_bounds = array<i64: 32, 32>}, {pipeline_mode = #tpu.pipeline_mode<synchronous>, transform_indices = @transform_28, window_bounds = array<i64: 32, 32>}, {pipeline_mode = #tpu.pipeline_mode<synchronous>, transform_indices = @transform_29, window_bounds = array<i64: 1, 32>}, {pipeline_mode = #tpu.pipeline_mode<synchronous>, transform_indices = @transform_30, window_bounds = array<i64: 1, 32>}, {pipeline_mode = #tpu.pipeline_mode<synchronous>, transform_indices = @transform_31, window_bounds = array<i64: 1, 32>}, {pipeline_mode = #tpu.pipeline_mode<synchronous>, transform_indices = @transform_32, window_bounds = array<i64: 1, 2>}, {pipeline_mode = #tpu.pipeline_mode<synchronous>, transform_indices = @transform_33, window_bounds = array<i64: 1, 2>}, {pipeline_mode = #tpu.pipeline_mode<synchronous>, transform_indices = @transform_34, window_bounds = array<i64: 1, 2>}, {pipeline_mode = #tpu.pipeline_mode<synchronous>, transform_indices = @transform_35, window_bounds = array<i64: 1, 2>}, {pipeline_mode = #tpu.pipeline_mode<synchronous>, transform_indices = @transform_36, window_bounds = array<i64: 32, 32>}, {pipeline_mode = #tpu.pipeline_mode<synchronous>, transform_indices = @transform_37, window_bounds = array<i64: 32, 32>}, {pipeline_mode = #tpu.pipeline_mode<synchronous>, transform_indices = @transform_38, window_bounds = array<i64: 8, 32>}, {pipeline_mode = #tpu.pipeline_mode<synchronous>, transform_indices = @transform_39, window_bounds = array<i64: 32, 2>}, {pipeline_mode = #tpu.pipeline_mode<synchronous>, transform_indices = @transform_40, window_bounds = array<i64: 8, 2>}, {pipeline_mode = #tpu.pipeline_mode<synchronous>, transform_indices = @transform_41, window_bounds = array<i64: 1, 128>}, {pipeline_mode = #tpu.pipeline_mode<synchronous>, transform_indices = @transform_42, window_bounds = array<i64: 32, 128>}, {pipeline_mode = #tpu.pipeline_mode<synchronous>, transform_indices = @transform_43, window_bounds = array<i64: 32, 128>}, {pipeline_mode = #tpu.pipeline_mode<synchronous>, transform_indices = @transform_44, window_bounds = array<i64: 1, 12>}, {pipeline_mode = #tpu.pipeline_mode<synchronous>, transform_indices = @transform_45, window_bounds = array<i64: 128, 12>}, {pipeline_mode = #tpu.pipeline_mode<synchronous>, transform_indices = @transform_46, window_bounds = array<i64: 1, 32>}, {pipeline_mode = #tpu.pipeline_mode<synchronous>, transform_indices = @transform_47, window_bounds = array<i64: 1, 32>}, {pipeline_mode = #tpu.pipeline_mode<synchronous>, transform_indices = @transform_48, window_bounds = array<i64: 1, 32>}, {pipeline_mode = #tpu.pipeline_mode<synchronous>, transform_indices = @transform_49, window_bounds = array<i64: 1, 4>}, {pipeline_mode = #tpu.pipeline_mode<synchronous>, transform_indices = @transform_50, window_bounds = array<i64: 1, 4>}, {pipeline_mode = #tpu.pipeline_mode<synchronous>, transform_indices = @transform_51, window_bounds = array<i64: 1, 4>}, {pipeline_mode = #tpu.pipeline_mode<synchronous>, transform_indices = @transform_52, window_bounds = array<i64: 1, 4>}, {pipeline_mode = #tpu.pipeline_mode<synchronous>, transform_indices = @transform_53, window_bounds = array<i64: 32, 32>}, {pipeline_mode = #tpu.pipeline_mode<synchronous>, transform_indices = @transform_54, window_bounds = array<i64: 32, 32>}, {pipeline_mode = #tpu.pipeline_mode<synchronous>, transform_indices = @transform_55, window_bounds = array<i64: 32, 32>}, {pipeline_mode = #tpu.pipeline_mode<synchronous>, transform_indices = @transform_56, window_bounds = array<i64: 32, 4>}, {pipeline_mode = #tpu.pipeline_mode<synchronous>, transform_indices = @transform_57, window_bounds = array<i64: 32, 4>}, {pipeline_mode = #tpu.pipeline_mode<synchronous>, transform_indices = @transform_58, window_bounds = array<i64: 1, 32>}, {pipeline_mode = #tpu.pipeline_mode<synchronous>, transform_indices = @transform_59, window_bounds = array<i64: 1, 32>}, {pipeline_mode = #tpu.pipeline_mode<synchronous>, transform_indices = @transform_60, window_bounds = array<i64: 1, 32>}, {pipeline_mode = #tpu.pipeline_mode<synchronous>, transform_indices = @transform_61, window_bounds = array<i64: 1, 32>}, {pipeline_mode = #tpu.pipeline_mode<synchronous>, transform_indices = @transform_62, window_bounds = array<i64: 1, 32>}, {pipeline_mode = #tpu.pipeline_mode<synchronous>, transform_indices = @transform_63, window_bounds = array<i64: 1, 32>}, {pipeline_mode = #tpu.pipeline_mode<synchronous>, transform_indices = @transform_64, window_bounds = array<i64: 1, 32>}, {pipeline_mode = #tpu.pipeline_mode<synchronous>, transform_indices = @transform_65, window_bounds = array<i64: 32, 32>}, {pipeline_mode = #tpu.pipeline_mode<synchronous>, transform_indices = @transform_66, window_bounds = array<i64: 32, 32>}, {pipeline_mode = #tpu.pipeline_mode<synchronous>, transform_indices = @transform_67, window_bounds = array<i64: 1, 32>}, {pipeline_mode = #tpu.pipeline_mode<synchronous>, transform_indices = @transform_68, window_bounds = array<i64: 32, 32>}, {pipeline_mode = #tpu.pipeline_mode<synchronous>, transform_indices = @transform_69, window_bounds = array<i64: 1, 32>}, {pipeline_mode = #tpu.pipeline_mode<synchronous>, transform_indices = @transform_70, window_bounds = array<i64: 1, 32>}, {pipeline_mode = #tpu.pipeline_mode<synchronous>, transform_indices = @transform_71, window_bounds = array<i64: 1, 32>}, {pipeline_mode = #tpu.pipeline_mode<synchronous>, transform_indices = @transform_72, window_bounds = array<i64: 1, 32>}, {pipeline_mode = #tpu.pipeline_mode<synchronous>, transform_indices = @transform_73, window_bounds = array<i64: 1, 3>}, {pipeline_mode = #tpu.pipeline_mode<synchronous>, transform_indices = @transform_74, window_bounds = array<i64: 1, 3>}, {pipeline_mode = #tpu.pipeline_mode<synchronous>, transform_indices = @transform_75, window_bounds = array<i64: 1, 3>}, {pipeline_mode = #tpu.pipeline_mode<synchronous>, transform_indices = @transform_76, window_bounds = array<i64: 32, 32>}, {pipeline_mode = #tpu.pipeline_mode<synchronous>, transform_indices = @transform_77, window_bounds = array<i64: 32, 32>}, {pipeline_mode = #tpu.pipeline_mode<synchronous>, transform_indices = @transform_78, window_bounds = array<i64: 3, 32>}, {pipeline_mode = #tpu.pipeline_mode<synchronous>, transform_indices = @transform_79, window_bounds = array<i64: 32, 3>}, {pipeline_mode = #tpu.pipeline_mode<synchronous>, transform_indices = @transform_80, window_bounds = array<i64: 2, 12>}]} {
    %c0 = arith.constant 0 : index
    %c0_0 = arith.constant 0 : index
    %0 = vector.load %arg4[%c0, %c0_0] : memref<1x32xf32, #tpu.memory_space<vmem>>, vector<1x32xf32>
    %c0_1 = arith.constant 0 : index
    %c0_2 = arith.constant 0 : index
    %1 = vector.load %arg5[%c0_1, %c0_2] : memref<1x96xf32, #tpu.memory_space<vmem>>, vector<1x96xf32>
    %c0_3 = arith.constant 0 : index
    %c0_4 = arith.constant 0 : index
    %2 = vector.load %arg6[%c0_3, %c0_4] : memref<32x32xf32, #tpu.memory_space<vmem>>, vector<32x32xf32>
    %c0_5 = arith.constant 0 : index
    %c0_6 = arith.constant 0 : index
    %3 = vector.load %arg7[%c0_5, %c0_6] : memref<32x96xf32, #tpu.memory_space<vmem>>, vector<32x96xf32>
    %c0_7 = arith.constant 0 : index
    %c0_8 = arith.constant 0 : index
    %4 = vector.load %arg8[%c0_7, %c0_8] : memref<1x32xf32, #tpu.memory_space<vmem>>, vector<1x32xf32>
    %c0_9 = arith.constant 0 : index
    %c0_10 = arith.constant 0 : index
    %5 = vector.load %arg9[%c0_9, %c0_10] : memref<1x32xf32, #tpu.memory_space<vmem>>, vector<1x32xf32>
    %c0_11 = arith.constant 0 : index
    %c0_12 = arith.constant 0 : index
    %6 = vector.load %arg10[%c0_11, %c0_12] : memref<1x32xf32, #tpu.memory_space<vmem>>, vector<1x32xf32>
    %c0_13 = arith.constant 0 : index
    %c0_14 = arith.constant 0 : index
    %7 = vector.load %arg11[%c0_13, %c0_14] : memref<1x32xf32, #tpu.memory_space<vmem>>, vector<1x32xf32>
    %c0_15 = arith.constant 0 : index
    %c0_16 = arith.constant 0 : index
    %8 = vector.load %arg12[%c0_15, %c0_16] : memref<1x32xf32, #tpu.memory_space<vmem>>, vector<1x32xf32>
    %c0_17 = arith.constant 0 : index
    %c0_18 = arith.constant 0 : index
    %9 = vector.load %arg13[%c0_17, %c0_18] : memref<1x32xf32, #tpu.memory_space<vmem>>, vector<1x32xf32>
    %c0_19 = arith.constant 0 : index
    %c0_20 = arith.constant 0 : index
    %10 = vector.load %arg14[%c0_19, %c0_20] : memref<32x32xf32, #tpu.memory_space<vmem>>, vector<32x32xf32>
    %c0_21 = arith.constant 0 : index
    %c0_22 = arith.constant 0 : index
    %11 = vector.load %arg15[%c0_21, %c0_22] : memref<32x32xf32, #tpu.memory_space<vmem>>, vector<32x32xf32>
    %c0_23 = arith.constant 0 : index
    %c0_24 = arith.constant 0 : index
    %12 = vector.load %arg16[%c0_23, %c0_24] : memref<32x32xf32, #tpu.memory_space<vmem>>, vector<32x32xf32>
    %c0_25 = arith.constant 0 : index
    %c0_26 = arith.constant 0 : index
    %13 = vector.load %arg17[%c0_25, %c0_26] : memref<32x32xf32, #tpu.memory_space<vmem>>, vector<32x32xf32>
    %c0_27 = arith.constant 0 : index
    %c0_28 = arith.constant 0 : index
    %14 = vector.load %arg18[%c0_27, %c0_28] : memref<1x32xf32, #tpu.memory_space<vmem>>, vector<1x32xf32>
    %c0_29 = arith.constant 0 : index
    %c0_30 = arith.constant 0 : index
    %15 = vector.load %arg19[%c0_29, %c0_30] : memref<1x32xf32, #tpu.memory_space<vmem>>, vector<1x32xf32>
    %c0_31 = arith.constant 0 : index
    %c0_32 = arith.constant 0 : index
    %16 = vector.load %arg20[%c0_31, %c0_32] : memref<1x32xf32, #tpu.memory_space<vmem>>, vector<1x32xf32>
    %c0_33 = arith.constant 0 : index
    %c0_34 = arith.constant 0 : index
    %17 = vector.load %arg21[%c0_33, %c0_34] : memref<1x32xf32, #tpu.memory_space<vmem>>, vector<1x32xf32>
    %c0_35 = arith.constant 0 : index
    %c0_36 = arith.constant 0 : index
    %18 = vector.load %arg22[%c0_35, %c0_36] : memref<1x32xf32, #tpu.memory_space<vmem>>, vector<1x32xf32>
    %c0_37 = arith.constant 0 : index
    %c0_38 = arith.constant 0 : index
    %19 = vector.load %arg23[%c0_37, %c0_38] : memref<1x32xf32, #tpu.memory_space<vmem>>, vector<1x32xf32>
    %c0_39 = arith.constant 0 : index
    %c0_40 = arith.constant 0 : index
    %20 = vector.load %arg24[%c0_39, %c0_40] : memref<1x32xf32, #tpu.memory_space<vmem>>, vector<1x32xf32>
    %c0_41 = arith.constant 0 : index
    %c0_42 = arith.constant 0 : index
    %21 = vector.load %arg25[%c0_41, %c0_42] : memref<1x32xf32, #tpu.memory_space<vmem>>, vector<1x32xf32>
    %c0_43 = arith.constant 0 : index
    %c0_44 = arith.constant 0 : index
    %22 = vector.load %arg26[%c0_43, %c0_44] : memref<32x32xf32, #tpu.memory_space<vmem>>, vector<32x32xf32>
    %c0_45 = arith.constant 0 : index
    %c0_46 = arith.constant 0 : index
    %23 = vector.load %arg27[%c0_45, %c0_46] : memref<32x32xf32, #tpu.memory_space<vmem>>, vector<32x32xf32>
    %c0_47 = arith.constant 0 : index
    %c0_48 = arith.constant 0 : index
    %24 = vector.load %arg28[%c0_47, %c0_48] : memref<32x32xf32, #tpu.memory_space<vmem>>, vector<32x32xf32>
    %c0_49 = arith.constant 0 : index
    %c0_50 = arith.constant 0 : index
    %25 = vector.load %arg29[%c0_49, %c0_50] : memref<32x32xf32, #tpu.memory_space<vmem>>, vector<32x32xf32>
    %c0_51 = arith.constant 0 : index
    %c0_52 = arith.constant 0 : index
    %26 = vector.load %arg30[%c0_51, %c0_52] : memref<1x32xf32, #tpu.memory_space<vmem>>, vector<1x32xf32>
    %c0_53 = arith.constant 0 : index
    %c0_54 = arith.constant 0 : index
    %27 = vector.load %arg31[%c0_53, %c0_54] : memref<1x32xf32, #tpu.memory_space<vmem>>, vector<1x32xf32>
    %c0_55 = arith.constant 0 : index
    %c0_56 = arith.constant 0 : index
    %28 = vector.load %arg32[%c0_55, %c0_56] : memref<1x32xf32, #tpu.memory_space<vmem>>, vector<1x32xf32>
    %c0_57 = arith.constant 0 : index
    %c0_58 = arith.constant 0 : index
    %29 = vector.load %arg33[%c0_57, %c0_58] : memref<1x2xf32, #tpu.memory_space<vmem>>, vector<1x2xf32>
    %c0_59 = arith.constant 0 : index
    %c0_60 = arith.constant 0 : index
    %30 = vector.load %arg34[%c0_59, %c0_60] : memref<1x2xf32, #tpu.memory_space<vmem>>, vector<1x2xf32>
    %c0_61 = arith.constant 0 : index
    %c0_62 = arith.constant 0 : index
    %31 = vector.load %arg35[%c0_61, %c0_62] : memref<1x2xf32, #tpu.memory_space<vmem>>, vector<1x2xf32>
    %c0_63 = arith.constant 0 : index
    %c0_64 = arith.constant 0 : index
    %32 = vector.load %arg36[%c0_63, %c0_64] : memref<1x2xf32, #tpu.memory_space<vmem>>, vector<1x2xf32>
    %c0_65 = arith.constant 0 : index
    %c0_66 = arith.constant 0 : index
    %33 = vector.load %arg37[%c0_65, %c0_66] : memref<32x32xf32, #tpu.memory_space<vmem>>, vector<32x32xf32>
    %c0_67 = arith.constant 0 : index
    %c0_68 = arith.constant 0 : index
    %34 = vector.load %arg38[%c0_67, %c0_68] : memref<32x32xf32, #tpu.memory_space<vmem>>, vector<32x32xf32>
    %c0_69 = arith.constant 0 : index
    %c0_70 = arith.constant 0 : index
    %35 = vector.load %arg39[%c0_69, %c0_70] : memref<8x32xf32, #tpu.memory_space<vmem>>, vector<8x32xf32>
    %c0_71 = arith.constant 0 : index
    %c0_72 = arith.constant 0 : index
    %36 = vector.load %arg40[%c0_71, %c0_72] : memref<32x2xf32, #tpu.memory_space<vmem>>, vector<32x2xf32>
    %c0_73 = arith.constant 0 : index
    %c0_74 = arith.constant 0 : index
    %37 = vector.load %arg41[%c0_73, %c0_74] : memref<8x2xf32, #tpu.memory_space<vmem>>, vector<8x2xf32>
    %c0_75 = arith.constant 0 : index
    %c0_76 = arith.constant 0 : index
    %38 = vector.load %arg42[%c0_75, %c0_76] : memref<1x128xf32, #tpu.memory_space<vmem>>, vector<1x128xf32>
    %c0_77 = arith.constant 0 : index
    %c0_78 = arith.constant 0 : index
    %39 = vector.load %arg43[%c0_77, %c0_78] : memref<32x128xf32, #tpu.memory_space<vmem>>, vector<32x128xf32>
    %c0_79 = arith.constant 0 : index
    %c0_80 = arith.constant 0 : index
    %40 = vector.load %arg44[%c0_79, %c0_80] : memref<32x128xf32, #tpu.memory_space<vmem>>, vector<32x128xf32>
    %c0_81 = arith.constant 0 : index
    %c0_82 = arith.constant 0 : index
    %41 = vector.load %arg45[%c0_81, %c0_82] : memref<1x12xf32, #tpu.memory_space<vmem>>, vector<1x12xf32>
    %c0_83 = arith.constant 0 : index
    %c0_84 = arith.constant 0 : index
    %42 = vector.load %arg46[%c0_83, %c0_84] : memref<128x12xf32, #tpu.memory_space<vmem>>, vector<128x12xf32>
    %c0_85 = arith.constant 0 : index
    %c0_86 = arith.constant 0 : index
    %43 = vector.load %arg47[%c0_85, %c0_86] : memref<1x32xf32, #tpu.memory_space<vmem>>, vector<1x32xf32>
    %c0_87 = arith.constant 0 : index
    %c0_88 = arith.constant 0 : index
    %44 = vector.load %arg48[%c0_87, %c0_88] : memref<1x32xf32, #tpu.memory_space<vmem>>, vector<1x32xf32>
    %c0_89 = arith.constant 0 : index
    %c0_90 = arith.constant 0 : index
    %45 = vector.load %arg49[%c0_89, %c0_90] : memref<1x32xf32, #tpu.memory_space<vmem>>, vector<1x32xf32>
    %c0_91 = arith.constant 0 : index
    %c0_92 = arith.constant 0 : index
    %46 = vector.load %arg50[%c0_91, %c0_92] : memref<1x4xf32, #tpu.memory_space<vmem>>, vector<1x4xf32>
    %c0_93 = arith.constant 0 : index
    %c0_94 = arith.constant 0 : index
    %47 = vector.load %arg51[%c0_93, %c0_94] : memref<1x4xf32, #tpu.memory_space<vmem>>, vector<1x4xf32>
    %c0_95 = arith.constant 0 : index
    %c0_96 = arith.constant 0 : index
    %48 = vector.load %arg52[%c0_95, %c0_96] : memref<1x4xf32, #tpu.memory_space<vmem>>, vector<1x4xf32>
    %c0_97 = arith.constant 0 : index
    %c0_98 = arith.constant 0 : index
    %49 = vector.load %arg53[%c0_97, %c0_98] : memref<1x4xf32, #tpu.memory_space<vmem>>, vector<1x4xf32>
    %c0_99 = arith.constant 0 : index
    %c0_100 = arith.constant 0 : index
    %50 = vector.load %arg54[%c0_99, %c0_100] : memref<32x32xf32, #tpu.memory_space<vmem>>, vector<32x32xf32>
    %c0_101 = arith.constant 0 : index
    %c0_102 = arith.constant 0 : index
    %51 = vector.load %arg55[%c0_101, %c0_102] : memref<32x32xf32, #tpu.memory_space<vmem>>, vector<32x32xf32>
    %c0_103 = arith.constant 0 : index
    %c0_104 = arith.constant 0 : index
    %52 = vector.load %arg56[%c0_103, %c0_104] : memref<32x32xf32, #tpu.memory_space<vmem>>, vector<32x32xf32>
    %c0_105 = arith.constant 0 : index
    %c0_106 = arith.constant 0 : index
    %53 = vector.load %arg57[%c0_105, %c0_106] : memref<32x4xf32, #tpu.memory_space<vmem>>, vector<32x4xf32>
    %c0_107 = arith.constant 0 : index
    %c0_108 = arith.constant 0 : index
    %54 = vector.load %arg58[%c0_107, %c0_108] : memref<32x4xf32, #tpu.memory_space<vmem>>, vector<32x4xf32>
    %c0_109 = arith.constant 0 : index
    %c0_110 = arith.constant 0 : index
    %55 = vector.load %arg59[%c0_109, %c0_110] : memref<1x32xf32, #tpu.memory_space<vmem>>, vector<1x32xf32>
    %c0_111 = arith.constant 0 : index
    %c0_112 = arith.constant 0 : index
    %56 = vector.load %arg60[%c0_111, %c0_112] : memref<1x32xf32, #tpu.memory_space<vmem>>, vector<1x32xf32>
    %c0_113 = arith.constant 0 : index
    %c0_114 = arith.constant 0 : index
    %57 = vector.load %arg61[%c0_113, %c0_114] : memref<1x32xf32, #tpu.memory_space<vmem>>, vector<1x32xf32>
    %c0_115 = arith.constant 0 : index
    %c0_116 = arith.constant 0 : index
    %58 = vector.load %arg62[%c0_115, %c0_116] : memref<1x32xf32, #tpu.memory_space<vmem>>, vector<1x32xf32>
    %c0_117 = arith.constant 0 : index
    %c0_118 = arith.constant 0 : index
    %59 = vector.load %arg63[%c0_117, %c0_118] : memref<1x32xf32, #tpu.memory_space<vmem>>, vector<1x32xf32>
    %c0_119 = arith.constant 0 : index
    %c0_120 = arith.constant 0 : index
    %60 = vector.load %arg64[%c0_119, %c0_120] : memref<1x32xf32, #tpu.memory_space<vmem>>, vector<1x32xf32>
    %c0_121 = arith.constant 0 : index
    %c0_122 = arith.constant 0 : index
    %61 = vector.load %arg65[%c0_121, %c0_122] : memref<1x32xf32, #tpu.memory_space<vmem>>, vector<1x32xf32>
    %c0_123 = arith.constant 0 : index
    %c0_124 = arith.constant 0 : index
    %62 = vector.load %arg66[%c0_123, %c0_124] : memref<32x32xf32, #tpu.memory_space<vmem>>, vector<32x32xf32>
    %c0_125 = arith.constant 0 : index
    %c0_126 = arith.constant 0 : index
    %63 = vector.load %arg67[%c0_125, %c0_126] : memref<32x32xf32, #tpu.memory_space<vmem>>, vector<32x32xf32>
    %c0_127 = arith.constant 0 : index
    %c0_128 = arith.constant 0 : index
    %64 = vector.load %arg68[%c0_127, %c0_128] : memref<1x32xf32, #tpu.memory_space<vmem>>, vector<1x32xf32>
    %c0_129 = arith.constant 0 : index
    %c0_130 = arith.constant 0 : index
    %65 = vector.load %arg69[%c0_129, %c0_130] : memref<32x32xf32, #tpu.memory_space<vmem>>, vector<32x32xf32>
    %c0_131 = arith.constant 0 : index
    %c0_132 = arith.constant 0 : index
    %66 = vector.load %arg70[%c0_131, %c0_132] : memref<1x32xf32, #tpu.memory_space<vmem>>, vector<1x32xf32>
    %c0_133 = arith.constant 0 : index
    %c0_134 = arith.constant 0 : index
    %67 = vector.load %arg71[%c0_133, %c0_134] : memref<1x32xf32, #tpu.memory_space<vmem>>, vector<1x32xf32>
    %c0_135 = arith.constant 0 : index
    %c0_136 = arith.constant 0 : index
    %68 = vector.load %arg72[%c0_135, %c0_136] : memref<1x32xf32, #tpu.memory_space<vmem>>, vector<1x32xf32>
    %c0_137 = arith.constant 0 : index
    %c0_138 = arith.constant 0 : index
    %69 = vector.load %arg73[%c0_137, %c0_138] : memref<1x32xf32, #tpu.memory_space<vmem>>, vector<1x32xf32>
    %c0_139 = arith.constant 0 : index
    %c0_140 = arith.constant 0 : index
    %70 = vector.load %arg74[%c0_139, %c0_140] : memref<1x3xf32, #tpu.memory_space<vmem>>, vector<1x3xf32>
    %c0_141 = arith.constant 0 : index
    %c0_142 = arith.constant 0 : index
    %71 = vector.load %arg75[%c0_141, %c0_142] : memref<1x3xf32, #tpu.memory_space<vmem>>, vector<1x3xf32>
    %c0_143 = arith.constant 0 : index
    %c0_144 = arith.constant 0 : index
    %72 = vector.load %arg76[%c0_143, %c0_144] : memref<1x3xf32, #tpu.memory_space<vmem>>, vector<1x3xf32>
    %c0_145 = arith.constant 0 : index
    %c0_146 = arith.constant 0 : index
    %73 = vector.load %arg77[%c0_145, %c0_146] : memref<32x32xf32, #tpu.memory_space<vmem>>, vector<32x32xf32>
    %c0_147 = arith.constant 0 : index
    %c0_148 = arith.constant 0 : index
    %74 = vector.load %arg78[%c0_147, %c0_148] : memref<32x32xf32, #tpu.memory_space<vmem>>, vector<32x32xf32>
    %c0_149 = arith.constant 0 : index
    %c0_150 = arith.constant 0 : index
    %75 = vector.load %arg79[%c0_149, %c0_150] : memref<3x32xf32, #tpu.memory_space<vmem>>, vector<3x32xf32>
    %c0_151 = arith.constant 0 : index
    %c0_152 = arith.constant 0 : index
    %76 = vector.load %arg80[%c0_151, %c0_152] : memref<32x3xf32, #tpu.memory_space<vmem>>, vector<32x3xf32>
    %c0_153 = arith.constant 0 : index
    %c0_154 = arith.constant 0 : index
    %77 = vector.load %arg1[%c0_153, %c0_154] : memref<2x3xf32, #tpu.memory_space<vmem>>, vector<2x3xf32>
    %c0_155 = arith.constant 0 : index
    %c0_156 = arith.constant 0 : index
    %c0_157 = arith.constant 0 : index
    %78 = vector.load %arg2[%c0_155, %c0_156, %c0_157] : memref<2x8x4xf32, #tpu.memory_space<vmem>>, vector<2x8x4xf32>
    %c0_158 = arith.constant 0 : index
    %c0_159 = arith.constant 0 : index
    %c0_160 = arith.constant 0 : index
    %79 = vector.load %arg3[%c0_158, %c0_159, %c0_160] : memref<2x4x2xf32, #tpu.memory_space<vmem>>, vector<2x4x2xf32>
    %cst = arith.constant dense<0.000000e+00> : vector<2x32xf32>
    %80 = tpu.matmul %77, %75, %cst {dimension_numbers = #tpu.dot_dimension_numbers<[1], [0], [0], [1], [0, 0, 1, 1], [], []>} : vector<2x3xf32>, vector<3x32xf32>, vector<2x32xf32> -> vector<2x32xf32>
    %81 = vector.broadcast %69 : vector<1x32xf32> to vector<2x32xf32>
    %82 = arith.addf %80, %81 : vector<2x32xf32>
    %cst_161 = arith.constant 0.000000e+00 : f32
    %83 = vector.broadcast %cst_161 : f32 to vector<2x32xf32>
    %84 = arith.maximumf %82, %83 : vector<2x32xf32>
    %cst_162 = arith.constant dense<0.000000e+00> : vector<2x32xf32>
    %85 = tpu.matmul %84, %74, %cst_162 {dimension_numbers = #tpu.dot_dimension_numbers<[1], [0], [0], [1], [0, 0, 1, 1], [], []>} : vector<2x32xf32>, vector<32x32xf32>, vector<2x32xf32> -> vector<2x32xf32>
    %86 = vector.broadcast %68 : vector<1x32xf32> to vector<2x32xf32>
    %87 = arith.addf %85, %86 : vector<2x32xf32>
    %cst_163 = arith.constant dense<0.000000e+00> : vector<2x32xf32>
    %88 = tpu.matmul %87, %73, %cst_163 {dimension_numbers = #tpu.dot_dimension_numbers<[1], [0], [0], [1], [0, 0, 1, 1], [], []>} : vector<2x32xf32>, vector<32x32xf32>, vector<2x32xf32> -> vector<2x32xf32>
    %89 = vector.broadcast %67 : vector<1x32xf32> to vector<2x32xf32>
    %90 = arith.addf %88, %89 : vector<2x32xf32>
    %91 = arith.negf %90 : vector<2x32xf32>
    %92 = math.exp %91 : vector<2x32xf32>
    %cst_164 = arith.constant 1.000000e+00 : f32
    %93 = vector.broadcast %cst_164 : f32 to vector<2x32xf32>
    %94 = arith.addf %93, %92 : vector<2x32xf32>
    %95 = arith.divf %93, %94 : vector<2x32xf32>
    %96 = arith.mulf %87, %95 : vector<2x32xf32>
    %cst_165 = arith.constant dense<0.000000e+00> : vector<2x3xf32>
    %97 = tpu.matmul %96, %76, %cst_165 {dimension_numbers = #tpu.dot_dimension_numbers<[1], [0], [0], [1], [0, 0, 1, 1], [], []>} : vector<2x32xf32>, vector<32x3xf32>, vector<2x3xf32> -> vector<2x3xf32>
    %98 = vector.broadcast %70 : vector<1x3xf32> to vector<2x3xf32>
    %99 = arith.addf %97, %98 : vector<2x3xf32>
    %100 = arith.addf %99, %77 : vector<2x3xf32>
    %cst_166 = arith.constant dense<0.000000e+00> : vector<2xf32>
    %101 = vector.multi_reduction <add>, %100, %cst_166 [1] : vector<2x3xf32> to vector<2xf32>
    %102 = vector.shape_cast %101 : vector<2xf32> to vector<2x1xf32>
    %cst_167 = arith.constant 3.000000e+00 : f32
    %103 = vector.broadcast %cst_167 : f32 to vector<2x1xf32>
    %104 = arith.divf %102, %103 : vector<2x1xf32>
    %105 = vector.broadcast %104 : vector<2x1xf32> to vector<2x3xf32>
    %106 = arith.subf %100, %105 : vector<2x3xf32>
    %107 = arith.mulf %106, %106 : vector<2x3xf32>
    %cst_168 = arith.constant dense<0.000000e+00> : vector<2xf32>
    %108 = vector.multi_reduction <add>, %107, %cst_168 [1] : vector<2x3xf32> to vector<2xf32>
    %109 = vector.shape_cast %108 : vector<2xf32> to vector<2x1xf32>
    %cst_169 = arith.constant 3.000000e+00 : f32
    %110 = vector.broadcast %cst_169 : f32 to vector<2x1xf32>
    %111 = arith.divf %109, %110 : vector<2x1xf32>
    %112 = vector.broadcast %104 : vector<2x1xf32> to vector<2x3xf32>
    %113 = arith.subf %100, %112 : vector<2x3xf32>
    %cst_170 = arith.constant 9.99999974E-6 : f32
    %114 = vector.broadcast %cst_170 : f32 to vector<2x1xf32>
    %115 = arith.addf %111, %114 : vector<2x1xf32>
    %116 = math.rsqrt %115 : vector<2x1xf32>
    %117 = vector.broadcast %116 : vector<2x1xf32> to vector<2x3xf32>
    %118 = arith.mulf %113, %117 : vector<2x3xf32>
    %119 = vector.broadcast %72 : vector<1x3xf32> to vector<2x3xf32>
    %120 = arith.mulf %118, %119 : vector<2x3xf32>
    %121 = vector.broadcast %71 : vector<1x3xf32> to vector<2x3xf32>
    %122 = arith.addf %120, %121 : vector<2x3xf32>
    %cst_171 = arith.constant dense<0xFF800000> : vector<2xf32>
    %123 = vector.multi_reduction <maximumf>, %122, %cst_171 [1] : vector<2x3xf32> to vector<2xf32>
    %124 = vector.shape_cast %123 : vector<2xf32> to vector<2x1xf32>
    %125 = vector.broadcast %124 : vector<2x1xf32> to vector<2x3xf32>
    %126 = arith.subf %122, %125 : vector<2x3xf32>
    %127 = math.exp %126 : vector<2x3xf32>
    %cst_172 = arith.constant dense<0.000000e+00> : vector<2xf32>
    %128 = vector.multi_reduction <add>, %127, %cst_172 [1] : vector<2x3xf32> to vector<2xf32>
    %129 = vector.shape_cast %128 : vector<2xf32> to vector<2x1xf32>
    %130 = tpu.reciprocal %129 {approx = true} : vector<2x1xf32> -> vector<2x1xf32>
    %131 = vector.broadcast %130 : vector<2x1xf32> to vector<2x3xf32>
    %132 = arith.mulf %127, %131 : vector<2x3xf32>
    %133 = arith.mulf %77, %132 : vector<2x3xf32>
    %cst_173 = arith.constant dense<0.000000e+00> : vector<2xf32>
    %134 = vector.multi_reduction <add>, %133, %cst_173 [1] : vector<2x3xf32> to vector<2xf32>
    %135 = vector.shape_cast %134 : vector<2xf32> to vector<2x1xf32>
    %136 = vector.shape_cast %78 : vector<2x8x4xf32> to vector<2x32xf32>
    %cst_174 = arith.constant dense<0.000000e+00> : vector<2x4xf32>
    %137 = tpu.matmul %136, %54, %cst_174 {dimension_numbers = #tpu.dot_dimension_numbers<[1], [0], [0], [1], [0, 0, 1, 1], [], []>} : vector<2x32xf32>, vector<32x4xf32>, vector<2x4xf32> -> vector<2x4xf32>
    %138 = vector.broadcast %47 : vector<1x4xf32> to vector<2x4xf32>
    %139 = arith.addf %137, %138 : vector<2x4xf32>
    %cst_175 = arith.constant dense<0.000000e+00> : vector<2x32xf32>
    %140 = tpu.matmul %136, %52, %cst_175 {dimension_numbers = #tpu.dot_dimension_numbers<[1], [0], [0], [1], [0, 0, 1, 1], [], []>} : vector<2x32xf32>, vector<32x32xf32>, vector<2x32xf32> -> vector<2x32xf32>
    %141 = vector.broadcast %45 : vector<1x32xf32> to vector<2x32xf32>
    %142 = arith.addf %140, %141 : vector<2x32xf32>
    %cst_176 = arith.constant 0.000000e+00 : f32
    %143 = vector.broadcast %cst_176 : f32 to vector<2x32xf32>
    %144 = arith.maximumf %142, %143 : vector<2x32xf32>
    %cst_177 = arith.constant dense<0.000000e+00> : vector<2x32xf32>
    %145 = tpu.matmul %144, %51, %cst_177 {dimension_numbers = #tpu.dot_dimension_numbers<[1], [0], [0], [1], [0, 0, 1, 1], [], []>} : vector<2x32xf32>, vector<32x32xf32>, vector<2x32xf32> -> vector<2x32xf32>
    %146 = vector.broadcast %44 : vector<1x32xf32> to vector<2x32xf32>
    %147 = arith.addf %145, %146 : vector<2x32xf32>
    %cst_178 = arith.constant dense<0.000000e+00> : vector<2x32xf32>
    %148 = tpu.matmul %147, %50, %cst_178 {dimension_numbers = #tpu.dot_dimension_numbers<[1], [0], [0], [1], [0, 0, 1, 1], [], []>} : vector<2x32xf32>, vector<32x32xf32>, vector<2x32xf32> -> vector<2x32xf32>
    %149 = vector.broadcast %43 : vector<1x32xf32> to vector<2x32xf32>
    %150 = arith.addf %148, %149 : vector<2x32xf32>
    %151 = arith.negf %150 : vector<2x32xf32>
    %152 = math.exp %151 : vector<2x32xf32>
    %cst_179 = arith.constant 1.000000e+00 : f32
    %153 = vector.broadcast %cst_179 : f32 to vector<2x32xf32>
    %154 = arith.addf %153, %152 : vector<2x32xf32>
    %155 = arith.divf %153, %154 : vector<2x32xf32>
    %156 = arith.mulf %147, %155 : vector<2x32xf32>
    %cst_180 = arith.constant dense<0.000000e+00> : vector<2x4xf32>
    %157 = tpu.matmul %156, %53, %cst_180 {dimension_numbers = #tpu.dot_dimension_numbers<[1], [0], [0], [1], [0, 0, 1, 1], [], []>} : vector<2x32xf32>, vector<32x4xf32>, vector<2x4xf32> -> vector<2x4xf32>
    %158 = vector.broadcast %46 : vector<1x4xf32> to vector<2x4xf32>
    %159 = arith.addf %157, %158 : vector<2x4xf32>
    %160 = arith.addf %159, %139 : vector<2x4xf32>
    %cst_181 = arith.constant dense<0.000000e+00> : vector<2xf32>
    %161 = vector.multi_reduction <add>, %160, %cst_181 [1] : vector<2x4xf32> to vector<2xf32>
    %162 = vector.shape_cast %161 : vector<2xf32> to vector<2x1xf32>
    %cst_182 = arith.constant 4.000000e+00 : f32
    %163 = vector.broadcast %cst_182 : f32 to vector<2x1xf32>
    %164 = arith.divf %162, %163 : vector<2x1xf32>
    %165 = vector.broadcast %164 : vector<2x1xf32> to vector<2x4xf32>
    %166 = arith.subf %160, %165 : vector<2x4xf32>
    %167 = arith.mulf %166, %166 : vector<2x4xf32>
    %cst_183 = arith.constant dense<0.000000e+00> : vector<2xf32>
    %168 = vector.multi_reduction <add>, %167, %cst_183 [1] : vector<2x4xf32> to vector<2xf32>
    %169 = vector.shape_cast %168 : vector<2xf32> to vector<2x1xf32>
    %cst_184 = arith.constant 4.000000e+00 : f32
    %170 = vector.broadcast %cst_184 : f32 to vector<2x1xf32>
    %171 = arith.divf %169, %170 : vector<2x1xf32>
    %172 = vector.broadcast %164 : vector<2x1xf32> to vector<2x4xf32>
    %173 = arith.subf %160, %172 : vector<2x4xf32>
    %cst_185 = arith.constant 9.99999974E-6 : f32
    %174 = vector.broadcast %cst_185 : f32 to vector<2x1xf32>
    %175 = arith.addf %171, %174 : vector<2x1xf32>
    %176 = math.rsqrt %175 : vector<2x1xf32>
    %177 = vector.broadcast %176 : vector<2x1xf32> to vector<2x4xf32>
    %178 = arith.mulf %173, %177 : vector<2x4xf32>
    %179 = vector.broadcast %49 : vector<1x4xf32> to vector<2x4xf32>
    %180 = arith.mulf %178, %179 : vector<2x4xf32>
    %181 = vector.broadcast %48 : vector<1x4xf32> to vector<2x4xf32>
    %182 = arith.addf %180, %181 : vector<2x4xf32>
    %cst_186 = arith.constant dense<0xFF800000> : vector<2xf32>
    %183 = vector.multi_reduction <maximumf>, %182, %cst_186 [1] : vector<2x4xf32> to vector<2xf32>
    %184 = vector.shape_cast %183 : vector<2xf32> to vector<2x1xf32>
    %185 = vector.broadcast %184 : vector<2x1xf32> to vector<2x4xf32>
    %186 = arith.subf %182, %185 : vector<2x4xf32>
    %187 = math.exp %186 : vector<2x4xf32>
    %cst_187 = arith.constant dense<0.000000e+00> : vector<2xf32>
    %188 = vector.multi_reduction <add>, %187, %cst_187 [1] : vector<2x4xf32> to vector<2xf32>
    %189 = vector.shape_cast %188 : vector<2xf32> to vector<2x1xf32>
    %190 = tpu.reciprocal %189 {approx = true} : vector<2x1xf32> -> vector<2x1xf32>
    %191 = vector.broadcast %190 : vector<2x1xf32> to vector<2x4xf32>
    %192 = arith.mulf %187, %191 : vector<2x4xf32>
    %193 = vector.shape_cast %192 : vector<2x4xf32> to vector<2x1x4xf32>
    %194 = vector.broadcast %193 : vector<2x1x4xf32> to vector<2x8x4xf32>
    %195 = arith.mulf %78, %194 : vector<2x8x4xf32>
    %cst_188 = arith.constant dense<0.000000e+00> : vector<2x8xf32>
    %196 = vector.multi_reduction <add>, %195, %cst_188 [2] : vector<2x8x4xf32> to vector<2x8xf32>
    %197 = vector.shape_cast %196 : vector<2x8xf32> to vector<2x8x1xf32>
    %198 = vector.shape_cast %79 : vector<2x4x2xf32> to vector<2x8xf32>
    %cst_189 = arith.constant dense<0.000000e+00> : vector<2x2xf32>
    %199 = tpu.matmul %198, %37, %cst_189 {dimension_numbers = #tpu.dot_dimension_numbers<[1], [0], [0], [1], [0, 0, 1, 1], [], []>} : vector<2x8xf32>, vector<8x2xf32>, vector<2x2xf32> -> vector<2x2xf32>
    %200 = vector.broadcast %30 : vector<1x2xf32> to vector<2x2xf32>
    %201 = arith.addf %199, %200 : vector<2x2xf32>
    %cst_190 = arith.constant dense<0.000000e+00> : vector<2x32xf32>
    %202 = tpu.matmul %198, %35, %cst_190 {dimension_numbers = #tpu.dot_dimension_numbers<[1], [0], [0], [1], [0, 0, 1, 1], [], []>} : vector<2x8xf32>, vector<8x32xf32>, vector<2x32xf32> -> vector<2x32xf32>
    %203 = vector.broadcast %28 : vector<1x32xf32> to vector<2x32xf32>
    %204 = arith.addf %202, %203 : vector<2x32xf32>
    %cst_191 = arith.constant 0.000000e+00 : f32
    %205 = vector.broadcast %cst_191 : f32 to vector<2x32xf32>
    %206 = arith.maximumf %204, %205 : vector<2x32xf32>
    %cst_192 = arith.constant dense<0.000000e+00> : vector<2x32xf32>
    %207 = tpu.matmul %206, %34, %cst_192 {dimension_numbers = #tpu.dot_dimension_numbers<[1], [0], [0], [1], [0, 0, 1, 1], [], []>} : vector<2x32xf32>, vector<32x32xf32>, vector<2x32xf32> -> vector<2x32xf32>
    %208 = vector.broadcast %27 : vector<1x32xf32> to vector<2x32xf32>
    %209 = arith.addf %207, %208 : vector<2x32xf32>
    %cst_193 = arith.constant dense<0.000000e+00> : vector<2x32xf32>
    %210 = tpu.matmul %209, %33, %cst_193 {dimension_numbers = #tpu.dot_dimension_numbers<[1], [0], [0], [1], [0, 0, 1, 1], [], []>} : vector<2x32xf32>, vector<32x32xf32>, vector<2x32xf32> -> vector<2x32xf32>
    %211 = vector.broadcast %26 : vector<1x32xf32> to vector<2x32xf32>
    %212 = arith.addf %210, %211 : vector<2x32xf32>
    %213 = arith.negf %212 : vector<2x32xf32>
    %214 = math.exp %213 : vector<2x32xf32>
    %cst_194 = arith.constant 1.000000e+00 : f32
    %215 = vector.broadcast %cst_194 : f32 to vector<2x32xf32>
    %216 = arith.addf %215, %214 : vector<2x32xf32>
    %217 = arith.divf %215, %216 : vector<2x32xf32>
    %218 = arith.mulf %209, %217 : vector<2x32xf32>
    %cst_195 = arith.constant dense<0.000000e+00> : vector<2x2xf32>
    %219 = tpu.matmul %218, %36, %cst_195 {dimension_numbers = #tpu.dot_dimension_numbers<[1], [0], [0], [1], [0, 0, 1, 1], [], []>} : vector<2x32xf32>, vector<32x2xf32>, vector<2x2xf32> -> vector<2x2xf32>
    %220 = vector.broadcast %29 : vector<1x2xf32> to vector<2x2xf32>
    %221 = arith.addf %219, %220 : vector<2x2xf32>
    %222 = arith.addf %221, %201 : vector<2x2xf32>
    %cst_196 = arith.constant dense<0.000000e+00> : vector<2xf32>
    %223 = vector.multi_reduction <add>, %222, %cst_196 [1] : vector<2x2xf32> to vector<2xf32>
    %224 = vector.shape_cast %223 : vector<2xf32> to vector<2x1xf32>
    %cst_197 = arith.constant 2.000000e+00 : f32
    %225 = vector.broadcast %cst_197 : f32 to vector<2x1xf32>
    %226 = arith.divf %224, %225 : vector<2x1xf32>
    %227 = vector.broadcast %226 : vector<2x1xf32> to vector<2x2xf32>
    %228 = arith.subf %222, %227 : vector<2x2xf32>
    %229 = arith.mulf %228, %228 : vector<2x2xf32>
    %cst_198 = arith.constant dense<0.000000e+00> : vector<2xf32>
    %230 = vector.multi_reduction <add>, %229, %cst_198 [1] : vector<2x2xf32> to vector<2xf32>
    %231 = vector.shape_cast %230 : vector<2xf32> to vector<2x1xf32>
    %cst_199 = arith.constant 2.000000e+00 : f32
    %232 = vector.broadcast %cst_199 : f32 to vector<2x1xf32>
    %233 = arith.divf %231, %232 : vector<2x1xf32>
    %234 = vector.broadcast %226 : vector<2x1xf32> to vector<2x2xf32>
    %235 = arith.subf %222, %234 : vector<2x2xf32>
    %cst_200 = arith.constant 9.99999974E-6 : f32
    %236 = vector.broadcast %cst_200 : f32 to vector<2x1xf32>
    %237 = arith.addf %233, %236 : vector<2x1xf32>
    %238 = math.rsqrt %237 : vector<2x1xf32>
    %239 = vector.broadcast %238 : vector<2x1xf32> to vector<2x2xf32>
    %240 = arith.mulf %235, %239 : vector<2x2xf32>
    %241 = vector.broadcast %32 : vector<1x2xf32> to vector<2x2xf32>
    %242 = arith.mulf %240, %241 : vector<2x2xf32>
    %243 = vector.broadcast %31 : vector<1x2xf32> to vector<2x2xf32>
    %244 = arith.addf %242, %243 : vector<2x2xf32>
    %cst_201 = arith.constant dense<0xFF800000> : vector<2xf32>
    %245 = vector.multi_reduction <maximumf>, %244, %cst_201 [1] : vector<2x2xf32> to vector<2xf32>
    %246 = vector.shape_cast %245 : vector<2xf32> to vector<2x1xf32>
    %247 = vector.broadcast %246 : vector<2x1xf32> to vector<2x2xf32>
    %248 = arith.subf %244, %247 : vector<2x2xf32>
    %249 = math.exp %248 : vector<2x2xf32>
    %cst_202 = arith.constant dense<0.000000e+00> : vector<2xf32>
    %250 = vector.multi_reduction <add>, %249, %cst_202 [1] : vector<2x2xf32> to vector<2xf32>
    %251 = vector.shape_cast %250 : vector<2xf32> to vector<2x1xf32>
    %252 = tpu.reciprocal %251 {approx = true} : vector<2x1xf32> -> vector<2x1xf32>
    %253 = vector.broadcast %252 : vector<2x1xf32> to vector<2x2xf32>
    %254 = arith.mulf %249, %253 : vector<2x2xf32>
    %255 = vector.shape_cast %254 : vector<2x2xf32> to vector<2x1x2xf32>
    %256 = vector.broadcast %255 : vector<2x1x2xf32> to vector<2x4x2xf32>
    %257 = arith.mulf %79, %256 : vector<2x4x2xf32>
    %cst_203 = arith.constant dense<0.000000e+00> : vector<2x4xf32>
    %258 = vector.multi_reduction <add>, %257, %cst_203 [2] : vector<2x4x2xf32> to vector<2x4xf32>
    %259 = vector.shape_cast %258 : vector<2x4xf32> to vector<2x4x1xf32>
    %260 = vector.broadcast %135 : vector<2x1xf32> to vector<2x32xf32>
    %261 = vector.broadcast %66 : vector<1x32xf32> to vector<2x32xf32>
    %262 = arith.mulf %260, %261 : vector<2x32xf32>
    %263 = vector.broadcast %59 : vector<1x32xf32> to vector<2x32xf32>
    %264 = arith.addf %262, %263 : vector<2x32xf32>
    %265 = vector.broadcast %135 : vector<2x1xf32> to vector<2x32xf32>
    %266 = vector.broadcast %64 : vector<1x32xf32> to vector<2x32xf32>
    %267 = arith.mulf %265, %266 : vector<2x32xf32>
    %268 = vector.broadcast %57 : vector<1x32xf32> to vector<2x32xf32>
    %269 = arith.addf %267, %268 : vector<2x32xf32>
    %cst_204 = arith.constant 0.000000e+00 : f32
    %270 = vector.broadcast %cst_204 : f32 to vector<2x32xf32>
    %271 = arith.maximumf %269, %270 : vector<2x32xf32>
    %cst_205 = arith.constant dense<0.000000e+00> : vector<2x32xf32>
    %272 = tpu.matmul %271, %63, %cst_205 {dimension_numbers = #tpu.dot_dimension_numbers<[1], [0], [0], [1], [0, 0, 1, 1], [], []>} : vector<2x32xf32>, vector<32x32xf32>, vector<2x32xf32> -> vector<2x32xf32>
    %273 = vector.broadcast %56 : vector<1x32xf32> to vector<2x32xf32>
    %274 = arith.addf %272, %273 : vector<2x32xf32>
    %cst_206 = arith.constant dense<0.000000e+00> : vector<2x32xf32>
    %275 = tpu.matmul %274, %62, %cst_206 {dimension_numbers = #tpu.dot_dimension_numbers<[1], [0], [0], [1], [0, 0, 1, 1], [], []>} : vector<2x32xf32>, vector<32x32xf32>, vector<2x32xf32> -> vector<2x32xf32>
    %276 = vector.broadcast %55 : vector<1x32xf32> to vector<2x32xf32>
    %277 = arith.addf %275, %276 : vector<2x32xf32>
    %278 = arith.negf %277 : vector<2x32xf32>
    %279 = math.exp %278 : vector<2x32xf32>
    %cst_207 = arith.constant 1.000000e+00 : f32
    %280 = vector.broadcast %cst_207 : f32 to vector<2x32xf32>
    %281 = arith.addf %280, %279 : vector<2x32xf32>
    %282 = arith.divf %280, %281 : vector<2x32xf32>
    %283 = arith.mulf %274, %282 : vector<2x32xf32>
    %cst_208 = arith.constant dense<0.000000e+00> : vector<2x32xf32>
    %284 = tpu.matmul %283, %65, %cst_208 {dimension_numbers = #tpu.dot_dimension_numbers<[1], [0], [0], [1], [0, 0, 1, 1], [], []>} : vector<2x32xf32>, vector<32x32xf32>, vector<2x32xf32> -> vector<2x32xf32>
    %285 = vector.broadcast %58 : vector<1x32xf32> to vector<2x32xf32>
    %286 = arith.addf %284, %285 : vector<2x32xf32>
    %287 = arith.addf %286, %264 : vector<2x32xf32>
    %cst_209 = arith.constant dense<0.000000e+00> : vector<2xf32>
    %288 = vector.multi_reduction <add>, %287, %cst_209 [1] : vector<2x32xf32> to vector<2xf32>
    %289 = vector.shape_cast %288 : vector<2xf32> to vector<2x1xf32>
    %cst_210 = arith.constant 3.200000e+01 : f32
    %290 = vector.broadcast %cst_210 : f32 to vector<2x1xf32>
    %291 = arith.divf %289, %290 : vector<2x1xf32>
    %292 = vector.broadcast %291 : vector<2x1xf32> to vector<2x32xf32>
    %293 = arith.subf %287, %292 : vector<2x32xf32>
    %294 = arith.mulf %293, %293 : vector<2x32xf32>
    %cst_211 = arith.constant dense<0.000000e+00> : vector<2xf32>
    %295 = vector.multi_reduction <add>, %294, %cst_211 [1] : vector<2x32xf32> to vector<2xf32>
    %296 = vector.shape_cast %295 : vector<2xf32> to vector<2x1xf32>
    %cst_212 = arith.constant 3.200000e+01 : f32
    %297 = vector.broadcast %cst_212 : f32 to vector<2x1xf32>
    %298 = arith.divf %296, %297 : vector<2x1xf32>
    %299 = vector.broadcast %291 : vector<2x1xf32> to vector<2x32xf32>
    %300 = arith.subf %287, %299 : vector<2x32xf32>
    %cst_213 = arith.constant 9.99999974E-6 : f32
    %301 = vector.broadcast %cst_213 : f32 to vector<2x1xf32>
    %302 = arith.addf %298, %301 : vector<2x1xf32>
    %303 = math.rsqrt %302 : vector<2x1xf32>
    %304 = vector.broadcast %303 : vector<2x1xf32> to vector<2x32xf32>
    %305 = arith.mulf %300, %304 : vector<2x32xf32>
    %306 = vector.broadcast %61 : vector<1x32xf32> to vector<2x32xf32>
    %307 = arith.mulf %305, %306 : vector<2x32xf32>
    %308 = vector.broadcast %60 : vector<1x32xf32> to vector<2x32xf32>
    %309 = arith.addf %307, %308 : vector<2x32xf32>
    %310 = tpu.concatenate %197, %259 in 1 : vector<2x8x1xf32>, vector<2x4x1xf32> -> vector<2x12x1xf32>
    %311 = vector.shape_cast %309 : vector<2x32xf32> to vector<2x1x32xf32>
    %312 = vector.broadcast %310 : vector<2x12x1xf32> to vector<2x12x32xf32>
    %313 = vector.broadcast %311 : vector<2x1x32xf32> to vector<2x12x32xf32>
    %314 = arith.addf %312, %313 : vector<2x12x32xf32>
    %315 = vector.shape_cast %314 : vector<2x12x32xf32> to vector<24x32xf32>
    %cst_214 = arith.constant dense<0.000000e+00> : vector<24x128xf32>
    %316 = tpu.matmul %315, %40, %cst_214 {dimension_numbers = #tpu.dot_dimension_numbers<[1], [0], [0], [1], [0, 0, 1, 1], [], []>} : vector<24x32xf32>, vector<32x128xf32>, vector<24x128xf32> -> vector<24x128xf32>
    %317 = vector.shape_cast %316 : vector<24x128xf32> to vector<2x12x128xf32>
    %318 = vector.shape_cast %38 : vector<1x128xf32> to vector<1x1x128xf32>
    %319 = vector.broadcast %318 : vector<1x1x128xf32> to vector<2x12x128xf32>
    %320 = arith.addf %317, %319 : vector<2x12x128xf32>
    %321 = tpu.transpose %320, [1, 0, 2] : vector<2x12x128xf32> -> vector<12x2x128xf32>
    %cst_215 = arith.constant 0.000000e+00 : f32
    %322 = vector.broadcast %cst_215 : f32 to vector<2x32xf32>
    %cst_216 = arith.constant 0.000000e+00 : f32
    %323 = vector.broadcast %cst_216 : f32 to vector<2x32xf32>
    %324 = vector.extract_strided_slice %321 {offsets = [0, 0, 0], sizes = [1, 2, 128], strides = [1, 1, 1]} : vector<12x2x128xf32> to vector<1x2x128xf32>
    %325 = vector.shape_cast %324 : vector<1x2x128xf32> to vector<2x128xf32>
    %cst_217 = arith.constant dense<0.000000e+00> : vector<2x128xf32>
    %326 = tpu.matmul %322, %39, %cst_217 {dimension_numbers = #tpu.dot_dimension_numbers<[1], [0], [0], [1], [0, 0, 1, 1], [], []>} : vector<2x32xf32>, vector<32x128xf32>, vector<2x128xf32> -> vector<2x128xf32>
    %327 = arith.addf %325, %326 : vector<2x128xf32>
    %328 = vector.extract_strided_slice %327 {offsets = [0, 0], sizes = [2, 32], strides = [1, 1]} : vector<2x128xf32> to vector<2x32xf32>
    %329 = arith.negf %328 : vector<2x32xf32>
    %330 = math.exp %329 : vector<2x32xf32>
    %cst_218 = arith.constant 1.000000e+00 : f32
    %331 = vector.broadcast %cst_218 : f32 to vector<2x32xf32>
    %332 = arith.addf %331, %330 : vector<2x32xf32>
    %333 = arith.divf %331, %332 : vector<2x32xf32>
    %334 = vector.extract_strided_slice %327 {offsets = [0, 32], sizes = [2, 32], strides = [1, 1]} : vector<2x128xf32> to vector<2x32xf32>
    %335 = arith.negf %334 : vector<2x32xf32>
    %336 = math.exp %335 : vector<2x32xf32>
    %cst_219 = arith.constant 1.000000e+00 : f32
    %337 = vector.broadcast %cst_219 : f32 to vector<2x32xf32>
    %338 = arith.addf %337, %336 : vector<2x32xf32>
    %339 = arith.divf %337, %338 : vector<2x32xf32>
    %340 = vector.extract_strided_slice %327 {offsets = [0, 64], sizes = [2, 32], strides = [1, 1]} : vector<2x128xf32> to vector<2x32xf32>
    %341 = math.tanh %340 : vector<2x32xf32>
    %342 = vector.extract_strided_slice %327 {offsets = [0, 96], sizes = [2, 32], strides = [1, 1]} : vector<2x128xf32> to vector<2x32xf32>
    %343 = arith.negf %342 : vector<2x32xf32>
    %344 = math.exp %343 : vector<2x32xf32>
    %cst_220 = arith.constant 1.000000e+00 : f32
    %345 = vector.broadcast %cst_220 : f32 to vector<2x32xf32>
    %346 = arith.addf %345, %344 : vector<2x32xf32>
    %347 = arith.divf %345, %346 : vector<2x32xf32>
    %348 = arith.mulf %339, %323 : vector<2x32xf32>
    %349 = arith.mulf %333, %341 : vector<2x32xf32>
    %350 = arith.addf %348, %349 : vector<2x32xf32>
    %351 = math.tanh %350 : vector<2x32xf32>
    %352 = arith.mulf %347, %351 : vector<2x32xf32>
    %353 = vector.extract_strided_slice %321 {offsets = [1, 0, 0], sizes = [1, 2, 128], strides = [1, 1, 1]} : vector<12x2x128xf32> to vector<1x2x128xf32>
    %354 = vector.shape_cast %353 : vector<1x2x128xf32> to vector<2x128xf32>
    %cst_221 = arith.constant dense<0.000000e+00> : vector<2x128xf32>
    %355 = tpu.matmul %352, %39, %cst_221 {dimension_numbers = #tpu.dot_dimension_numbers<[1], [0], [0], [1], [0, 0, 1, 1], [], []>} : vector<2x32xf32>, vector<32x128xf32>, vector<2x128xf32> -> vector<2x128xf32>
    %356 = arith.addf %354, %355 : vector<2x128xf32>
    %357 = vector.extract_strided_slice %356 {offsets = [0, 0], sizes = [2, 32], strides = [1, 1]} : vector<2x128xf32> to vector<2x32xf32>
    %358 = arith.negf %357 : vector<2x32xf32>
    %359 = math.exp %358 : vector<2x32xf32>
    %cst_222 = arith.constant 1.000000e+00 : f32
    %360 = vector.broadcast %cst_222 : f32 to vector<2x32xf32>
    %361 = arith.addf %360, %359 : vector<2x32xf32>
    %362 = arith.divf %360, %361 : vector<2x32xf32>
    %363 = vector.extract_strided_slice %356 {offsets = [0, 32], sizes = [2, 32], strides = [1, 1]} : vector<2x128xf32> to vector<2x32xf32>
    %364 = arith.negf %363 : vector<2x32xf32>
    %365 = math.exp %364 : vector<2x32xf32>
    %cst_223 = arith.constant 1.000000e+00 : f32
    %366 = vector.broadcast %cst_223 : f32 to vector<2x32xf32>
    %367 = arith.addf %366, %365 : vector<2x32xf32>
    %368 = arith.divf %366, %367 : vector<2x32xf32>
    %369 = vector.extract_strided_slice %356 {offsets = [0, 64], sizes = [2, 32], strides = [1, 1]} : vector<2x128xf32> to vector<2x32xf32>
    %370 = math.tanh %369 : vector<2x32xf32>
    %371 = vector.extract_strided_slice %356 {offsets = [0, 96], sizes = [2, 32], strides = [1, 1]} : vector<2x128xf32> to vector<2x32xf32>
    %372 = arith.negf %371 : vector<2x32xf32>
    %373 = math.exp %372 : vector<2x32xf32>
    %cst_224 = arith.constant 1.000000e+00 : f32
    %374 = vector.broadcast %cst_224 : f32 to vector<2x32xf32>
    %375 = arith.addf %374, %373 : vector<2x32xf32>
    %376 = arith.divf %374, %375 : vector<2x32xf32>
    %377 = arith.mulf %368, %350 : vector<2x32xf32>
    %378 = arith.mulf %362, %370 : vector<2x32xf32>
    %379 = arith.addf %377, %378 : vector<2x32xf32>
    %380 = math.tanh %379 : vector<2x32xf32>
    %381 = arith.mulf %376, %380 : vector<2x32xf32>
    %382 = vector.extract_strided_slice %321 {offsets = [2, 0, 0], sizes = [1, 2, 128], strides = [1, 1, 1]} : vector<12x2x128xf32> to vector<1x2x128xf32>
    %383 = vector.shape_cast %382 : vector<1x2x128xf32> to vector<2x128xf32>
    %cst_225 = arith.constant dense<0.000000e+00> : vector<2x128xf32>
    %384 = tpu.matmul %381, %39, %cst_225 {dimension_numbers = #tpu.dot_dimension_numbers<[1], [0], [0], [1], [0, 0, 1, 1], [], []>} : vector<2x32xf32>, vector<32x128xf32>, vector<2x128xf32> -> vector<2x128xf32>
    %385 = arith.addf %383, %384 : vector<2x128xf32>
    %386 = vector.extract_strided_slice %385 {offsets = [0, 0], sizes = [2, 32], strides = [1, 1]} : vector<2x128xf32> to vector<2x32xf32>
    %387 = arith.negf %386 : vector<2x32xf32>
    %388 = math.exp %387 : vector<2x32xf32>
    %cst_226 = arith.constant 1.000000e+00 : f32
    %389 = vector.broadcast %cst_226 : f32 to vector<2x32xf32>
    %390 = arith.addf %389, %388 : vector<2x32xf32>
    %391 = arith.divf %389, %390 : vector<2x32xf32>
    %392 = vector.extract_strided_slice %385 {offsets = [0, 32], sizes = [2, 32], strides = [1, 1]} : vector<2x128xf32> to vector<2x32xf32>
    %393 = arith.negf %392 : vector<2x32xf32>
    %394 = math.exp %393 : vector<2x32xf32>
    %cst_227 = arith.constant 1.000000e+00 : f32
    %395 = vector.broadcast %cst_227 : f32 to vector<2x32xf32>
    %396 = arith.addf %395, %394 : vector<2x32xf32>
    %397 = arith.divf %395, %396 : vector<2x32xf32>
    %398 = vector.extract_strided_slice %385 {offsets = [0, 64], sizes = [2, 32], strides = [1, 1]} : vector<2x128xf32> to vector<2x32xf32>
    %399 = math.tanh %398 : vector<2x32xf32>
    %400 = vector.extract_strided_slice %385 {offsets = [0, 96], sizes = [2, 32], strides = [1, 1]} : vector<2x128xf32> to vector<2x32xf32>
    %401 = arith.negf %400 : vector<2x32xf32>
    %402 = math.exp %401 : vector<2x32xf32>
    %cst_228 = arith.constant 1.000000e+00 : f32
    %403 = vector.broadcast %cst_228 : f32 to vector<2x32xf32>
    %404 = arith.addf %403, %402 : vector<2x32xf32>
    %405 = arith.divf %403, %404 : vector<2x32xf32>
    %406 = arith.mulf %397, %379 : vector<2x32xf32>
    %407 = arith.mulf %391, %399 : vector<2x32xf32>
    %408 = arith.addf %406, %407 : vector<2x32xf32>
    %409 = math.tanh %408 : vector<2x32xf32>
    %410 = arith.mulf %405, %409 : vector<2x32xf32>
    %411 = vector.extract_strided_slice %321 {offsets = [3, 0, 0], sizes = [1, 2, 128], strides = [1, 1, 1]} : vector<12x2x128xf32> to vector<1x2x128xf32>
    %412 = vector.shape_cast %411 : vector<1x2x128xf32> to vector<2x128xf32>
    %cst_229 = arith.constant dense<0.000000e+00> : vector<2x128xf32>
    %413 = tpu.matmul %410, %39, %cst_229 {dimension_numbers = #tpu.dot_dimension_numbers<[1], [0], [0], [1], [0, 0, 1, 1], [], []>} : vector<2x32xf32>, vector<32x128xf32>, vector<2x128xf32> -> vector<2x128xf32>
    %414 = arith.addf %412, %413 : vector<2x128xf32>
    %415 = vector.extract_strided_slice %414 {offsets = [0, 0], sizes = [2, 32], strides = [1, 1]} : vector<2x128xf32> to vector<2x32xf32>
    %416 = arith.negf %415 : vector<2x32xf32>
    %417 = math.exp %416 : vector<2x32xf32>
    %cst_230 = arith.constant 1.000000e+00 : f32
    %418 = vector.broadcast %cst_230 : f32 to vector<2x32xf32>
    %419 = arith.addf %418, %417 : vector<2x32xf32>
    %420 = arith.divf %418, %419 : vector<2x32xf32>
    %421 = vector.extract_strided_slice %414 {offsets = [0, 32], sizes = [2, 32], strides = [1, 1]} : vector<2x128xf32> to vector<2x32xf32>
    %422 = arith.negf %421 : vector<2x32xf32>
    %423 = math.exp %422 : vector<2x32xf32>
    %cst_231 = arith.constant 1.000000e+00 : f32
    %424 = vector.broadcast %cst_231 : f32 to vector<2x32xf32>
    %425 = arith.addf %424, %423 : vector<2x32xf32>
    %426 = arith.divf %424, %425 : vector<2x32xf32>
    %427 = vector.extract_strided_slice %414 {offsets = [0, 64], sizes = [2, 32], strides = [1, 1]} : vector<2x128xf32> to vector<2x32xf32>
    %428 = math.tanh %427 : vector<2x32xf32>
    %429 = vector.extract_strided_slice %414 {offsets = [0, 96], sizes = [2, 32], strides = [1, 1]} : vector<2x128xf32> to vector<2x32xf32>
    %430 = arith.negf %429 : vector<2x32xf32>
    %431 = math.exp %430 : vector<2x32xf32>
    %cst_232 = arith.constant 1.000000e+00 : f32
    %432 = vector.broadcast %cst_232 : f32 to vector<2x32xf32>
    %433 = arith.addf %432, %431 : vector<2x32xf32>
    %434 = arith.divf %432, %433 : vector<2x32xf32>
    %435 = arith.mulf %426, %408 : vector<2x32xf32>
    %436 = arith.mulf %420, %428 : vector<2x32xf32>
    %437 = arith.addf %435, %436 : vector<2x32xf32>
    %438 = math.tanh %437 : vector<2x32xf32>
    %439 = arith.mulf %434, %438 : vector<2x32xf32>
    %440 = vector.extract_strided_slice %321 {offsets = [4, 0, 0], sizes = [1, 2, 128], strides = [1, 1, 1]} : vector<12x2x128xf32> to vector<1x2x128xf32>
    %441 = vector.shape_cast %440 : vector<1x2x128xf32> to vector<2x128xf32>
    %cst_233 = arith.constant dense<0.000000e+00> : vector<2x128xf32>
    %442 = tpu.matmul %439, %39, %cst_233 {dimension_numbers = #tpu.dot_dimension_numbers<[1], [0], [0], [1], [0, 0, 1, 1], [], []>} : vector<2x32xf32>, vector<32x128xf32>, vector<2x128xf32> -> vector<2x128xf32>
    %443 = arith.addf %441, %442 : vector<2x128xf32>
    %444 = vector.extract_strided_slice %443 {offsets = [0, 0], sizes = [2, 32], strides = [1, 1]} : vector<2x128xf32> to vector<2x32xf32>
    %445 = arith.negf %444 : vector<2x32xf32>
    %446 = math.exp %445 : vector<2x32xf32>
    %cst_234 = arith.constant 1.000000e+00 : f32
    %447 = vector.broadcast %cst_234 : f32 to vector<2x32xf32>
    %448 = arith.addf %447, %446 : vector<2x32xf32>
    %449 = arith.divf %447, %448 : vector<2x32xf32>
    %450 = vector.extract_strided_slice %443 {offsets = [0, 32], sizes = [2, 32], strides = [1, 1]} : vector<2x128xf32> to vector<2x32xf32>
    %451 = arith.negf %450 : vector<2x32xf32>
    %452 = math.exp %451 : vector<2x32xf32>
    %cst_235 = arith.constant 1.000000e+00 : f32
    %453 = vector.broadcast %cst_235 : f32 to vector<2x32xf32>
    %454 = arith.addf %453, %452 : vector<2x32xf32>
    %455 = arith.divf %453, %454 : vector<2x32xf32>
    %456 = vector.extract_strided_slice %443 {offsets = [0, 64], sizes = [2, 32], strides = [1, 1]} : vector<2x128xf32> to vector<2x32xf32>
    %457 = math.tanh %456 : vector<2x32xf32>
    %458 = vector.extract_strided_slice %443 {offsets = [0, 96], sizes = [2, 32], strides = [1, 1]} : vector<2x128xf32> to vector<2x32xf32>
    %459 = arith.negf %458 : vector<2x32xf32>
    %460 = math.exp %459 : vector<2x32xf32>
    %cst_236 = arith.constant 1.000000e+00 : f32
    %461 = vector.broadcast %cst_236 : f32 to vector<2x32xf32>
    %462 = arith.addf %461, %460 : vector<2x32xf32>
    %463 = arith.divf %461, %462 : vector<2x32xf32>
    %464 = arith.mulf %455, %437 : vector<2x32xf32>
    %465 = arith.mulf %449, %457 : vector<2x32xf32>
    %466 = arith.addf %464, %465 : vector<2x32xf32>
    %467 = math.tanh %466 : vector<2x32xf32>
    %468 = arith.mulf %463, %467 : vector<2x32xf32>
    %469 = vector.extract_strided_slice %321 {offsets = [5, 0, 0], sizes = [1, 2, 128], strides = [1, 1, 1]} : vector<12x2x128xf32> to vector<1x2x128xf32>
    %470 = vector.shape_cast %469 : vector<1x2x128xf32> to vector<2x128xf32>
    %cst_237 = arith.constant dense<0.000000e+00> : vector<2x128xf32>
    %471 = tpu.matmul %468, %39, %cst_237 {dimension_numbers = #tpu.dot_dimension_numbers<[1], [0], [0], [1], [0, 0, 1, 1], [], []>} : vector<2x32xf32>, vector<32x128xf32>, vector<2x128xf32> -> vector<2x128xf32>
    %472 = arith.addf %470, %471 : vector<2x128xf32>
    %473 = vector.extract_strided_slice %472 {offsets = [0, 0], sizes = [2, 32], strides = [1, 1]} : vector<2x128xf32> to vector<2x32xf32>
    %474 = arith.negf %473 : vector<2x32xf32>
    %475 = math.exp %474 : vector<2x32xf32>
    %cst_238 = arith.constant 1.000000e+00 : f32
    %476 = vector.broadcast %cst_238 : f32 to vector<2x32xf32>
    %477 = arith.addf %476, %475 : vector<2x32xf32>
    %478 = arith.divf %476, %477 : vector<2x32xf32>
    %479 = vector.extract_strided_slice %472 {offsets = [0, 32], sizes = [2, 32], strides = [1, 1]} : vector<2x128xf32> to vector<2x32xf32>
    %480 = arith.negf %479 : vector<2x32xf32>
    %481 = math.exp %480 : vector<2x32xf32>
    %cst_239 = arith.constant 1.000000e+00 : f32
    %482 = vector.broadcast %cst_239 : f32 to vector<2x32xf32>
    %483 = arith.addf %482, %481 : vector<2x32xf32>
    %484 = arith.divf %482, %483 : vector<2x32xf32>
    %485 = vector.extract_strided_slice %472 {offsets = [0, 64], sizes = [2, 32], strides = [1, 1]} : vector<2x128xf32> to vector<2x32xf32>
    %486 = math.tanh %485 : vector<2x32xf32>
    %487 = vector.extract_strided_slice %472 {offsets = [0, 96], sizes = [2, 32], strides = [1, 1]} : vector<2x128xf32> to vector<2x32xf32>
    %488 = arith.negf %487 : vector<2x32xf32>
    %489 = math.exp %488 : vector<2x32xf32>
    %cst_240 = arith.constant 1.000000e+00 : f32
    %490 = vector.broadcast %cst_240 : f32 to vector<2x32xf32>
    %491 = arith.addf %490, %489 : vector<2x32xf32>
    %492 = arith.divf %490, %491 : vector<2x32xf32>
    %493 = arith.mulf %484, %466 : vector<2x32xf32>
    %494 = arith.mulf %478, %486 : vector<2x32xf32>
    %495 = arith.addf %493, %494 : vector<2x32xf32>
    %496 = math.tanh %495 : vector<2x32xf32>
    %497 = arith.mulf %492, %496 : vector<2x32xf32>
    %498 = vector.extract_strided_slice %321 {offsets = [6, 0, 0], sizes = [1, 2, 128], strides = [1, 1, 1]} : vector<12x2x128xf32> to vector<1x2x128xf32>
    %499 = vector.shape_cast %498 : vector<1x2x128xf32> to vector<2x128xf32>
    %cst_241 = arith.constant dense<0.000000e+00> : vector<2x128xf32>
    %500 = tpu.matmul %497, %39, %cst_241 {dimension_numbers = #tpu.dot_dimension_numbers<[1], [0], [0], [1], [0, 0, 1, 1], [], []>} : vector<2x32xf32>, vector<32x128xf32>, vector<2x128xf32> -> vector<2x128xf32>
    %501 = arith.addf %499, %500 : vector<2x128xf32>
    %502 = vector.extract_strided_slice %501 {offsets = [0, 0], sizes = [2, 32], strides = [1, 1]} : vector<2x128xf32> to vector<2x32xf32>
    %503 = arith.negf %502 : vector<2x32xf32>
    %504 = math.exp %503 : vector<2x32xf32>
    %cst_242 = arith.constant 1.000000e+00 : f32
    %505 = vector.broadcast %cst_242 : f32 to vector<2x32xf32>
    %506 = arith.addf %505, %504 : vector<2x32xf32>
    %507 = arith.divf %505, %506 : vector<2x32xf32>
    %508 = vector.extract_strided_slice %501 {offsets = [0, 32], sizes = [2, 32], strides = [1, 1]} : vector<2x128xf32> to vector<2x32xf32>
    %509 = arith.negf %508 : vector<2x32xf32>
    %510 = math.exp %509 : vector<2x32xf32>
    %cst_243 = arith.constant 1.000000e+00 : f32
    %511 = vector.broadcast %cst_243 : f32 to vector<2x32xf32>
    %512 = arith.addf %511, %510 : vector<2x32xf32>
    %513 = arith.divf %511, %512 : vector<2x32xf32>
    %514 = vector.extract_strided_slice %501 {offsets = [0, 64], sizes = [2, 32], strides = [1, 1]} : vector<2x128xf32> to vector<2x32xf32>
    %515 = math.tanh %514 : vector<2x32xf32>
    %516 = vector.extract_strided_slice %501 {offsets = [0, 96], sizes = [2, 32], strides = [1, 1]} : vector<2x128xf32> to vector<2x32xf32>
    %517 = arith.negf %516 : vector<2x32xf32>
    %518 = math.exp %517 : vector<2x32xf32>
    %cst_244 = arith.constant 1.000000e+00 : f32
    %519 = vector.broadcast %cst_244 : f32 to vector<2x32xf32>
    %520 = arith.addf %519, %518 : vector<2x32xf32>
    %521 = arith.divf %519, %520 : vector<2x32xf32>
    %522 = arith.mulf %513, %495 : vector<2x32xf32>
    %523 = arith.mulf %507, %515 : vector<2x32xf32>
    %524 = arith.addf %522, %523 : vector<2x32xf32>
    %525 = math.tanh %524 : vector<2x32xf32>
    %526 = arith.mulf %521, %525 : vector<2x32xf32>
    %527 = vector.extract_strided_slice %321 {offsets = [7, 0, 0], sizes = [1, 2, 128], strides = [1, 1, 1]} : vector<12x2x128xf32> to vector<1x2x128xf32>
    %528 = vector.shape_cast %527 : vector<1x2x128xf32> to vector<2x128xf32>
    %cst_245 = arith.constant dense<0.000000e+00> : vector<2x128xf32>
    %529 = tpu.matmul %526, %39, %cst_245 {dimension_numbers = #tpu.dot_dimension_numbers<[1], [0], [0], [1], [0, 0, 1, 1], [], []>} : vector<2x32xf32>, vector<32x128xf32>, vector<2x128xf32> -> vector<2x128xf32>
    %530 = arith.addf %528, %529 : vector<2x128xf32>
    %531 = vector.extract_strided_slice %530 {offsets = [0, 0], sizes = [2, 32], strides = [1, 1]} : vector<2x128xf32> to vector<2x32xf32>
    %532 = arith.negf %531 : vector<2x32xf32>
    %533 = math.exp %532 : vector<2x32xf32>
    %cst_246 = arith.constant 1.000000e+00 : f32
    %534 = vector.broadcast %cst_246 : f32 to vector<2x32xf32>
    %535 = arith.addf %534, %533 : vector<2x32xf32>
    %536 = arith.divf %534, %535 : vector<2x32xf32>
    %537 = vector.extract_strided_slice %530 {offsets = [0, 32], sizes = [2, 32], strides = [1, 1]} : vector<2x128xf32> to vector<2x32xf32>
    %538 = arith.negf %537 : vector<2x32xf32>
    %539 = math.exp %538 : vector<2x32xf32>
    %cst_247 = arith.constant 1.000000e+00 : f32
    %540 = vector.broadcast %cst_247 : f32 to vector<2x32xf32>
    %541 = arith.addf %540, %539 : vector<2x32xf32>
    %542 = arith.divf %540, %541 : vector<2x32xf32>
    %543 = vector.extract_strided_slice %530 {offsets = [0, 64], sizes = [2, 32], strides = [1, 1]} : vector<2x128xf32> to vector<2x32xf32>
    %544 = math.tanh %543 : vector<2x32xf32>
    %545 = vector.extract_strided_slice %530 {offsets = [0, 96], sizes = [2, 32], strides = [1, 1]} : vector<2x128xf32> to vector<2x32xf32>
    %546 = arith.negf %545 : vector<2x32xf32>
    %547 = math.exp %546 : vector<2x32xf32>
    %cst_248 = arith.constant 1.000000e+00 : f32
    %548 = vector.broadcast %cst_248 : f32 to vector<2x32xf32>
    %549 = arith.addf %548, %547 : vector<2x32xf32>
    %550 = arith.divf %548, %549 : vector<2x32xf32>
    %551 = arith.mulf %542, %524 : vector<2x32xf32>
    %552 = arith.mulf %536, %544 : vector<2x32xf32>
    %553 = arith.addf %551, %552 : vector<2x32xf32>
    %554 = math.tanh %553 : vector<2x32xf32>
    %555 = arith.mulf %550, %554 : vector<2x32xf32>
    %556 = vector.extract_strided_slice %321 {offsets = [8, 0, 0], sizes = [1, 2, 128], strides = [1, 1, 1]} : vector<12x2x128xf32> to vector<1x2x128xf32>
    %557 = vector.shape_cast %556 : vector<1x2x128xf32> to vector<2x128xf32>
    %cst_249 = arith.constant dense<0.000000e+00> : vector<2x128xf32>
    %558 = tpu.matmul %555, %39, %cst_249 {dimension_numbers = #tpu.dot_dimension_numbers<[1], [0], [0], [1], [0, 0, 1, 1], [], []>} : vector<2x32xf32>, vector<32x128xf32>, vector<2x128xf32> -> vector<2x128xf32>
    %559 = arith.addf %557, %558 : vector<2x128xf32>
    %560 = vector.extract_strided_slice %559 {offsets = [0, 0], sizes = [2, 32], strides = [1, 1]} : vector<2x128xf32> to vector<2x32xf32>
    %561 = arith.negf %560 : vector<2x32xf32>
    %562 = math.exp %561 : vector<2x32xf32>
    %cst_250 = arith.constant 1.000000e+00 : f32
    %563 = vector.broadcast %cst_250 : f32 to vector<2x32xf32>
    %564 = arith.addf %563, %562 : vector<2x32xf32>
    %565 = arith.divf %563, %564 : vector<2x32xf32>
    %566 = vector.extract_strided_slice %559 {offsets = [0, 32], sizes = [2, 32], strides = [1, 1]} : vector<2x128xf32> to vector<2x32xf32>
    %567 = arith.negf %566 : vector<2x32xf32>
    %568 = math.exp %567 : vector<2x32xf32>
    %cst_251 = arith.constant 1.000000e+00 : f32
    %569 = vector.broadcast %cst_251 : f32 to vector<2x32xf32>
    %570 = arith.addf %569, %568 : vector<2x32xf32>
    %571 = arith.divf %569, %570 : vector<2x32xf32>
    %572 = vector.extract_strided_slice %559 {offsets = [0, 64], sizes = [2, 32], strides = [1, 1]} : vector<2x128xf32> to vector<2x32xf32>
    %573 = math.tanh %572 : vector<2x32xf32>
    %574 = vector.extract_strided_slice %559 {offsets = [0, 96], sizes = [2, 32], strides = [1, 1]} : vector<2x128xf32> to vector<2x32xf32>
    %575 = arith.negf %574 : vector<2x32xf32>
    %576 = math.exp %575 : vector<2x32xf32>
    %cst_252 = arith.constant 1.000000e+00 : f32
    %577 = vector.broadcast %cst_252 : f32 to vector<2x32xf32>
    %578 = arith.addf %577, %576 : vector<2x32xf32>
    %579 = arith.divf %577, %578 : vector<2x32xf32>
    %580 = arith.mulf %571, %553 : vector<2x32xf32>
    %581 = arith.mulf %565, %573 : vector<2x32xf32>
    %582 = arith.addf %580, %581 : vector<2x32xf32>
    %583 = math.tanh %582 : vector<2x32xf32>
    %584 = arith.mulf %579, %583 : vector<2x32xf32>
    %585 = vector.extract_strided_slice %321 {offsets = [9, 0, 0], sizes = [1, 2, 128], strides = [1, 1, 1]} : vector<12x2x128xf32> to vector<1x2x128xf32>
    %586 = vector.shape_cast %585 : vector<1x2x128xf32> to vector<2x128xf32>
    %cst_253 = arith.constant dense<0.000000e+00> : vector<2x128xf32>
    %587 = tpu.matmul %584, %39, %cst_253 {dimension_numbers = #tpu.dot_dimension_numbers<[1], [0], [0], [1], [0, 0, 1, 1], [], []>} : vector<2x32xf32>, vector<32x128xf32>, vector<2x128xf32> -> vector<2x128xf32>
    %588 = arith.addf %586, %587 : vector<2x128xf32>
    %589 = vector.extract_strided_slice %588 {offsets = [0, 0], sizes = [2, 32], strides = [1, 1]} : vector<2x128xf32> to vector<2x32xf32>
    %590 = arith.negf %589 : vector<2x32xf32>
    %591 = math.exp %590 : vector<2x32xf32>
    %cst_254 = arith.constant 1.000000e+00 : f32
    %592 = vector.broadcast %cst_254 : f32 to vector<2x32xf32>
    %593 = arith.addf %592, %591 : vector<2x32xf32>
    %594 = arith.divf %592, %593 : vector<2x32xf32>
    %595 = vector.extract_strided_slice %588 {offsets = [0, 32], sizes = [2, 32], strides = [1, 1]} : vector<2x128xf32> to vector<2x32xf32>
    %596 = arith.negf %595 : vector<2x32xf32>
    %597 = math.exp %596 : vector<2x32xf32>
    %cst_255 = arith.constant 1.000000e+00 : f32
    %598 = vector.broadcast %cst_255 : f32 to vector<2x32xf32>
    %599 = arith.addf %598, %597 : vector<2x32xf32>
    %600 = arith.divf %598, %599 : vector<2x32xf32>
    %601 = vector.extract_strided_slice %588 {offsets = [0, 64], sizes = [2, 32], strides = [1, 1]} : vector<2x128xf32> to vector<2x32xf32>
    %602 = math.tanh %601 : vector<2x32xf32>
    %603 = vector.extract_strided_slice %588 {offsets = [0, 96], sizes = [2, 32], strides = [1, 1]} : vector<2x128xf32> to vector<2x32xf32>
    %604 = arith.negf %603 : vector<2x32xf32>
    %605 = math.exp %604 : vector<2x32xf32>
    %cst_256 = arith.constant 1.000000e+00 : f32
    %606 = vector.broadcast %cst_256 : f32 to vector<2x32xf32>
    %607 = arith.addf %606, %605 : vector<2x32xf32>
    %608 = arith.divf %606, %607 : vector<2x32xf32>
    %609 = arith.mulf %600, %582 : vector<2x32xf32>
    %610 = arith.mulf %594, %602 : vector<2x32xf32>
    %611 = arith.addf %609, %610 : vector<2x32xf32>
    %612 = math.tanh %611 : vector<2x32xf32>
    %613 = arith.mulf %608, %612 : vector<2x32xf32>
    %614 = vector.extract_strided_slice %321 {offsets = [10, 0, 0], sizes = [1, 2, 128], strides = [1, 1, 1]} : vector<12x2x128xf32> to vector<1x2x128xf32>
    %615 = vector.shape_cast %614 : vector<1x2x128xf32> to vector<2x128xf32>
    %cst_257 = arith.constant dense<0.000000e+00> : vector<2x128xf32>
    %616 = tpu.matmul %613, %39, %cst_257 {dimension_numbers = #tpu.dot_dimension_numbers<[1], [0], [0], [1], [0, 0, 1, 1], [], []>} : vector<2x32xf32>, vector<32x128xf32>, vector<2x128xf32> -> vector<2x128xf32>
    %617 = arith.addf %615, %616 : vector<2x128xf32>
    %618 = vector.extract_strided_slice %617 {offsets = [0, 0], sizes = [2, 32], strides = [1, 1]} : vector<2x128xf32> to vector<2x32xf32>
    %619 = arith.negf %618 : vector<2x32xf32>
    %620 = math.exp %619 : vector<2x32xf32>
    %cst_258 = arith.constant 1.000000e+00 : f32
    %621 = vector.broadcast %cst_258 : f32 to vector<2x32xf32>
    %622 = arith.addf %621, %620 : vector<2x32xf32>
    %623 = arith.divf %621, %622 : vector<2x32xf32>
    %624 = vector.extract_strided_slice %617 {offsets = [0, 32], sizes = [2, 32], strides = [1, 1]} : vector<2x128xf32> to vector<2x32xf32>
    %625 = arith.negf %624 : vector<2x32xf32>
    %626 = math.exp %625 : vector<2x32xf32>
    %cst_259 = arith.constant 1.000000e+00 : f32
    %627 = vector.broadcast %cst_259 : f32 to vector<2x32xf32>
    %628 = arith.addf %627, %626 : vector<2x32xf32>
    %629 = arith.divf %627, %628 : vector<2x32xf32>
    %630 = vector.extract_strided_slice %617 {offsets = [0, 64], sizes = [2, 32], strides = [1, 1]} : vector<2x128xf32> to vector<2x32xf32>
    %631 = math.tanh %630 : vector<2x32xf32>
    %632 = vector.extract_strided_slice %617 {offsets = [0, 96], sizes = [2, 32], strides = [1, 1]} : vector<2x128xf32> to vector<2x32xf32>
    %633 = arith.negf %632 : vector<2x32xf32>
    %634 = math.exp %633 : vector<2x32xf32>
    %cst_260 = arith.constant 1.000000e+00 : f32
    %635 = vector.broadcast %cst_260 : f32 to vector<2x32xf32>
    %636 = arith.addf %635, %634 : vector<2x32xf32>
    %637 = arith.divf %635, %636 : vector<2x32xf32>
    %638 = arith.mulf %629, %611 : vector<2x32xf32>
    %639 = arith.mulf %623, %631 : vector<2x32xf32>
    %640 = arith.addf %638, %639 : vector<2x32xf32>
    %641 = math.tanh %640 : vector<2x32xf32>
    %642 = arith.mulf %637, %641 : vector<2x32xf32>
    %643 = vector.extract_strided_slice %321 {offsets = [11, 0, 0], sizes = [1, 2, 128], strides = [1, 1, 1]} : vector<12x2x128xf32> to vector<1x2x128xf32>
    %644 = vector.shape_cast %643 : vector<1x2x128xf32> to vector<2x128xf32>
    %cst_261 = arith.constant dense<0.000000e+00> : vector<2x128xf32>
    %645 = tpu.matmul %642, %39, %cst_261 {dimension_numbers = #tpu.dot_dimension_numbers<[1], [0], [0], [1], [0, 0, 1, 1], [], []>} : vector<2x32xf32>, vector<32x128xf32>, vector<2x128xf32> -> vector<2x128xf32>
    %646 = arith.addf %644, %645 : vector<2x128xf32>
    %647 = vector.extract_strided_slice %646 {offsets = [0, 0], sizes = [2, 32], strides = [1, 1]} : vector<2x128xf32> to vector<2x32xf32>
    %648 = arith.negf %647 : vector<2x32xf32>
    %649 = math.exp %648 : vector<2x32xf32>
    %cst_262 = arith.constant 1.000000e+00 : f32
    %650 = vector.broadcast %cst_262 : f32 to vector<2x32xf32>
    %651 = arith.addf %650, %649 : vector<2x32xf32>
    %652 = arith.divf %650, %651 : vector<2x32xf32>
    %653 = vector.extract_strided_slice %646 {offsets = [0, 32], sizes = [2, 32], strides = [1, 1]} : vector<2x128xf32> to vector<2x32xf32>
    %654 = arith.negf %653 : vector<2x32xf32>
    %655 = math.exp %654 : vector<2x32xf32>
    %cst_263 = arith.constant 1.000000e+00 : f32
    %656 = vector.broadcast %cst_263 : f32 to vector<2x32xf32>
    %657 = arith.addf %656, %655 : vector<2x32xf32>
    %658 = arith.divf %656, %657 : vector<2x32xf32>
    %659 = vector.extract_strided_slice %646 {offsets = [0, 64], sizes = [2, 32], strides = [1, 1]} : vector<2x128xf32> to vector<2x32xf32>
    %660 = math.tanh %659 : vector<2x32xf32>
    %661 = vector.extract_strided_slice %646 {offsets = [0, 96], sizes = [2, 32], strides = [1, 1]} : vector<2x128xf32> to vector<2x32xf32>
    %662 = arith.negf %661 : vector<2x32xf32>
    %663 = math.exp %662 : vector<2x32xf32>
    %cst_264 = arith.constant 1.000000e+00 : f32
    %664 = vector.broadcast %cst_264 : f32 to vector<2x32xf32>
    %665 = arith.addf %664, %663 : vector<2x32xf32>
    %666 = arith.divf %664, %665 : vector<2x32xf32>
    %667 = arith.mulf %658, %640 : vector<2x32xf32>
    %668 = arith.mulf %652, %660 : vector<2x32xf32>
    %669 = arith.addf %667, %668 : vector<2x32xf32>
    %670 = math.tanh %669 : vector<2x32xf32>
    %671 = arith.mulf %666, %670 : vector<2x32xf32>
    %672 = vector.shape_cast %352 : vector<2x32xf32> to vector<2x1x32xf32>
    %673 = vector.shape_cast %381 : vector<2x32xf32> to vector<2x1x32xf32>
    %674 = vector.shape_cast %410 : vector<2x32xf32> to vector<2x1x32xf32>
    %675 = vector.shape_cast %439 : vector<2x32xf32> to vector<2x1x32xf32>
    %676 = vector.shape_cast %468 : vector<2x32xf32> to vector<2x1x32xf32>
    %677 = vector.shape_cast %497 : vector<2x32xf32> to vector<2x1x32xf32>
    %678 = vector.shape_cast %526 : vector<2x32xf32> to vector<2x1x32xf32>
    %679 = vector.shape_cast %555 : vector<2x32xf32> to vector<2x1x32xf32>
    %680 = vector.shape_cast %584 : vector<2x32xf32> to vector<2x1x32xf32>
    %681 = vector.shape_cast %613 : vector<2x32xf32> to vector<2x1x32xf32>
    %682 = vector.shape_cast %642 : vector<2x32xf32> to vector<2x1x32xf32>
    %683 = vector.shape_cast %671 : vector<2x32xf32> to vector<2x1x32xf32>
    %684 = tpu.concatenate %672, %673, %674, %675, %676, %677, %678, %679, %680, %681, %682, %683 in 1 : vector<2x1x32xf32>, vector<2x1x32xf32>, vector<2x1x32xf32>, vector<2x1x32xf32>, vector<2x1x32xf32>, vector<2x1x32xf32>, vector<2x1x32xf32>, vector<2x1x32xf32>, vector<2x1x32xf32>, vector<2x1x32xf32>, vector<2x1x32xf32>, vector<2x1x32xf32> -> vector<2x12x32xf32>
    %685 = vector.shape_cast %684 : vector<2x12x32xf32> to vector<24x32xf32>
    %cst_265 = arith.constant dense<0.000000e+00> : vector<24x96xf32>
    %686 = tpu.matmul %685, %3, %cst_265 {dimension_numbers = #tpu.dot_dimension_numbers<[1], [0], [0], [1], [0, 0, 1, 1], [], []>} : vector<24x32xf32>, vector<32x96xf32>, vector<24x96xf32> -> vector<24x96xf32>
    %687 = vector.shape_cast %686 : vector<24x96xf32> to vector<2x12x96xf32>
    %688 = vector.shape_cast %1 : vector<1x96xf32> to vector<1x1x96xf32>
    %689 = vector.broadcast %688 : vector<1x1x96xf32> to vector<2x12x96xf32>
    %690 = arith.addf %687, %689 : vector<2x12x96xf32>
    %691 = vector.extract_strided_slice %690 {offsets = [0, 0, 0], sizes = [2, 12, 32], strides = [1, 1, 1]} : vector<2x12x96xf32> to vector<2x12x32xf32>
    %692 = vector.shape_cast %691 : vector<2x12x32xf32> to vector<2x12x4x8xf32>
    %693 = tpu.transpose %692, [0, 2, 1, 3] : vector<2x12x4x8xf32> -> vector<2x4x12x8xf32>
    %694 = vector.shape_cast %693 : vector<2x4x12x8xf32> to vector<8x12x8xf32>
    %cst_266 = arith.constant 0.353553385 : f32
    %695 = vector.broadcast %cst_266 : f32 to vector<8x12x8xf32>
    %696 = arith.mulf %694, %695 : vector<8x12x8xf32>
    %697 = vector.extract_strided_slice %690 {offsets = [0, 0, 32], sizes = [2, 12, 32], strides = [1, 1, 1]} : vector<2x12x96xf32> to vector<2x12x32xf32>
    %698 = vector.shape_cast %697 : vector<2x12x32xf32> to vector<2x12x4x8xf32>
    %699 = tpu.transpose %698, [0, 2, 1, 3] : vector<2x12x4x8xf32> -> vector<2x4x12x8xf32>
    %700 = vector.shape_cast %699 : vector<2x4x12x8xf32> to vector<8x12x8xf32>
    %701 = vector.extract_strided_slice %690 {offsets = [0, 0, 64], sizes = [2, 12, 32], strides = [1, 1, 1]} : vector<2x12x96xf32> to vector<2x12x32xf32>
    %702 = vector.shape_cast %701 : vector<2x12x32xf32> to vector<2x12x4x8xf32>
    %703 = tpu.transpose %702, [0, 2, 1, 3] : vector<2x12x4x8xf32> -> vector<2x4x12x8xf32>
    %704 = vector.shape_cast %703 : vector<2x4x12x8xf32> to vector<8x12x8xf32>
    "tpu.trace_start"() <{level = 10 : i32, message = "hqd,hkd->hqk"}> : () -> ()
    %cst_267 = arith.constant dense<0.000000e+00> : vector<8x12x12xf32>
    %705 = tpu.matmul %696, %700, %cst_267 {dimension_numbers = #tpu.dot_dimension_numbers<[2], [2], [1], [1], [0, 0, 0, 1, 1, 1], [0], [0]>} : vector<8x12x8xf32>, vector<8x12x8xf32>, vector<8x12x12xf32> -> vector<8x12x12xf32>
    "tpu.trace_stop"() : () -> ()
    %cst_268 = arith.constant dense<0xFF800000> : vector<8x12xf32>
    %706 = vector.multi_reduction <maximumf>, %705, %cst_268 [2] : vector<8x12x12xf32> to vector<8x12xf32>
    %707 = vector.shape_cast %706 : vector<8x12xf32> to vector<8x12x1xf32>
    %708 = vector.broadcast %707 : vector<8x12x1xf32> to vector<8x12x12xf32>
    %709 = arith.subf %705, %708 : vector<8x12x12xf32>
    %710 = math.exp %709 : vector<8x12x12xf32>
    %cst_269 = arith.constant dense<0.000000e+00> : vector<8x12xf32>
    %711 = vector.multi_reduction <add>, %710, %cst_269 [2] : vector<8x12x12xf32> to vector<8x12xf32>
    %712 = vector.shape_cast %711 : vector<8x12xf32> to vector<8x12x1xf32>
    %713 = tpu.reciprocal %712 {approx = true} : vector<8x12x1xf32> -> vector<8x12x1xf32>
    %714 = vector.broadcast %713 : vector<8x12x1xf32> to vector<8x12x12xf32>
    %715 = arith.mulf %710, %714 : vector<8x12x12xf32>
    "tpu.trace_start"() <{level = 10 : i32, message = "hqk,hkd->hqd"}> : () -> ()
    %cst_270 = arith.constant dense<0.000000e+00> : vector<8x12x8xf32>
    %716 = tpu.matmul %715, %704, %cst_270 {dimension_numbers = #tpu.dot_dimension_numbers<[2], [1], [1], [2], [0, 0, 0, 1, 1, 2], [0], [0]>} : vector<8x12x12xf32>, vector<8x12x8xf32>, vector<8x12x8xf32> -> vector<8x12x8xf32>
    "tpu.trace_stop"() : () -> ()
    %717 = vector.shape_cast %716 : vector<8x12x8xf32> to vector<2x4x12x8xf32>
    %718 = tpu.transpose %717, [0, 2, 1, 3] : vector<2x4x12x8xf32> -> vector<2x12x4x8xf32>
    %719 = vector.shape_cast %718 : vector<2x12x4x8xf32> to vector<2x12x32xf32>
    %720 = vector.shape_cast %719 : vector<2x12x32xf32> to vector<24x32xf32>
    %cst_271 = arith.constant dense<0.000000e+00> : vector<24x32xf32>
    %721 = tpu.matmul %720, %2, %cst_271 {dimension_numbers = #tpu.dot_dimension_numbers<[1], [0], [0], [1], [0, 0, 1, 1], [], []>} : vector<24x32xf32>, vector<32x32xf32>, vector<24x32xf32> -> vector<24x32xf32>
    %722 = vector.shape_cast %721 : vector<24x32xf32> to vector<2x12x32xf32>
    %723 = vector.shape_cast %0 : vector<1x32xf32> to vector<1x1x32xf32>
    %724 = vector.broadcast %723 : vector<1x1x32xf32> to vector<2x12x32xf32>
    %725 = arith.addf %722, %724 : vector<2x12x32xf32>
    %726 = vector.shape_cast %725 : vector<2x12x32xf32> to vector<24x32xf32>
    %cst_272 = arith.constant dense<0.000000e+00> : vector<24x32xf32>
    %727 = tpu.matmul %726, %12, %cst_272 {dimension_numbers = #tpu.dot_dimension_numbers<[1], [0], [0], [1], [0, 0, 1, 1], [], []>} : vector<24x32xf32>, vector<32x32xf32>, vector<24x32xf32> -> vector<24x32xf32>
    %728 = vector.shape_cast %727 : vector<24x32xf32> to vector<2x12x32xf32>
    %729 = vector.shape_cast %6 : vector<1x32xf32> to vector<1x1x32xf32>
    %730 = vector.broadcast %729 : vector<1x1x32xf32> to vector<2x12x32xf32>
    %731 = arith.addf %728, %730 : vector<2x12x32xf32>
    %cst_273 = arith.constant 0.000000e+00 : f32
    %732 = vector.broadcast %cst_273 : f32 to vector<2x12x32xf32>
    %733 = arith.maximumf %731, %732 : vector<2x12x32xf32>
    %734 = vector.shape_cast %733 : vector<2x12x32xf32> to vector<24x32xf32>
    %cst_274 = arith.constant dense<0.000000e+00> : vector<24x32xf32>
    %735 = tpu.matmul %734, %11, %cst_274 {dimension_numbers = #tpu.dot_dimension_numbers<[1], [0], [0], [1], [0, 0, 1, 1], [], []>} : vector<24x32xf32>, vector<32x32xf32>, vector<24x32xf32> -> vector<24x32xf32>
    %736 = vector.shape_cast %735 : vector<24x32xf32> to vector<2x12x32xf32>
    %737 = vector.shape_cast %5 : vector<1x32xf32> to vector<1x1x32xf32>
    %738 = vector.broadcast %737 : vector<1x1x32xf32> to vector<2x12x32xf32>
    %739 = arith.addf %736, %738 : vector<2x12x32xf32>
    %740 = vector.shape_cast %739 : vector<2x12x32xf32> to vector<24x32xf32>
    %cst_275 = arith.constant dense<0.000000e+00> : vector<24x32xf32>
    %741 = tpu.matmul %740, %10, %cst_275 {dimension_numbers = #tpu.dot_dimension_numbers<[1], [0], [0], [1], [0, 0, 1, 1], [], []>} : vector<24x32xf32>, vector<32x32xf32>, vector<24x32xf32> -> vector<24x32xf32>
    %742 = vector.shape_cast %741 : vector<24x32xf32> to vector<2x12x32xf32>
    %743 = vector.shape_cast %4 : vector<1x32xf32> to vector<1x1x32xf32>
    %744 = vector.broadcast %743 : vector<1x1x32xf32> to vector<2x12x32xf32>
    %745 = arith.addf %742, %744 : vector<2x12x32xf32>
    %746 = arith.negf %745 : vector<2x12x32xf32>
    %747 = math.exp %746 : vector<2x12x32xf32>
    %cst_276 = arith.constant 1.000000e+00 : f32
    %748 = vector.broadcast %cst_276 : f32 to vector<2x12x32xf32>
    %749 = arith.addf %748, %747 : vector<2x12x32xf32>
    %750 = arith.divf %748, %749 : vector<2x12x32xf32>
    %751 = arith.mulf %739, %750 : vector<2x12x32xf32>
    %752 = vector.shape_cast %751 : vector<2x12x32xf32> to vector<24x32xf32>
    %cst_277 = arith.constant dense<0.000000e+00> : vector<24x32xf32>
    %753 = tpu.matmul %752, %13, %cst_277 {dimension_numbers = #tpu.dot_dimension_numbers<[1], [0], [0], [1], [0, 0, 1, 1], [], []>} : vector<24x32xf32>, vector<32x32xf32>, vector<24x32xf32> -> vector<24x32xf32>
    %754 = vector.shape_cast %753 : vector<24x32xf32> to vector<2x12x32xf32>
    %755 = vector.shape_cast %7 : vector<1x32xf32> to vector<1x1x32xf32>
    %756 = vector.broadcast %755 : vector<1x1x32xf32> to vector<2x12x32xf32>
    %757 = arith.addf %754, %756 : vector<2x12x32xf32>
    %758 = arith.addf %757, %725 : vector<2x12x32xf32>
    %cst_278 = arith.constant dense<0.000000e+00> : vector<2x12xf32>
    %759 = vector.multi_reduction <add>, %758, %cst_278 [2] : vector<2x12x32xf32> to vector<2x12xf32>
    %760 = vector.shape_cast %759 : vector<2x12xf32> to vector<2x12x1xf32>
    %cst_279 = arith.constant 3.200000e+01 : f32
    %761 = vector.broadcast %cst_279 : f32 to vector<2x12x1xf32>
    %762 = arith.divf %760, %761 : vector<2x12x1xf32>
    %763 = vector.broadcast %762 : vector<2x12x1xf32> to vector<2x12x32xf32>
    %764 = arith.subf %758, %763 : vector<2x12x32xf32>
    %765 = arith.mulf %764, %764 : vector<2x12x32xf32>
    %cst_280 = arith.constant dense<0.000000e+00> : vector<2x12xf32>
    %766 = vector.multi_reduction <add>, %765, %cst_280 [2] : vector<2x12x32xf32> to vector<2x12xf32>
    %767 = vector.shape_cast %766 : vector<2x12xf32> to vector<2x12x1xf32>
    %cst_281 = arith.constant 3.200000e+01 : f32
    %768 = vector.broadcast %cst_281 : f32 to vector<2x12x1xf32>
    %769 = arith.divf %767, %768 : vector<2x12x1xf32>
    %770 = vector.broadcast %762 : vector<2x12x1xf32> to vector<2x12x32xf32>
    %771 = arith.subf %758, %770 : vector<2x12x32xf32>
    %cst_282 = arith.constant 9.99999974E-6 : f32
    %772 = vector.broadcast %cst_282 : f32 to vector<2x12x1xf32>
    %773 = arith.addf %769, %772 : vector<2x12x1xf32>
    %774 = math.rsqrt %773 : vector<2x12x1xf32>
    %775 = vector.broadcast %774 : vector<2x12x1xf32> to vector<2x12x32xf32>
    %776 = arith.mulf %771, %775 : vector<2x12x32xf32>
    %777 = vector.shape_cast %9 : vector<1x32xf32> to vector<1x1x32xf32>
    %778 = vector.broadcast %777 : vector<1x1x32xf32> to vector<2x12x32xf32>
    %779 = arith.mulf %776, %778 : vector<2x12x32xf32>
    %780 = vector.shape_cast %8 : vector<1x32xf32> to vector<1x1x32xf32>
    %781 = vector.broadcast %780 : vector<1x1x32xf32> to vector<2x12x32xf32>
    %782 = arith.addf %779, %781 : vector<2x12x32xf32>
    %783 = arith.addf %782, %684 : vector<2x12x32xf32>
    %cst_283 = arith.constant dense<0.000000e+00> : vector<2x12xf32>
    %784 = vector.multi_reduction <add>, %783, %cst_283 [2] : vector<2x12x32xf32> to vector<2x12xf32>
    %785 = vector.shape_cast %784 : vector<2x12xf32> to vector<2x12x1xf32>
    %cst_284 = arith.constant 3.200000e+01 : f32
    %786 = vector.broadcast %cst_284 : f32 to vector<2x12x1xf32>
    %787 = arith.divf %785, %786 : vector<2x12x1xf32>
    %788 = vector.broadcast %787 : vector<2x12x1xf32> to vector<2x12x32xf32>
    %789 = arith.subf %783, %788 : vector<2x12x32xf32>
    %790 = arith.mulf %789, %789 : vector<2x12x32xf32>
    %cst_285 = arith.constant dense<0.000000e+00> : vector<2x12xf32>
    %791 = vector.multi_reduction <add>, %790, %cst_285 [2] : vector<2x12x32xf32> to vector<2x12xf32>
    %792 = vector.shape_cast %791 : vector<2x12xf32> to vector<2x12x1xf32>
    %cst_286 = arith.constant 3.200000e+01 : f32
    %793 = vector.broadcast %cst_286 : f32 to vector<2x12x1xf32>
    %794 = arith.divf %792, %793 : vector<2x12x1xf32>
    %795 = vector.broadcast %787 : vector<2x12x1xf32> to vector<2x12x32xf32>
    %796 = arith.subf %783, %795 : vector<2x12x32xf32>
    %cst_287 = arith.constant 9.99999974E-6 : f32
    %797 = vector.broadcast %cst_287 : f32 to vector<2x12x1xf32>
    %798 = arith.addf %794, %797 : vector<2x12x1xf32>
    %799 = math.rsqrt %798 : vector<2x12x1xf32>
    %800 = vector.broadcast %799 : vector<2x12x1xf32> to vector<2x12x32xf32>
    %801 = arith.mulf %796, %800 : vector<2x12x32xf32>
    %802 = vector.shape_cast %15 : vector<1x32xf32> to vector<1x1x32xf32>
    %803 = vector.broadcast %802 : vector<1x1x32xf32> to vector<2x12x32xf32>
    %804 = arith.mulf %801, %803 : vector<2x12x32xf32>
    %805 = vector.shape_cast %14 : vector<1x32xf32> to vector<1x1x32xf32>
    %806 = vector.broadcast %805 : vector<1x1x32xf32> to vector<2x12x32xf32>
    %807 = arith.addf %804, %806 : vector<2x12x32xf32>
    %808 = vector.extract_strided_slice %807 {offsets = [0, 8, 0], sizes = [2, 4, 32], strides = [1, 1, 1]} : vector<2x12x32xf32> to vector<2x4x32xf32>
    %809 = vector.shape_cast %808 : vector<2x4x32xf32> to vector<8x32xf32>
    %cst_288 = arith.constant dense<0.000000e+00> : vector<8x32xf32>
    %810 = tpu.matmul %809, %24, %cst_288 {dimension_numbers = #tpu.dot_dimension_numbers<[1], [0], [0], [1], [0, 0, 1, 1], [], []>} : vector<8x32xf32>, vector<32x32xf32>, vector<8x32xf32> -> vector<8x32xf32>
    %811 = vector.shape_cast %810 : vector<8x32xf32> to vector<2x4x32xf32>
    %812 = vector.shape_cast %18 : vector<1x32xf32> to vector<1x1x32xf32>
    %813 = vector.broadcast %812 : vector<1x1x32xf32> to vector<2x4x32xf32>
    %814 = arith.addf %811, %813 : vector<2x4x32xf32>
    %cst_289 = arith.constant 0.000000e+00 : f32
    %815 = vector.broadcast %cst_289 : f32 to vector<2x4x32xf32>
    %816 = arith.maximumf %814, %815 : vector<2x4x32xf32>
    %817 = vector.shape_cast %816 : vector<2x4x32xf32> to vector<8x32xf32>
    %cst_290 = arith.constant dense<0.000000e+00> : vector<8x32xf32>
    %818 = tpu.matmul %817, %23, %cst_290 {dimension_numbers = #tpu.dot_dimension_numbers<[1], [0], [0], [1], [0, 0, 1, 1], [], []>} : vector<8x32xf32>, vector<32x32xf32>, vector<8x32xf32> -> vector<8x32xf32>
    %819 = vector.shape_cast %818 : vector<8x32xf32> to vector<2x4x32xf32>
    %820 = vector.shape_cast %17 : vector<1x32xf32> to vector<1x1x32xf32>
    %821 = vector.broadcast %820 : vector<1x1x32xf32> to vector<2x4x32xf32>
    %822 = arith.addf %819, %821 : vector<2x4x32xf32>
    %823 = vector.shape_cast %822 : vector<2x4x32xf32> to vector<8x32xf32>
    %cst_291 = arith.constant dense<0.000000e+00> : vector<8x32xf32>
    %824 = tpu.matmul %823, %22, %cst_291 {dimension_numbers = #tpu.dot_dimension_numbers<[1], [0], [0], [1], [0, 0, 1, 1], [], []>} : vector<8x32xf32>, vector<32x32xf32>, vector<8x32xf32> -> vector<8x32xf32>
    %825 = vector.shape_cast %824 : vector<8x32xf32> to vector<2x4x32xf32>
    %826 = vector.shape_cast %16 : vector<1x32xf32> to vector<1x1x32xf32>
    %827 = vector.broadcast %826 : vector<1x1x32xf32> to vector<2x4x32xf32>
    %828 = arith.addf %825, %827 : vector<2x4x32xf32>
    %829 = arith.negf %828 : vector<2x4x32xf32>
    %830 = math.exp %829 : vector<2x4x32xf32>
    %cst_292 = arith.constant 1.000000e+00 : f32
    %831 = vector.broadcast %cst_292 : f32 to vector<2x4x32xf32>
    %832 = arith.addf %831, %830 : vector<2x4x32xf32>
    %833 = arith.divf %831, %832 : vector<2x4x32xf32>
    %834 = arith.mulf %822, %833 : vector<2x4x32xf32>
    %835 = vector.shape_cast %834 : vector<2x4x32xf32> to vector<8x32xf32>
    %cst_293 = arith.constant dense<0.000000e+00> : vector<8x32xf32>
    %836 = tpu.matmul %835, %25, %cst_293 {dimension_numbers = #tpu.dot_dimension_numbers<[1], [0], [0], [1], [0, 0, 1, 1], [], []>} : vector<8x32xf32>, vector<32x32xf32>, vector<8x32xf32> -> vector<8x32xf32>
    %837 = vector.shape_cast %836 : vector<8x32xf32> to vector<2x4x32xf32>
    %838 = vector.shape_cast %19 : vector<1x32xf32> to vector<1x1x32xf32>
    %839 = vector.broadcast %838 : vector<1x1x32xf32> to vector<2x4x32xf32>
    %840 = arith.addf %837, %839 : vector<2x4x32xf32>
    %841 = arith.addf %840, %808 : vector<2x4x32xf32>
    %cst_294 = arith.constant dense<0.000000e+00> : vector<2x4xf32>
    %842 = vector.multi_reduction <add>, %841, %cst_294 [2] : vector<2x4x32xf32> to vector<2x4xf32>
    %843 = vector.shape_cast %842 : vector<2x4xf32> to vector<2x4x1xf32>
    %cst_295 = arith.constant 3.200000e+01 : f32
    %844 = vector.broadcast %cst_295 : f32 to vector<2x4x1xf32>
    %845 = arith.divf %843, %844 : vector<2x4x1xf32>
    %846 = vector.broadcast %845 : vector<2x4x1xf32> to vector<2x4x32xf32>
    %847 = arith.subf %841, %846 : vector<2x4x32xf32>
    %848 = arith.mulf %847, %847 : vector<2x4x32xf32>
    %cst_296 = arith.constant dense<0.000000e+00> : vector<2x4xf32>
    %849 = vector.multi_reduction <add>, %848, %cst_296 [2] : vector<2x4x32xf32> to vector<2x4xf32>
    %850 = vector.shape_cast %849 : vector<2x4xf32> to vector<2x4x1xf32>
    %cst_297 = arith.constant 3.200000e+01 : f32
    %851 = vector.broadcast %cst_297 : f32 to vector<2x4x1xf32>
    %852 = arith.divf %850, %851 : vector<2x4x1xf32>
    %853 = vector.broadcast %845 : vector<2x4x1xf32> to vector<2x4x32xf32>
    %854 = arith.subf %841, %853 : vector<2x4x32xf32>
    %cst_298 = arith.constant 9.99999974E-6 : f32
    %855 = vector.broadcast %cst_298 : f32 to vector<2x4x1xf32>
    %856 = arith.addf %852, %855 : vector<2x4x1xf32>
    %857 = math.rsqrt %856 : vector<2x4x1xf32>
    %858 = vector.broadcast %857 : vector<2x4x1xf32> to vector<2x4x32xf32>
    %859 = arith.mulf %854, %858 : vector<2x4x32xf32>
    %860 = vector.shape_cast %21 : vector<1x32xf32> to vector<1x1x32xf32>
    %861 = vector.broadcast %860 : vector<1x1x32xf32> to vector<2x4x32xf32>
    %862 = arith.mulf %859, %861 : vector<2x4x32xf32>
    %863 = vector.shape_cast %20 : vector<1x32xf32> to vector<1x1x32xf32>
    %864 = vector.broadcast %863 : vector<1x1x32xf32> to vector<2x4x32xf32>
    %865 = arith.addf %862, %864 : vector<2x4x32xf32>
    %866 = vector.shape_cast %865 : vector<2x4x32xf32> to vector<2x128xf32>
    %cst_299 = arith.constant dense<0.000000e+00> : vector<2x12xf32>
    %867 = tpu.matmul %866, %42, %cst_299 {dimension_numbers = #tpu.dot_dimension_numbers<[1], [0], [0], [1], [0, 0, 1, 1], [], []>} : vector<2x128xf32>, vector<128x12xf32>, vector<2x12xf32> -> vector<2x12xf32>
    %868 = vector.broadcast %41 : vector<1x12xf32> to vector<2x12xf32>
    %869 = arith.addf %867, %868 : vector<2x12xf32>
    %c0_300 = arith.constant 0 : index
    %c0_301 = arith.constant 0 : index
    %870 = vector.load %arg81[%c0_300, %c0_301] : memref<2x12xf32, #tpu.memory_space<vmem>>, vector<2x12xf32>
    tpu.vector_store %arg81[%c0_300, %c0_301], %869 {strides = array<i32>} : memref<2x12xf32, #tpu.memory_space<vmem>>, vector<2x12xf32>,
    return
  }
  func.func @transform_0(%arg0: i32) -> (i32, i32) {
    %c0_i32 = arith.constant 0 : i32
    %c0_i32_0 = arith.constant 0 : i32
    %c0_i32_1 = arith.constant 0 : i32
    return %c0_i32, %c0_i32_0 : i32, i32
  }
  func.func @transform_1(%arg0: i32) -> (i32, i32, i32) {
    %c0_i32 = arith.constant 0 : i32
    %c0_i32_0 = arith.constant 0 : i32
    %c0_i32_1 = arith.constant 0 : i32
    %c0_i32_2 = arith.constant 0 : i32
    return %c0_i32, %c0_i32_0, %c0_i32_1 : i32, i32, i32
  }
  func.func @transform_2(%arg0: i32) -> (i32, i32, i32) {
    %c0_i32 = arith.constant 0 : i32
    %c0_i32_0 = arith.constant 0 : i32
    %c0_i32_1 = arith.constant 0 : i32
    %c0_i32_2 = arith.constant 0 : i32
    return %c0_i32, %c0_i32_0, %c0_i32_1 : i32, i32, i32
  }
  func.func @transform_3(%arg0: i32) -> (i32, i32) {
    %c0_i32 = arith.constant 0 : i32
    %c0_i32_0 = arith.constant 0 : i32
    %c0_i32_1 = arith.constant 0 : i32
    return %c0_i32, %c0_i32_0 : i32, i32
  }
  func.func @transform_4(%arg0: i32) -> (i32, i32) {
    %c0_i32 = arith.constant 0 : i32
    %c0_i32_0 = arith.constant 0 : i32
    %c0_i32_1 = arith.constant 0 : i32
    return %c0_i32, %c0_i32_0 : i32, i32
  }
  func.func @transform_5(%arg0: i32) -> (i32, i32) {
    %c0_i32 = arith.constant 0 : i32
    %c0_i32_0 = arith.constant 0 : i32
    %c0_i32_1 = arith.constant 0 : i32
    return %c0_i32, %c0_i32_0 : i32, i32
  }
  func.func @transform_6(%arg0: i32) -> (i32, i32) {
    %c0_i32 = arith.constant 0 : i32
    %c0_i32_0 = arith.constant 0 : i32
    %c0_i32_1 = arith.constant 0 : i32
    return %c0_i32, %c0_i32_0 : i32, i32
  }
  func.func @transform_7(%arg0: i32) -> (i32, i32) {
    %c0_i32 = arith.constant 0 : i32
    %c0_i32_0 = arith.constant 0 : i32
    %c0_i32_1 = arith.constant 0 : i32
    return %c0_i32, %c0_i32_0 : i32, i32
  }
  func.func @transform_8(%arg0: i32) -> (i32, i32) {
    %c0_i32 = arith.constant 0 : i32
    %c0_i32_0 = arith.constant 0 : i32
    %c0_i32_1 = arith.constant 0 : i32
    return %c0_i32, %c0_i32_0 : i32, i32
  }
  func.func @transform_9(%arg0: i32) -> (i32, i32) {
    %c0_i32 = arith.constant 0 : i32
    %c0_i32_0 = arith.constant 0 : i32
    %c0_i32_1 = arith.constant 0 : i32
    return %c0_i32, %c0_i32_0 : i32, i32
  }
  func.func @transform_10(%arg0: i32) -> (i32, i32) {
    %c0_i32 = arith.constant 0 : i32
    %c0_i32_0 = arith.constant 0 : i32
    %c0_i32_1 = arith.constant 0 : i32
    return %c0_i32, %c0_i32_0 : i32, i32
  }
  func.func @transform_11(%arg0: i32) -> (i32, i32) {
    %c0_i32 = arith.constant 0 : i32
    %c0_i32_0 = arith.constant 0 : i32
    %c0_i32_1 = arith.constant 0 : i32
    return %c0_i32, %c0_i32_0 : i32, i32
  }
  func.func @transform_12(%arg0: i32) -> (i32, i32) {
    %c0_i32 = arith.constant 0 : i32
    %c0_i32_0 = arith.constant 0 : i32
    %c0_i32_1 = arith.constant 0 : i32
    return %c0_i32, %c0_i32_0 : i32, i32
  }
  func.func @transform_13(%arg0: i32) -> (i32, i32) {
    %c0_i32 = arith.constant 0 : i32
    %c0_i32_0 = arith.constant 0 : i32
    %c0_i32_1 = arith.constant 0 : i32
    return %c0_i32, %c0_i32_0 : i32, i32
  }
  func.func @transform_14(%arg0: i32) -> (i32, i32) {
    %c0_i32 = arith.constant 0 : i32
    %c0_i32_0 = arith.constant 0 : i32
    %c0_i32_1 = arith.constant 0 : i32
    return %c0_i32, %c0_i32_0 : i32, i32
  }
  func.func @transform_15(%arg0: i32) -> (i32, i32) {
    %c0_i32 = arith.constant 0 : i32
    %c0_i32_0 = arith.constant 0 : i32
    %c0_i32_1 = arith.constant 0 : i32
    return %c0_i32, %c0_i32_0 : i32, i32
  }
  func.func @transform_16(%arg0: i32) -> (i32, i32) {
    %c0_i32 = arith.constant 0 : i32
    %c0_i32_0 = arith.constant 0 : i32
    %c0_i32_1 = arith.constant 0 : i32
    return %c0_i32, %c0_i32_0 : i32, i32
  }
  func.func @transform_17(%arg0: i32) -> (i32, i32) {
    %c0_i32 = arith.constant 0 : i32
    %c0_i32_0 = arith.constant 0 : i32
    %c0_i32_1 = arith.constant 0 : i32
    return %c0_i32, %c0_i32_0 : i32, i32
  }
  func.func @transform_18(%arg0: i32) -> (i32, i32) {
    %c0_i32 = arith.constant 0 : i32
    %c0_i32_0 = arith.constant 0 : i32
    %c0_i32_1 = arith.constant 0 : i32
    return %c0_i32, %c0_i32_0 : i32, i32
  }
  func.func @transform_19(%arg0: i32) -> (i32, i32) {
    %c0_i32 = arith.constant 0 : i32
    %c0_i32_0 = arith.constant 0 : i32
    %c0_i32_1 = arith.constant 0 : i32
    return %c0_i32, %c0_i32_0 : i32, i32
  }
  func.func @transform_20(%arg0: i32) -> (i32, i32) {
    %c0_i32 = arith.constant 0 : i32
    %c0_i32_0 = arith.constant 0 : i32
    %c0_i32_1 = arith.constant 0 : i32
    return %c0_i32, %c0_i32_0 : i32, i32
  }
  func.func @transform_21(%arg0: i32) -> (i32, i32) {
    %c0_i32 = arith.constant 0 : i32
    %c0_i32_0 = arith.constant 0 : i32
    %c0_i32_1 = arith.constant 0 : i32
    return %c0_i32, %c0_i32_0 : i32, i32
  }
  func.func @transform_22(%arg0: i32) -> (i32, i32) {
    %c0_i32 = arith.constant 0 : i32
    %c0_i32_0 = arith.constant 0 : i32
    %c0_i32_1 = arith.constant 0 : i32
    return %c0_i32, %c0_i32_0 : i32, i32
  }
  func.func @transform_23(%arg0: i32) -> (i32, i32) {
    %c0_i32 = arith.constant 0 : i32
    %c0_i32_0 = arith.constant 0 : i32
    %c0_i32_1 = arith.constant 0 : i32
    return %c0_i32, %c0_i32_0 : i32, i32
  }
  func.func @transform_24(%arg0: i32) -> (i32, i32) {
    %c0_i32 = arith.constant 0 : i32
    %c0_i32_0 = arith.constant 0 : i32
    %c0_i32_1 = arith.constant 0 : i32
    return %c0_i32, %c0_i32_0 : i32, i32
  }
  func.func @transform_25(%arg0: i32) -> (i32, i32) {
    %c0_i32 = arith.constant 0 : i32
    %c0_i32_0 = arith.constant 0 : i32
    %c0_i32_1 = arith.constant 0 : i32
    return %c0_i32, %c0_i32_0 : i32, i32
  }
  func.func @transform_26(%arg0: i32) -> (i32, i32) {
    %c0_i32 = arith.constant 0 : i32
    %c0_i32_0 = arith.constant 0 : i32
    %c0_i32_1 = arith.constant 0 : i32
    return %c0_i32, %c0_i32_0 : i32, i32
  }
  func.func @transform_27(%arg0: i32) -> (i32, i32) {
    %c0_i32 = arith.constant 0 : i32
    %c0_i32_0 = arith.constant 0 : i32
    %c0_i32_1 = arith.constant 0 : i32
    return %c0_i32, %c0_i32_0 : i32, i32
  }
  func.func @transform_28(%arg0: i32) -> (i32, i32) {
    %c0_i32 = arith.constant 0 : i32
    %c0_i32_0 = arith.constant 0 : i32
    %c0_i32_1 = arith.constant 0 : i32
    return %c0_i32, %c0_i32_0 : i32, i32
  }
  func.func @transform_29(%arg0: i32) -> (i32, i32) {
    %c0_i32 = arith.constant 0 : i32
    %c0_i32_0 = arith.constant 0 : i32
    %c0_i32_1 = arith.constant 0 : i32
    return %c0_i32, %c0_i32_0 : i32, i32
  }
  func.func @transform_30(%arg0: i32) -> (i32, i32) {
    %c0_i32 = arith.constant 0 : i32
    %c0_i32_0 = arith.constant 0 : i32
    %c0_i32_1 = arith.constant 0 : i32
    return %c0_i32, %c0_i32_0 : i32, i32
  }
  func.func @transform_31(%arg0: i32) -> (i32, i32) {
    %c0_i32 = arith.constant 0 : i32
    %c0_i32_0 = arith.constant 0 : i32
    %c0_i32_1 = arith.constant 0 : i32
    return %c0_i32, %c0_i32_0 : i32, i32
  }
  func.func @transform_32(%arg0: i32) -> (i32, i32) {
    %c0_i32 = arith.constant 0 : i32
    %c0_i32_0 = arith.constant 0 : i32
    %c0_i32_1 = arith.constant 0 : i32
    return %c0_i32, %c0_i32_0 : i32, i32
  }
  func.func @transform_33(%arg0: i32) -> (i32, i32) {
    %c0_i32 = arith.constant 0 : i32
    %c0_i32_0 = arith.constant 0 : i32
    %c0_i32_1 = arith.constant 0 : i32
    return %c0_i32, %c0_i32_0 : i32, i32
  }
  func.func @transform_34(%arg0: i32) -> (i32, i32) {
    %c0_i32 = arith.constant 0 : i32
    %c0_i32_0 = arith.constant 0 : i32
    %c0_i32_1 = arith.constant 0 : i32
    return %c0_i32, %c0_i32_0 : i32, i32
  }
  func.func @transform_35(%arg0: i32) -> (i32, i32) {
    %c0_i32 = arith.constant 0 : i32
    %c0_i32_0 = arith.constant 0 : i32
    %c0_i32_1 = arith.constant 0 : i32
    return %c0_i32, %c0_i32_0 : i32, i32
  }
  func.func @transform_36(%arg0: i32) -> (i32, i32) {
    %c0_i32 = arith.constant 0 : i32
    %c0_i32_0 = arith.constant 0 : i32
    %c0_i32_1 = arith.constant 0 : i32
    return %c0_i32, %c0_i32_0 : i32, i32
  }
  func.func @transform_37(%arg0: i32) -> (i32, i32) {
    %c0_i32 = arith.constant 0 : i32
    %c0_i32_0 = arith.constant 0 : i32
    %c0_i32_1 = arith.constant 0 : i32
    return %c0_i32, %c0_i32_0 : i32, i32
  }
  func.func @transform_38(%arg0: i32) -> (i32, i32) {
    %c0_i32 = arith.constant 0 : i32
    %c0_i32_0 = arith.constant 0 : i32
    %c0_i32_1 = arith.constant 0 : i32
    return %c0_i32, %c0_i32_0 : i32, i32
  }
  func.func @transform_39(%arg0: i32) -> (i32, i32) {
    %c0_i32 = arith.constant 0 : i32
    %c0_i32_0 = arith.constant 0 : i32
    %c0_i32_1 = arith.constant 0 : i32
    return %c0_i32, %c0_i32_0 : i32, i32
  }
  func.func @transform_40(%arg0: i32) -> (i32, i32) {
    %c0_i32 = arith.constant 0 : i32
    %c0_i32_0 = arith.constant 0 : i32
    %c0_i32_1 = arith.constant 0 : i32
    return %c0_i32, %c0_i32_0 : i32, i32
  }
  func.func @transform_41(%arg0: i32) -> (i32, i32) {
    %c0_i32 = arith.constant 0 : i32
    %c0_i32_0 = arith.constant 0 : i32
    %c0_i32_1 = arith.constant 0 : i32
    return %c0_i32, %c0_i32_0 : i32, i32
  }
  func.func @transform_42(%arg0: i32) -> (i32, i32) {
    %c0_i32 = arith.constant 0 : i32
    %c0_i32_0 = arith.constant 0 : i32
    %c0_i32_1 = arith.constant 0 : i32
    return %c0_i32, %c0_i32_0 : i32, i32
  }
  func.func @transform_43(%arg0: i32) -> (i32, i32) {
    %c0_i32 = arith.constant 0 : i32
    %c0_i32_0 = arith.constant 0 : i32
    %c0_i32_1 = arith.constant 0 : i32
    return %c0_i32, %c0_i32_0 : i32, i32
  }
  func.func @transform_44(%arg0: i32) -> (i32, i32) {
    %c0_i32 = arith.constant 0 : i32
    %c0_i32_0 = arith.constant 0 : i32
    %c0_i32_1 = arith.constant 0 : i32
    return %c0_i32, %c0_i32_0 : i32, i32
  }
  func.func @transform_45(%arg0: i32) -> (i32, i32) {
    %c0_i32 = arith.constant 0 : i32
    %c0_i32_0 = arith.constant 0 : i32
    %c0_i32_1 = arith.constant 0 : i32
    return %c0_i32, %c0_i32_0 : i32, i32
  }
  func.func @transform_46(%arg0: i32) -> (i32, i32) {
    %c0_i32 = arith.constant 0 : i32
    %c0_i32_0 = arith.constant 0 : i32
    %c0_i32_1 = arith.constant 0 : i32
    return %c0_i32, %c0_i32_0 : i32, i32
  }
  func.func @transform_47(%arg0: i32) -> (i32, i32) {
    %c0_i32 = arith.constant 0 : i32
    %c0_i32_0 = arith.constant 0 : i32
    %c0_i32_1 = arith.constant 0 : i32
    return %c0_i32, %c0_i32_0 : i32, i32
  }
  func.func @transform_48(%arg0: i32) -> (i32, i32) {
    %c0_i32 = arith.constant 0 : i32
    %c0_i32_0 = arith.constant 0 : i32
    %c0_i32_1 = arith.constant 0 : i32
    return %c0_i32, %c0_i32_0 : i32, i32
  }
  func.func @transform_49(%arg0: i32) -> (i32, i32) {
    %c0_i32 = arith.constant 0 : i32
    %c0_i32_0 = arith.constant 0 : i32
    %c0_i32_1 = arith.constant 0 : i32
    return %c0_i32, %c0_i32_0 : i32, i32
  }
  func.func @transform_50(%arg0: i32) -> (i32, i32) {
    %c0_i32 = arith.constant 0 : i32
    %c0_i32_0 = arith.constant 0 : i32
    %c0_i32_1 = arith.constant 0 : i32
    return %c0_i32, %c0_i32_0 : i32, i32
  }
  func.func @transform_51(%arg0: i32) -> (i32, i32) {
    %c0_i32 = arith.constant 0 : i32
    %c0_i32_0 = arith.constant 0 : i32
    %c0_i32_1 = arith.constant 0 : i32
    return %c0_i32, %c0_i32_0 : i32, i32
  }
  func.func @transform_52(%arg0: i32) -> (i32, i32) {
    %c0_i32 = arith.constant 0 : i32
    %c0_i32_0 = arith.constant 0 : i32
    %c0_i32_1 = arith.constant 0 : i32
    return %c0_i32, %c0_i32_0 : i32, i32
  }
  func.func @transform_53(%arg0: i32) -> (i32, i32) {
    %c0_i32 = arith.constant 0 : i32
    %c0_i32_0 = arith.constant 0 : i32
    %c0_i32_1 = arith.constant 0 : i32
    return %c0_i32, %c0_i32_0 : i32, i32
  }
  func.func @transform_54(%arg0: i32) -> (i32, i32) {
    %c0_i32 = arith.constant 0 : i32
    %c0_i32_0 = arith.constant 0 : i32
    %c0_i32_1 = arith.constant 0 : i32
    return %c0_i32, %c0_i32_0 : i32, i32
  }
  func.func @transform_55(%arg0: i32) -> (i32, i32) {
    %c0_i32 = arith.constant 0 : i32
    %c0_i32_0 = arith.constant 0 : i32
    %c0_i32_1 = arith.constant 0 : i32
    return %c0_i32, %c0_i32_0 : i32, i32
  }
  func.func @transform_56(%arg0: i32) -> (i32, i32) {
    %c0_i32 = arith.constant 0 : i32
    %c0_i32_0 = arith.constant 0 : i32
    %c0_i32_1 = arith.constant 0 : i32
    return %c0_i32, %c0_i32_0 : i32, i32
  }
  func.func @transform_57(%arg0: i32) -> (i32, i32) {
    %c0_i32 = arith.constant 0 : i32
    %c0_i32_0 = arith.constant 0 : i32
    %c0_i32_1 = arith.constant 0 : i32
    return %c0_i32, %c0_i32_0 : i32, i32
  }
  func.func @transform_58(%arg0: i32) -> (i32, i32) {
    %c0_i32 = arith.constant 0 : i32
    %c0_i32_0 = arith.constant 0 : i32
    %c0_i32_1 = arith.constant 0 : i32
    return %c0_i32, %c0_i32_0 : i32, i32
  }
  func.func @transform_59(%arg0: i32) -> (i32, i32) {
    %c0_i32 = arith.constant 0 : i32
    %c0_i32_0 = arith.constant 0 : i32
    %c0_i32_1 = arith.constant 0 : i32
    return %c0_i32, %c0_i32_0 : i32, i32
  }
  func.func @transform_60(%arg0: i32) -> (i32, i32) {
    %c0_i32 = arith.constant 0 : i32
    %c0_i32_0 = arith.constant 0 : i32
    %c0_i32_1 = arith.constant 0 : i32
    return %c0_i32, %c0_i32_0 : i32, i32
  }
  func.func @transform_61(%arg0: i32) -> (i32, i32) {
    %c0_i32 = arith.constant 0 : i32
    %c0_i32_0 = arith.constant 0 : i32
    %c0_i32_1 = arith.constant 0 : i32
    return %c0_i32, %c0_i32_0 : i32, i32
  }
  func.func @transform_62(%arg0: i32) -> (i32, i32) {
    %c0_i32 = arith.constant 0 : i32
    %c0_i32_0 = arith.constant 0 : i32
    %c0_i32_1 = arith.constant 0 : i32
    return %c0_i32, %c0_i32_0 : i32, i32
  }
  func.func @transform_63(%arg0: i32) -> (i32, i32) {
    %c0_i32 = arith.constant 0 : i32
    %c0_i32_0 = arith.constant 0 : i32
    %c0_i32_1 = arith.constant 0 : i32
    return %c0_i32, %c0_i32_0 : i32, i32
  }
  func.func @transform_64(%arg0: i32) -> (i32, i32) {
    %c0_i32 = arith.constant 0 : i32
    %c0_i32_0 = arith.constant 0 : i32
    %c0_i32_1 = arith.constant 0 : i32
    return %c0_i32, %c0_i32_0 : i32, i32
  }
  func.func @transform_65(%arg0: i32) -> (i32, i32) {
    %c0_i32 = arith.constant 0 : i32
    %c0_i32_0 = arith.constant 0 : i32
    %c0_i32_1 = arith.constant 0 : i32
    return %c0_i32, %c0_i32_0 : i32, i32
  }
  func.func @transform_66(%arg0: i32) -> (i32, i32) {
    %c0_i32 = arith.constant 0 : i32
    %c0_i32_0 = arith.constant 0 : i32
    %c0_i32_1 = arith.constant 0 : i32
    return %c0_i32, %c0_i32_0 : i32, i32
  }
  func.func @transform_67(%arg0: i32) -> (i32, i32) {
    %c0_i32 = arith.constant 0 : i32
    %c0_i32_0 = arith.constant 0 : i32
    %c0_i32_1 = arith.constant 0 : i32
    return %c0_i32, %c0_i32_0 : i32, i32
  }
  func.func @transform_68(%arg0: i32) -> (i32, i32) {
    %c0_i32 = arith.constant 0 : i32
    %c0_i32_0 = arith.constant 0 : i32
    %c0_i32_1 = arith.constant 0 : i32
    return %c0_i32, %c0_i32_0 : i32, i32
  }
  func.func @transform_69(%arg0: i32) -> (i32, i32) {
    %c0_i32 = arith.constant 0 : i32
    %c0_i32_0 = arith.constant 0 : i32
    %c0_i32_1 = arith.constant 0 : i32
    return %c0_i32, %c0_i32_0 : i32, i32
  }
  func.func @transform_70(%arg0: i32) -> (i32, i32) {
    %c0_i32 = arith.constant 0 : i32
    %c0_i32_0 = arith.constant 0 : i32
    %c0_i32_1 = arith.constant 0 : i32
    return %c0_i32, %c0_i32_0 : i32, i32
  }
  func.func @transform_71(%arg0: i32) -> (i32, i32) {
    %c0_i32 = arith.constant 0 : i32
    %c0_i32_0 = arith.constant 0 : i32
    %c0_i32_1 = arith.constant 0 : i32
    return %c0_i32, %c0_i32_0 : i32, i32
  }
  func.func @transform_72(%arg0: i32) -> (i32, i32) {
    %c0_i32 = arith.constant 0 : i32
    %c0_i32_0 = arith.constant 0 : i32
    %c0_i32_1 = arith.constant 0 : i32
    return %c0_i32, %c0_i32_0 : i32, i32
  }
  func.func @transform_73(%arg0: i32) -> (i32, i32) {
    %c0_i32 = arith.constant 0 : i32
    %c0_i32_0 = arith.constant 0 : i32
    %c0_i32_1 = arith.constant 0 : i32
    return %c0_i32, %c0_i32_0 : i32, i32
  }
  func.func @transform_74(%arg0: i32) -> (i32, i32) {
    %c0_i32 = arith.constant 0 : i32
    %c0_i32_0 = arith.constant 0 : i32
    %c0_i32_1 = arith.constant 0 : i32
    return %c0_i32, %c0_i32_0 : i32, i32
  }
  func.func @transform_75(%arg0: i32) -> (i32, i32) {
    %c0_i32 = arith.constant 0 : i32
    %c0_i32_0 = arith.constant 0 : i32
    %c0_i32_1 = arith.constant 0 : i32
    return %c0_i32, %c0_i32_0 : i32, i32
  }
  func.func @transform_76(%arg0: i32) -> (i32, i32) {
    %c0_i32 = arith.constant 0 : i32
    %c0_i32_0 = arith.constant 0 : i32
    %c0_i32_1 = arith.constant 0 : i32
    return %c0_i32, %c0_i32_0 : i32, i32
  }
  func.func @transform_77(%arg0: i32) -> (i32, i32) {
    %c0_i32 = arith.constant 0 : i32
    %c0_i32_0 = arith.constant 0 : i32
    %c0_i32_1 = arith.constant 0 : i32
    return %c0_i32, %c0_i32_0 : i32, i32
  }
  func.func @transform_78(%arg0: i32) -> (i32, i32) {
    %c0_i32 = arith.constant 0 : i32
    %c0_i32_0 = arith.constant 0 : i32
    %c0_i32_1 = arith.constant 0 : i32
    return %c0_i32, %c0_i32_0 : i32, i32
  }
  func.func @transform_79(%arg0: i32) -> (i32, i32) {
    %c0_i32 = arith.constant 0 : i32
    %c0_i32_0 = arith.constant 0 : i32
    %c0_i32_1 = arith.constant 0 : i32
    return %c0_i32, %c0_i32_0 : i32, i32
  }
  func.func @transform_80(%arg0: i32) -> (i32, i32) {
    %c0_i32 = arith.constant 0 : i32
    %c0_i32_0 = arith.constant 0 : i32
    %c0_i32_1 = arith.constant 0 : i32
    return %c0_i32, %c0_i32_0 : i32, i32
  }
}

</mosaic_0001>

<bundles_post_ra>
// kernel: tft_forward.1
= control target key start
LH: loop header
LB: loop body
LE: loop exit
PB: predicated region body
PF: predicated region fallthrough
CT: control target
= control target key end

     0   :  { %s8535_s6 = smov 1   ;;  %s8536_s10 = smov 2   ;;  %s11200_s0 = inlined_call_operand.smem [shape: u32[81], index: -1, kind: input, shape index: {}] }
   0x1   :  { %s8689_s5 = sld [smem:[%s11200_s0]]   ;;  %s8537_s14 = smov 3  }
   0x2   :  { %s8694_s9 = sld [smem:[%s11200_s0 + %s8535_s6]]   ;;  %s8538_s18 = smov 4  }
   0x3   :  { %s8699_s13 = sld [smem:[%s11200_s0 + %s8536_s10]]   ;;  %s8539_s22 = smov 5  }
   0x4   :  { %s8704_s17 = sld [smem:[%s11200_s0 + %s8537_s14]]   ;;  %s8540_s26 = smov 6  }
   0x5   :  { %s8709_s21 = sld [smem:[%s11200_s0 + %s8538_s18]]   ;;  %s8541_s30 = smov 7  }
   0x6   :  { %s8714_s25 = sld [smem:[%s11200_s0 + %s8539_s22]]   ;;  %s8542_s4 = smov 8  }
   0x7   :  { %11248 = sst [smem:[#allocation84_spill]] %s8689_s5  ;;  %s8543_s10 = smov 9  }
   0x8   :  { %11249 = sst [smem:[#allocation85_spill]] %s8694_s9  ;;  %s8544_s15 = smov 10  }
   0x9   :  { %11250 = sst [smem:[#allocation86_spill]] %s8699_s13  ;;  %s8545_s20 = smov 11  }
   0xa   :  { %11251 = sst [smem:[#allocation87_spill]] %s8704_s17  ;;  %s8547_s1 = smov 13  }
   0xb   :  { %11252 = sst [smem:[#allocation88_spill]] %s8709_s21  ;;  %s8548_s7 = smov 14  }
   0xc   :  { %11253 = sst [smem:[#allocation89_spill]] %s8714_s25  ;;  %s8550_s22 = smov 16  }
   0xd   :  { %s8719_s29 = sld [smem:[%s11200_s0 + %s8540_s26]]   ;;  %s8546_s26 = smov 12  }
   0xe   :  { %s8724_s3 = sld [smem:[%s11200_s0 + %s8541_s30]]   ;;  %s8551_s28 = smov 17  }
   0xf   :  { %s8729_s8 = sld [smem:[%s11200_s0 + %s8542_s4]]  }
  0x10   :  { %s8734_s14 = sld [smem:[%s11200_s0 + %s8543_s10]]  }
  0x11   :  { %s8739_s19 = sld [smem:[%s11200_s0 + %s8544_s15]]   ;;  %s8549_s15 = smov 15  }
  0x12   :  { %s8744_s24 = sld [smem:[%s11200_s0 + %s8545_s20]]  }
  0x13   :  { %11254 = sst [smem:[#allocation90_spill]] %s8719_s29 }
  0x14   :  { %11255 = sst [smem:[#allocation91_spill]] %s8724_s3 }
  0x15   :  { %11256 = sst [smem:[#allocation92_spill]] %s8729_s8 }
  0x16   :  { %11257 = sst [smem:[#allocation93_spill]] %s8734_s14 }
  0x17   :  { %11258 = sst [smem:[#allocation94_spill]] %s8739_s19 }
  0x18   :  { %11259 = sst [smem:[#allocation95_spill]] %s8744_s24 }
  0x19   :  { %s8749_s30 = sld [smem:[%s11200_s0 + %s8546_s26]]  }
  0x1a   :  { %s8754_s6 = sld [smem:[%s11200_s0 + %s8547_s1]]  }
  0x1b   :  { %s8759_s12 = sld [smem:[%s11200_s0 + %s8548_s7]]   ;;  %s8552_s7 = smov 18  }
  0x1c   :  { %s8764_s20 = sld [smem:[%s11200_s0 + %s8549_s15]]   ;;  %s8553_s15 = smov 19  }
  0x1d   :  { %s8769_s27 = sld [smem:[%s11200_s0 + %s8550_s22]]   ;;  %s8554_s22 = smov 20  }
  0x1e   :  { %s8774_s4 = sld [smem:[%s11200_s0 + %s8551_s28]]   ;;  %s8555_s28 = smov 21  }
  0x1f   :  { %11260 = sst [smem:[#allocation96_spill]] %s8749_s30 }
  0x20   :  { %11261 = sst [smem:[#allocation97_spill]] %s8754_s6 }
  0x21   :  { %11262 = sst [smem:[#allocation98_spill]] %s8759_s12 }
  0x22   :  { %11263 = sst [smem:[#allocation99_spill]] %s8764_s20 }
  0x23   :  { %11264 = sst [smem:[#allocation100_spill]] %s8769_s27 }
  0x24   :  { %11265 = sst [smem:[#allocation101_spill]] %s8774_s4 }
  0x25   :  { %s8779_s24 = sld [smem:[%s11200_s0 + %s8552_s7]]   ;;  %s8556_s7 = smov 22  }
  0x26   :  { %s8784_s30 = sld [smem:[%s11200_s0 + %s8553_s15]]   ;;  %s8557_s15 = smov 23  }
  0x27   :  { %s8789_s19 = sld [smem:[%s11200_s0 + %s8554_s22]]   ;;  %s8558_s22 = smov 24  }
  0x28   :  { %s8794_s4 = sld [smem:[%s11200_s0 + %s8555_s28]]   ;;  %s8559_s28 = smov 25  }
  0x2b   :  { %11266 = sst [smem:[#allocation102_spill]] %s8779_s24 }
  0x2c   :  { %11267 = sst [smem:[#allocation103_spill]] %s8784_s30 }
  0x2d   :  { %11268 = sst [smem:[#allocation104_spill]] %s8789_s19 }
  0x2e   :  { %11269 = sst [smem:[#allocation105_spill]] %s8794_s4 }
  0x2f   :  { %s8799_s24 = sld [smem:[%s11200_s0 + %s8556_s7]]   ;;  %s8560_s7 = smov 26  }
  0x30   :  { %s8804_s30 = sld [smem:[%s11200_s0 + %s8557_s15]]   ;;  %s8561_s15 = smov 27  }
  0x31   :  { %s8809_s19 = sld [smem:[%s11200_s0 + %s8558_s22]]   ;;  %s8562_s22 = smov 28  }
  0x32   :  { %s8814_s4 = sld [smem:[%s11200_s0 + %s8559_s28]]   ;;  %s8563_s28 = smov 29  }
  0x35   :  { %11270 = sst [smem:[#allocation106_spill]] %s8799_s24 }
  0x36   :  { %11271 = sst [smem:[#allocation107_spill]] %s8804_s30 }
  0x37   :  { %11272 = sst [smem:[#allocation108_spill]] %s8809_s19 }
  0x38   :  { %11273 = sst [smem:[#allocation109_spill]] %s8814_s4 }
  0x39   :  { %s8819_s24 = sld [smem:[%s11200_s0 + %s8560_s7]]   ;;  %s8564_s7 = smov 30  }
  0x3a   :  { %s8824_s30 = sld [smem:[%s11200_s0 + %s8561_s15]]   ;;  %s8565_s15 = smov 31  }
  0x3b   :  { %s8829_s19 = sld [smem:[%s11200_s0 + %s8562_s22]]   ;;  %s8566_s22 = smov 32  }
  0x3c   :  { %s8834_s4 = sld [smem:[%s11200_s0 + %s8563_s28]]   ;;  %s8567_s28 = smov 33  }
  0x3d   :  { %s8844_s27 = sld [smem:[%s11200_s0 + %s8565_s15]]   ;;  %s8569_s15 = smov 35  }
  0x3e   :  { %s8849_s3 = sld [smem:[%s11200_s0 + %s8566_s22]]   ;;  %s8570_s22 = smov 36  }
  0x3f   :  { %11274 = sst [smem:[#allocation110_spill]] %s8819_s24 }
  0x40   :  { %11275 = sst [smem:[#allocation111_spill]] %s8824_s30 }
  0x41   :  { %s8839_s24 = sld [smem:[%s11200_s0 + %s8564_s7]]   ;;  %s8568_s7 = smov 34  }
  0x42   :  { %11276 = sst [smem:[#allocation112_spill]] %s8834_s4 }
  0x43   :  { %11278 = sst [smem:[#allocation114_spill]] %s8844_s27 }
  0x44   :  { %11279 = sst [smem:[#allocation115_spill]] %s8849_s3 }
  0x45   :  { %s8854_s8 = sld [smem:[%s11200_s0 + %s8567_s28]]   ;;  %s8571_s28 = smov 37  }
  0x46   :  { %s8859_s6 = sld [smem:[%s11200_s0 + %s8568_s7]]   ;;  %s8572_s7 = smov 38  }
  0x47   :  { %11277 = sst [smem:[#allocation113_spill]] %s8839_s24 }
  0x48   :  { %s8864_s14 = sld [smem:[%s11200_s0 + %s8569_s15]]   ;;  %s8573_s15 = smov 39  }
  0x49   :  { %s8869_s12 = sld [smem:[%s11200_s0 + %s8570_s22]]   ;;  %s8574_s22 = smov 40  }
  0x4a   :  { %s8874_s17 = sld [smem:[%s11200_s0 + %s8571_s28]]   ;;  %s8575_s28 = smov 41  }
  0x4b   :  { %s8879_s20 = sld [smem:[%s11200_s0 + %s8572_s7]]   ;;  %s8576_s7 = smov 42  }
  0x4c   :  { %11280 = sst [smem:[#allocation116_spill]] %s8859_s6 }
  0x4d   :  { %s8884_s25 = sld [smem:[%s11200_s0 + %s8573_s15]]   ;;  %s8577_s15 = smov 43  }
  0x4e   :  { %s8889_s21 = sld [smem:[%s11200_s0 + %s8574_s22]]   ;;  %s8578_s22 = smov 44  }
  0x4f   :  { %11281 = sst [smem:[#allocation117_spill]] %s8869_s12 }
  0x50   :  { %s8894_s29 = sld [smem:[%s11200_s0 + %s8575_s28]]   ;;  %s8579_s28 = smov 45  }
  0x51   :  { %11282 = sst [smem:[#allocation118_spill]] %s8879_s20 }
  0x52   :  { %s8899_s4 = sld [smem:[%s11200_s0 + %s8576_s7]]   ;;  %s8580_s7 = smov 46  }
  0x53   :  { %11283 = sst [smem:[#allocation119_spill]] %s8884_s25 }
  0x54   :  { %11284 = sst [smem:[#allocation120_spill]] %s8889_s21 }
  0x55   :  { %s8904_s25 = sld [smem:[%s11200_s0 + %s8577_s15]]   ;;  %s8581_s15 = smov 47  }
  0x56   :  { %11285 = sst [smem:[#allocation121_spill]] %s8894_s29 }
  0x57   :  { %s8909_s24 = sld [smem:[%s11200_s0 + %s8578_s22]]   ;;  %s8582_s22 = smov 48  }
  0x58   :  { %11286 = sst [smem:[#allocation122_spill]] %s8899_s4 }
  0x59   :  { %s8914_s21 = sld [smem:[%s11200_s0 + %s8579_s28]]   ;;  %s8583_s28 = smov 49  }
  0x5a   :  { %s8919_s4 = sld [smem:[%s11200_s0 + %s8580_s7]]   ;;  %s8584_s7 = smov 50  }
  0x5b   :  { %s8924_s27 = sld [smem:[%s11200_s0 + %s8581_s15]]   ;;  %s8585_s15 = smov 51  }
  0x5c   :  { %s8929_s20 = sld [smem:[%s11200_s0 + %s8582_s22]]   ;;  %s8586_s22 = smov 52  }
  0x5d   :  { %11287 = sst [smem:[#allocation123_spill]] %s8909_s24 }
  0x5e   :  { %s8939_s13 = sld [smem:[%s11200_s0 + %s8584_s7]]   ;;  %s8588_s7 = smov 54  }
  0x5f   :  { %11288 = sst [smem:[#allocation124_spill]] %s8914_s21 }
  0x60   :  { %s8934_s21 = sld [smem:[%s11200_s0 + %s8583_s28]]   ;;  %s8587_s28 = smov 53  }
  0x61   :  { %11289 = sst [smem:[#allocation125_spill]] %s8924_s27 }
  0x62   :  { %s8944_s9 = sld [smem:[%s11200_s0 + %s8585_s15]]   ;;  %s8589_s15 = smov 55  }
  0x63   :  { %s8949_s5 = sld [smem:[%s11200_s0 + %s8586_s22]]   ;;  %s8590_s22 = smov 56  }
  0x64   :  { %s8959_s27 = sld [smem:[%s11200_s0 + %s8588_s7]]   ;;  %s8592_s7 = smov 58  }
  0x65   :  { %s8969_s24 = sld [smem:[%s11200_s0 + %s8590_s22]]   ;;  %s8594_s22 = smov 60  }
  0x66   :  { %11290 = sst [smem:[#allocation126_spill]] %s8934_s21 }
  0x67   :  { %s8954_s21 = sld [smem:[%s11200_s0 + %s8587_s28]]   ;;  %s8591_s28 = smov 57  }
  0x68   :  { %11291 = sst [smem:[#allocation127_spill]] %s8944_s9 }
  0x69   :  { %s8964_s9 = sld [smem:[%s11200_s0 + %s8589_s15]]   ;;  %s8593_s15 = smov 59  }
  0x6a   :  { %s8979_s29 = sld [smem:[%s11200_s0 + %s8592_s7]]   ;;  %s8596_s7 = smov 62  }
  0x6b   :  { %11294 = sst [smem:[#allocation130_spill]] %s8969_s24 }
  0x6c   :  { %s8989_s24 = sld [smem:[%s11200_s0 + %s8594_s22]]   ;;  %s8598_s22 = smov 64  }
  0x6d   :  { %11292 = sst [smem:[#allocation128_spill]] %s8954_s21 }
  0x6e   :  { %s8974_s21 = sld [smem:[%s11200_s0 + %s8591_s28]]   ;;  %s8595_s28 = smov 61  }
  0x6f   :  { %11293 = sst [smem:[#allocation129_spill]] %s8964_s9 }
  0x70   :  { %s8984_s9 = sld [smem:[%s11200_s0 + %s8593_s15]]   ;;  %s8597_s15 = smov 63  }
  0x71   :  { %s8999_s12 = sld [smem:[%s11200_s0 + %s8596_s7]]   ;;  %s8600_s7 = smov 66  }
  0x72   :  { %s9009_s6 = sld [smem:[%s11200_s0 + %s8598_s22]]   ;;  %s8602_s22 = smov 68  }
  0x73   :  { %s9019_s3 = sld [smem:[%s11200_s0 + %s8600_s7]]   ;;  %s8604_s7 = smov 70  }
  0x74   :  { %11295 = sst [smem:[#allocation131_spill]] %s8974_s21 }
  0x75   :  { %s8994_s21 = sld [smem:[%s11200_s0 + %s8595_s28]]   ;;  %s8599_s28 = smov 65  }
  0x76   :  { %11296 = sst [smem:[#allocation132_spill]] %s8984_s9 }
  0x77   :  { %s9004_s9 = sld [smem:[%s11200_s0 + %s8597_s15]]   ;;  %s8601_s15 = smov 67  }
  0x78   :  { %s9029_s30 = sld [smem:[%s11200_s0 + %s8602_s22]]   ;;  %s8606_s22 = smov 72  }
  0x79   :  { %11300 = sst [smem:[#allocation136_spill]] %s9019_s3 }
  0x7a   :  { %s9039_s3 = sld [smem:[%s11200_s0 + %s8604_s7]]   ;;  %s8608_s7 = smov 74  }
  0x7b   :  { %11297 = sst [smem:[#allocation133_spill]] %s8994_s21 }
  0x7c   :  { %s9014_s21 = sld [smem:[%s11200_s0 + %s8599_s28]]   ;;  %s8603_s28 = smov 69  }
  0x7d   :  { %11298 = sst [smem:[#allocation134_spill]] %s9004_s9 }
  0x7e   :  { %s9024_s9 = sld [smem:[%s11200_s0 + %s8601_s15]]   ;;  %s8605_s15 = smov 71  }
  0x7f   :  { %11302 = sst [smem:[#allocation138_spill]] %s9029_s30 }
  0x80   :  { %11304 = sst [smem:[#allocation140_spill]] %s9039_s3 }
  0x81   :  { %s9049_s30 = sld [smem:[%s11200_s0 + %s8606_s22]]   ;;  %s8610_s22 = smov 76  }
  0x82   :  { %11299 = sst [smem:[#allocation135_spill]] %s9014_s21 }
  0x83   :  { %s9034_s21 = sld [smem:[%s11200_s0 + %s8603_s28]]   ;;  %s8607_s28 = smov 73  }
  0x84   :  { %11301 = sst [smem:[#allocation137_spill]] %s9024_s9 }
  0x85   :  { %s9044_s9 = sld [smem:[%s11200_s0 + %s8605_s15]]   ;;  %s8609_s15 = smov 75  }
  0x86   :  { %s9059_s3 = sld [smem:[%s11200_s0 + %s8608_s7]]   ;;  %s8612_s7 = smov 78  }
  0x87   :  { %11306 = sst [smem:[#allocation142_spill]] %s9049_s30 }
  0x88   :  { %s9069_s30 = sld [smem:[%s11200_s0 + %s8610_s22]]   ;;  %s8614_s22 = smov 80  }
  0x89   :  { %11303 = sst [smem:[#allocation139_spill]] %s9034_s21 }
  0x8a   :  { %s9054_s21 = sld [smem:[%s11200_s0 + %s8607_s28]]   ;;  %s8611_s28 = smov 77  }
  0x8b   :  { %11305 = sst [smem:[#allocation141_spill]] %s9044_s9 }
  0x8c   :  { %11308 = sst [smem:[#allocation144_spill]] %s9059_s3 }
  0x8d   :  { %s9064_s9 = sld [smem:[%s11200_s0 + %s8609_s15]]   ;;  %s8613_s15 = smov 79  }
  0x8e   :  { %11310 = sst [smem:[#allocation146_spill]] %s9069_s30 }
  0x8f   :  { %s9079_s3 = sld [smem:[%s11200_s0 + %s8612_s7]]  }
  0x90   :  { %11307 = sst [smem:[#allocation143_spill]] %s9054_s21 }
  0x91   :  { %s9074_s21 = sld [smem:[%s11200_s0 + %s8611_s28]]  }
  0x92   :  { %s9089_s30 = sld [smem:[%s11200_s0 + %s8614_s22]]  }
  0x93   :  { %11309 = sst [smem:[#allocation145_spill]] %s9064_s9 }
  0x94   :  { %s9084_s9 = sld [smem:[%s11200_s0 + %s8613_s15]]  }
  0x95   :  { %166 = vsyncpa [#allocation3], 0 }
  0x96   :  { %167 = vsyncpa [#allocation5], 0 }
  0x97   :  { %168 = vsyncpa [#allocation8], 0 }
  0x98   :  { %169 = vsyncpa [#allocation11], 0 }
  0x99   :  { %170 = vsyncpa [#allocation14], 0 }
  0x9a   :  { %171 = vsyncpa [#allocation17], 0 }
  0x9b   :  { %172 = vsyncpa [#allocation20], 0 }
  0x9c   :  { %173 = vsyncpa [#allocation23], 0 }
  0x9d   :  { %174 = vsyncpa [#allocation26], 0 }
  0x9e   :  { %175 = vsyncpa [#allocation29], 0 }
  0x9f   :  { %176 = vsyncpa [#allocation32], 0 }
  0xa0   :  { %177 = vsyncpa [#allocation35], 0 }
  0xa1   :  { %178 = vsyncpa [#allocation38], 0 }
  0xa2   :  { %179 = vsyncpa [#allocation41], 0 }
  0xa3   :  { %180 = vsyncpa [#allocation44], 0 }
  0xa4   :  { %181 = vsyncpa [#allocation47], 0 }
  0xa5   :  { %182 = vsyncpa [#allocation50], 0 }
  0xa6   :  { %183 = vsyncpa [#allocation53], 0 }
  0xa7   :  { %184 = vsyncpa [#allocation56], 0 }
  0xa8   :  { %185 = vsyncpa [#allocation59], 0 }
  0xa9   :  { %186 = vsyncpa [#allocation62], 0  ;;  %s258_s0 = sshll.u32 %s8829_s19, 4  ;;  %s8615_s28 = smov [#allocation4]   ;;  %s259_s0 = int_to_ptr.hbm [resolvable:$true] %s258_s0 }
  0xaa   :  { %s260_s1 = sshll.u32 %s8615_s28, 4  ;;  %s289_s2 = sshll.u32 %s8854_s8, 4  ;;  %s261_s1 = int_to_ptr.vmem [resolvable:$true] %s260_s1  ;;  %s290_s2 = int_to_ptr.hbm [resolvable:$true] %s289_s2 }
  0xab   :  { %s7533_s7 = sshra.s32 %s259_s0, 4  ;;  %s7537_s11 = scalar_lea.hbm %s8829_s19, 32  ;;  %s7534_s7 = int_to_ptr.hbm [resolvable:$true] %s7533_s7 }
  0xac   :  { %s7535_s10 = scalar_lea.hbm %s7534_s7, 32  ;;  %p7538_p1 = scmp.lt.s32.totalorder %s7534_s7, %s8829_s19 }
  0xad   :  { %p7536_p0 = scmp.ne.s32.totalorder %s7534_s7, %s7535_s10  ;;  %p7539_p2 = scmp.lt.s32.totalorder %s7537_s11, %s7535_s10 }
  0xaf   :  { %p7540_p3 = por %p7539_p2, %p7538_p1 }
  0xb1   :  { %p7541_p4 = pnand %p7540_p3, %p7536_p0 }
  0xb3   :  { %7544 = shalt.err (!%p7541_p4)
}
  0xb4   :  { %s8616_s15 = smov 128   ;;  %s8617_s16 = smov 8  }
  0xb5   :  { %266 = dma.hbm_to_vmem [thread:$0]  %s259_s0, 512, %s261_s1, [#allocation5], %s8616_s15, %s8616_s15, %s8617_s16  }
  0xb6   :  { %s8618_s18 = smov [#allocation7]   ;;  %s311_s23 = sshll.u32 %s8864_s14, 4  ;;  %s312_s23 = int_to_ptr.hbm [resolvable:$true] %s311_s23 }
  0xb7   :  { %s291_s22 = sshll.u32 %s8618_s18, 4  ;;  %s7557_s19 = sshra.s32 %s290_s2, 4  ;;  %s292_s22 = int_to_ptr.vmem [resolvable:$true] %s291_s22  ;;  %s7558_s19 = int_to_ptr.hbm [resolvable:$true] %s7557_s19 }
  0xb8   :  { %s7559_s26 = scalar_lea.hbm %s7558_s19, 1  ;;  %s7561_s28 = scalar_lea.hbm %s8854_s8, 1 }
  0xb9   :  { %p7560_p5 = scmp.ne.s32.totalorder %s7558_s19, %s7559_s26  ;;  %p7562_p6 = scmp.lt.s32.totalorder %s7558_s19, %s8854_s8 }
  0xba   :  { %p7563_p7 = scmp.lt.s32.totalorder %s7561_s28, %s7559_s26 }
  0xbc   :  { %p7564_p8 = por %p7563_p7, %p7562_p6 }
  0xbe   :  { %p7565_p9 = pnand %p7564_p8, %p7560_p5 }
  0xc0   :  { %7568 = shalt.err (!%p7565_p9)
}
  0xc1   :  { %294 = dma.hbm_to_vmem [thread:$0]  %s290_s2, 16, %s292_s22, [#allocation8]  }
  0xc2   :  { %s334_s0 = sshll.u32 %s8874_s17, 4  ;;  %s8619_s1 = smov [#allocation10]   ;;  %s9102_s0 = int_to_ptr.hbm [resolvable:$true] %s334_s0 }
  0xc3   :  { %s313_s7 = sshll.u32 %s8619_s1, 4  ;;  %s7581_s10 = sshra.s32 %s312_s23, 4  ;;  %s314_s7 = int_to_ptr.vmem [resolvable:$true] %s313_s7  ;;  %s7582_s10 = int_to_ptr.hbm [resolvable:$true] %s7581_s10 }
  0xc4   :  { %s7583_s11 = scalar_lea.hbm %s7582_s10, 1  ;;  %s7585_s18 = scalar_lea.hbm %s8864_s14, 1 }
  0xc5   :  { %p7584_p10 = scmp.ne.s32.totalorder %s7582_s10, %s7583_s11  ;;  %p7586_p11 = scmp.lt.s32.totalorder %s7582_s10, %s8864_s14 }
  0xc6   :  { %p7587_p12 = scmp.lt.s32.totalorder %s7585_s18, %s7583_s11 }
  0xc8   :  { %p7588_p13 = por %p7587_p12, %p7586_p11 }
  0xca   :  { %p7589_p0 = pnand %p7588_p13, %p7584_p10 }
  0xcc   :  { %7592 = shalt.err (!%p7589_p0)
}
  0xcd   :  { %316 = dma.hbm_to_vmem [thread:$0]  %s312_s23, 16, %s314_s7, [#allocation11]  }
  0xce   :  { %s8620_s8 = smov [#allocation13]   ;;  %s366_s22 = sshll.u32 %s8904_s25, 4  ;;  %s9107_s22 = int_to_ptr.hbm [resolvable:$true] %s366_s22 }
  0xcf   :  { %s336_s2 = sshll.u32 %s8620_s8, 4  ;;  %s7605_s19 = sshra.s32 %s9102_s0, 4  ;;  %s337_s2 = int_to_ptr.vmem [resolvable:$true] %s336_s2  ;;  %s7606_s19 = int_to_ptr.hbm [resolvable:$true] %s7605_s19 }
  0xd0   :  { %s7607_s26 = scalar_lea.hbm %s7606_s19, 32  ;;  %s7609_s14 = scalar_lea.hbm %s8874_s17, 32 }
  0xd1   :  { %p7608_p1 = scmp.ne.s32.totalorder %s7606_s19, %s7607_s26  ;;  %p7610_p2 = scmp.lt.s32.totalorder %s7606_s19, %s8874_s17 }
  0xd2   :  { %p7611_p3 = scmp.lt.s32.totalorder %s7609_s14, %s7607_s26 }
  0xd4   :  { %p7612_p4 = por %p7611_p3, %p7610_p2 }
  0xd6   :  { %p7613_p5 = pnand %p7612_p4, %p7608_p1 }
  0xd8   :  { %7616 = shalt.err (!%p7613_p5)
}
  0xd9   :  { %342 = dma.hbm_to_vmem [thread:$0]  %s9102_s0, 512, %s337_s2, [#allocation14], %s8616_s15, %s8616_s15, %s8617_s16  }
  0xda   :  { %s393_s23 = sshll.u32 %s8919_s4, 4  ;;  %s8621_s28 = smov [#allocation16]   ;;  %s394_s23 = int_to_ptr.hbm [resolvable:$true] %s393_s23 }
  0xdb   :  { %s368_s1 = sshll.u32 %s8621_s28, 4  ;;  %s7629_s7 = sshra.s32 %s9107_s22, 4  ;;  %s369_s1 = int_to_ptr.vmem [resolvable:$true] %s368_s1  ;;  %s7630_s7 = int_to_ptr.hbm [resolvable:$true] %s7629_s7 }
  0xdc   :  { %s7631_s17 = scalar_lea.hbm %s7630_s7, 32  ;;  %s7633_s10 = scalar_lea.hbm %s8904_s25, 32 }
  0xdd   :  { %p7632_p6 = scmp.ne.s32.totalorder %s7630_s7, %s7631_s17  ;;  %p7634_p7 = scmp.lt.s32.totalorder %s7630_s7, %s8904_s25 }
  0xde   :  { %p7635_p8 = scmp.lt.s32.totalorder %s7633_s10, %s7631_s17 }
  0xe0   :  { %p7636_p9 = por %p7635_p8, %p7634_p7 }
  0xe2   :  { %p7637_p10 = pnand %p7636_p9, %p7632_p6 }
  0xe4   :  { %7640 = shalt.err (!%p7637_p10)
}
  0xe5   :  { %374 = dma.hbm_to_vmem [thread:$0]  %s9107_s22, 512, %s369_s1, [#allocation17], %s8616_s15, %s8616_s15, %s8617_s16  }
  0xe6   :  { %s8622_s0 = smov [#allocation19]   ;;  %s415_s18 = sshll.u32 %s8929_s20, 4  ;;  %s416_s18 = int_to_ptr.hbm [resolvable:$true] %s415_s18 }
  0xe7   :  { %s395_s11 = sshll.u32 %s8622_s0, 4  ;;  %s7653_s8 = sshra.s32 %s394_s23, 4  ;;  %s396_s11 = int_to_ptr.vmem [resolvable:$true] %s395_s11  ;;  %s7654_s8 = int_to_ptr.hbm [resolvable:$true] %s7653_s8 }
  0xe8   :  { %s7655_s25 = scalar_lea.hbm %s7654_s8, 1  ;;  %s7657_s2 = scalar_lea.hbm %s8919_s4, 1 }
  0xe9   :  { %p7656_p11 = scmp.ne.s32.totalorder %s7654_s8, %s7655_s25  ;;  %p7658_p12 = scmp.lt.s32.totalorder %s7654_s8, %s8919_s4 }
  0xea   :  { %p7659_p13 = scmp.lt.s32.totalorder %s7657_s2, %s7655_s25 }
  0xec   :  { %p7660_p0 = por %p7659_p13, %p7658_p12 }
  0xee   :  { %p7661_p1 = pnand %p7660_p0, %p7656_p11 }
  0xf0   :  { %7664 = shalt.err (!%p7661_p1)
}
  0xf1   :  { %398 = dma.hbm_to_vmem [thread:$0]  %s394_s23, 16, %s396_s11, [#allocation20]  }
  0xf2   :  { %s437_s22 = sshll.u32 %s8939_s13, 4  ;;  %s8623_s19 = smov [#allocation22]   ;;  %s438_s22 = int_to_ptr.hbm [resolvable:$true] %s437_s22 }
  0xf3   :  { %s417_s26 = sshll.u32 %s8623_s19, 4  ;;  %s7677_s14 = sshra.s32 %s416_s18, 4  ;;  %s418_s26 = int_to_ptr.vmem [resolvable:$true] %s417_s26  ;;  %s7678_s14 = int_to_ptr.hbm [resolvable:$true] %s7677_s14 }
  0xf4   :  { %s7679_s28 = scalar_lea.hbm %s7678_s14, 1  ;;  %s7681_s1 = scalar_lea.hbm %s8929_s20, 1 }
  0xf5   :  { %p7680_p2 = scmp.ne.s32.totalorder %s7678_s14, %s7679_s28  ;;  %p7682_p3 = scmp.lt.s32.totalorder %s7678_s14, %s8929_s20 }
  0xf6   :  { %p7683_p4 = scmp.lt.s32.totalorder %s7681_s1, %s7679_s28 }
  0xf8   :  { %p7684_p5 = por %p7683_p4, %p7682_p3 }
  0xfa   :  { %p7685_p6 = pnand %p7684_p5, %p7680_p2 }
  0xfc   :  { %7688 = shalt.err (!%p7685_p6)
}
  0xfd   :  { %420 = dma.hbm_to_vmem [thread:$0]  %s416_s18, 16, %s418_s26, [#allocation23]  }
  0xfe   :  { %s8624_s4 = smov [#allocation25]   ;;  %s459_s7 = sshll.u32 %s8949_s5, 4  ;;  %s460_s7 = int_to_ptr.hbm [resolvable:$true] %s459_s7 }
  0xff   :  { %s439_s23 = sshll.u32 %s8624_s4, 4  ;;  %s7701_s17 = sshra.s32 %s438_s22, 4  ;;  %s440_s23 = int_to_ptr.vmem [resolvable:$true] %s439_s23  ;;  %s7702_s17 = int_to_ptr.hbm [resolvable:$true] %s7701_s17 }
 0x100   :  { %s7703_s10 = scalar_lea.hbm %s7702_s17, 1  ;;  %s7705_s0 = scalar_lea.hbm %s8939_s13, 1 }
 0x101   :  { %p7704_p7 = scmp.ne.s32.totalorder %s7702_s17, %s7703_s10  ;;  %p7706_p8 = scmp.lt.s32.totalorder %s7702_s17, %s8939_s13 }
 0x102   :  { %p7707_p9 = scmp.lt.s32.totalorder %s7705_s0, %s7703_s10 }
 0x104   :  { %p7708_p10 = por %p7707_p9, %p7706_p8 }
 0x106   :  { %p7709_p11 = pnand %p7708_p10, %p7704_p7 }
 0x108   :  { %7712 = shalt.err (!%p7709_p11)
}
 0x109   :  { %442 = dma.hbm_to_vmem [thread:$0]  %s438_s22, 16, %s440_s23, [#allocation26]  }
 0x10a   :  { %s482_s20 = sshll.u32 %s8959_s27, 4  ;;  %s8625_s11 = smov [#allocation28]   ;;  %s9134_s20 = int_to_ptr.hbm [resolvable:$true] %s482_s20 }
 0x10b   :  { %s461_s18 = sshll.u32 %s8625_s11, 4  ;;  %s7725_s8 = sshra.s32 %s460_s7, 4  ;;  %s462_s18 = int_to_ptr.vmem [resolvable:$true] %s461_s18  ;;  %s7726_s8 = int_to_ptr.hbm [resolvable:$true] %s7725_s8 }
 0x10c   :  { %s7727_s25 = scalar_lea.hbm %s7726_s8, 1  ;;  %s7729_s2 = scalar_lea.hbm %s8949_s5, 1 }
 0x10d   :  { %p7728_p12 = scmp.ne.s32.totalorder %s7726_s8, %s7727_s25  ;;  %p7730_p13 = scmp.lt.s32.totalorder %s7726_s8, %s8949_s5 }
 0x10e   :  { %p7731_p0 = scmp.lt.s32.totalorder %s7729_s2, %s7727_s25 }
 0x110   :  { %p7732_p1 = por %p7731_p0, %p7730_p13 }
 0x112   :  { %p7733_p2 = pnand %p7732_p1, %p7728_p12 }
 0x114   :  { %7736 = shalt.err (!%p7733_p2)
}
 0x115   :  { %464 = dma.hbm_to_vmem [thread:$0]  %s460_s7, 16, %s462_s18, [#allocation29]  }
 0x116   :  { %s8626_s13 = smov [#allocation31]   ;;  %s513_s19 = sshll.u32 %s8979_s29, 4  ;;  %s514_s19 = int_to_ptr.hbm [resolvable:$true] %s513_s19 }
 0x117   :  { %s484_s22 = sshll.u32 %s8626_s13, 4  ;;  %s7749_s26 = sshra.s32 %s9134_s20, 4  ;;  %s485_s22 = int_to_ptr.vmem [resolvable:$true] %s484_s22  ;;  %s7750_s26 = int_to_ptr.hbm [resolvable:$true] %s7749_s26 }
 0x118   :  { %s7751_s14 = scalar_lea.hbm %s7750_s26, 32  ;;  %s7753_s28 = scalar_lea.hbm %s8959_s27, 32 }
 0x119   :  { %p7752_p3 = scmp.ne.s32.totalorder %s7750_s26, %s7751_s14  ;;  %p7754_p4 = scmp.lt.s32.totalorder %s7750_s26, %s8959_s27 }
 0x11a   :  { %p7755_p5 = scmp.lt.s32.totalorder %s7753_s28, %s7751_s14 }
 0x11c   :  { %p7756_p6 = por %p7755_p5, %p7754_p4 }
 0x11e   :  { %p7757_p7 = pnand %p7756_p6, %p7752_p3 }
 0x120   :  { %7760 = shalt.err (!%p7757_p7)
}
 0x121   :  { %490 = dma.hbm_to_vmem [thread:$0]  %s9134_s20, 512, %s485_s22, [#allocation32], %s8616_s15, %s8616_s15, %s8617_s16  }
 0x122   :  { %s535_s5 = sshll.u32 %s8989_s24, 4  ;;  %s8627_s1 = smov [#allocation34]   ;;  %s536_s5 = int_to_ptr.hbm [resolvable:$true] %s535_s5 }
 0x123   :  { %s515_s4 = sshll.u32 %s8627_s1, 4  ;;  %s7773_s23 = sshra.s32 %s514_s19, 4  ;;  %s516_s4 = int_to_ptr.vmem [resolvable:$true] %s515_s4  ;;  %s7774_s23 = int_to_ptr.hbm [resolvable:$true] %s7773_s23 }
 0x124   :  { %s7775_s27 = scalar_lea.hbm %s7774_s23, 1  ;;  %s7777_s7 = scalar_lea.hbm %s8979_s29, 1 }
 0x125   :  { %p7776_p8 = scmp.ne.s32.totalorder %s7774_s23, %s7775_s27  ;;  %p7778_p9 = scmp.lt.s32.totalorder %s7774_s23, %s8979_s29 }
 0x126   :  { %p7779_p10 = scmp.lt.s32.totalorder %s7777_s7, %s7775_s27 }
 0x128   :  { %p7780_p11 = por %p7779_p10, %p7778_p9 }
 0x12a   :  { %p7781_p12 = pnand %p7780_p11, %p7776_p8 }
 0x12c   :  { %7784 = shalt.err (!%p7781_p12)
}
 0x12d   :  { %518 = dma.hbm_to_vmem [thread:$0]  %s514_s19, 16, %s516_s4, [#allocation35]  }
 0x12e   :  { %s8628_s17 = smov [#allocation37]   ;;  %s557_s0 = sshll.u32 %s8999_s12, 4  ;;  %s558_s0 = int_to_ptr.hbm [resolvable:$true] %s557_s0 }
 0x12f   :  { %s537_s10 = sshll.u32 %s8628_s17, 4  ;;  %s7797_s20 = sshra.s32 %s536_s5, 4  ;;  %s538_s10 = int_to_ptr.vmem [resolvable:$true] %s537_s10  ;;  %s7798_s20 = int_to_ptr.hbm [resolvable:$true] %s7797_s20 }
 0x130   :  { %s7799_s11 = scalar_lea.hbm %s7798_s20, 1  ;;  %s7801_s18 = scalar_lea.hbm %s8989_s24, 1 }
 0x131   :  { %p7800_p13 = scmp.ne.s32.totalorder %s7798_s20, %s7799_s11  ;;  %p7802_p0 = scmp.lt.s32.totalorder %s7798_s20, %s8989_s24 }
 0x132   :  { %p7803_p1 = scmp.lt.s32.totalorder %s7801_s18, %s7799_s11 }
 0x134   :  { %p7804_p2 = por %p7803_p1, %p7802_p0 }
 0x136   :  { %p7805_p3 = pnand %p7804_p2, %p7800_p13 }
 0x138   :  { %7808 = shalt.err (!%p7805_p3)
}
 0x139   :  { %540 = dma.hbm_to_vmem [thread:$0]  %s536_s5, 16, %s538_s10, [#allocation38]  }
 0x13a   :  { %s579_s29 = sshll.u32 %s9009_s6, 4  ;;  %s8629_s8 = smov [#allocation40]   ;;  %s580_s29 = int_to_ptr.hbm [resolvable:$true] %s579_s29 }
 0x13b   :  { %s559_s25 = sshll.u32 %s8629_s8, 4  ;;  %s7821_s2 = sshra.s32 %s558_s0, 4  ;;  %s560_s25 = int_to_ptr.vmem [resolvable:$true] %s559_s25  ;;  %s7822_s2 = int_to_ptr.hbm [resolvable:$true] %s7821_s2 }
 0x13c   :  { %s7823_s13 = scalar_lea.hbm %s7822_s2, 1  ;;  %s7825_s22 = scalar_lea.hbm %s8999_s12, 1 }
 0x13d   :  { %p7824_p4 = scmp.ne.s32.totalorder %s7822_s2, %s7823_s13  ;;  %p7826_p5 = scmp.lt.s32.totalorder %s7822_s2, %s8999_s12 }
 0x13e   :  { %p7827_p6 = scmp.lt.s32.totalorder %s7825_s22, %s7823_s13 }
 0x140   :  { %p7828_p7 = por %p7827_p6, %p7826_p5 }
 0x142   :  { %p7829_p8 = pnand %p7828_p7, %p7824_p4 }
 0x144   :  { %7832 = shalt.err (!%p7829_p8)
}
 0x145   :  { %562 = dma.hbm_to_vmem [thread:$0]  %s558_s0, 16, %s560_s25, [#allocation41]  }
 0x146   :  { %s11311_s24 = sld [smem:[#allocation136_spill]]  ;;  %s8630_s19 = smov [#allocation43]  }
 0x147   :  { %s581_s26 = sshll.u32 %s8630_s19, 4  ;;  %s7845_s28 = sshra.s32 %s580_s29, 4  ;;  %s582_s26 = int_to_ptr.vmem [resolvable:$true] %s581_s26  ;;  %s7846_s28 = int_to_ptr.hbm [resolvable:$true] %s7845_s28 }
 0x148   :  { %s7847_s5 = scalar_lea.hbm %s7846_s28, 1  ;;  %s7849_s1 = scalar_lea.hbm %s9009_s6, 1 }
 0x149   :  { %p7848_p9 = scmp.ne.s32.totalorder %s7846_s28, %s7847_s5  ;;  %p7850_p10 = scmp.lt.s32.totalorder %s7846_s28, %s9009_s6 }
 0x14a   :  { %p7851_p11 = scmp.lt.s32.totalorder %s7849_s1, %s7847_s5 }
 0x14c   :  { %s602_s14 = sshll.u32 %s11311_s24, 4  ;;  %p7852_p12 = por %p7851_p11, %p7850_p10  ;;  %s9156_s14 = int_to_ptr.hbm [resolvable:$true] %s602_s14 }
 0x14e   :  { %p7853_p13 = pnand %p7852_p12, %p7848_p9 }
 0x150   :  { %7856 = shalt.err (!%p7853_p13)
}
 0x151   :  { %584 = dma.hbm_to_vmem [thread:$0]  %s580_s29, 16, %s582_s26, [#allocation44]  }
 0x152   :  { %s11312_s12 = sld [smem:[#allocation138_spill]]  ;;  %s8631_s23 = smov [#allocation46]  }
 0x153   :  { %s604_s27 = sshll.u32 %s8631_s23, 4  ;;  %s7869_s7 = sshra.s32 %s9156_s14, 4  ;;  %s605_s27 = int_to_ptr.vmem [resolvable:$true] %s604_s27  ;;  %s7870_s7 = int_to_ptr.hbm [resolvable:$true] %s7869_s7 }
 0x154   :  { %s7871_s17 = scalar_lea.hbm %s7870_s7, 32  ;;  %s7873_s6 = scalar_lea.hbm %s11311_s24, 32 }
 0x155   :  { %p7872_p0 = scmp.ne.s32.totalorder %s7870_s7, %s7871_s17  ;;  %p7874_p1 = scmp.lt.s32.totalorder %s7870_s7, %s11311_s24 }
 0x156   :  { %p7875_p2 = scmp.lt.s32.totalorder %s7873_s6, %s7871_s17 }
 0x158   :  { %s626_s4 = sshll.u32 %s11312_s12, 4  ;;  %p7876_p3 = por %p7875_p2, %p7874_p1  ;;  %s9161_s4 = int_to_ptr.hbm [resolvable:$true] %s626_s4 }
 0x15a   :  { %p7877_p4 = pnand %p7876_p3, %p7872_p0 }
 0x15c   :  { %7880 = shalt.err (!%p7877_p4)
}
 0x15d   :  { %s11313_s10 = sld [smem:[#allocation140_spill]]  ;;  %s8632_s0 = smov [#allocation49]  }
 0x15e   :  { %610 = dma.hbm_to_vmem [thread:$0]  %s9156_s14, 512, %s605_s27, [#allocation47], %s8616_s15, %s8616_s15, %s8617_s16  }
 0x15f   :  { %s628_s20 = sshll.u32 %s8632_s0, 4  ;;  %s7893_s18 = sshra.s32 %s9161_s4, 4  ;;  %s629_s20 = int_to_ptr.vmem [resolvable:$true] %s628_s20  ;;  %s7894_s18 = int_to_ptr.hbm [resolvable:$true] %s7893_s18 }
 0x160   :  { %s7895_s29 = scalar_lea.hbm %s7894_s18, 32  ;;  %s7897_s8 = scalar_lea.hbm %s11312_s12, 32 }
 0x161   :  { %p7896_p5 = scmp.ne.s32.totalorder %s7894_s18, %s7895_s29  ;;  %p7898_p6 = scmp.lt.s32.totalorder %s7894_s18, %s11312_s12 }
 0x162   :  { %p7899_p7 = scmp.lt.s32.totalorder %s7897_s8, %s7895_s29 }
 0x163   :  { %s651_s11 = sshll.u32 %s11313_s10, 4  ;;  %s652_s11 = int_to_ptr.hbm [resolvable:$true] %s651_s11 }
 0x164   :  { %p7900_p8 = por %p7899_p7, %p7898_p6 }
 0x166   :  { %p7901_p9 = pnand %p7900_p8, %p7896_p5 }
 0x168   :  { %7904 = shalt.err (!%p7901_p9)
}
 0x169   :  { %s11314_s25 = sld [smem:[#allocation142_spill]]  ;;  %s8633_s13 = smov [#allocation52]  }
 0x16a   :  { %634 = dma.hbm_to_vmem [thread:$0]  %s9161_s4, 512, %s629_s20, [#allocation50], %s8616_s15, %s8616_s15, %s8617_s16  }
 0x16b   :  { %s653_s22 = sshll.u32 %s8633_s13, 4  ;;  %s7917_s24 = sshra.s32 %s652_s11, 4  ;;  %s654_s22 = int_to_ptr.vmem [resolvable:$true] %s653_s22  ;;  %s7918_s24 = int_to_ptr.hbm [resolvable:$true] %s7917_s24 }
 0x16c   :  { %s7919_s19 = scalar_lea.hbm %s7918_s24, 1  ;;  %s7921_s26 = scalar_lea.hbm %s11313_s10, 1 }
 0x16d   :  { %p7920_p10 = scmp.ne.s32.totalorder %s7918_s24, %s7919_s19  ;;  %p7922_p11 = scmp.lt.s32.totalorder %s7918_s24, %s11313_s10 }
 0x16e   :  { %p7923_p12 = scmp.lt.s32.totalorder %s7921_s26, %s7919_s19 }
 0x16f   :  { %s673_s2 = sshll.u32 %s11314_s25, 4  ;;  %s674_s2 = int_to_ptr.hbm [resolvable:$true] %s673_s2 }
 0x170   :  { %p7924_p13 = por %p7923_p12, %p7922_p11 }
 0x172   :  { %p7925_p0 = pnand %p7924_p13, %p7920_p10 }
 0x174   :  { %7928 = shalt.err (!%p7925_p0)
}
 0x175   :  { %656 = dma.hbm_to_vmem [thread:$0]  %s652_s11, 16, %s654_s22, [#allocation53]  }
 0x176   :  { %s11315_s14 = sld [smem:[#allocation144_spill]]  ;;  %s8634_s28 = smov [#allocation55]  }
 0x177   :  { %s675_s5 = sshll.u32 %s8634_s28, 4  ;;  %s7941_s12 = sshra.s32 %s674_s2, 4  ;;  %s676_s5 = int_to_ptr.vmem [resolvable:$true] %s675_s5  ;;  %s7942_s12 = int_to_ptr.hbm [resolvable:$true] %s7941_s12 }
 0x178   :  { %s7943_s4 = scalar_lea.hbm %s7942_s12, 1  ;;  %s7945_s23 = scalar_lea.hbm %s11314_s25, 1 }
 0x179   :  { %p7944_p1 = scmp.ne.s32.totalorder %s7942_s12, %s7943_s4  ;;  %p7946_p2 = scmp.lt.s32.totalorder %s7942_s12, %s11314_s25 }
 0x17a   :  { %p7947_p3 = scmp.lt.s32.totalorder %s7945_s23, %s7943_s4 }
 0x17c   :  { %s695_s1 = sshll.u32 %s11315_s14, 4  ;;  %p7948_p4 = por %p7947_p3, %p7946_p2  ;;  %s696_s1 = int_to_ptr.hbm [resolvable:$true] %s695_s1 }
 0x17e   :  { %p7949_p5 = pnand %p7948_p4, %p7944_p1 }
 0x180   :  { %7952 = shalt.err (!%p7949_p5)
}
 0x181   :  { %678 = dma.hbm_to_vmem [thread:$0]  %s674_s2, 16, %s676_s5, [#allocation56]  }
 0x182   :  { %s11316_s27 = sld [smem:[#allocation111_spill]]  ;;  %s8635_s17 = smov [#allocation58]  }
 0x183   :  { %s697_s6 = sshll.u32 %s8635_s17, 4  ;;  %s7965_s10 = sshra.s32 %s696_s1, 4  ;;  %s698_s6 = int_to_ptr.vmem [resolvable:$true] %s697_s6  ;;  %s7966_s10 = int_to_ptr.hbm [resolvable:$true] %s7965_s10 }
 0x184   :  { %s7967_s0 = scalar_lea.hbm %s7966_s10, 1  ;;  %s7969_s20 = scalar_lea.hbm %s11315_s14, 1 }
 0x185   :  { %p7968_p6 = scmp.ne.s32.totalorder %s7966_s10, %s7967_s0  ;;  %p7970_p7 = scmp.lt.s32.totalorder %s7966_s10, %s11315_s14 }
 0x186   :  { %p7971_p8 = scmp.lt.s32.totalorder %s7969_s20, %s7967_s0 }
 0x188   :  { %s245_s7 = sshll.u32 %s11316_s27, 4  ;;  %p7972_p9 = por %p7971_p8, %p7970_p7  ;;  %s9185_s7 = int_to_ptr.hbm [resolvable:$true] %s245_s7 }
 0x18a   :  { %p7973_p10 = pnand %p7972_p9, %p7968_p6 }
 0x18c   :  { %7976 = shalt.err (!%p7973_p10)
}
 0x18d   :  { %700 = dma.hbm_to_vmem [thread:$0]  %s696_s1, 16, %s698_s6, [#allocation59]  }
 0x18e   :  { %s11317_s11 = sld [smem:[#allocation115_spill]]  ;;  %s8636_s18 = smov [#allocation2]  }
 0x18f   :  { %s247_s29 = sshll.u32 %s8636_s18, 4  ;;  %s7989_s25 = sshra.s32 %s9185_s7, 4  ;;  %s248_s29 = int_to_ptr.vmem [resolvable:$true] %s247_s29  ;;  %s7990_s25 = int_to_ptr.hbm [resolvable:$true] %s7989_s25 }
 0x190   :  { %s7991_s2 = scalar_lea.hbm %s7990_s25, 32  ;;  %s7993_s13 = scalar_lea.hbm %s11316_s27, 32 }
 0x191   :  { %p7992_p11 = scmp.ne.s32.totalorder %s7990_s25, %s7991_s2  ;;  %p7994_p12 = scmp.lt.s32.totalorder %s7990_s25, %s11316_s27 }
 0x192   :  { %p7995_p13 = scmp.lt.s32.totalorder %s7993_s13, %s7991_s2 }
 0x194   :  { %s278_s8 = sshll.u32 %s11317_s11, 4  ;;  %p7996_p0 = por %p7995_p13, %p7994_p12  ;;  %s279_s8 = int_to_ptr.hbm [resolvable:$true] %s278_s8 }
 0x196   :  { %p7997_p1 = pnand %p7996_p0, %p7992_p11 }
 0x198   :  { %8000 = shalt.err (!%p7997_p1)
}
 0x199   :  { %s11318_s22 = sld [smem:[#allocation116_spill]]  ;;  %s8637_s19 = smov [#allocation6]  }
 0x19a   :  { %253 = dma.hbm_to_vmem [thread:$0]  %s9185_s7, 512, %s248_s29, [#allocation3], %s8616_s15, %s8616_s15, %s8617_s16  }
 0x19b   :  { %s280_s26 = sshll.u32 %s8637_s19, 4  ;;  %s8013_s14 = sshra.s32 %s279_s8, 4  ;;  %s281_s26 = int_to_ptr.vmem [resolvable:$true] %s280_s26  ;;  %s8014_s14 = int_to_ptr.hbm [resolvable:$true] %s8013_s14 }
 0x19c   :  { %s8015_s28 = scalar_lea.hbm %s8014_s14, 1  ;;  %s8017_s5 = scalar_lea.hbm %s11317_s11, 1 }
 0x19d   :  { %p8016_p2 = scmp.ne.s32.totalorder %s8014_s14, %s8015_s28  ;;  %p8018_p3 = scmp.lt.s32.totalorder %s8014_s14, %s11317_s11 }
 0x19e   :  { %p8019_p4 = scmp.lt.s32.totalorder %s8017_s5, %s8015_s28 }
 0x19f   :  { %s300_s24 = sshll.u32 %s11318_s22, 4  ;;  %s301_s24 = int_to_ptr.hbm [resolvable:$true] %s300_s24 }
 0x1a0   :  { %p8020_p5 = por %p8019_p4, %p8018_p3 }
 0x1a2   :  { %p8021_p6 = pnand %p8020_p5, %p8016_p2 }
 0x1a4   :  { %8024 = shalt.err (!%p8021_p6)
}
 0x1a5   :  { %283 = dma.hbm_to_vmem [thread:$0]  %s279_s8, 16, %s281_s26, [#allocation5]  }
 0x1a6   :  { %s11319_s1 = sld [smem:[#allocation117_spill]]  ;;  %s8638_s12 = smov [#allocation9]  }
 0x1a7   :  { %s302_s4 = sshll.u32 %s8638_s12, 4  ;;  %s8037_s27 = sshra.s32 %s301_s24, 4  ;;  %s303_s4 = int_to_ptr.vmem [resolvable:$true] %s302_s4  ;;  %s8038_s27 = int_to_ptr.hbm [resolvable:$true] %s8037_s27 }
 0x1a8   :  { %s8039_s7 = scalar_lea.hbm %s8038_s27, 1  ;;  %s8041_s17 = scalar_lea.hbm %s11318_s22, 1 }
 0x1a9   :  { %p8040_p7 = scmp.ne.s32.totalorder %s8038_s27, %s8039_s7  ;;  %p8042_p8 = scmp.lt.s32.totalorder %s8038_s27, %s11318_s22 }
 0x1aa   :  { %p8043_p9 = scmp.lt.s32.totalorder %s8041_s17, %s8039_s7 }
 0x1ac   :  { %s321_s23 = sshll.u32 %s11319_s1, 4  ;;  %p8044_p10 = por %p8043_p9, %p8042_p8  ;;  %s9201_s23 = int_to_ptr.hbm [resolvable:$true] %s321_s23 }
 0x1ae   :  { %p8045_p11 = pnand %p8044_p10, %p8040_p7 }
 0x1b0   :  { %8048 = shalt.err (!%p8045_p11)
}
 0x1b1   :  { %305 = dma.hbm_to_vmem [thread:$0]  %s301_s24, 16, %s303_s4, [#allocation8]  }
 0x1b2   :  { %s11320_s6 = sld [smem:[#allocation121_spill]]  ;;  %s8639_s0 = smov [#allocation12]  }
 0x1b3   :  { %s323_s20 = sshll.u32 %s8639_s0, 4  ;;  %s8061_s11 = sshra.s32 %s9201_s23, 4  ;;  %s324_s20 = int_to_ptr.vmem [resolvable:$true] %s323_s20  ;;  %s8062_s11 = int_to_ptr.hbm [resolvable:$true] %s8061_s11 }
 0x1b4   :  { %s8063_s18 = scalar_lea.hbm %s8062_s11, 32  ;;  %s8065_s29 = scalar_lea.hbm %s11319_s1, 32 }
 0x1b5   :  { %p8064_p12 = scmp.ne.s32.totalorder %s8062_s11, %s8063_s18  ;;  %p8066_p13 = scmp.lt.s32.totalorder %s8062_s11, %s11319_s1 }
 0x1b6   :  { %p8067_p0 = scmp.lt.s32.totalorder %s8065_s29, %s8063_s18 }
 0x1b8   :  { %s354_s10 = sshll.u32 %s11320_s6, 4  ;;  %p8068_p1 = por %p8067_p0, %p8066_p13  ;;  %s355_s10 = int_to_ptr.hbm [resolvable:$true] %s354_s10 }
 0x1ba   :  { %p8069_p2 = pnand %p8068_p1, %p8064_p12 }
 0x1bc   :  { %8072 = shalt.err (!%p8069_p2)
}
 0x1bd   :  { %s11321_s8 = sld [smem:[#allocation123_spill]]  ;;  %s8640_s25 = smov [#allocation15]  }
 0x1be   :  { %329 = dma.hbm_to_vmem [thread:$0]  %s9201_s23, 512, %s324_s20, [#allocation11], %s8616_s15, %s8616_s15, %s8617_s16  }
 0x1bf   :  { %s356_s2 = sshll.u32 %s8640_s25, 4  ;;  %s8085_s22 = sshra.s32 %s355_s10, 4  ;;  %s357_s2 = int_to_ptr.vmem [resolvable:$true] %s356_s2  ;;  %s8086_s22 = int_to_ptr.hbm [resolvable:$true] %s8085_s22 }
 0x1c0   :  { %s8087_s24 = scalar_lea.hbm %s8086_s22, 1  ;;  %s8089_s19 = scalar_lea.hbm %s11320_s6, 1 }
 0x1c1   :  { %p8088_p3 = scmp.ne.s32.totalorder %s8086_s22, %s8087_s24  ;;  %p8090_p4 = scmp.lt.s32.totalorder %s8086_s22, %s11320_s6 }
 0x1c2   :  { %p8091_p5 = scmp.lt.s32.totalorder %s8089_s19, %s8087_s24 }
 0x1c3   :  { %s380_s13 = sshll.u32 %s11321_s8, 4  ;;  %s381_s13 = int_to_ptr.hbm [resolvable:$true] %s380_s13 }
 0x1c4   :  { %p8092_p6 = por %p8091_p5, %p8090_p4 }
 0x1c6   :  { %p8093_p7 = pnand %p8092_p6, %p8088_p3 }
 0x1c8   :  { %8096 = shalt.err (!%p8093_p7)
}
 0x1c9   :  { %359 = dma.hbm_to_vmem [thread:$0]  %s355_s10, 16, %s357_s2, [#allocation14]  }
 0x1ca   :  { %s11322_s26 = sld [smem:[#allocation125_spill]]  ;;  %s8641_s28 = smov [#allocation18]  }
 0x1cb   :  { %s382_s5 = sshll.u32 %s8641_s28, 4  ;;  %s8109_s1 = sshra.s32 %s381_s13, 4  ;;  %s383_s5 = int_to_ptr.vmem [resolvable:$true] %s382_s5  ;;  %s8110_s1 = int_to_ptr.hbm [resolvable:$true] %s8109_s1 }
 0x1cc   :  { %s8111_s12 = scalar_lea.hbm %s8110_s1, 1  ;;  %s8113_s4 = scalar_lea.hbm %s11321_s8, 1 }
 0x1cd   :  { %p8112_p8 = scmp.ne.s32.totalorder %s8110_s1, %s8111_s12  ;;  %p8114_p9 = scmp.lt.s32.totalorder %s8110_s1, %s11321_s8 }
 0x1ce   :  { %p8115_p10 = scmp.lt.s32.totalorder %s8113_s4, %s8111_s12 }
 0x1d0   :  { %s404_s14 = sshll.u32 %s11322_s26, 4  ;;  %p8116_p11 = por %p8115_p10, %p8114_p9  ;;  %s405_s14 = int_to_ptr.hbm [resolvable:$true] %s404_s14 }
 0x1d2   :  { %p8117_p12 = pnand %p8116_p11, %p8112_p8 }
 0x1d4   :  { %8120 = shalt.err (!%p8117_p12)
}
 0x1d5   :  { %385 = dma.hbm_to_vmem [thread:$0]  %s381_s13, 16, %s383_s5, [#allocation17]  }
 0x1d6   :  { %s11323_s23 = sld [smem:[#allocation126_spill]]  ;;  %s8642_s27 = smov [#allocation21]  }
 0x1d7   :  { %s406_s7 = sshll.u32 %s8642_s27, 4  ;;  %s8133_s6 = sshra.s32 %s405_s14, 4  ;;  %s407_s7 = int_to_ptr.vmem [resolvable:$true] %s406_s7  ;;  %s8134_s6 = int_to_ptr.hbm [resolvable:$true] %s8133_s6 }
 0x1d8   :  { %s8135_s10 = scalar_lea.hbm %s8134_s6, 1  ;;  %s8137_s0 = scalar_lea.hbm %s11322_s26, 1 }
 0x1d9   :  { %p8136_p13 = scmp.ne.s32.totalorder %s8134_s6, %s8135_s10  ;;  %p8138_p0 = scmp.lt.s32.totalorder %s8134_s6, %s11322_s26 }
 0x1da   :  { %p8139_p1 = scmp.lt.s32.totalorder %s8137_s0, %s8135_s10 }
 0x1dc   :  { %s426_s17 = sshll.u32 %s11323_s23, 4  ;;  %p8140_p2 = por %p8139_p1, %p8138_p0  ;;  %s427_s17 = int_to_ptr.hbm [resolvable:$true] %s426_s17 }
 0x1de   :  { %p8141_p3 = pnand %p8140_p2, %p8136_p13 }
 0x1e0   :  { %8144 = shalt.err (!%p8141_p3)
}
 0x1e1   :  { %409 = dma.hbm_to_vmem [thread:$0]  %s405_s14, 16, %s407_s7, [#allocation20]  }
 0x1e2   :  { %s11324_s20 = sld [smem:[#allocation127_spill]]  ;;  %s8643_s18 = smov [#allocation24]  }
 0x1e3   :  { %s428_s29 = sshll.u32 %s8643_s18, 4  ;;  %s8157_s8 = sshra.s32 %s427_s17, 4  ;;  %s429_s29 = int_to_ptr.vmem [resolvable:$true] %s428_s29  ;;  %s8158_s8 = int_to_ptr.hbm [resolvable:$true] %s8157_s8 }
 0x1e4   :  { %s8159_s25 = scalar_lea.hbm %s8158_s8, 1  ;;  %s8161_s2 = scalar_lea.hbm %s11323_s23, 1 }
 0x1e5   :  { %p8160_p4 = scmp.ne.s32.totalorder %s8158_s8, %s8159_s25  ;;  %p8162_p5 = scmp.lt.s32.totalorder %s8158_s8, %s11323_s23 }
 0x1e6   :  { %p8163_p6 = scmp.lt.s32.totalorder %s8161_s2, %s8159_s25 }
 0x1e8   :  { %s448_s11 = sshll.u32 %s11324_s20, 4  ;;  %p8164_p7 = por %p8163_p6, %p8162_p5  ;;  %s449_s11 = int_to_ptr.hbm [resolvable:$true] %s448_s11 }
 0x1ea   :  { %p8165_p8 = pnand %p8164_p7, %p8160_p4 }
 0x1ec   :  { %8168 = shalt.err (!%p8165_p8)
}
 0x1ed   :  { %431 = dma.hbm_to_vmem [thread:$0]  %s427_s17, 16, %s429_s29, [#allocation23]  }
 0x1ee   :  { %s11325_s13 = sld [smem:[#allocation128_spill]]  ;;  %s8644_s22 = smov [#allocation27]  }
 0x1ef   :  { %s450_s24 = sshll.u32 %s8644_s22, 4  ;;  %s8181_s26 = sshra.s32 %s449_s11, 4  ;;  %s451_s24 = int_to_ptr.vmem [resolvable:$true] %s450_s24  ;;  %s8182_s26 = int_to_ptr.hbm [resolvable:$true] %s8181_s26 }
 0x1f0   :  { %s8183_s14 = scalar_lea.hbm %s8182_s26, 1  ;;  %s8185_s28 = scalar_lea.hbm %s11324_s20, 1 }
 0x1f1   :  { %p8184_p9 = scmp.ne.s32.totalorder %s8182_s26, %s8183_s14  ;;  %p8186_p10 = scmp.lt.s32.totalorder %s8182_s26, %s11324_s20 }
 0x1f2   :  { %p8187_p11 = scmp.lt.s32.totalorder %s8185_s28, %s8183_s14 }
 0x1f4   :  { %s469_s19 = sshll.u32 %s11325_s13, 4  ;;  %p8188_p12 = por %p8187_p11, %p8186_p10  ;;  %s9226_s19 = int_to_ptr.hbm [resolvable:$true] %s469_s19 }
 0x1f6   :  { %p8189_p13 = pnand %p8188_p12, %p8184_p9 }
 0x1f8   :  { %8192 = shalt.err (!%p8189_p13)
}
 0x1f9   :  { %453 = dma.hbm_to_vmem [thread:$0]  %s449_s11, 16, %s451_s24, [#allocation26]  }
 0x1fa   :  { %s11326_s5 = sld [smem:[#allocation129_spill]]  ;;  %s8645_s12 = smov [#allocation30]  }
 0x1fb   :  { %s471_s4 = sshll.u32 %s8645_s12, 4  ;;  %s8205_s23 = sshra.s32 %s9226_s19, 4  ;;  %s472_s4 = int_to_ptr.vmem [resolvable:$true] %s471_s4  ;;  %s8206_s23 = int_to_ptr.hbm [resolvable:$true] %s8205_s23 }
 0x1fc   :  { %s8207_s27 = scalar_lea.hbm %s8206_s23, 32  ;;  %s8209_s7 = scalar_lea.hbm %s11325_s13, 32 }
 0x1fd   :  { %p8208_p0 = scmp.ne.s32.totalorder %s8206_s23, %s8207_s27  ;;  %p8210_p1 = scmp.lt.s32.totalorder %s8206_s23, %s11325_s13 }
 0x1fe   :  { %p8211_p2 = scmp.lt.s32.totalorder %s8209_s7, %s8207_s27 }
 0x200   :  { %s495_s1 = sshll.u32 %s11326_s5, 4  ;;  %p8212_p3 = por %p8211_p2, %p8210_p1  ;;  %s9231_s1 = int_to_ptr.hbm [resolvable:$true] %s495_s1 }
 0x202   :  { %p8213_p4 = pnand %p8212_p3, %p8208_p0 }
 0x204   :  { %8216 = shalt.err (!%p8213_p4)
}
 0x205   :  { %s11327_s17 = sld [smem:[#allocation132_spill]]  ;;  %s8646_s6 = smov [#allocation33]  }
 0x206   :  { %477 = dma.hbm_to_vmem [thread:$0]  %s9226_s19, 512, %s472_s4, [#allocation29], %s8616_s15, %s8616_s15, %s8617_s16  }
 0x207   :  { %s497_s10 = sshll.u32 %s8646_s6, 4  ;;  %s8229_s20 = sshra.s32 %s9231_s1, 4  ;;  %s498_s10 = int_to_ptr.vmem [resolvable:$true] %s497_s10  ;;  %s8230_s20 = int_to_ptr.hbm [resolvable:$true] %s8229_s20 }
 0x208   :  { %s8231_s11 = scalar_lea.hbm %s8230_s20, 32  ;;  %s8233_s18 = scalar_lea.hbm %s11326_s5, 32 }
 0x209   :  { %p8232_p5 = scmp.ne.s32.totalorder %s8230_s20, %s8231_s11  ;;  %p8234_p6 = scmp.lt.s32.totalorder %s8230_s20, %s11326_s5 }
 0x20a   :  { %p8235_p7 = scmp.lt.s32.totalorder %s8233_s18, %s8231_s11 }
 0x20b   :  { %s524_s0 = sshll.u32 %s11327_s17, 4  ;;  %s525_s0 = int_to_ptr.hbm [resolvable:$true] %s524_s0 }
 0x20c   :  { %p8236_p8 = por %p8235_p7, %p8234_p6 }
 0x20e   :  { %p8237_p9 = pnand %p8236_p8, %p8232_p5 }
 0x210   :  { %8240 = shalt.err (!%p8237_p9)
}
 0x211   :  { %s11328_s29 = sld [smem:[#allocation133_spill]]  ;;  %s8647_s25 = smov [#allocation36]  }
 0x212   :  { %503 = dma.hbm_to_vmem [thread:$0]  %s9231_s1, 512, %s498_s10, [#allocation32], %s8616_s15, %s8616_s15, %s8617_s16  }
 0x213   :  { %s526_s2 = sshll.u32 %s8647_s25, 4  ;;  %s8253_s13 = sshra.s32 %s525_s0, 4  ;;  %s527_s2 = int_to_ptr.vmem [resolvable:$true] %s526_s2  ;;  %s8254_s13 = int_to_ptr.hbm [resolvable:$true] %s8253_s13 }
 0x214   :  { %s8255_s22 = scalar_lea.hbm %s8254_s13, 1  ;;  %s8257_s24 = scalar_lea.hbm %s11327_s17, 1 }
 0x215   :  { %p8256_p10 = scmp.ne.s32.totalorder %s8254_s13, %s8255_s22  ;;  %p8258_p11 = scmp.lt.s32.totalorder %s8254_s13, %s11327_s17 }
 0x216   :  { %p8259_p12 = scmp.lt.s32.totalorder %s8257_s24, %s8255_s22 }
 0x217   :  { %s546_s8 = sshll.u32 %s11328_s29, 4  ;;  %s547_s8 = int_to_ptr.hbm [resolvable:$true] %s546_s8 }
 0x218   :  { %p8260_p13 = por %p8259_p12, %p8258_p11 }
 0x21a   :  { %p8261_p0 = pnand %p8260_p13, %p8256_p10 }
 0x21c   :  { %8264 = shalt.err (!%p8261_p0)
}
 0x21d   :  { %529 = dma.hbm_to_vmem [thread:$0]  %s525_s0, 16, %s527_s2, [#allocation35]  }
 0x21e   :  { %s11329_s19 = sld [smem:[#allocation134_spill]]  ;;  %s8648_s26 = smov [#allocation39]  }
 0x21f   :  { %s548_s14 = sshll.u32 %s8648_s26, 4  ;;  %s8277_s5 = sshra.s32 %s547_s8, 4  ;;  %s549_s14 = int_to_ptr.vmem [resolvable:$true] %s548_s14  ;;  %s8278_s5 = int_to_ptr.hbm [resolvable:$true] %s8277_s5 }
 0x220   :  { %s8279_s1 = scalar_lea.hbm %s8278_s5, 1  ;;  %s8281_s12 = scalar_lea.hbm %s11328_s29, 1 }
 0x221   :  { %p8280_p1 = scmp.ne.s32.totalorder %s8278_s5, %s8279_s1  ;;  %p8282_p2 = scmp.lt.s32.totalorder %s8278_s5, %s11328_s29 }
 0x222   :  { %p8283_p3 = scmp.lt.s32.totalorder %s8281_s12, %s8279_s1 }
 0x224   :  { %s568_s28 = sshll.u32 %s11329_s19, 4  ;;  %p8284_p4 = por %p8283_p3, %p8282_p2  ;;  %s569_s28 = int_to_ptr.hbm [resolvable:$true] %s568_s28 }
 0x226   :  { %p8285_p5 = pnand %p8284_p4, %p8280_p1 }
 0x228   :  { %8288 = shalt.err (!%p8285_p5)
}
 0x229   :  { %551 = dma.hbm_to_vmem [thread:$0]  %s547_s8, 16, %s549_s14, [#allocation38]  }
 0x22a   :  { %s11330_s4 = sld [smem:[#allocation135_spill]]  ;;  %s8649_s27 = smov [#allocation42]  }
 0x22b   :  { %s570_s7 = sshll.u32 %s8649_s27, 4  ;;  %s8301_s17 = sshra.s32 %s569_s28, 4  ;;  %s571_s7 = int_to_ptr.vmem [resolvable:$true] %s570_s7  ;;  %s8302_s17 = int_to_ptr.hbm [resolvable:$true] %s8301_s17 }
 0x22c   :  { %s8303_s6 = scalar_lea.hbm %s8302_s17, 1  ;;  %s8305_s10 = scalar_lea.hbm %s11329_s19, 1 }
 0x22d   :  { %p8304_p6 = scmp.ne.s32.totalorder %s8302_s17, %s8303_s6  ;;  %p8306_p7 = scmp.lt.s32.totalorder %s8302_s17, %s11329_s19 }
 0x22e   :  { %p8307_p8 = scmp.lt.s32.totalorder %s8305_s10, %s8303_s6 }
 0x230   :  { %s589_s23 = sshll.u32 %s11330_s4, 4  ;;  %p8308_p9 = por %p8307_p8, %p8306_p7  ;;  %s9255_s23 = int_to_ptr.hbm [resolvable:$true] %s589_s23 }
 0x232   :  { %p8309_p10 = pnand %p8308_p9, %p8304_p6 }
 0x234   :  { %8312 = shalt.err (!%p8309_p10)
}
 0x235   :  { %573 = dma.hbm_to_vmem [thread:$0]  %s569_s28, 16, %s571_s7, [#allocation41]  }
 0x236   :  { %s11331_s0 = sld [smem:[#allocation137_spill]]  ;;  %s8650_s20 = smov [#allocation45]  }
 0x237   :  { %s591_s11 = sshll.u32 %s8650_s20, 4  ;;  %s8325_s29 = sshra.s32 %s9255_s23, 4  ;;  %s592_s11 = int_to_ptr.vmem [resolvable:$true] %s591_s11  ;;  %s8326_s29 = int_to_ptr.hbm [resolvable:$true] %s8325_s29 }
 0x238   :  { %s8327_s8 = scalar_lea.hbm %s8326_s29, 32  ;;  %s8329_s25 = scalar_lea.hbm %s11330_s4, 32 }
 0x239   :  { %p8328_p11 = scmp.ne.s32.totalorder %s8326_s29, %s8327_s8  ;;  %p8330_p12 = scmp.lt.s32.totalorder %s8326_s29, %s11330_s4 }
 0x23a   :  { %p8331_p13 = scmp.lt.s32.totalorder %s8329_s25, %s8327_s8 }
 0x23c   :  { %s616_s18 = sshll.u32 %s11331_s0, 4  ;;  %p8332_p0 = por %p8331_p13, %p8330_p12  ;;  %s617_s18 = int_to_ptr.hbm [resolvable:$true] %s616_s18 }
 0x23e   :  { %p8333_p1 = pnand %p8332_p0, %p8328_p11 }
 0x240   :  { %8336 = shalt.err (!%p8333_p1)
}
 0x241   :  { %s11332_s2 = sld [smem:[#allocation139_spill]]  ;;  %s8651_s22 = smov [#allocation48]  }
 0x242   :  { %597 = dma.hbm_to_vmem [thread:$0]  %s9255_s23, 512, %s592_s11, [#allocation44], %s8616_s15, %s8616_s15, %s8617_s16  }
 0x243   :  { %s618_s24 = sshll.u32 %s8651_s22, 4  ;;  %s8349_s19 = sshra.s32 %s617_s18, 4  ;;  %s619_s24 = int_to_ptr.vmem [resolvable:$true] %s618_s24  ;;  %s8350_s19 = int_to_ptr.hbm [resolvable:$true] %s8349_s19 }
 0x244   :  { %s8351_s26 = scalar_lea.hbm %s8350_s19, 1  ;;  %s8353_s14 = scalar_lea.hbm %s11331_s0, 1 }
 0x245   :  { %p8352_p2 = scmp.ne.s32.totalorder %s8350_s19, %s8351_s26  ;;  %p8354_p3 = scmp.lt.s32.totalorder %s8350_s19, %s11331_s0 }
 0x246   :  { %p8355_p4 = scmp.lt.s32.totalorder %s8353_s14, %s8351_s26 }
 0x247   :  { %s640_s13 = sshll.u32 %s11332_s2, 4  ;;  %s641_s13 = int_to_ptr.hbm [resolvable:$true] %s640_s13 }
 0x248   :  { %p8356_p5 = por %p8355_p4, %p8354_p3 }
 0x24a   :  { %p8357_p6 = pnand %p8356_p5, %p8352_p2 }
 0x24c   :  { %8360 = shalt.err (!%p8357_p6)
}
 0x24d   :  { %621 = dma.hbm_to_vmem [thread:$0]  %s617_s18, 16, %s619_s24, [#allocation47]  }
 0x24e   :  { %s11333_s28 = sld [smem:[#allocation141_spill]]  ;;  %s8652_s5 = smov [#allocation51]  }
 0x24f   :  { %s642_s1 = sshll.u32 %s8652_s5, 4  ;;  %s8373_s4 = sshra.s32 %s641_s13, 4  ;;  %s643_s1 = int_to_ptr.vmem [resolvable:$true] %s642_s1  ;;  %s8374_s4 = int_to_ptr.hbm [resolvable:$true] %s8373_s4 }
 0x250   :  { %s8375_s23 = scalar_lea.hbm %s8374_s4, 1  ;;  %s8377_s27 = scalar_lea.hbm %s11332_s2, 1 }
 0x251   :  { %p8376_p7 = scmp.ne.s32.totalorder %s8374_s4, %s8375_s23  ;;  %p8378_p8 = scmp.lt.s32.totalorder %s8374_s4, %s11332_s2 }
 0x252   :  { %p8379_p9 = scmp.lt.s32.totalorder %s8377_s27, %s8375_s23 }
 0x254   :  { %s662_s12 = sshll.u32 %s11333_s28, 4  ;;  %p8380_p10 = por %p8379_p9, %p8378_p8  ;;  %s663_s12 = int_to_ptr.hbm [resolvable:$true] %s662_s12 }
 0x256   :  { %p8381_p11 = pnand %p8380_p10, %p8376_p7 }
 0x258   :  { %8384 = shalt.err (!%p8381_p11)
}
 0x259   :  { %645 = dma.hbm_to_vmem [thread:$0]  %s641_s13, 16, %s643_s1, [#allocation50]  }
 0x25a   :  { %s11334_s7 = sld [smem:[#allocation143_spill]]  ;;  %s8653_s6 = smov [#allocation54]  }
 0x25b   :  { %s664_s10 = sshll.u32 %s8653_s6, 4  ;;  %s8397_s0 = sshra.s32 %s663_s12, 4  ;;  %s665_s10 = int_to_ptr.vmem [resolvable:$true] %s664_s10  ;;  %s8398_s0 = int_to_ptr.hbm [resolvable:$true] %s8397_s0 }
 0x25c   :  { %s8399_s20 = scalar_lea.hbm %s8398_s0, 1  ;;  %s8401_s11 = scalar_lea.hbm %s11333_s28, 1 }
 0x25d   :  { %p8400_p12 = scmp.ne.s32.totalorder %s8398_s0, %s8399_s20  ;;  %p8402_p13 = scmp.lt.s32.totalorder %s8398_s0, %s11333_s28 }
 0x25e   :  { %p8403_p0 = scmp.lt.s32.totalorder %s8401_s11, %s8399_s20 }
 0x260   :  { %s684_s17 = sshll.u32 %s11334_s7, 4  ;;  %p8404_p1 = por %p8403_p0, %p8402_p13  ;;  %s685_s17 = int_to_ptr.hbm [resolvable:$true] %s684_s17 }
 0x262   :  { %p8405_p2 = pnand %p8404_p1, %p8400_p12 }
 0x264   :  { %8408 = shalt.err (!%p8405_p2)
}
 0x265   :  { %667 = dma.hbm_to_vmem [thread:$0]  %s663_s12, 16, %s665_s10, [#allocation53]  }
 0x266   :  { %s11335_s18 = sld [smem:[#allocation145_spill]]  ;;  %s8654_s29 = smov [#allocation57]  }
 0x267   :  { %s686_s8 = sshll.u32 %s8654_s29, 4  ;;  %s8421_s2 = sshra.s32 %s685_s17, 4  ;;  %s687_s8 = int_to_ptr.vmem [resolvable:$true] %s686_s8  ;;  %s8422_s2 = int_to_ptr.hbm [resolvable:$true] %s8421_s2 }
 0x268   :  { %s8423_s13 = scalar_lea.hbm %s8422_s2, 1  ;;  %s8425_s22 = scalar_lea.hbm %s11334_s7, 1 }
 0x269   :  { %p8424_p3 = scmp.ne.s32.totalorder %s8422_s2, %s8423_s13  ;;  %p8426_p4 = scmp.lt.s32.totalorder %s8422_s2, %s11334_s7 }
 0x26a   :  { %p8427_p5 = scmp.lt.s32.totalorder %s8425_s22, %s8423_s13 }
 0x26c   :  { %s706_s25 = sshll.u32 %s11335_s18, 4  ;;  %p8428_p6 = por %p8427_p5, %p8426_p4  ;;  %s707_s25 = int_to_ptr.hbm [resolvable:$true] %s706_s25 }
 0x26e   :  { %p8429_p7 = pnand %p8428_p6, %p8424_p3 }
 0x270   :  { %8432 = shalt.err (!%p8429_p7)
}
 0x271   :  { %689 = dma.hbm_to_vmem [thread:$0]  %s685_s17, 16, %s687_s8, [#allocation56]  }
 0x272   :  { %s718_s24 = sshll.u32 %s9074_s21, 4  ;;  %s8655_s19 = smov [#allocation60]   ;;  %s9280_s24 = int_to_ptr.hbm [resolvable:$true] %s718_s24 }
 0x273   :  { %s708_s26 = sshll.u32 %s8655_s19, 4  ;;  %s8445_s14 = sshra.s32 %s707_s25, 4  ;;  %s709_s26 = int_to_ptr.vmem [resolvable:$true] %s708_s26  ;;  %s8446_s14 = int_to_ptr.hbm [resolvable:$true] %s8445_s14 }
 0x274   :  { %s8447_s28 = scalar_lea.hbm %s8446_s14, 1  ;;  %s8449_s5 = scalar_lea.hbm %s11335_s18, 1 }
 0x275   :  { %p8448_p8 = scmp.ne.s32.totalorder %s8446_s14, %s8447_s28  ;;  %p8450_p9 = scmp.lt.s32.totalorder %s8446_s14, %s11335_s18 }
 0x276   :  { %p8451_p10 = scmp.lt.s32.totalorder %s8449_s5, %s8447_s28 }
 0x278   :  { %p8452_p11 = por %p8451_p10, %p8450_p9 }
 0x27a   :  { %p8453_p12 = pnand %p8452_p11, %p8448_p8 }
 0x27c   :  { %8456 = shalt.err (!%p8453_p12)
}
 0x27d   :  { %711 = dma.hbm_to_vmem [thread:$0]  %s707_s25, 16, %s709_s26, [#allocation59]  }
 0x27e   :  { %s8656_s1 = smov [#allocation61]   ;;  %s8469_s4 = sshra.s32 %s9280_s24, 4  ;;  %s8470_s4 = int_to_ptr.hbm [resolvable:$true] %s8469_s4 }
 0x27f   :  { %s720_s12 = sshll.u32 %s8656_s1, 4  ;;  %s8471_s23 = scalar_lea.hbm %s8470_s4, 32  ;;  %s721_s12 = int_to_ptr.vmem [resolvable:$true] %s720_s12 }
 0x280   :  { %p8472_p13 = scmp.ne.s32.totalorder %s8470_s4, %s8471_s23  ;;  %s8473_s27 = scalar_lea.hbm %s9074_s21, 32 }
 0x281   :  { %p8474_p0 = scmp.lt.s32.totalorder %s8470_s4, %s9074_s21  ;;  %p8475_p1 = scmp.lt.s32.totalorder %s8473_s27, %s8471_s23 }
 0x283   :  { %p8476_p2 = por %p8475_p1, %p8474_p0 }
 0x285   :  { %p8477_p3 = pnand %p8476_p2, %p8472_p13 }
 0x287   :  { %8480 = shalt.err (!%p8477_p3)
}
 0x288   :  { %726 = dma.hbm_to_vmem [thread:$0]  %s9280_s24, 512, %s721_s12, [#allocation62], %s8616_s15, %s8616_s15, %s8617_s16  }
 0x289   :  { %8493 = dma.done.wait [#allocation3], 512  }
 0x28a   :  { %8494 = vsyncadd [#allocation3], 4294966784 }
 0x28b   :  { %8495 = dma.done.wait [#allocation5], 528  }
 0x28c   :  { %8496 = vsyncadd [#allocation5], 4294966768 }
 0x28d   :  { %8497 = dma.done.wait [#allocation8], 32  }
 0x28e   :  { %8498 = vsyncadd [#allocation8], 4294967264 }
 0x28f   :  { %8499 = dma.done.wait [#allocation11], 528  }
 0x290   :  { %8500 = vsyncadd [#allocation11], 4294966768 }
 0x291   :  { %8501 = dma.done.wait [#allocation14], 528  }
 0x292   :  { %8502 = vsyncadd [#allocation14], 4294966768 }
 0x293   :  { %8503 = dma.done.wait [#allocation17], 528  }
 0x294   :  { %8504 = vsyncadd [#allocation17], 4294966768 }
 0x295   :  { %8505 = dma.done.wait [#allocation20], 32  }
 0x296   :  { %8506 = vsyncadd [#allocation20], 4294967264 }
 0x297   :  { %8507 = dma.done.wait [#allocation23], 32  }
 0x298   :  { %8508 = vsyncadd [#allocation23], 4294967264 }
 0x299   :  { %8509 = dma.done.wait [#allocation26], 32  }
 0x29a   :  { %8510 = vsyncadd [#allocation26], 4294967264 }
 0x29b   :  { %8511 = dma.done.wait [#allocation29], 528  }
 0x29c   :  { %8512 = vsyncadd [#allocation29], 4294966768 }
 0x29d   :  { %8513 = dma.done.wait [#allocation32], 1024  }
 0x29e   :  { %8514 = vsyncadd [#allocation32], 4294966272 }
 0x29f   :  { %8515 = dma.done.wait [#allocation35], 32  }
 0x2a0   :  { %8516 = vsyncadd [#allocation35], 4294967264 }
 0x2a1   :  { %8517 = dma.done.wait [#allocation38], 32  }
 0x2a2   :  { %8518 = vsyncadd [#allocation38], 4294967264 }
 0x2a3   :  { %8519 = dma.done.wait [#allocation41], 32  }
 0x2a4   :  { %8520 = vsyncadd [#allocation41], 4294967264 }
 0x2a5   :  { %8521 = dma.done.wait [#allocation44], 528  }
 0x2a6   :  { %8522 = vsyncadd [#allocation44], 4294966768 }
 0x2a7   :  { %8523 = dma.done.wait [#allocation47], 528  }
 0x2a8   :  { %8524 = vsyncadd [#allocation47], 4294966768 }
 0x2a9   :  { %8525 = dma.done.wait [#allocation50], 528  }
 0x2aa   :  { %8526 = vsyncadd [#allocation50], 4294966768 }
 0x2ab   :  { %8527 = dma.done.wait [#allocation53], 32  }
 0x2ac   :  { %8528 = vsyncadd [#allocation53], 4294967264 }
 0x2ad   :  { %8529 = dma.done.wait [#allocation56], 32  }
 0x2ae   :  { %8530 = vsyncadd [#allocation56], 4294967264 }
 0x2af   :  { %8531 = dma.done.wait [#allocation59], 32  }
 0x2b0   :  { %8532 = vsyncadd [#allocation59], 4294967264 }
 0x2b1   :  { %8533 = dma.done.wait [#allocation62], 512  }
 0x2b2   :  { %8534 = vsyncadd [#allocation62], 4294966784  ;;  %s11336_s21 = sld [smem:[#allocation84_spill]]  ;;  %v8657_v0 = vmov 1983009808   ;;  %vm1073_vm0 = vcmask 1042432  }
 0x2b3   :  { %s11337_s15 = sld [smem:[#allocation85_spill]]  ;;  %v1255_v1 = vunpack.c.l.s4 %v8657_v0  ;;  %v8658_v3 = vmov 1934713408   ;;  %vm1069_vm1 = vcmask 23552   ;;  %v1056_v5 = vld [vmem:[%s9079_s3] sm:$0x7] }
 0x2b4   :  { %v1278_v4 = vunpack.c.l.s4 %v8658_v3  ;;  %6946 = vmatpush.msk.msra.mxu0 %vm1073_vm0, %v1056_v5  ;;  %v1055_v12 = vld [vmem:[#allocation61 + $0x18] sm:$0xff]  ;;  %vm1252_vm2 = vcmask 1047556   ;;  %s8659_s3 = smov 12   ;;  %s8660_s7 = smov 20   ;;  %v1054_v39 = vld [vmem:[#allocation61 + $0x10] sm:$0xff]  ;;  %v1053_v40 = vld [vmem:[#allocation61 + $0x8] sm:$0xff] }
 0x2b5   :  { %v9291_v2 = vunpack.c.0.s8 %v1255_v1  ;;  %1117 = vmatpush.msra.mxu3 %v1055_v12  ;;  %s8661_s17 = smov 4   ;;  %s8662_s6 = smov 16   ;;  %v1052_v41 = vld [vmem:[#allocation61] sm:$0xff]  ;;  %v1011_v43 = vld [vmem:[#allocation33 + $0x10] sm:$0xff]  ;;  %v1010_v44 = vld [vmem:[#allocation33 + $0x8] sm:$0xff]  ;;  %vm1333_vm3 = vcmask 31744  }
 0x2b6   :  { %v9303_v14 = vunpack.c.0.s8 %v1278_v4  ;;  %s8663_s10 = smov 24   ;;  %s8664_s0 = smov 28   ;;  %v1012_v42 = vld [vmem:[#allocation33 + $0x18] sm:$0xff]  ;;  %v1009_v45 = vld [vmem:[#allocation33] sm:$0xff]  ;;  %v7232_v62 = vld [vmem:[#allocation55] ss:$0 sm:$0xff] }
 0x2b7   :  { %s11338_s20 = sld [smem:[#allocation86_spill]]  ;;  %1118 = vmatpush.msra.mxu3 %v1054_v39  ;;  %1388 = vmatpush.msra.mxu1 %v1012_v42  ;;  %s8665_s18 = smov 6   ;;  %vm1101_vm4 = vcmask 261120   ;;  %vm1335_vm5 = vcmask 64512   ;;  %vm1337_vm6 = vcmask 97280   ;;  %vm1339_vm7 = vcmask 130048  }
 0x2b8   :  { %v9295_v6 = vld [vmem:[%s11336_s21] sm:$0x3]  ;;  %s11339_s11 = sld [smem:[#allocation146_spill]]  ;;  %s8666_s29 = smov 2   ;;  %vm1341_vm8 = vcmask 162816   ;;  %vm1343_vm9 = vcmask 195584  }
 0x2b9   :  { %v1062_v7 = vld [vmem:[%s11337_s15] sm:$0xff]  ;;  %v6952_v9 = vld.sshfl [vmem:[%s11337_s15 + $0x8] sm:$0xff pattern:$0x76325410]  ;;  %6947 = vmatmul.msk.f32.vlgmr.msra.gmra.mxu0 %vm1069_vm1, %v9295_v6  ;;  %1119 = vmatpush.msra.mxu3 %v1053_v40  ;;  %vm1345_vm10 = vcmask 228352   ;;  %s11340_s8 = sld [smem:[#allocation118_spill]] }
 0x2ba   :  { %v1257_v8 = vperm.slane %v1062_v7, %v9291_v2  ;;  %v1063_v10 = vld [vmem:[%s11337_s15 + $0x8] sm:$0xff]  ;;  %v1251_v11 = vrot.slane %v1062_v7, 4  ;;  %v1273_v13 = vrot.slane %v6952_v9, 4  ;;  %1389 = vmatpush.msra.mxu1 %v1011_v43  ;;  %s11341_s25 = sld [smem:[#allocation131_spill]]  ;;  %vm1597_vm11 = vcmask 15360   ;;  %v1059_v40 = vld [vmem:[%s9084_s9 + $0x10] sm:$0xff] }
 0x2bb   :  { %v1263_v15 = vrot.slane %v1063_v10, 4  ;;  %1120 = vmatpush.msra.mxu3 %v1052_v41  ;;  %vm1600_vm12 = vcmask 48128   ;;  %v1058_v42 = vld [vmem:[%s9084_s9 + $0x8] sm:$0xff]  ;;  %s11343_s2 = sld [smem:[#allocation130_spill]]  ;;  %s8673_s14 = smov 64  }
 0x2bc   :  { %v1275_v16 = vrot.slane %v1257_v8, 4  ;;  %v1253_v17 = vsel %vm1252_vm2, 0.0, %v1251_v11  ;;  %v1274_v18 = vsel %vm1252_vm2, %v1273_v13, %v1257_v8  ;;  %1390 = vmatpush.msra.mxu1 %v1010_v44  ;;  %v1057_v44 = vld [vmem:[%s9084_s9] sm:$0xff]  ;;  %s11344_s13 = sld [smem:[#allocation120_spill]]  ;;  %s8674_s28 = smov 32  }
 0x2bd   :  { %v1261_v19 = vperm.slane %v1253_v17, %v9291_v2  ;;  %v1264_v20 = vsel %vm1252_vm2, 0.0, %v1263_v15  ;;  %v9311_v22 = vperm.slane %v1274_v18, %v9303_v14  ;;  %v6959_v46 = vld.sshfl [vmem:[%s11338_s20] sm:$0x33 pattern:$0x76325410]  ;;  %s11345_s22 = sld [smem:[#allocation113_spill]] }
 0x2be   :  { %v1276_v21 = vsel %vm1252_vm2, %v6952_v9, %v1275_v16  ;;  %v1272_v23 = vperm.slane %v1264_v20, %v9291_v2  ;;  %1391 = vmatpush.msra.mxu1 %v1009_v45  ;;  %v1051_v47 = vld [vmem:[%s11339_s11 + $0x18] sm:$0xff]  ;;  %v1050_v48 = vld [vmem:[%s11339_s11 + $0x10] sm:$0xff]  ;;  %v6960_v49 = vld.sshfl [vmem:[%s11338_s20 + $0x4] sm:$0x33 pattern:$0x76325410] }
 0x2bf   :  { %v1284_v24 = vperm.slane %v1276_v21, %v9303_v14  ;;  %v1287_v25 = vrot.slane %v1261_v19, 4  ;;  %v1297_v29 = vrot.slane %v9311_v22, 4  ;;  %v1571_v50 = vrot.slane %v6959_v46, 4  ;;  %1143 = vmatpush.msra.mxu2 %v1051_v47  ;;  %v1049_v17 = vld [vmem:[%s11339_s11 + $0x8] sm:$0xff]  ;;  %v1048_v18 = vld [vmem:[%s11339_s11] sm:$0xff]  ;;  %v1007_v20 = vld [vmem:[#allocation31 + $0x10] sm:$0xff] }
 0x2c0   :  { %v1285_v26 = vrot.slane %v1272_v23, 4  ;;  %v1569_v51 = vrot.slane %v6960_v49, 4  ;;  %v1006_v21 = vld [vmem:[#allocation31 + $0x8] sm:$0xff]  ;;  %v1017_v43 = vld [vmem:[%s11341_s25] sm:$0xff]  ;;  %v7235_v45 = vld [vmem:[#allocation52] ss:$0 sm:$0xff] }
 0x2c1   :  { %1310 = vrot.lane.b32.xlu0 %v1284_v24, %s8617_s16  ;;  %v1299_v27 = vrot.slane %v1284_v24, 4  ;;  %v1288_v28 = vsel %vm1252_vm2, %v1272_v23, %v1287_v25  ;;  %v1298_v36 = vsel %vm1252_vm2, 0.0, %v1297_v29  ;;  %v1572_v52 = vsel %vm1252_vm2, %v6960_v49, %v1571_v50  ;;  %1144 = vmatpush.msra.mxu2 %v1050_v48  ;;  %v7233_v23 = vld [vmem:[#allocation54] ss:$0 sm:$0xff]  ;;  %v7234_v24 = vld [vmem:[#allocation22] ss:$0 sm:$0xff] }
 0x2c2   :  { %v1286_v30 = vsel %vm1252_vm2, %v1285_v26, %v1261_v19  ;;  %v1296_v31 = vperm.slane %v1288_v28, %v9303_v14  ;;  %v1570_v53 = vsel %vm1252_vm2, %v1569_v51, %v6959_v46  ;;  %v1580_v54 = vperm.slane %v1572_v52, %v9303_v14  ;;  %v1008_v19 = vld [vmem:[#allocation31 + $0x18] sm:$0xff]  ;;  %v1019_v39 = vld [vmem:[%s11341_s25 + $0x10] sm:$0xff]  ;;  %v1018_v41 = vld [vmem:[%s11341_s25 + $0x8] sm:$0xff]  ;;  %s11346_s24 = sld [smem:[#allocation119_spill]]  ;;  %s8675_s12 = smov 112  }
 0x2c3   :  { %v1300_v32 = vsel %vm1252_vm2, 0.0, %v1299_v27  ;;  %v1292_v33 = vperm.slane %v1286_v30, %v9303_v14  ;;  %v9336_v55 = vperm.slane %v1570_v53, %v9303_v14  ;;  %1145 = vmatpush.msra.mxu2 %v1049_v17  ;;  %v962_v27 = vld [vmem:[%s11340_s8] sm:$0xff]  ;;  %v1003_v49 = vld [vmem:[#allocation30 + $0x10] sm:$0xff]  ;;  %v1002_v51 = vld [vmem:[#allocation30 + $0x8] sm:$0xff]  ;;  %s11347_s19 = sld [smem:[#allocation112_spill]]  ;;  %s8676_s4 = smov 104  }
 0x2c4   :  { %1314 = vrot.lane.b32.xlu1 %v1300_v32, %s8659_s3  ;;  %v1303_v34 = vrot.slane %v1296_v31, 4  ;;  %v1583_v56 = vrot.slane %v1580_v54, 4  ;;  %v1004_v48 = vld [vmem:[#allocation30 + $0x18] sm:$0xff]  ;;  %v1001_v52 = vld [vmem:[#allocation30] sm:$0xff]  ;;  %s11348_s26 = sld [smem:[#allocation122_spill]]  ;;  %s8677_s23 = smov 120  }
 0x2c5   :  { %v1301_v35 = vrot.slane %v1292_v33, 4  ;;  %v1581_v57 = vrot.slane %v9336_v55, 4  ;;  %1146 = vmatpush.msra.mxu2 %v1048_v18  ;;  %s11351_s5 = sld [smem:[#allocation90_spill]]  ;;  %s8678_s27 = smov 96  }
 0x2c6   :  { %v1304_v37 = vsel %vm1252_vm2, 0.0, %v1303_v34  ;;  %v1584_v58 = vsel %vm1252_vm2, 0.0, %v1583_v56  ;;  %s11352_s1 = sld [smem:[#allocation88_spill]] }
 0x2c7   :  { %v1302_v38 = vsel %vm1252_vm2, 0.0, %v1301_v35  ;;  %v1582_v59 = vsel %vm1252_vm2, 0.0, %v1581_v57  ;;  %1415 = vmatpush.msrb.mxu2 %v1008_v19  ;;  %v1016_v19 = vld [vmem:[%s11343_s2 + $0x18] sm:$0xff]  ;;  %s11353_s21 = sld [smem:[#allocation89_spill]] }
 0x2c8   :  { %1322 = vrot.lane.b32.xlu2 %v1302_v38, %s8660_s7  ;;  %v1060_v38 = vld [vmem:[%s9084_s9 + $0x18] sm:$0xff]  ;;  %s11342_s9 = sld [smem:[#allocation114_spill]] }
 0x2c9   :  { %1306 = vrot.lane.b32.xlu0 %v1298_v36, %s8661_s17  ;;  %1416 = vmatpush.msrb.mxu2 %v1007_v20  ;;  %v1015_v20 = vld [vmem:[%s11343_s2 + $0x10] sm:$0xff]  ;;  %s11356_s3 = sld [smem:[#allocation98_spill]] }
 0x2ca   :  { %1189 = vmatpush.msrb.mxu3 %v1060_v38  ;;  %s11357_s7 = sld [smem:[#allocation93_spill]] }
 0x2cb   :  { %1417 = vmatpush.msrb.mxu2 %v1006_v21  ;;  %s11365_s11 = sld [smem:[#allocation96_spill]] }
 0x2cc   :  { %1318 = vrot.lane.b32.xlu1 %v1292_v33, %s8662_s6  ;;  %1190 = vmatpush.msrb.mxu3 %v1059_v40  ;;  %s11368_s8 = sld [smem:[#allocation102_spill]] }
 0x2ce   :  { %1191 = vmatpush.msrb.mxu3 %v1058_v42 }
 0x2d0   :  { %1326 = vrot.lane.b32.xlu2 %v1296_v31, %s8663_s10  ;;  %1192 = vmatpush.msrb.mxu3 %v1057_v44 }
 0x2d1   :  { %1330 = vrot.lane.b32.xlu0 %v1304_v37, %s8664_s0  ;;  %v1020_v37 = vld [vmem:[%s11341_s25 + $0x18] sm:$0xff]  ;;  %s11361_s0 = sld [smem:[#allocation100_spill]] }
 0x2d2   :  { %1365 = vmatpush.msrb.mxu0 %v1020_v37  ;;  %s11369_s25 = sld [smem:[#allocation101_spill]] }
 0x2d4   :  { %1586 = vrot.lane.b32.xlu1 %v1582_v59, %s8666_s29  ;;  %1366 = vmatpush.msrb.mxu0 %v1019_v39  ;;  %s11367_s29 = sld [smem:[#allocation110_spill]] }
 0x2d6   :  { %1367 = vmatpush.msrb.mxu0 %v1018_v41 }
 0x2d8   :  { %1590 = vrot.lane.b32.xlu2 %v1580_v54, %s8661_s17  ;;  %1368 = vmatpush.msrb.mxu0 %v1017_v43  ;;  %s11358_s17 = sld [smem:[#allocation97_spill]] }
 0x2d9   :  { %1594 = vrot.lane.b32.xlu0 %v1584_v58, %s8665_s18  ;;  %s11366_s18 = sld [smem:[#allocation95_spill]] }
 0x2da   :  { %1487 = vmatpush.msra.mxu0 %v1016_v19 }
 0x2dc   :  { %1488 = vmatpush.msra.mxu0 %v1015_v20 }
 0x322   :  { %v1323_v61 = vpop.permute.xlu2 %1322 }
 0x32a   :  { %v1327_v10 = vpop.permute.xlu2 %1326 }
 0x332   :  { %v1591_v33 = vpop.permute.xlu2 %1590 }
 0x333   :  { %v1311_v60 = vpop.permute.xlu0 %1310 }
 0x336   :  { %v1315_v63 = vpop.permute.xlu1 %1314  ;;  %v1094_v0 = vpop.f32.mrf.mxu0 }
 0x337   :  { %v1095_v1 = vadd.f32 %v7232_v62, %v1094_v0 }
 0x339   :  { %v1097_v3 = vmax.f32 %v1095_v1, 0.0 }
 0x33b   :  { %v1307_v4 = vpop.permute.xlu0 %1306  ;;  %6948 = vmatmul.msk.f32.vlgmr.msra.gmra.mxu3 %vm1101_vm4, %v1097_v3 }
 0x33c   :  { %v1334_v5 = vsel %vm1333_vm3, %v9311_v22, %v1307_v4  ;;  %v1005_v22 = vld [vmem:[#allocation31] sm:$0xff]  ;;  %1441 = vmatpush.msra.mxu3 %v1004_v48 }
 0x33d   :  { %v1336_v7 = vsel %vm1335_vm5, %v1334_v5, %v1311_v60  ;;  %1418 = vmatpush.msrb.mxu2 %v1005_v22  ;;  %v961_v4 = vld [vmem:[#allocation13 + $0x18] sm:$0xff]  ;;  %v7236_v5 = vld [vmem:[#allocation21] ss:$0 sm:$0xff] }
 0x33e   :  { %v1338_v8 = vsel %vm1337_vm6, %v1336_v7, %v1315_v63  ;;  %v1319_v9 = vpop.permute.xlu1 %1318  ;;  %1442 = vmatpush.msra.mxu3 %v1003_v49  ;;  %v960_v7 = vld [vmem:[#allocation13 + $0x10] sm:$0xff]  ;;  %v1014_v22 = vld [vmem:[%s11343_s2 + $0x8] sm:$0xff] }
 0x33f   :  { %v1340_v11 = vsel %vm1339_vm7, %v1338_v8, %v1319_v9  ;;  %v959_v8 = vld [vmem:[#allocation13 + $0x8] sm:$0xff]  ;;  %1489 = vmatpush.msra.mxu0 %v1014_v22 }
 0x340   :  { %v1342_v12 = vsel %vm1341_vm8, %v1340_v11, %v1323_v61  ;;  %1443 = vmatpush.msra.mxu3 %v1002_v51  ;;  %v958_v11 = vld [vmem:[#allocation13] sm:$0xff]  ;;  %vm1198_vm8 = vcmask 17408  }
 0x341   :  { %v1344_v13 = vsel %vm1343_vm9, %v1342_v12, %v1327_v10  ;;  %v7237_v10 = vld [vmem:[%s11342_s9] ss:$0 sm:$0xff]  ;;  %s11370_s9 = sld [smem:[#allocation105_spill]] }
 0x342   :  { %1444 = vmatpush.msra.mxu3 %v1001_v52 }
 0x343   :  { %v1331_v15 = vpop.permute.xlu0 %1330 }
 0x344   :  { %v1346_v16 = vsel %vm1345_vm10, %v1344_v13, %v1331_v15 }
 0x345   :  { %6954 = vmatmul.msk.f32.vlgmr.msra.gmra.mxu1 %vm1101_vm4, %v1346_v16  ;;  %6953 = vmatmul.msk.f32.vlgmr.msrb.gmra.mxu0 %vm1101_vm4, %v1346_v16  ;;  %v7239_v16 = vld [vmem:[#allocation57] ss:$0 sm:$0xff] }
 0x346   :  { %v1587_v31 = vpop.permute.xlu1 %1586 }
 0x347   :  { %v1598_v32 = vsel %vm1597_vm11, %v9336_v55, %v1587_v31 }
 0x348   :  { %v1599_v34 = vsel %vm1333_vm3, %v1598_v32, %v1591_v33  ;;  %v955_v32 = vld [vmem:[#allocation12 + $0x8] sm:$0xff]  ;;  %v954_v33 = vld [vmem:[#allocation12] sm:$0xff] }
 0x34b   :  { %v1595_v35 = vpop.permute.xlu0 %1594 }
 0x34c   :  { %v9360_v36 = vsel %vm1600_vm12, %v1599_v34, %v1595_v35 }
 0x3be   :  { %v1122_v25 = vpop.f32.mrf.mxu3 }
 0x3bf   :  { %v9352_v26 = vadd.f32 %v7233_v23, %v1122_v25  ;;  %v1013_v25 = vld [vmem:[%s11343_s2] sm:$0xff]  ;;  %s11371_s2 = sld [smem:[#allocation109_spill]] }
 0x3c0   :  { %1490 = vmatpush.msra.mxu0 %v1013_v25 }
 0x3c1   :  { %6949 = vmatmul.msk.f32.vlgmr.msra.gmra.mxu2 %vm1101_vm4, %v9352_v26 }
 0x3c2   :  { %v1393_v28 = vpop.f32.mrf.mxu1  ;;  %1646 = vmatpush.msra.mxu2 %v962_v27 }
 0x3c3   :  { %v1394_v29 = vadd.f32 %v7234_v24, %v1393_v28  ;;  %v7240_v24 = vld [vmem:[#allocation19] ss:$0 sm:$0xff]  ;;  %v957_v28 = vld [vmem:[#allocation12 + $0x18] sm:$0xff] }
 0x3c4   :  { %1696 = vmatpush.msrb.mxu0 %v957_v28 }
 0x3c5   :  { %v1396_v30 = vmax.f32 %v1394_v29, 0.0  ;;  %v967_v29 = vld [vmem:[%s11344_s13] sm:$0xff]  ;;  %s11372_s13 = sld [smem:[#allocation104_spill]] }
 0x3c6   :  { %1623 = vmatpush.msrb.mxu1 %v967_v29 }
 0x3c7   :  { %6961 = vmatmul.msk.f32.vlgmr.msrb.gmra.mxu1 %vm1335_vm5, %v9360_v36 }
 0x3c9   :  { %6955 = vmatmul.msk.f32.vlgmr.msrb.gmra.mxu2 %vm1101_vm4, %v1396_v30  ;;  %v956_v30 = vld [vmem:[#allocation12 + $0x10] sm:$0xff] }
 0x3ca   :  { %1697 = vmatpush.msrb.mxu0 %v956_v30 }
 0x3cc   :  { %1698 = vmatpush.msrb.mxu0 %v955_v32 }
 0x3ce   :  { %1699 = vmatpush.msrb.mxu0 %v954_v33  ;;  %v7245_v33 = vld [vmem:[#allocation60] ss:$0 sm:$0xff] }
 0x3d1   :  { %6962 = vmatmul.msk.f32.vlgmr.msra.gmra.mxu2 %vm1335_vm5, %v9360_v36 }
 0x444   :  { %v1148_v46 = vpop.f32.mrf.mxu2 }
 0x445   :  { %v1149_v47 = vadd.f32 %v7235_v45, %v1148_v46 }
 0x447   :  { %v6950_v50 = vmul.f32 -1.442695, %v1149_v47  ;;  %v7241_v47 = vld [vmem:[%s11345_s22] ss:$0 sm:$0xff]  ;;  %s11373_s22 = sld [smem:[#allocation103_spill]] }
 0x449   :  { %7279 = vpow2.f32 %v6950_v50  ;;  %v8667_v50 = vmov 3.0  }
 0x44c   :  { %v1420_v1 = vpop.f32.mrf.mxu2 }
 0x44d   :  { %v1421_v9 = vadd.f32 %v7236_v5, %v1420_v1  ;;  %v965_v1 = vld [vmem:[%s11346_s24 + $0x10] sm:$0xff]  ;;  %v963_v5 = vld [vmem:[%s11346_s24] sm:$0xff] }
 0x44f   :  { %v7280_v53 = vpop.eup %7279 }
 0x450   :  { %v1154_v54 = vadd.f32 1.0, %v7280_v53 }
 0x452   :  { %7281 = vrcp.f32 %v1154_v54  ;;  %v1166_v58 = vand.u32 2147483648, %v1154_v54  ;;  %v1164_v60 = vand.u32 2147483647, %v1154_v54  ;;  %vm1160_vm14 = vweird.f32 %v1154_v54 }
 0x454   :  { %v1167_v62 = vor.u32 1.1754944e-38, %v1166_v58  ;;  %vm1165_vm1 = vcmp.eq.f32.partialorder %v1164_v60, 8.507059e+37  ;;  %v1648_v12 = vpop.f32.mrf.mxu2 }
 0x455   :  { %v1649_v13 = vadd.f32 %v7237_v10, %v1648_v12 }
 0x457   :  { %v1651_v15 = vmax.f32 %v1649_v13, 0.0 }
 0x458   :  { %v7282_v55 = vpop.eup %7281 }
 0x459   :  { %v1156_v56 = vmul.f32 %v7282_v55, %v1154_v54  ;;  %vm1161_vm13 = vweird.f32 %v7282_v55 }
 0x45a   :  { %vm1162_vm15 = vmor %vm1160_vm14, %vm1161_vm13 }
 0x45b   :  { %v1157_v57 = vsub.f32 1.0, %v1156_v56 }
 0x45d   :  { %v1158_v59 = vmul.f32 %v7282_v55, %v1157_v57 }
 0x45f   :  { %v1159_v61 = vadd.f32 %v7282_v55, %v1158_v59 }
 0x461   :  { %v1163_v63 = vsel %vm1162_vm15, %v7282_v55, %v1159_v61 }
 0x462   :  { %v1168_v0 = vsel %vm1165_vm1, %v1167_v62, %v1163_v63  ;;  %v9391_v62 = vpop.f32.mrf.mxu0 }
 0x463   :  { %v1170_v3 = vmul.f32 %v1168_v0, %v9352_v26  ;;  %v966_v0 = vld [vmem:[%s11346_s24 + $0x18] sm:$0xff] }
 0x464   :  { %1742 = vmatpush.msra.mxu1 %v966_v0 }
 0x465   :  { %6951 = vmatmul.msk.f32.vlgmr.msrb.gmra.mxu3 %vm1101_vm4, %v1170_v3  ;;  %v964_v3 = vld [vmem:[%s11346_s24 + $0x8] sm:$0xff]  ;;  %s11374_s24 = sld [smem:[#allocation106_spill]] }
 0x466   :  { %1670 = vmatpush.msrb.mxu3 %v961_v4  ;;  %1743 = vmatpush.msra.mxu1 %v965_v1  ;;  %v7244_v4 = vld [vmem:[%s11347_s19] ss:$0 sm:$0xff]  ;;  %s11375_s19 = sld [smem:[#allocation108_spill]] }
 0x468   :  { %1671 = vmatpush.msrb.mxu3 %v960_v7  ;;  %1744 = vmatpush.msra.mxu1 %v964_v3 }
 0x46a   :  { %1672 = vmatpush.msrb.mxu3 %v959_v8  ;;  %1745 = vmatpush.msra.mxu1 %v963_v5 }
 0x46c   :  { %1673 = vmatpush.msrb.mxu3 %v958_v11 }
 0x46d   :  { %6956 = vmatmul.msk.f32.vlgmr.msra.gmra.mxu3 %vm1101_vm4, %v1421_v9 }
 0x475   :  { %6963 = vmatmul.msk.f32.vlgmr.msrb.gmra.mxu3 %vm1101_vm4, %v1651_v15 }
 0x4e8   :  { %v1194_v17 = vpop.f32.mrf.mxu3 }
 0x4e9   :  { %v1195_v18 = vadd.f32 %v7239_v16, %v1194_v17 }
 0x4eb   :  { %v1197_v21 = vadd.f32 %v1195_v18, %v9295_v6 }
 0x4ed   :  { %v1199_v23 = vsel %vm1198_vm8, %v1197_v21, 0.0 }
 0x4ee   :  { %1200 = vadd.xlane.f32.xlu1 %v1199_v23 }
 0x4f0   :  { %v1446_v26 = vpop.f32.mrf.mxu3 }
 0x4f1   :  { %v1447_v27 = vadd.f32 %v7240_v24, %v1446_v26 }
 0x4f3   :  { %v6957_v31 = vmul.f32 -1.442695, %v1447_v27 }
 0x4f5   :  { %7283 = vpow2.f32 %v6957_v31 }
 0x4f8   :  { %v1675_v48 = vpop.f32.mrf.mxu3 }
 0x4f9   :  { %v1676_v49 = vadd.f32 %v7241_v47, %v1675_v48 }
 0x4fb   :  { %v7284_v34 = vpop.eup %7283 }
 0x4fc   :  { %v1452_v35 = vadd.f32 1.0, %v7284_v34 }
 0x4fe   :  { %7285 = vrcp.f32 %v1452_v35  ;;  %v1464_v39 = vand.u32 2147483648, %v1452_v35  ;;  %vm1458_vm10 = vweird.f32 %v1452_v35  ;;  %v1462_v41 = vand.u32 2147483647, %v1452_v35 }
 0x4ff   :  { %7287 = vrcp.f32 %v8667_v50 }
 0x500   :  { %v1465_v36 = vor.u32 1.1754944e-38, %v1464_v39  ;;  %vm1463_vm13 = vcmp.eq.f32.partialorder %v1462_v41, 8.507059e+37  ;;  %v1625_v41 = vpop.f32.mrf.mxu1 }
 0x504   :  { %v7286_v37 = vpop.eup %7285 }
 0x505   :  { %v1454_v38 = vmul.f32 %v7286_v37, %v1452_v35  ;;  %vm1459_vm11 = vweird.f32 %v7286_v37  ;;  %v7288_v51 = vpop.eup %7287 }
 0x506   :  { %vm1460_vm12 = vmor %vm1458_vm10, %vm1459_vm11  ;;  %v1203_v52 = vmul.f32 3.0, %v7288_v51  ;;  %vm1207_vm14 = vweird.f32 %v7288_v51 }
 0x507   :  { %v1455_v40 = vsub.f32 1.0, %v1454_v38 }
 0x508   :  { %v1204_v53 = vsub.f32 1.0, %v1203_v52  ;;  %v7238_v52 = vld [vmem:[#allocation25] ss:$0 sm:$0xff] }
 0x509   :  { %v1456_v42 = vmul.f32 %v7286_v37, %v1455_v40 }
 0x50a   :  { %v1205_v54 = vmul.f32 %v7288_v51, %v1204_v53 }
 0x50b   :  { %v1457_v43 = vadd.f32 %v7286_v37, %v1456_v42  ;;  %v7243_v42 = vld [vmem:[#allocation7] ss:$0 sm:$0xff] }
 0x50c   :  { %v1206_v55 = vadd.f32 %v7288_v51, %v1205_v54 }
 0x50d   :  { %v1461_v44 = vsel %vm1460_vm12, %v7286_v37, %v1457_v43  ;;  %v7246_v37 = vld [vmem:[#allocation58] ss:$0 sm:$0xff] }
 0x50e   :  { %v1466_v45 = vsel %vm1463_vm13, %v1465_v36, %v1461_v44  ;;  %v1208_v56 = vsel %vm1207_vm14, %v7288_v51, %v1206_v55  ;;  %v7247_v36 = vld [vmem:[#allocation6] ss:$0 sm:$0xff]  ;;  %v1626_v44 = vadd.f32 %v7243_v42, %v1625_v41  ;;  %v7242_v51 = vld [vmem:[#allocation24] ss:$0 sm:$0xff] }
 0x50f   :  { %v1468_v46 = vmul.f32 %v1466_v45, %v1421_v9 }
 0x511   :  { %6958 = vmatmul.msk.f32.vlgmr.msra.gmra.mxu0 %vm1101_vm4, %v1468_v46 }
 0x519   :  { %6964 = vmatmul.msk.f32.vlgmr.msrb.gmra.mxu0 %vm1101_vm4, %v1676_v49 }
 0x561   :  { %v1201_v57 = vpop.xlane.xlu1 %1200 }
 0x562   :  { %v1209_v58 = vmul.f32 %v1208_v56, %v1201_v57 }
 0x564   :  { %v1210_v59 = vsub.f32 %v1197_v21, %v1209_v58 }
 0x566   :  { %v1211_v60 = vmul.f32 %v1210_v59, %v1210_v59 }
 0x568   :  { %v1212_v61 = vsel %vm1198_vm8, %v1211_v60, 0.0 }
 0x569   :  { %1213 = vadd.xlane.f32.xlu2 %v1212_v61 }
 0x58e   :  { %v9393_v63 = vpop.f32.mrf.mxu0 }
 0x58f   :  { %v1493_v54 = vadd.f32 %v7242_v51, %v9393_v63 }
 0x596   :  { %v1701_v7 = vpop.f32.mrf.mxu0 }
 0x597   :  { %v1702_v8 = vadd.f32 %v7244_v4, %v1701_v7 }
 0x599   :  { %v6965_v9 = vmul.f32 -1.442695, %v1702_v8 }
 0x59b   :  { %7289 = vpow2.f32 %v6965_v9  ;;  %v8669_v9 = vmov 4.0  }
 0x5a1   :  { %v7290_v10 = vpop.eup %7289 }
 0x5a2   :  { %v1707_v11 = vadd.f32 1.0, %v7290_v10 }
 0x5a4   :  { %7291 = vrcp.f32 %v1707_v11  ;;  %v1719_v15 = vand.u32 2147483648, %v1707_v11  ;;  %vm1713_vm15 = vweird.f32 %v1707_v11  ;;  %v1717_v17 = vand.u32 2147483647, %v1707_v11 }
 0x5a6   :  { %v1720_v19 = vor.u32 1.1754944e-38, %v1719_v15  ;;  %vm1718_vm11 = vcmp.eq.f32.partialorder %v1717_v17, 8.507059e+37 }
 0x5aa   :  { %v7292_v12 = vpop.eup %7291 }
 0x5ab   :  { %v1709_v13 = vmul.f32 %v7292_v12, %v1707_v11  ;;  %vm1714_vm1 = vweird.f32 %v7292_v12 }
 0x5ac   :  { %vm1715_vm10 = vmor %vm1713_vm15, %vm1714_vm1  ;;  %vm1751_vm15 = vcmask 9216   ;;  %vm1496_vm1 = vcmask 25600  }
 0x5ad   :  { %v1710_v16 = vsub.f32 1.0, %v1709_v13 }
 0x5af   :  { %v1711_v18 = vmul.f32 %v7292_v12, %v1710_v16 }
 0x5b1   :  { %v1712_v20 = vadd.f32 %v7292_v12, %v1711_v18 }
 0x5b3   :  { %v1716_v21 = vsel %vm1715_vm10, %v7292_v12, %v1712_v20 }
 0x5b4   :  { %v1721_v22 = vsel %vm1718_vm11, %v1720_v19, %v1716_v21 }
 0x5b5   :  { %v1723_v23 = vmul.f32 %v1721_v22, %v1676_v49 }
 0x5b7   :  { %6966 = vmatmul.msk.f32.vlgmr.msra.gmra.mxu1 %vm1101_vm4, %v1723_v23 }
 0x5dc   :  { %v1214_v24 = vpop.xlane.xlu2 %1213 }
 0x5dd   :  { %v1215_v25 = vmul.f32 %v1214_v24, %v1208_v56  ;;  %v1371_v56 = vadd.f32 %v7238_v52, %v9391_v62 }
 0x5df   :  { %v1216_v26 = vadd.f32 1e-05, %v1215_v25  ;;  %v1495_v57 = vadd.f32 %v1493_v54, %v1371_v56 }
 0x5e1   :  { %7293 = vrsqrt.f32 %v1216_v26  ;;  %vm1223_vm13 = vweird.f32 %v1216_v26  ;;  %v1497_v58 = vsel %vm1496_vm1, %v1495_v57, 0.0 }
 0x5e7   :  { %v7294_v27 = vpop.eup %7293 }
 0x5e8   :  { %v1218_v28 = vmul.f32 %v7294_v27, %v1216_v26  ;;  %vm1224_vm12 = vweird.f32 %v7294_v27 }
 0x5e9   :  { %vm1225_vm14 = vmor %vm1223_vm13, %vm1224_vm12 }
 0x5ea   :  { %v1219_v29 = vmul.f32 %v7294_v27, %v1218_v28 }
 0x5ec   :  { %v1220_v30 = vmul.f32 0.5, %v1219_v29 }
 0x5ee   :  { %v1221_v31 = vsub.f32 1.5, %v1220_v30 }
 0x5f0   :  { %v1222_v32 = vmul.f32 %v7294_v27, %v1221_v31 }
 0x5f2   :  { %v1226_v34 = vsel %vm1225_vm14, %v7294_v27, %v1222_v32 }
 0x5f3   :  { %v1227_v35 = vmul.f32 %v1226_v34, %v1210_v59  ;;  %v8668_v59 = vmov 2.0  }
 0x5f5   :  { %v1231_v38 = vmul.f32 %v7245_v33, %v1227_v35 }
 0x5f7   :  { %v1235_v39 = vadd.f32 %v7246_v37, %v1231_v38 }
 0x5f9   :  { %v1236_v40 = vsel %vm1198_vm8, %v1235_v39, -inf }
 0x5fa   :  { %1237 = vmax.xlane.f32.xlu0 %v1236_v40 }
 0x634   :  { %v1747_v43 = vpop.f32.mrf.mxu1 }
 0x635   :  { %v1748_v45 = vadd.f32 %v7247_v36, %v1747_v43  ;;  %v1035_v36 = vld [vmem:[#allocation46 + $0x18] sm:$0xff]  ;;  %v1034_v43 = vld [vmem:[#allocation46 + $0x10] sm:$0xff] }
 0x636   :  { %1850 = vmatpush.msrb.mxu2 %v1035_v36 }
 0x637   :  { %v1750_v46 = vadd.f32 %v1748_v45, %v1626_v44  ;;  %v1033_v44 = vld [vmem:[#allocation46 + $0x8] sm:$0xff]  ;;  %v1032_v45 = vld [vmem:[#allocation46] sm:$0xff] }
 0x638   :  { %1851 = vmatpush.msrb.mxu2 %v1034_v43 }
 0x639   :  { %v1752_v47 = vsel %vm1751_vm15, %v1750_v46, 0.0 }
 0x63a   :  { %1753 = vadd.xlane.f32.xlu0 %v1752_v47  ;;  %1852 = vmatpush.msrb.mxu2 %v1033_v44  ;;  %v7252_v47 = vld [vmem:[#allocation37] ss:$0 sm:$0xff] }
 0x63c   :  { %1853 = vmatpush.msrb.mxu2 %v1032_v45 }
 0x66d   :  { %v1238_v48 = vpop.xlane.xlu0 %1237 }
 0x66e   :  { %v1239_v49 = vsub.f32 %v1235_v39, %v1238_v48  ;;  %v7249_v39 = vld [vmem:[#allocation9] ss:$0 sm:$0xff] }
 0x670   :  { %v1240_v50 = vmul.f32 1.442695, %v1239_v49 }
 0x672   :  { %7295 = vpow2.f32 %v1240_v50 }
 0x673   :  { %7297 = vrcp.f32 %v8668_v59 }
 0x674   :  { %7299 = vrcp.f32 %v8669_v9 }
 0x678   :  { %v7296_v53 = vpop.eup %7295 }
 0x679   :  { %v1242_v55 = vsel %vm1198_vm8, %v7296_v53, 0.0  ;;  %v7298_v60 = vpop.eup %7297 }
 0x67a   :  { %1243 = vadd.xlane.f32.xlu2 %v1242_v55  ;;  %v1756_v61 = vmul.f32 2.0, %v7298_v60  ;;  %vm1760_vm10 = vweird.f32 %v7298_v60  ;;  %v7300_v10 = vpop.eup %7299 }
 0x67b   :  { %v1501_v11 = vmul.f32 4.0, %v7300_v10  ;;  %vm1505_vm11 = vweird.f32 %v7300_v10 }
 0x67c   :  { %v1757_v0 = vsub.f32 1.0, %v1756_v61  ;;  %v7253_v61 = vld [vmem:[#allocation28] ss:$0 sm:$0xff] }
 0x67d   :  { %v1502_v12 = vsub.f32 1.0, %v1501_v11 }
 0x67e   :  { %v1758_v1 = vmul.f32 %v7298_v60, %v1757_v0 }
 0x67f   :  { %v1503_v13 = vmul.f32 %v7300_v10, %v1502_v12 }
 0x680   :  { %v1759_v3 = vadd.f32 %v7298_v60, %v1758_v1 }
 0x681   :  { %v1504_v16 = vadd.f32 %v7300_v10, %v1503_v13  ;;  %v1029_v13 = vld [vmem:[#allocation45 + $0x8] sm:$0xff] }
 0x682   :  { %1498 = vadd.xlane.f32.xlu2 %v1497_v58  ;;  %v1761_v4 = vsel %vm1760_vm10, %v7298_v60, %v1759_v3  ;;  %v7254_v3 = vld [vmem:[#allocation27] ss:$0 sm:$0xff] }
 0x683   :  { %v1506_v17 = vsel %vm1505_vm11, %v7300_v10, %v1504_v16  ;;  %v7255_v16 = vld [vmem:[#allocation36] ss:$0 sm:$0xff] }
 0x6ad   :  { %v1754_v63 = vpop.xlane.xlu0 %1753 }
 0x6ae   :  { %v1762_v5 = vmul.f32 %v1761_v4, %v1754_v63 }
 0x6b0   :  { %v1763_v7 = vsub.f32 %v1750_v46, %v1762_v5  ;;  %v7251_v46 = vld [vmem:[#allocation48] ss:$0 sm:$0xff] }
 0x6b2   :  { %v1764_v8 = vmul.f32 %v1763_v7, %v1763_v7 }
 0x6b4   :  { %v1765_v62 = vsel %vm1751_vm15, %v1764_v8, 0.0  ;;  %v1030_v8 = vld [vmem:[#allocation45 + $0x10] sm:$0xff] }
 0x6b5   :  { %1766 = vadd.xlane.f32.xlu2 %v1765_v62 }
 0x6ed   :  { %v1244_v15 = vpop.xlane.xlu2 %1243 }
 0x6ee   :  { %7301 = vrcp.f32 %v1244_v15  ;;  %v1028_v15 = vld [vmem:[#allocation45] sm:$0xff] }
 0x6f4   :  { %v7302_v18 = vpop.eup %7301 }
 0x6f5   :  { %v1499_v19 = vpop.xlane.xlu2 %1498  ;;  %v1246_v20 = vmul.f32 %v7302_v18, %v7296_v53 }
 0x6f6   :  { %v1507_v21 = vmul.f32 %v1506_v17, %v1499_v19 }
 0x6f7   :  { %v1247_v22 = vmul.f32 %v1246_v20, %v9295_v6  ;;  %v7248_v6 = vld [vmem:[#allocation10] ss:$0 sm:$0xff] }
 0x6f8   :  { %v1508_v23 = vsub.f32 %v1495_v57, %v1507_v21 }
 0x6f9   :  { %v1248_v24 = vsel %vm1198_vm8, %v1247_v22, 0.0 }
 0x6fa   :  { %1249 = vadd.xlane.f32.xlu1 %v1248_v24  ;;  %v1509_v25 = vmul.f32 %v1508_v23, %v1508_v23 }
 0x6fc   :  { %v1510_v26 = vsel %vm1496_vm1, %v1509_v25, 0.0 }
 0x702   :  { %1511 = vadd.xlane.f32.xlu1 %v1510_v26 }
 0x728   :  { %v1767_v27 = vpop.xlane.xlu2 %1766 }
 0x729   :  { %v1768_v28 = vmul.f32 %v1767_v27, %v1761_v4 }
 0x72b   :  { %v1769_v29 = vadd.f32 1e-05, %v1768_v28  ;;  %v1065_v28 = vld [vmem:[%s11338_s20 + $0x4] sm:$0xf] }
 0x72d   :  { %7303 = vrsqrt.f32 %v1769_v29  ;;  %vm1776_vm13 = vweird.f32 %v1769_v29 }
 0x733   :  { %v7304_v30 = vpop.eup %7303 }
 0x734   :  { %v1771_v31 = vmul.f32 %v7304_v30, %v1769_v29  ;;  %vm1777_vm12 = vweird.f32 %v7304_v30 }
 0x735   :  { %vm1778_vm14 = vmor %vm1776_vm13, %vm1777_vm12 }
 0x736   :  { %v1772_v32 = vmul.f32 %v7304_v30, %v1771_v31 }
 0x738   :  { %v1773_v33 = vmul.f32 0.5, %v1772_v32  ;;  %v1040_v32 = vld [vmem:[#allocation49 + $0x18] sm:$0xff] }
 0x739   :  { %1922 = vmatpush.msra.mxu0 %v1040_v32 }
 0x73a   :  { %v1774_v34 = vsub.f32 1.5, %v1773_v33  ;;  %v1039_v33 = vld [vmem:[#allocation49 + $0x10] sm:$0xff] }
 0x73b   :  { %1923 = vmatpush.msra.mxu0 %v1039_v33 }
 0x73c   :  { %v1775_v35 = vmul.f32 %v7304_v30, %v1774_v34  ;;  %v1038_v34 = vld [vmem:[#allocation49 + $0x8] sm:$0xff] }
 0x73d   :  { %1924 = vmatpush.msra.mxu0 %v1038_v34 }
 0x73e   :  { %v1779_v37 = vsel %vm1778_vm14, %v7304_v30, %v1775_v35  ;;  %v7256_v35 = vld [vmem:[#allocation34] ss:$0 sm:$0xff] }
 0x73f   :  { %v1780_v38 = vmul.f32 %v1779_v37, %v1763_v7  ;;  %v1031_v7 = vld [vmem:[#allocation45 + $0x18] sm:$0xff] }
 0x740   :  { %1876 = vmatpush.msra.mxu3 %v1031_v7  ;;  %v7258_v7 = vld [vmem:[#allocation40] ss:$0 sm:$0xff] }
 0x741   :  { %v1784_v40 = vmul.f32 %v7248_v6, %v1780_v38  ;;  %v1037_v6 = vld [vmem:[#allocation49] sm:$0xff] }
 0x742   :  { %1877 = vmatpush.msra.mxu3 %v1030_v8  ;;  %1925 = vmatpush.msra.mxu0 %v1037_v6  ;;  %v976_v6 = vld [vmem:[#allocation16 + $0x18] sm:$0xff] }
 0x743   :  { %v1788_v41 = vadd.f32 %v7249_v39, %v1784_v40  ;;  %2037 = vmatpush.msrb.mxu1 %v976_v6 }
 0x744   :  { %1878 = vmatpush.msra.mxu3 %v1029_v13 }
 0x745   :  { %v1789_v42 = vsel %vm1751_vm15, %v1788_v41, -inf }
 0x746   :  { %1790 = vmax.xlane.f32.xlu1 %v1789_v42  ;;  %1879 = vmatpush.msra.mxu3 %v1028_v15  ;;  %v7532_v15 = vld [vmem:[%s11337_s15 + $0x8] sm:$0xff] }
 0x76d   :  { %v9412_v48 = vpop.xlane.xlu1 %1249 }
 0x76e   :  { %v1826_v49 = vmul.f32 %v7251_v46, %v9412_v48 }
 0x770   :  { %v1830_v50 = vadd.f32 %v7252_v47, %v1826_v49  ;;  %v7531_v47 = vld [vmem:[%s11337_s15] sm:$0xff]  ;;  %s11355_s15 = sld [smem:[#allocation87_spill]] }
 0x772   :  { %v1831_v51 = vmax.f32 %v1830_v50, 0.0 }
 0x774   :  { %6967 = vmatmul.msk.f32.vlgmr.msrb.gmra.mxu2 %vm1101_vm4, %v1831_v51 }
 0x775   :  { %v1512_v52 = vpop.xlane.xlu1 %1511 }
 0x776   :  { %v1513_v53 = vmul.f32 %v1512_v52, %v1506_v17 }
 0x778   :  { %v1514_v54 = vadd.f32 1e-05, %v1513_v53 }
 0x77a   :  { %7305 = vrsqrt.f32 %v1514_v54  ;;  %vm1521_vm10 = vweird.f32 %v1514_v54 }
 0x780   :  { %v7306_v55 = vpop.eup %7305 }
 0x781   :  { %v1516_v56 = vmul.f32 %v7306_v55, %v1514_v54  ;;  %vm1522_vm8 = vweird.f32 %v7306_v55  ;;  %v1064_v54 = vld [vmem:[%s11338_s20] sm:$0xf]  ;;  %s11362_s20 = sld [smem:[#allocation94_spill]] }
 0x782   :  { %vm1523_vm11 = vmor %vm1521_vm10, %vm1522_vm8  ;;  %vm1931_vm8 = vcmask 254976  }
 0x783   :  { %v1517_v57 = vmul.f32 %v7306_v55, %v1516_v56 }
 0x785   :  { %v1518_v58 = vmul.f32 0.5, %v1517_v57 }
 0x787   :  { %v1519_v59 = vsub.f32 1.5, %v1518_v58 }
 0x789   :  { %v1520_v60 = vmul.f32 %v7306_v55, %v1519_v59 }
 0x78b   :  { %v1524_v0 = vsel %vm1523_vm11, %v7306_v55, %v1520_v60 }
 0x78c   :  { %v1525_v1 = vmul.f32 %v1524_v0, %v1508_v23 }
 0x78e   :  { %v1529_v4 = vmul.f32 %v7253_v61, %v1525_v1 }
 0x790   :  { %v1533_v63 = vadd.f32 %v7254_v3, %v1529_v4  ;;  %v8670_v3 = vmov 0   ;;  %v7250_v4 = vld [vmem:[#allocation51] ss:$0 sm:$0xff] }
 0x791   :  { %7230 = vset.pattern.permute.xlu1 %v8670_v3  ;;  %7231 = vset.pattern.permute.xlu2 %v8670_v3 }
 0x792   :  { %v1534_v5 = vsel %vm1496_vm1, %v1533_v63, -inf  ;;  %7229 = vset.pattern.permute.xlu0 %v8670_v3 }
 0x793   :  { %1535 = vmax.xlane.f32.xlu0 %v1534_v5  ;;  %v7257_v5 = vld [vmem:[#allocation39] ss:$0 sm:$0xff] }
 0x7b9   :  { %v1791_v62 = vpop.xlane.xlu1 %1790 }
 0x7ba   :  { %v1792_v9 = vsub.f32 %v1788_v41, %v1791_v62 }
 0x7bc   :  { %v1793_v10 = vmul.f32 1.442695, %v1792_v9 }
 0x7be   :  { %7307 = vpow2.f32 %v1793_v10 }
 0x7c4   :  { %v7308_v11 = vpop.eup %7307 }
 0x7c5   :  { %v1795_v12 = vsel %vm1751_vm15, %v7308_v11, 0.0  ;;  %vm1808_vm15 = vcmask 11264  }
 0x7c6   :  { %1796 = vadd.xlane.f32.xlu0 %v1795_v12 }
 0x7f7   :  { %v1855_v17 = vpop.f32.mrf.mxu2 }
 0x7f8   :  { %v1856_v18 = vadd.f32 %v7255_v16, %v1855_v17 }
 0x7fa   :  { %6968 = vmatmul.msk.f32.vlgmr.msra.gmra.mxu3 %vm1101_vm4, %v1856_v18 }
 0x806   :  { %v1536_v19 = vpop.xlane.xlu0 %1535 }
 0x807   :  { %v1537_v20 = vsub.f32 %v1533_v63, %v1536_v19  ;;  %v1818_v63 = vmul.f32 %v7250_v4, %v9412_v48  ;;  %v8671_v48 = vmov 32.0  }
 0x809   :  { %v1538_v21 = vmul.f32 1.442695, %v1537_v20  ;;  %v1822_v9 = vadd.f32 %v7258_v7, %v1818_v63 }
 0x80b   :  { %7309 = vpow2.f32 %v1538_v21 }
 0x811   :  { %v7310_v22 = vpop.eup %7309 }
 0x812   :  { %v1540_v23 = vsel %vm1496_vm1, %v7310_v22, 0.0 }
 0x813   :  { %1541 = vadd.xlane.f32.xlu2 %v1540_v23 }
 0x839   :  { %v1797_v24 = vpop.xlane.xlu0 %1796 }
 0x83a   :  { %7311 = vrcp.f32 %v1797_v24 }
 0x840   :  { %v7312_v25 = vpop.eup %7311 }
 0x841   :  { %v1799_v26 = vmul.f32 %v7312_v25, %v7308_v11 }
 0x843   :  { %v1801_v27 = vrot.slane %v1799_v26, 1  ;;  %v1802_v52 = vperm.slane %v1799_v26, 0 }
 0x845   :  { %v1803_v29 = vperm.slane %v1801_v27, 0  ;;  %v1806_v57 = vmul.f32 %v1802_v52, %v1064_v54 }
 0x847   :  { %v1807_v30 = vmul.f32 %v1803_v29, %v1065_v28  ;;  %v1809_v0 = vsel %vm1808_vm15, %v1806_v57, 0.0 }
 0x849   :  { %v9422_v31 = vsel %vm1808_vm15, %v1807_v30, 0.0 }
 0x87d   :  { %v1881_v37 = vpop.f32.mrf.mxu3 }
 0x87e   :  { %v1882_v38 = vadd.f32 %v7256_v35, %v1881_v37  ;;  %v975_v37 = vld [vmem:[#allocation16 + $0x10] sm:$0xff] }
 0x87f   :  { %2038 = vmatpush.msrb.mxu1 %v975_v37 }
 0x880   :  { %v6969_v39 = vmul.f32 -1.442695, %v1882_v38  ;;  %v974_v38 = vld [vmem:[#allocation16 + $0x8] sm:$0xff] }
 0x881   :  { %2039 = vmatpush.msrb.mxu1 %v974_v38 }
 0x882   :  { %7313 = vpow2.f32 %v6969_v39  ;;  %v973_v39 = vld [vmem:[#allocation16] sm:$0xff] }
 0x883   :  { %2040 = vmatpush.msrb.mxu1 %v973_v39 }
 0x886   :  { %v1542_v40 = vpop.xlane.xlu2 %1541 }
 0x887   :  { %7315 = vrcp.f32 %v1542_v40 }
 0x888   :  { %v7314_v41 = vpop.eup %7313 }
 0x889   :  { %v1887_v42 = vadd.f32 1.0, %v7314_v41 }
 0x88b   :  { %7317 = vrcp.f32 %v1887_v42  ;;  %v1899_v53 = vand.u32 2147483648, %v1887_v42  ;;  %v1897_v56 = vand.u32 2147483647, %v1887_v42  ;;  %vm1893_vm12 = vweird.f32 %v1887_v42 }
 0x88c   :  { %7319 = vrcp.f32 %v8671_v48 }
 0x88d   :  { %v7316_v36 = vpop.eup %7315  ;;  %v1900_v59 = vor.u32 1.1754944e-38, %v1899_v53  ;;  %vm1898_vm14 = vcmp.eq.f32.partialorder %v1897_v56, 8.507059e+37  ;;  %v7260_v53 = vld [vmem:[#allocation42] ss:$0 sm:$0xff] }
 0x88e   :  { %v1544_v43 = vmul.f32 %v7316_v36, %v7310_v22 }
 0x890   :  { %v1547_v44 = vperm.slane %v1544_v43, 0  ;;  %v1546_v10 = vrot.slane %v1544_v43, 1 }
 0x891   :  { %v7318_v45 = vpop.eup %7317 }
 0x892   :  { %v1889_v46 = vmul.f32 %v7318_v45, %v1887_v42  ;;  %v1551_v49 = vmul.f32 %v7531_v47, %v1547_v44  ;;  %vm1894_vm1 = vweird.f32 %v7318_v45  ;;  %v1548_v13 = vperm.slane %v1546_v10, 0  ;;  %v7320_v20 = vpop.eup %7319  ;;  %v9439_v42 = vld [vmem:[%s11348_s26 + $0x18] sm:$0xff]  ;;  %v9450_v47 = vld [vmem:[%s11348_s26 + $0x8] sm:$0xff] }
 0x893   :  { %vm1895_vm13 = vmor %vm1893_vm12, %vm1894_vm1  ;;  %v1936_v21 = vmul.f32 32.0, %v7320_v20  ;;  %vm1940_vm10 = vweird.f32 %v7320_v20  ;;  %2158 = vmatpush.msra.mxu2 %v9439_v42  ;;  %2223 = vmatpush.msrb.mxu3 %v9439_v42 }
 0x894   :  { %v1890_v50 = vsub.f32 1.0, %v1889_v46  ;;  %v1553_v51 = vsel %vm1333_vm3, %v1551_v49, 0.0  ;;  %v1552_v16 = vmul.f32 %v7532_v15, %v1548_v13  ;;  %2288 = vmatpush.msrb.mxu0 %v9439_v42  ;;  %2743 = vmatpush.msra.mxu1 %v9439_v42  ;;  %v7259_v49 = vld [vmem:[#allocation43] ss:$0 sm:$0xff] }
 0x895   :  { %1554 = vadd.xlane.f32.xlu2 %v1553_v51  ;;  %v1937_v22 = vsub.f32 1.0, %v1936_v21 }
 0x896   :  { %v1891_v55 = vmul.f32 %v7318_v45, %v1890_v50  ;;  %v1556_v17 = vsel %vm1333_vm3, %v1552_v16, 0.0  ;;  %v9454_v50 = vld [vmem:[%s11348_s26] sm:$0xff] }
 0x897   :  { %v1938_v23 = vmul.f32 %v7320_v20, %v1937_v22 }
 0x898   :  { %v1892_v58 = vadd.f32 %v7318_v45, %v1891_v55  ;;  %v8672_v55 = vmov 0.0  }
 0x899   :  { %v1939_v24 = vadd.f32 %v7320_v20, %v1938_v23 }
 0x89a   :  { %v1896_v60 = vsel %vm1895_vm13, %v7318_v45, %v1892_v58  ;;  %v9446_v45 = vld [vmem:[%s11348_s26 + $0x10] sm:$0xff]  ;;  %s11376_s26 = sld [smem:[#allocation107_spill]] }
 0x89b   :  { %v1901_v61 = vsel %vm1898_vm14, %v1900_v59, %v1896_v60  ;;  %v9433_v25 = vsel %vm1940_vm10, %v7320_v20, %v1939_v24  ;;  %2159 = vmatpush.msra.mxu2 %v9446_v45  ;;  %2224 = vmatpush.msrb.mxu3 %v9446_v45 }
 0x89c   :  { %v1903_v1 = vmul.f32 %v1901_v61, %v1856_v18  ;;  %2289 = vmatpush.msrb.mxu0 %v9446_v45  ;;  %2744 = vmatpush.msra.mxu1 %v9446_v45 }
 0x89d   :  { %1810 = vadd.xlane.f32.xlu2 %v1809_v0  ;;  %2160 = vmatpush.msra.mxu2 %v9450_v47 }
 0x89e   :  { %6970 = vmatmul.msk.f32.vlgmr.msra.gmra.mxu0 %vm1101_vm4, %v1903_v1  ;;  %2225 = vmatpush.msrb.mxu3 %v9450_v47 }
 0x89f   :  { %2290 = vmatpush.msrb.mxu0 %v9450_v47  ;;  %2745 = vmatpush.msra.mxu1 %v9450_v47 }
 0x8a0   :  { %2161 = vmatpush.msra.mxu2 %v9454_v50  ;;  %2226 = vmatpush.msrb.mxu3 %v9454_v50 }
 0x8a1   :  { %2162 = vmatmul.f32.vlgmr.msra.gmra.mxu2 %v8672_v55  ;;  %2291 = vmatpush.msrb.mxu0 %v9454_v50 }
 0x8a2   :  { %2353 = vmatpush.msrb.mxu2 %v9439_v42  ;;  %2418 = vmatpush.msra.mxu3 %v9439_v42 }
 0x8a3   :  { %2483 = vmatpush.msra.mxu0 %v9439_v42  ;;  %2746 = vmatpush.msra.mxu1 %v9454_v50 }
 0x8a4   :  { %2354 = vmatpush.msrb.mxu2 %v9446_v45  ;;  %2419 = vmatpush.msra.mxu3 %v9446_v45 }
 0x8a5   :  { %2484 = vmatpush.msra.mxu0 %v9446_v45 }
 0x8a6   :  { %2355 = vmatpush.msrb.mxu2 %v9450_v47  ;;  %2420 = vmatpush.msra.mxu3 %v9450_v47 }
 0x8a7   :  { %2485 = vmatpush.msra.mxu0 %v9450_v47 }
 0x8a8   :  { %2356 = vmatpush.msrb.mxu2 %v9454_v50  ;;  %2421 = vmatpush.msra.mxu3 %v9454_v50 }
 0x8a9   :  { %2486 = vmatpush.msra.mxu0 %v9454_v50 }
 0x8aa   :  { %2548 = vmatpush.msra.mxu2 %v9439_v42 }
 0x8ac   :  { %2549 = vmatpush.msra.mxu2 %v9446_v45 }
 0x8ae   :  { %2550 = vmatpush.msra.mxu2 %v9450_v47 }
 0x8b0   :  { %2551 = vmatpush.msra.mxu2 %v9454_v50 }
 0x908   :  { %v1555_v18 = vpop.xlane.xlu2 %1554 }
 0x910   :  { %v1811_v19 = vpop.xlane.xlu2 %1810 }
 0x91b   :  { %v1927_v8 = vpop.f32.mrf.mxu0 }
 0x91c   :  { %v1928_v62 = vadd.f32 %v7257_v5, %v1927_v8 }
 0x91e   :  { %v1930_v11 = vadd.f32 %v1928_v62, %v1822_v9  ;;  %v9489_v9 = vld [vmem:[#allocation15] ss:$0 sm:$0xff] }
 0x920   :  { %v1932_v12 = vsel %vm1931_vm8, %v1930_v11, 0.0 }
 0x921   :  { %1933 = vadd.xlane.f32.xlu1 %v1932_v12 }
 0x924   :  { %v2163_v20 = vpop.f32.mrf.mxu2 }
 0x929   :  { %1557 = vadd.xlane.f32.xlu1 %v1556_v17 }
 0x942   :  { %1978 = vperm.xlu1 %7230, %v1811_v19  }
 0x994   :  { %v1934_v26 = vpop.xlane.xlu1 %1933 }
 0x995   :  { %v1942_v27 = vmul.f32 %v9433_v25, %v1934_v26 }
 0x997   :  { %v1943_v28 = vsub.f32 %v1930_v11, %v1942_v27 }
 0x999   :  { %v1944_v29 = vmul.f32 %v1943_v28, %v1943_v28 }
 0x99b   :  { %v1945_v30 = vsel %vm1931_vm8, %v1944_v29, 0.0  ;;  %vm2920_vm8 = vcmask 1040384  }
 0x99c   :  { %1946 = vadd.xlane.f32.xlu0 %v1945_v30  ;;  %v1558_v32 = vpop.xlane.xlu1 %1557 }
 0x99d   :  { %1983 = vperm.xlu2 %7231, %v1558_v32  }
 0x9b0   :  { %1973 = vperm.xlu0 %7229, %v1555_v18  }
 0x9b4   :  { %v1979_v59 = vpop.permute.xlu1 %1978 }
 0x9f7   :  { %v1984_v3 = vpop.permute.xlu2 %1983 }
 0xa0f   :  { %v1947_v33 = vpop.xlane.xlu0 %1946 }
 0xa10   :  { %v1948_v34 = vmul.f32 %v1947_v33, %v9433_v25 }
 0xa12   :  { %v1949_v35 = vadd.f32 1e-05, %v1948_v34 }
 0xa14   :  { %7321 = vrsqrt.f32 %v1949_v35  ;;  %vm1956_vm11 = vweird.f32 %v1949_v35 }
 0xa1a   :  { %v7322_v40 = vpop.eup %7321 }
 0xa1b   :  { %v1951_v41 = vmul.f32 %v7322_v40, %v1949_v35  ;;  %vm1957_vm3 = vweird.f32 %v7322_v40 }
 0xa1c   :  { %vm1958_vm15 = vmor %vm1956_vm11, %vm1957_vm3 }
 0xa1d   :  { %v1952_v36 = vmul.f32 %v7322_v40, %v1951_v41 }
 0xa1f   :  { %v1953_v43 = vmul.f32 0.5, %v1952_v36 }
 0xa21   :  { %v1954_v44 = vsub.f32 1.5, %v1953_v43 }
 0xa22   :  { %v1974_v60 = vpop.permute.xlu0 %1973 }
 0xa23   :  { %v1955_v46 = vmul.f32 %v7322_v40, %v1954_v44 }
 0xa25   :  { %v1959_v51 = vsel %vm1958_vm15, %v7322_v40, %v1955_v46 }
 0xa26   :  { %v1960_v52 = vmul.f32 %v1959_v51, %v1943_v28 }
 0xa28   :  { %v1964_v54 = vmul.f32 %v7259_v49, %v1960_v52 }
 0xa2a   :  { %v1968_v56 = vadd.f32 %v7260_v53, %v1964_v54 }
 0xa2c   :  { %v1970_v57 = vrot.slane %v1968_v56, 1  ;;  %v1991_v58 = vperm.slane %v1968_v56, 0 }
 0xa2e   :  { %v9474_v61 = vperm.slane %v1970_v57, 0  ;;  %v1996_v0 = vadd.f32 %v1991_v58, %v1979_v59  ;;  %v1995_v1 = vadd.f32 %v1991_v58, %v1974_v60 }
 0xa30   :  { %v1997_v4 = vadd.f32 %v9474_v61, %v1984_v3  ;;  %2009 = vst [vmem:[#allocation1 + $0x10] ss:$2 sm:$0xff] %v1996_v0  ;;  %v2003_v63 = vrot.slane %v1995_v1, 4 }
 0xa31   :  { %2005 = vst [vmem:[#allocation1] ss:$2 sm:$0xff] %v1995_v1 }
 0xa32   :  { %v2004_v5 = vrot.slane %v1997_v4, 4  ;;  %2011 = vst [vmem:[#allocation1 + $0x11] ss:$2 sm:$0xff] %v1997_v4 }
 0xa33   :  { %2007 = vst [vmem:[#allocation1 + $0x1] ss:$2 sm:$0xff] %v2003_v63 }
 0xa34   :  { %2013 = vst [vmem:[#allocation1 + $0x20] ss:$2 sm:$0xff] %v2004_v5 }
 0xa39   :  { %v2017_v8 = vld.sshfl [vmem:[#allocation1 + $0x10] sm:$0xff pattern:$0x75316420] }
 0xa3a   :  { %v2016_v7 = vld.sshfl [vmem:[#allocation1] sm:$0xff pattern:$0x75316420] }
 0xa3b   :  { %6971 = vmatmul.msk.f32.vlgmr.msrb.gmra.mxu1 %vm1101_vm4, %v2016_v7 }
 0xa43   :  { %6972 = vmatmul.msk.f32.gmra.mxu1 %vm1101_vm4, %v2017_v8 }
 0xab8   :  { %v9487_v62 = vpop.f32.mrf.mxu1 }
 0xab9   :  { %v2065_v10 = vadd.f32 %v9489_v9, %v9487_v62 }
 0xabb   :  { %v2069_v12 = vperm.slane %v2065_v10, %v9291_v2 }
 0xabd   :  { %v2077_v16 = vrot.slane %v2069_v12, 4 }
 0xac0   :  { %v9493_v11 = vpop.f32.mrf.mxu1 }
 0xac1   :  { %v2055_v13 = vrot.slane %v9493_v11, 4 }
 0xac3   :  { %v2070_v15 = vadd.f32 %v9489_v9, %v2055_v13 }
 0xac5   :  { %v2074_v17 = vperm.slane %v2070_v15, %v9291_v2 }
 0xac7   :  { %v2075_v18 = vrot.slane %v2074_v17, 4  ;;  %v9500_v19 = vsel %vm1252_vm2, %v2074_v17, %v2077_v16 }
 0xac9   :  { %v2076_v48 = vsel %vm1252_vm2, %v2075_v18, %v2069_v12 }
 0xaca   :  { %v2082_v21 = vperm.slane %v2076_v48, %v9303_v14 }
 0xacc   :  { %v2166_v22 = vadd.f32 %v2163_v20, %v2082_v21  ;;  %v2087_v55 = vrot.slane %v2082_v21, 4 }
 0xace   :  { %7323 = vtanh.f32 %v2166_v22  ;;  %v6974_v24 = vmul.f32 -1.442695, %v2166_v22  ;;  %v2088_v56 = vsel %vm1252_vm2, 0.0, %v2087_v55 }
 0xad0   :  { %7325 = vpow2.f32 %v6974_v24 }
 0xad4   :  { %v7324_v23 = vpop.eup %7323 }
 0xad5   :  { %2189 = vrot.lane.b32.xlu1 %v7324_v23, %s8673_s14 }
 0xad6   :  { %v7326_v26 = vpop.eup %7325 }
 0xad7   :  { %v2170_v27 = vadd.f32 1.0, %v7326_v26 }
 0xad9   :  { %7327 = vrcp.f32 %v2170_v27  ;;  %v2182_v34 = vand.u32 2147483648, %v2170_v27  ;;  %vm2176_vm12 = vweird.f32 %v2170_v27  ;;  %v2180_v35 = vand.u32 2147483647, %v2170_v27 }
 0xadb   :  { %v2183_v37 = vor.u32 1.1754944e-38, %v2182_v34  ;;  %vm2181_vm14 = vcmp.eq.f32.partialorder %v2180_v35, 8.507059e+37 }
 0xadf   :  { %v7328_v28 = vpop.eup %7327 }
 0xae0   :  { %v2172_v29 = vmul.f32 %v7328_v28, %v2170_v27  ;;  %vm2177_vm1 = vweird.f32 %v7328_v28 }
 0xae1   :  { %vm2178_vm13 = vmor %vm2176_vm12, %vm2177_vm1  ;;  %vm2922_vm1 = vcmask 1041409  }
 0xae2   :  { %v2173_v30 = vsub.f32 1.0, %v2172_v29 }
 0xae4   :  { %v2174_v32 = vmul.f32 %v7328_v28, %v2173_v30 }
 0xae6   :  { %v2175_v33 = vadd.f32 %v7328_v28, %v2174_v32 }
 0xae8   :  { %v2179_v6 = vsel %vm2178_vm13, %v7328_v28, %v2175_v33 }
 0xae9   :  { %v2184_v39 = vsel %vm2181_vm14, %v2183_v37, %v2179_v6 }
 0xaea   :  { %v2187_v41 = vmul.f32 0.0, %v2184_v39 }
 0xb47   :  { %v2190_v38 = vpop.permute.xlu1 %2189 }
 0xb48   :  { %v2192_v40 = vmul.f32 %v2190_v38, %v2184_v39  ;;  %v2086_v38 = vperm.slane %v9500_v19, %v9303_v14 }
 0xb4a   :  { %2194 = vrot.lane.b32.xlu2 %v2192_v40, %s8674_s28 }
 0xba4   :  { %v2195_v36 = vpop.permute.xlu2 %2194 }
 0xba5   :  { %v2197_v43 = vadd.f32 %v2195_v36, %v2187_v41 }
 0xba7   :  { %7329 = vtanh.f32 %v2197_v43 }
 0xbad   :  { %v7330_v44 = vpop.eup %7329 }
 0xbae   :  { %2200 = vrot.lane.b32.xlu1 %v7330_v44, %s8673_s14 }
 0xc20   :  { %v2201_v46 = vpop.permute.xlu1 %2200 }
 0xc21   :  { %v2203_v49 = vmul.f32 %v2201_v46, %v2184_v39 }
 0xc23   :  { %2205 = vst [vmem:[#allocation1] ss:$2 sm:$0xff] %v2203_v49  ;;  %v2919_v51 = vrot.slane %v2203_v49, 3 }
 0xc25   :  { %v2921_v52 = vsel %vm2920_vm8, %v2203_v49, %v2919_v51  ;;  %v2923_v26 = vsel %vm2922_vm1, %v2203_v49, %v2919_v51 }
 0xc26   :  { %v2924_v32 = vrot.slane %v2923_v26, 1 }
 0xc2a   :  { %v2206_v53 = vld.sshfl [vmem:[#allocation1] sm:$0xff pattern:$0x75316420] }
 0xc2b   :  { %2207 = vrot.lane.b32.xlu2 %v2206_v53, %s8674_s28 }
 0xc85   :  { %v2208_v54 = vpop.permute.xlu2 %2207 }
 0xc86   :  { %6975 = vmatmul.msk.f32.vlgmr.msrb.gmra.mxu3 %vm1101_vm4, %v2208_v54 }
 0xc87   :  { %2613 = vmatpush.msrb.mxu3 %v9439_v42 }
 0xc89   :  { %2614 = vmatpush.msrb.mxu3 %v9446_v45 }
 0xc8b   :  { %2615 = vmatpush.msrb.mxu3 %v9450_v47 }
 0xc8d   :  { %2616 = vmatpush.msrb.mxu3 %v9454_v50 }
 0xd09   :  { %v2228_v57 = vpop.f32.mrf.mxu3 }
 0xd0a   :  { %v2231_v58 = vadd.f32 %v2228_v57, %v2088_v56 }
 0xd0c   :  { %7331 = vtanh.f32 %v2231_v58  ;;  %v6976_v60 = vmul.f32 -1.442695, %v2231_v58 }
 0xd0e   :  { %7333 = vpow2.f32 %v6976_v60 }
 0xd12   :  { %v7332_v59 = vpop.eup %7331 }
 0xd13   :  { %2254 = vrot.lane.b32.xlu0 %v7332_v59, %s8673_s14 }
 0xd14   :  { %v7334_v0 = vpop.eup %7333 }
 0xd15   :  { %v2235_v1 = vadd.f32 1.0, %v7334_v0 }
 0xd17   :  { %7335 = vrcp.f32 %v2235_v1  ;;  %v2247_v8 = vand.u32 2147483648, %v2235_v1  ;;  %vm2241_vm3 = vweird.f32 %v2235_v1  ;;  %v2245_v10 = vand.u32 2147483647, %v2235_v1 }
 0xd19   :  { %v2248_v13 = vor.u32 1.1754944e-38, %v2247_v8  ;;  %vm2246_vm15 = vcmp.eq.f32.partialorder %v2245_v10, 8.507059e+37 }
 0xd1d   :  { %v7336_v3 = vpop.eup %7335 }
 0xd1e   :  { %v2237_v4 = vmul.f32 %v7336_v3, %v2235_v1  ;;  %vm2242_vm10 = vweird.f32 %v7336_v3 }
 0xd1f   :  { %vm2243_vm11 = vmor %vm2241_vm3, %vm2242_vm10  ;;  %vm3016_vm3 = vcmask 1041408  }
 0xd20   :  { %v2238_v63 = vsub.f32 1.0, %v2237_v4 }
 0xd22   :  { %v2239_v5 = vmul.f32 %v7336_v3, %v2238_v63 }
 0xd24   :  { %v2240_v7 = vadd.f32 %v7336_v3, %v2239_v5 }
 0xd26   :  { %v2244_v12 = vsel %vm2243_vm11, %v7336_v3, %v2240_v7 }
 0xd27   :  { %v2249_v16 = vsel %vm2246_vm15, %v2248_v13, %v2244_v12 }
 0xd28   :  { %v2252_v18 = vmul.f32 %v2249_v16, %v2197_v43 }
 0xd85   :  { %v2255_v15 = vpop.permute.xlu0 %2254 }
 0xd86   :  { %v2257_v17 = vmul.f32 %v2255_v15, %v2249_v16 }
 0xd88   :  { %2259 = vrot.lane.b32.xlu1 %v2257_v17, %s8674_s28 }
 0xdfa   :  { %v2260_v48 = vpop.permute.xlu1 %2259 }
 0xdfb   :  { %v2262_v20 = vadd.f32 %v2260_v48, %v2252_v18  ;;  %v2089_v48 = vrot.slane %v2086_v38, 4 }
 0xdfd   :  { %7337 = vtanh.f32 %v2262_v20 }
 0xe03   :  { %v7338_v21 = vpop.eup %7337 }
 0xe04   :  { %2265 = vrot.lane.b32.xlu2 %v7338_v21, %s8673_s14 }
 0xe5e   :  { %v2266_v22 = vpop.permute.xlu2 %2265 }
 0xe5f   :  { %v2268_v23 = vmul.f32 %v2266_v22, %v2249_v16 }
 0xe61   :  { %2270 = vst [vmem:[#allocation1] ss:$2 sm:$0xff] %v2268_v23  ;;  %v2927_v24 = vrot.slane %v2268_v23, 3 }
 0xe63   :  { %v2928_v27 = vsel %vm2920_vm8, %v2268_v23, %v2927_v24  ;;  %v2929_v28 = vsel %vm2922_vm1, %v2268_v23, %v2927_v24 }
 0xe64   :  { %v2930_v29 = vrot.slane %v2929_v28, 1  ;;  %v2974_v30 = vperm.slane %v2928_v27, 0 }
 0xe66   :  { %v2975_v33 = vperm.slane %v2930_v29, 0  ;;  %v3014_v34 = vsel %vm2920_vm8, %v2921_v52, %v2974_v30 }
 0xe68   :  { %v2271_v35 = vld.sshfl [vmem:[#allocation1] sm:$0xff pattern:$0x75316420]  ;;  %v3015_v6 = vsel %vm2920_vm8, %v2924_v32, %v2975_v33 }
 0xe69   :  { %2272 = vrot.lane.b32.xlu0 %v2271_v35, %s8674_s28 }
 0xedb   :  { %v2273_v37 = vpop.permute.xlu0 %2272 }
 0xedc   :  { %6977 = vmatmul.msk.f32.vlgmr.msrb.gmra.mxu0 %vm1101_vm4, %v2273_v37 }
 0xedd   :  { %2678 = vmatpush.msrb.mxu0 %v9439_v42 }
 0xedf   :  { %2679 = vmatpush.msrb.mxu0 %v9446_v45 }
 0xee1   :  { %2680 = vmatpush.msrb.mxu0 %v9450_v47 }
 0xee3   :  { %2681 = vmatpush.msrb.mxu0 %v9454_v50 }
 0xf59   :  { %v2293_v39 = vpop.f32.mrf.mxu0 }
 0xf5a   :  { %v2296_v40 = vadd.f32 %v2293_v39, %v2086_v38 }
 0xf5c   :  { %7339 = vtanh.f32 %v2296_v40  ;;  %v6978_v36 = vmul.f32 -1.442695, %v2296_v40 }
 0xf5e   :  { %7341 = vpow2.f32 %v6978_v36 }
 0xf62   :  { %v7340_v41 = vpop.eup %7339 }
 0xf63   :  { %2319 = vrot.lane.b32.xlu1 %v7340_v41, %s8673_s14 }
 0xf64   :  { %v7342_v43 = vpop.eup %7341 }
 0xf65   :  { %v2300_v44 = vadd.f32 1.0, %v7342_v43 }
 0xf67   :  { %7343 = vrcp.f32 %v2300_v44  ;;  %v2312_v54 = vand.u32 2147483648, %v2300_v44  ;;  %vm2306_vm13 = vweird.f32 %v2300_v44  ;;  %v2310_v19 = vand.u32 2147483647, %v2300_v44 }
 0xf69   :  { %v2313_v56 = vor.u32 1.1754944e-38, %v2312_v54  ;;  %vm2311_vm10 = vcmp.eq.f32.partialorder %v2310_v19, 8.507059e+37 }
 0xf6d   :  { %v7344_v46 = vpop.eup %7343 }
 0xf6e   :  { %v2302_v49 = vmul.f32 %v7344_v46, %v2300_v44  ;;  %vm2307_vm12 = vweird.f32 %v7344_v46 }
 0xf6f   :  { %vm2308_vm14 = vmor %vm2306_vm13, %vm2307_vm12 }
 0xf70   :  { %v2303_v51 = vsub.f32 1.0, %v2302_v49 }
 0xf72   :  { %v2304_v52 = vmul.f32 %v7344_v46, %v2303_v51 }
 0xf74   :  { %v2305_v53 = vadd.f32 %v7344_v46, %v2304_v52 }
 0xf76   :  { %v2309_v55 = vsel %vm2308_vm14, %v7344_v46, %v2305_v53 }
 0xf77   :  { %v2314_v58 = vsel %vm2311_vm10, %v2313_v56, %v2309_v55 }
 0xf78   :  { %v2317_v60 = vmul.f32 %v2314_v58, %v2262_v20  ;;  %v2090_v20 = vsel %vm1252_vm2, 0.0, %v2089_v48 }
 0xfd5   :  { %v2320_v57 = vpop.permute.xlu1 %2319 }
 0xfd6   :  { %v2322_v59 = vmul.f32 %v2320_v57, %v2314_v58 }
 0xfd8   :  { %2324 = vrot.lane.b32.xlu2 %v2322_v59, %s8674_s28 }
0x1032   :  { %v2325_v0 = vpop.permute.xlu2 %2324 }
0x1033   :  { %v2327_v1 = vadd.f32 %v2325_v0, %v2317_v60 }
0x1035   :  { %7345 = vtanh.f32 %v2327_v1 }
0x103b   :  { %v7346_v3 = vpop.eup %7345 }
0x103c   :  { %2330 = vrot.lane.b32.xlu0 %v7346_v3, %s8673_s14  ;;  %v2063_v3 = vrot.slane %v9489_v9, 4 }
0x10ae   :  { %v2331_v4 = vpop.permute.xlu0 %2330 }
0x10af   :  { %v2333_v63 = vmul.f32 %v2331_v4, %v2314_v58 }
0x10b1   :  { %2335 = vst [vmem:[#allocation1] ss:$2 sm:$0xff] %v2333_v63  ;;  %v2931_v5 = vrot.slane %v2333_v63, 3 }
0x10b3   :  { %v2932_v7 = vsel %vm2920_vm8, %v2333_v63, %v2931_v5  ;;  %v2933_v8 = vsel %vm2922_vm1, %v2333_v63, %v2931_v5  ;;  %v2054_v63 = vrot.slane %v9487_v62, 4 }
0x10b4   :  { %v2934_v10 = vrot.slane %v2933_v8, 1  ;;  %v2978_v12 = vperm.slane %v2932_v7, 0 }
0x10b5   :  { %v2091_v7 = vadd.f32 %v2063_v3, %v2054_v63 }
0x10b6   :  { %v2979_v13 = vperm.slane %v2934_v10, 0  ;;  %v9537_v15 = vsel %vm3016_vm3, %v3014_v34, %v2978_v12 }
0x10b8   :  { %v2336_v16 = vld.sshfl [vmem:[#allocation1] sm:$0xff pattern:$0x75316420]  ;;  %v9540_v17 = vsel %vm3016_vm3, %v3015_v6, %v2979_v13 }
0x10b9   :  { %2337 = vrot.lane.b32.xlu1 %v2336_v16, %s8674_s28 }
0x10e3   :  { %1813 = vadd.xlane.f32.xlu1 %v9422_v31 }
0x112b   :  { %v2338_v18 = vpop.permute.xlu1 %2337 }
0x112c   :  { %6979 = vmatmul.msk.f32.vlgmr.msrb.gmra.mxu2 %vm1101_vm4, %v2338_v18 }
0x112d   :  { %2808 = vmatpush.msrb.mxu2 %v9439_v42 }
0x112f   :  { %2809 = vmatpush.msrb.mxu2 %v9446_v45 }
0x1131   :  { %2810 = vmatpush.msrb.mxu2 %v9450_v47 }
0x1133   :  { %2811 = vmatpush.msrb.mxu2 %v9454_v50 }
0x1156   :  { %v1814_v40 = vpop.xlane.xlu1 %1813 }
0x11af   :  { %v2358_v21 = vpop.f32.mrf.mxu2 }
0x11b0   :  { %v2361_v22 = vadd.f32 %v2358_v21, %v2090_v20 }
0x11b2   :  { %7347 = vtanh.f32 %v2361_v22  ;;  %v6980_v31 = vmul.f32 -1.442695, %v2361_v22 }
0x11b4   :  { %7349 = vpow2.f32 %v6980_v31 }
0x11b8   :  { %v7348_v23 = vpop.eup %7347 }
0x11b9   :  { %2384 = vrot.lane.b32.xlu2 %v7348_v23, %s8673_s14 }
0x11ba   :  { %v7350_v24 = vpop.eup %7349 }
0x11bb   :  { %v2365_v26 = vadd.f32 1.0, %v7350_v24 }
0x11bd   :  { %7351 = vrcp.f32 %v2365_v26  ;;  %v2377_v33 = vand.u32 2147483648, %v2365_v26  ;;  %vm2371_vm15 = vweird.f32 %v2365_v26  ;;  %v2375_v34 = vand.u32 2147483647, %v2365_v26 }
0x11bf   :  { %v2378_v6 = vor.u32 1.1754944e-38, %v2377_v33  ;;  %vm2376_vm13 = vcmp.eq.f32.partialorder %v2375_v34, 8.507059e+37 }
0x11c3   :  { %v7352_v27 = vpop.eup %7351 }
0x11c4   :  { %v2367_v28 = vmul.f32 %v7352_v27, %v2365_v26  ;;  %vm2372_vm11 = vweird.f32 %v7352_v27 }
0x11c5   :  { %vm2373_vm12 = vmor %vm2371_vm15, %vm2372_vm11 }
0x11c6   :  { %v2368_v29 = vsub.f32 1.0, %v2367_v28 }
0x11c8   :  { %v2369_v30 = vmul.f32 %v7352_v27, %v2368_v29 }
0x11ca   :  { %v2370_v32 = vadd.f32 %v7352_v27, %v2369_v30 }
0x11cc   :  { %v2374_v35 = vsel %vm2373_vm12, %v7352_v27, %v2370_v32  ;;  %vm3021_vm12 = vcmask 1043456  }
0x11cd   :  { %v2379_v38 = vsel %vm2376_vm13, %v2378_v6, %v2374_v35 }
0x11ce   :  { %v2382_v41 = vmul.f32 %v2379_v38, %v2327_v1 }
0x1213   :  { %v2385_v37 = vpop.permute.xlu2 %2384 }
0x1214   :  { %v2387_v39 = vmul.f32 %v2385_v37, %v2379_v38 }
0x1216   :  { %2389 = vrot.lane.b32.xlu0 %v2387_v39, %s8674_s28 }
0x121e   :  { %1988 = vperm.xlu0 %7229, %v1814_v40  }
0x1288   :  { %v2390_v36 = vpop.permute.xlu0 %2389 }
0x1289   :  { %v9552_v43 = vadd.f32 %v2390_v36, %v2382_v41 }
0x128b   :  { %7353 = vtanh.f32 %v9552_v43 }
0x1290   :  { %v1989_v44 = vpop.permute.xlu0 %1988 }
0x1291   :  { %v7354_v46 = vpop.eup %7353  ;;  %v1998_v49 = vadd.f32 %v9474_v61, %v1989_v44 }
0x1292   :  { %2395 = vrot.lane.b32.xlu2 %v7354_v46, %s8673_s14 }
0x1293   :  { %2015 = vst [vmem:[#allocation1 + $0x21] ss:$2 sm:$0xff] %v1998_v49 }
0x129a   :  { %v2018_v51 = vld.sshfl [vmem:[#allocation1 + $0x20] sm:$0xff pattern:$0x75316420] }
0x129b   :  { %6973 = vmatmul.msk.f32.gmra.mxu1 %vm1101_vm4, %v2018_v51 }
0x12ec   :  { %v2396_v52 = vpop.permute.xlu2 %2395 }
0x12ed   :  { %v2398_v53 = vmul.f32 %v2396_v52, %v2379_v38 }
0x12ef   :  { %2400 = vst [vmem:[#allocation1] ss:$2 sm:$0xff] %v2398_v53  ;;  %v2935_v54 = vrot.slane %v2398_v53, 3 }
0x12f1   :  { %v2936_v19 = vsel %vm2920_vm8, %v2398_v53, %v2935_v54  ;;  %v2937_v55 = vsel %vm2922_vm1, %v2398_v53, %v2935_v54 }
0x12f2   :  { %v2938_v56 = vrot.slane %v2937_v55, 1  ;;  %v2982_v57 = vperm.slane %v2936_v19, 0 }
0x12f4   :  { %v2983_v58 = vperm.slane %v2938_v56, 0  ;;  %v9562_v61 = vsel %vm1073_vm0, %v9537_v15, %v2982_v57 }
0x12f6   :  { %v2401_v59 = vld.sshfl [vmem:[#allocation1] sm:$0xff pattern:$0x75316420]  ;;  %v9566_v60 = vsel %vm1073_vm0, %v9540_v17, %v2983_v58 }
0x12f7   :  { %2402 = vrot.lane.b32.xlu2 %v2401_v59, %s8674_s28 }
0x1318   :  { %v9574_v1 = vpop.f32.mrf.mxu1 }
0x1319   :  { %v2096_v4 = vadd.f32 %v2063_v3, %v9574_v1 }
0x131b   :  { %v9580_v5 = vperm.slane %v2096_v4, %v9291_v2 }
0x1351   :  { %v2403_v0 = vpop.permute.xlu2 %2402 }
0x1352   :  { %6981 = vmatmul.msk.f32.vlgmr.msra.gmra.mxu3 %vm1101_vm4, %v2403_v0 }
0x1353   :  { %2873 = vmatpush.msra.mxu3 %v9439_v42  ;;  %v2101_v42 = vrot.slane %v9580_v5, 4 }
0x1355   :  { %2874 = vmatpush.msra.mxu3 %v9446_v45  ;;  %v9584_v45 = vperm.slane %v2091_v7, %v9291_v2 }
0x1357   :  { %2875 = vmatpush.msra.mxu3 %v9450_v47  ;;  %v2102_v47 = vsel %vm1252_vm2, %v2101_v42, %v9584_v45 }
0x1359   :  { %2876 = vmatpush.msra.mxu3 %v9454_v50  ;;  %v2108_v50 = vperm.slane %v2102_v47, %v9303_v14 }
0x135b   :  { %v2113_v46 = vrot.slane %v2108_v50, 4 }
0x135d   :  { %v2114_v49 = vsel %vm1252_vm2, 0.0, %v2113_v46 }
0x13d5   :  { %v2423_v8 = vpop.f32.mrf.mxu3 }
0x13d6   :  { %v2426_v10 = vadd.f32 %v2423_v8, %v2108_v50 }
0x13d8   :  { %7355 = vtanh.f32 %v2426_v10  ;;  %v6982_v62 = vmul.f32 -1.442695, %v2426_v10 }
0x13da   :  { %7357 = vpow2.f32 %v6982_v62 }
0x13de   :  { %v7356_v12 = vpop.eup %7355 }
0x13df   :  { %2449 = vrot.lane.b32.xlu0 %v7356_v12, %s8673_s14 }
0x13e0   :  { %v7358_v13 = vpop.eup %7357 }
0x13e1   :  { %v2430_v15 = vadd.f32 1.0, %v7358_v13 }
0x13e3   :  { %7359 = vrcp.f32 %v2430_v15  ;;  %v2442_v21 = vand.u32 2147483648, %v2430_v15  ;;  %vm2436_vm10 = vweird.f32 %v2430_v15  ;;  %v2440_v22 = vand.u32 2147483647, %v2430_v15 }
0x13e5   :  { %v2443_v31 = vor.u32 1.1754944e-38, %v2442_v21  ;;  %vm2441_vm15 = vcmp.eq.f32.partialorder %v2440_v22, 8.507059e+37 }
0x13e9   :  { %v7360_v16 = vpop.eup %7359 }
0x13ea   :  { %v2432_v17 = vmul.f32 %v7360_v16, %v2430_v15  ;;  %vm2437_vm14 = vweird.f32 %v7360_v16 }
0x13eb   :  { %vm2438_vm11 = vmor %vm2436_vm10, %vm2437_vm14 }
0x13ec   :  { %v2433_v18 = vsub.f32 1.0, %v2432_v17 }
0x13ee   :  { %v2434_v48 = vmul.f32 %v7360_v16, %v2433_v18 }
0x13f0   :  { %v2435_v20 = vadd.f32 %v7360_v16, %v2434_v48 }
0x13f2   :  { %v2439_v23 = vsel %vm2438_vm11, %v7360_v16, %v2435_v20 }
0x13f3   :  { %v2444_v26 = vsel %vm2441_vm15, %v2443_v31, %v2439_v23  ;;  %vm3024_vm15 = vcmask 1044480   ;;  %v2103_v31 = vrot.slane %v9584_v45, 4 }
0x13f4   :  { %v2447_v28 = vmul.f32 %v2444_v26, %v9552_v43 }
0x1451   :  { %v2450_v24 = vpop.permute.xlu0 %2449 }
0x1452   :  { %v2452_v27 = vmul.f32 %v2450_v24, %v2444_v26  ;;  %v2104_v24 = vsel %vm1252_vm2, %v9580_v5, %v2103_v31 }
0x1454   :  { %2454 = vrot.lane.b32.xlu2 %v2452_v27, %s8674_s28 }
0x14ae   :  { %v2455_v29 = vpop.permute.xlu2 %2454 }
0x14af   :  { %v2457_v30 = vadd.f32 %v2455_v29, %v2447_v28 }
0x14b1   :  { %7361 = vtanh.f32 %v2457_v30 }
0x14b7   :  { %v7362_v32 = vpop.eup %7361 }
0x14b8   :  { %2460 = vrot.lane.b32.xlu0 %v7362_v32, %s8673_s14 }
0x152a   :  { %v2461_v33 = vpop.permute.xlu0 %2460 }
0x152b   :  { %v2463_v34 = vmul.f32 %v2461_v33, %v2444_v26  ;;  %v2112_v26 = vperm.slane %v2104_v24, %v9303_v14 }
0x152d   :  { %2465 = vst [vmem:[#allocation1] ss:$2 sm:$0xff] %v2463_v34  ;;  %v2939_v35 = vrot.slane %v2463_v34, 3 }
0x152f   :  { %v2940_v6 = vsel %vm2920_vm8, %v2463_v34, %v2939_v35  ;;  %v2941_v37 = vsel %vm2922_vm1, %v2463_v34, %v2939_v35 }
0x1530   :  { %v2942_v38 = vrot.slane %v2941_v37, 1  ;;  %v2986_v39 = vperm.slane %v2940_v6, 0 }
0x1532   :  { %v2987_v40 = vperm.slane %v2942_v38, 0  ;;  %v3022_v41 = vsel %vm3021_vm12, %v9562_v61, %v2986_v39 }
0x1534   :  { %v2466_v36 = vld.sshfl [vmem:[#allocation1] sm:$0xff pattern:$0x75316420]  ;;  %v3023_v43 = vsel %vm3021_vm12, %v9566_v60, %v2987_v40 }
0x1535   :  { %2467 = vrot.lane.b32.xlu2 %v2466_v36, %s8674_s28 }
0x158f   :  { %v2468_v44 = vpop.permute.xlu2 %2467 }
0x1590   :  { %6983 = vmatmul.msk.f32.vlgmr.msra.gmra.mxu0 %vm1101_vm4, %v2468_v44 }
0x160d   :  { %v2488_v51 = vpop.f32.mrf.mxu0 }
0x160e   :  { %v2491_v52 = vadd.f32 %v2488_v51, %v2114_v49 }
0x1610   :  { %7363 = vtanh.f32 %v2491_v52  ;;  %v6984_v54 = vmul.f32 -1.442695, %v2491_v52 }
0x1612   :  { %7365 = vpow2.f32 %v6984_v54 }
0x1616   :  { %v7364_v53 = vpop.eup %7363 }
0x1617   :  { %2514 = vrot.lane.b32.xlu0 %v7364_v53, %s8673_s14 }
0x1618   :  { %v7366_v19 = vpop.eup %7365 }
0x1619   :  { %v2495_v55 = vadd.f32 1.0, %v7366_v19 }
0x161b   :  { %7367 = vrcp.f32 %v2495_v55  ;;  %v2507_v60 = vand.u32 2147483648, %v2495_v55  ;;  %vm2501_vm14 = vweird.f32 %v2495_v55  ;;  %v2505_v0 = vand.u32 2147483647, %v2495_v55 }
0x161d   :  { %v2508_v4 = vor.u32 1.1754944e-38, %v2507_v60  ;;  %vm2506_vm11 = vcmp.eq.f32.partialorder %v2505_v0, 8.507059e+37 }
0x1621   :  { %v7368_v56 = vpop.eup %7367 }
0x1622   :  { %v2497_v57 = vmul.f32 %v7368_v56, %v2495_v55  ;;  %vm2502_vm13 = vweird.f32 %v7368_v56 }
0x1623   :  { %vm2503_vm10 = vmor %vm2501_vm14, %vm2502_vm13 }
0x1624   :  { %v2498_v58 = vsub.f32 1.0, %v2497_v57 }
0x1626   :  { %v2499_v61 = vmul.f32 %v7368_v56, %v2498_v58 }
0x1628   :  { %v2500_v59 = vadd.f32 %v7368_v56, %v2499_v61 }
0x162a   :  { %v2504_v3 = vsel %vm2503_vm10, %v7368_v56, %v2500_v59 }
0x162b   :  { %v2509_v7 = vsel %vm2506_vm11, %v2508_v4, %v2504_v3  ;;  %v2115_v3 = vrot.slane %v2112_v26, 4 }
0x162c   :  { %v2512_v47 = vmul.f32 %v2509_v7, %v2457_v30 }
0x162d   :  { %v2116_v4 = vsel %vm1252_vm2, 0.0, %v2115_v3 }
0x1689   :  { %v2515_v63 = vpop.permute.xlu0 %2514 }
0x168a   :  { %v2517_v42 = vmul.f32 %v2515_v63, %v2509_v7 }
0x168c   :  { %2519 = vrot.lane.b32.xlu2 %v2517_v42, %s8674_s28 }
0x16e6   :  { %v2520_v50 = vpop.permute.xlu2 %2519 }
0x16e7   :  { %v2522_v8 = vadd.f32 %v2520_v50, %v2512_v47 }
0x16e9   :  { %7369 = vtanh.f32 %v2522_v8 }
0x16ef   :  { %v7370_v10 = vpop.eup %7369 }
0x16f0   :  { %2525 = vrot.lane.b32.xlu0 %v7370_v10, %s8673_s14 }
0x1762   :  { %v2526_v12 = vpop.permute.xlu0 %2525 }
0x1763   :  { %v2528_v62 = vmul.f32 %v2526_v12, %v2509_v7 }
0x1765   :  { %2530 = vst [vmem:[#allocation1] ss:$2 sm:$0xff] %v2528_v62  ;;  %v2943_v13 = vrot.slane %v2528_v62, 3 }
0x1767   :  { %v2944_v15 = vsel %vm2920_vm8, %v2528_v62, %v2943_v13  ;;  %v2945_v16 = vsel %vm2922_vm1, %v2528_v62, %v2943_v13 }
0x1768   :  { %v2946_v17 = vrot.slane %v2945_v16, 1  ;;  %v2990_v18 = vperm.slane %v2944_v15, 0 }
0x176a   :  { %v2991_v48 = vperm.slane %v2946_v17, 0  ;;  %v3025_v20 = vsel %vm3024_vm15, %v3022_v41, %v2990_v18 }
0x176c   :  { %v2531_v21 = vld.sshfl [vmem:[#allocation1] sm:$0xff pattern:$0x75316420]  ;;  %v3026_v22 = vsel %vm3024_vm15, %v3023_v43, %v2991_v48  ;;  %vm3027_vm15 = vcmask 1045504  }
0x176d   :  { %2532 = vrot.lane.b32.xlu1 %v2531_v21, %s8674_s28 }
0x17df   :  { %v2533_v23 = vpop.permute.xlu1 %2532 }
0x17e0   :  { %6985 = vmatmul.msk.f32.vlgmr.msra.gmra.mxu2 %vm1101_vm4, %v2533_v23 }
0x1863   :  { %v2553_v27 = vpop.f32.mrf.mxu2 }
0x1864   :  { %v2556_v28 = vadd.f32 %v2553_v27, %v2112_v26 }
0x1866   :  { %7371 = vtanh.f32 %v2556_v28  ;;  %v6986_v30 = vmul.f32 -1.442695, %v2556_v28 }
0x1868   :  { %7373 = vpow2.f32 %v6986_v30 }
0x186c   :  { %v7372_v29 = vpop.eup %7371 }
0x186d   :  { %2579 = vrot.lane.b32.xlu2 %v7372_v29, %s8673_s14 }
0x186e   :  { %v7374_v32 = vpop.eup %7373 }
0x186f   :  { %v2560_v33 = vadd.f32 1.0, %v7374_v32 }
0x1871   :  { %7375 = vrcp.f32 %v2560_v33  ;;  %v2572_v5 = vand.u32 2147483648, %v2560_v33  ;;  %vm2566_vm14 = vweird.f32 %v2560_v33  ;;  %v2570_v38 = vand.u32 2147483647, %v2560_v33 }
0x1873   :  { %v2573_v40 = vor.u32 1.1754944e-38, %v2572_v5  ;;  %vm2571_vm11 = vcmp.eq.f32.partialorder %v2570_v38, 8.507059e+37 }
0x1877   :  { %v7376_v34 = vpop.eup %7375 }
0x1878   :  { %v2562_v35 = vmul.f32 %v7376_v34, %v2560_v33  ;;  %vm2567_vm13 = vweird.f32 %v7376_v34 }
0x1879   :  { %vm2568_vm10 = vmor %vm2566_vm14, %vm2567_vm13 }
0x187a   :  { %v2563_v6 = vsub.f32 1.0, %v2562_v35 }
0x187c   :  { %v2564_v45 = vmul.f32 %v7376_v34, %v2563_v6 }
0x187e   :  { %v2565_v37 = vadd.f32 %v7376_v34, %v2564_v45 }
0x1880   :  { %v2569_v39 = vsel %vm2568_vm10, %v7376_v34, %v2565_v37 }
0x1881   :  { %v2574_v36 = vsel %vm2571_vm11, %v2573_v40, %v2569_v39  ;;  %v2056_v39 = vrot.slane %v9574_v1, 4 }
0x1882   :  { %v2577_v44 = vmul.f32 %v2574_v36, %v2522_v8 }
0x1883   :  { %v2122_v40 = vadd.f32 %v9489_v9, %v2056_v39 }
0x18c7   :  { %v2580_v41 = vpop.permute.xlu2 %2579 }
0x18c8   :  { %v2582_v43 = vmul.f32 %v2580_v41, %v2574_v36  ;;  %v9639_v41 = vperm.slane %v2122_v40, %v9291_v2 }
0x18ca   :  { %2584 = vrot.lane.b32.xlu0 %v2582_v43, %s8674_s28  ;;  %v2127_v43 = vrot.slane %v9639_v41, 4 }
0x193c   :  { %v2585_v46 = vpop.permute.xlu0 %2584 }
0x193d   :  { %v2587_v49 = vadd.f32 %v2585_v46, %v2577_v44 }
0x193f   :  { %7377 = vtanh.f32 %v2587_v49 }
0x1945   :  { %v7378_v51 = vpop.eup %7377 }
0x1946   :  { %2590 = vrot.lane.b32.xlu2 %v7378_v51, %s8673_s14 }
0x19a0   :  { %v2591_v52 = vpop.permute.xlu2 %2590 }
0x19a1   :  { %v2593_v53 = vmul.f32 %v2591_v52, %v2574_v36  ;;  %v2117_v36 = vadd.f32 %v9489_v9, %v9493_v11 }
0x19a3   :  { %2595 = vst [vmem:[#allocation1] ss:$2 sm:$0xff] %v2593_v53  ;;  %v2947_v54 = vrot.slane %v2593_v53, 3  ;;  %v9645_v44 = vperm.slane %v2117_v36, %v9291_v2 }
0x19a5   :  { %v2948_v19 = vsel %vm2920_vm8, %v2593_v53, %v2947_v54  ;;  %v2949_v55 = vsel %vm2922_vm1, %v2593_v53, %v2947_v54  ;;  %v2128_v46 = vsel %vm1252_vm2, %v2127_v43, %v9645_v44 }
0x19a6   :  { %v2950_v56 = vrot.slane %v2949_v55, 1  ;;  %v2994_v57 = vperm.slane %v2948_v19, 0 }
0x19a8   :  { %v2995_v58 = vperm.slane %v2950_v56, 0  ;;  %v3028_v61 = vsel %vm3027_vm15, %v3025_v20, %v2994_v57 }
0x19aa   :  { %v2596_v59 = vld.sshfl [vmem:[#allocation1] sm:$0xff pattern:$0x75316420]  ;;  %v3029_v60 = vsel %vm3027_vm15, %v3026_v22, %v2995_v58  ;;  %vm3030_vm15 = vcmask 1046528  }
0x19ab   :  { %2597 = vrot.lane.b32.xlu0 %v2596_v59, %s8674_s28 }
0x1a1d   :  { %v2598_v0 = vpop.permute.xlu0 %2597 }
0x1a1e   :  { %6987 = vmatmul.msk.f32.vlgmr.msrb.gmra.mxu3 %vm1101_vm4, %v2598_v0 }
0x1aa1   :  { %v2618_v63 = vpop.f32.mrf.mxu3 }
0x1aa2   :  { %v2621_v7 = vadd.f32 %v2618_v63, %v2116_v4 }
0x1aa4   :  { %7379 = vtanh.f32 %v2621_v7  ;;  %v6988_v47 = vmul.f32 -1.442695, %v2621_v7 }
0x1aa6   :  { %7381 = vpow2.f32 %v6988_v47 }
0x1aaa   :  { %v7380_v42 = vpop.eup %7379 }
0x1aab   :  { %2644 = vrot.lane.b32.xlu2 %v7380_v42, %s8673_s14 }
0x1aac   :  { %v7382_v50 = vpop.eup %7381 }
0x1aad   :  { %v2625_v8 = vadd.f32 1.0, %v7382_v50 }
0x1aaf   :  { %7383 = vrcp.f32 %v2625_v8  ;;  %v2637_v16 = vand.u32 2147483648, %v2625_v8  ;;  %vm2631_vm14 = vweird.f32 %v2625_v8  ;;  %v2635_v17 = vand.u32 2147483647, %v2625_v8 }
0x1ab1   :  { %v2638_v48 = vor.u32 1.1754944e-38, %v2637_v16  ;;  %vm2636_vm11 = vcmp.eq.f32.partialorder %v2635_v17, 8.507059e+37 }
0x1ab5   :  { %v7384_v10 = vpop.eup %7383 }
0x1ab6   :  { %v2627_v12 = vmul.f32 %v7384_v10, %v2625_v8  ;;  %vm2632_vm13 = vweird.f32 %v7384_v10 }
0x1ab7   :  { %vm2633_vm10 = vmor %vm2631_vm14, %vm2632_vm13 }
0x1ab8   :  { %v2628_v62 = vsub.f32 1.0, %v2627_v12 }
0x1aba   :  { %v2629_v13 = vmul.f32 %v7384_v10, %v2628_v62 }
0x1abc   :  { %v2630_v15 = vadd.f32 %v7384_v10, %v2629_v13 }
0x1abe   :  { %v2634_v18 = vsel %vm2633_vm10, %v7384_v10, %v2630_v15 }
0x1abf   :  { %v2639_v21 = vsel %vm2636_vm11, %v2638_v48, %v2634_v18 }
0x1ac0   :  { %v2642_v23 = vmul.f32 %v2639_v21, %v2587_v49  ;;  %v2134_v49 = vperm.slane %v2128_v46, %v9303_v14 }
0x1ac2   :  { %v2139_v62 = vrot.slane %v2134_v49, 4 }
0x1ac4   :  { %v2140_v13 = vsel %vm1252_vm2, 0.0, %v2139_v62 }
0x1b05   :  { %v2645_v20 = vpop.permute.xlu2 %2644 }
0x1b06   :  { %v2647_v22 = vmul.f32 %v2645_v20, %v2639_v21 }
0x1b08   :  { %2649 = vrot.lane.b32.xlu0 %v2647_v22, %s8674_s28 }
0x1b7a   :  { %v2650_v31 = vpop.permute.xlu0 %2649 }
0x1b7b   :  { %v2652_v24 = vadd.f32 %v2650_v31, %v2642_v23 }
0x1b7d   :  { %7385 = vtanh.f32 %v2652_v24 }
0x1b83   :  { %v7386_v26 = vpop.eup %7385 }
0x1b84   :  { %2655 = vrot.lane.b32.xlu1 %v7386_v26, %s8673_s14 }
0x1bf6   :  { %v2656_v27 = vpop.permute.xlu1 %2655 }
0x1bf7   :  { %v2658_v28 = vmul.f32 %v2656_v27, %v2639_v21 }
0x1bf9   :  { %2660 = vst [vmem:[#allocation1] ss:$2 sm:$0xff] %v2658_v28  ;;  %v2951_v29 = vrot.slane %v2658_v28, 3 }
0x1bfb   :  { %v2952_v30 = vsel %vm2920_vm8, %v2658_v28, %v2951_v29  ;;  %v2953_v32 = vsel %vm2922_vm1, %v2658_v28, %v2951_v29 }
0x1bfc   :  { %v2954_v33 = vrot.slane %v2953_v32, 1  ;;  %v2998_v34 = vperm.slane %v2952_v30, 0 }
0x1bfe   :  { %v2999_v35 = vperm.slane %v2954_v33, 0  ;;  %v9626_v6 = vsel %vm3030_vm15, %v3028_v61, %v2998_v34 }
0x1bff   :  { %11349 = vst [vmem:[#allocation147_spill] sm:$0xff] %v9626_v6 }
0x1c00   :  { %v2661_v45 = vld.sshfl [vmem:[#allocation1] sm:$0xff pattern:$0x75316420]  ;;  %v9628_v37 = vsel %vm3030_vm15, %v3029_v60, %v2999_v35 }
0x1c01   :  { %11350 = vst [vmem:[#allocation148_spill] sm:$0xff] %v9628_v37  ;;  %v11242_v5 = vrot.slane %v9628_v37, 4  ;;  %2662 = vrot.lane.b32.xlu2 %v2661_v45, %s8674_s28 }
0x1c02   :  { %3051 = vst [vmem:[#allocation1 + $0x11] ss:$2 sm:$0xff] %v9628_v37 }
0x1c03   :  { %3053 = vst [vmem:[#allocation1 + $0x20] ss:$2 sm:$0xff] %v11242_v5 }
0x1c5b   :  { %v2663_v38 = vpop.permute.xlu2 %2662 }
0x1c5c   :  { %6989 = vmatmul.msk.f32.vlgmr.msrb.gmra.mxu0 %vm1101_vm4, %v2663_v38 }
0x1cd9   :  { %v2683_v51 = vpop.f32.mrf.mxu0 }
0x1cda   :  { %v2686_v1 = vadd.f32 %v2683_v51, %v2134_v49 }
0x1cdc   :  { %7387 = vtanh.f32 %v2686_v1  ;;  %v6990_v53 = vmul.f32 -1.442695, %v2686_v1 }
0x1cde   :  { %7389 = vpow2.f32 %v6990_v53 }
0x1ce2   :  { %v7388_v52 = vpop.eup %7387 }
0x1ce3   :  { %2709 = vrot.lane.b32.xlu0 %v7388_v52, %s8673_s14 }
0x1ce4   :  { %v7390_v54 = vpop.eup %7389 }
0x1ce5   :  { %v2690_v9 = vadd.f32 1.0, %v7390_v54 }
0x1ce7   :  { %7391 = vrcp.f32 %v2690_v9  ;;  %v2702_v58 = vand.u32 2147483648, %v2690_v9  ;;  %vm2696_vm14 = vweird.f32 %v2690_v9  ;;  %v2700_v61 = vand.u32 2147483647, %v2690_v9 }
0x1ce9   :  { %v2703_v60 = vor.u32 1.1754944e-38, %v2702_v58  ;;  %vm2701_vm11 = vcmp.eq.f32.partialorder %v2700_v61, 8.507059e+37 }
0x1ced   :  { %v7392_v11 = vpop.eup %7391 }
0x1cee   :  { %v2692_v19 = vmul.f32 %v7392_v11, %v2690_v9  ;;  %vm2697_vm13 = vweird.f32 %v7392_v11 }
0x1cef   :  { %vm2698_vm10 = vmor %vm2696_vm14, %vm2697_vm13 }
0x1cf0   :  { %v2693_v55 = vsub.f32 1.0, %v2692_v19 }
0x1cf2   :  { %v2694_v56 = vmul.f32 %v7392_v11, %v2693_v55 }
0x1cf4   :  { %v2695_v57 = vadd.f32 %v7392_v11, %v2694_v56 }
0x1cf6   :  { %v2699_v59 = vsel %vm2698_vm10, %v7392_v11, %v2695_v57  ;;  %v2129_v57 = vrot.slane %v9645_v44, 4 }
0x1cf7   :  { %v2704_v3 = vsel %vm2701_vm11, %v2703_v60, %v2699_v59 }
0x1cf8   :  { %v2707_v63 = vmul.f32 %v2704_v3, %v2652_v24  ;;  %v2130_v58 = vsel %vm1252_vm2, %v9639_v41, %v2129_v57 }
0x1cf9   :  { %v2138_v61 = vperm.slane %v2130_v58, %v9303_v14 }
0x1d55   :  { %v2710_v0 = vpop.permute.xlu0 %2709 }
0x1d56   :  { %v2712_v4 = vmul.f32 %v2710_v0, %v2704_v3 }
0x1d58   :  { %2714 = vrot.lane.b32.xlu1 %v2712_v4, %s8674_s28 }
0x1dca   :  { %v2715_v7 = vpop.permute.xlu1 %2714 }
0x1dcb   :  { %v2717_v42 = vadd.f32 %v2715_v7, %v2707_v63 }
0x1dcd   :  { %7393 = vtanh.f32 %v2717_v42 }
0x1dd3   :  { %v7394_v47 = vpop.eup %7393 }
0x1dd4   :  { %2720 = vrot.lane.b32.xlu2 %v7394_v47, %s8673_s14 }
0x1e2e   :  { %v2721_v50 = vpop.permute.xlu2 %2720 }
0x1e2f   :  { %v2723_v8 = vmul.f32 %v2721_v50, %v2704_v3 }
0x1e31   :  { %2725 = vst [vmem:[#allocation1] ss:$2 sm:$0xff] %v2723_v8  ;;  %v2955_v40 = vrot.slane %v2723_v8, 3 }
0x1e33   :  { %v2957_v46 = vsel %vm2922_vm1, %v2723_v8, %v2955_v40  ;;  %v2956_v53 = vsel %vm2920_vm8, %v2723_v8, %v2955_v40 }
0x1e34   :  { %v2958_v54 = vrot.slane %v2957_v46, 1 }
0x1e38   :  { %v2726_v10 = vld.sshfl [vmem:[#allocation1] sm:$0xff pattern:$0x75316420] }
0x1e39   :  { %2727 = vrot.lane.b32.xlu0 %v2726_v10, %s8674_s28 }
0x1eab   :  { %v2728_v12 = vpop.permute.xlu0 %2727 }
0x1eac   :  { %6991 = vmatmul.msk.f32.vlgmr.msra.gmra.mxu1 %vm1101_vm4, %v2728_v12 }
0x1f29   :  { %v2748_v15 = vpop.f32.mrf.mxu1 }
0x1f2a   :  { %v2751_v16 = vadd.f32 %v2748_v15, %v2140_v13 }
0x1f2c   :  { %7395 = vtanh.f32 %v2751_v16  ;;  %v6992_v18 = vmul.f32 -1.442695, %v2751_v16 }
0x1f2e   :  { %7397 = vpow2.f32 %v6992_v18 }
0x1f32   :  { %v7396_v17 = vpop.eup %7395 }
0x1f33   :  { %2774 = vrot.lane.b32.xlu1 %v7396_v17, %s8673_s14 }
0x1f34   :  { %v7398_v48 = vpop.eup %7397 }
0x1f35   :  { %v2755_v20 = vadd.f32 1.0, %v7398_v48 }
0x1f37   :  { %7399 = vrcp.f32 %v2755_v20  ;;  %v2767_v26 = vand.u32 2147483648, %v2755_v20  ;;  %vm2761_vm13 = vweird.f32 %v2755_v20  ;;  %v2765_v27 = vand.u32 2147483647, %v2755_v20 }
0x1f39   :  { %v2768_v29 = vor.u32 1.1754944e-38, %v2767_v26  ;;  %vm2766_vm10 = vcmp.eq.f32.partialorder %v2765_v27, 8.507059e+37 }
0x1f3d   :  { %v7400_v21 = vpop.eup %7399 }
0x1f3e   :  { %v2757_v22 = vmul.f32 %v7400_v21, %v2755_v20  ;;  %vm2762_vm15 = vweird.f32 %v7400_v21 }
0x1f3f   :  { %vm2763_vm14 = vmor %vm2761_vm13, %vm2762_vm15 }
0x1f40   :  { %v2758_v23 = vsub.f32 1.0, %v2757_v22 }
0x1f42   :  { %v2759_v31 = vmul.f32 %v7400_v21, %v2758_v23 }
0x1f44   :  { %v2760_v24 = vadd.f32 %v7400_v21, %v2759_v31 }
0x1f46   :  { %v2764_v28 = vsel %vm2763_vm14, %v7400_v21, %v2760_v24 }
0x1f47   :  { %v2769_v32 = vsel %vm2766_vm10, %v2768_v29, %v2764_v28  ;;  %v11243_v29 = vrot.slane %v9626_v6, 4 }
0x1f48   :  { %v2772_v34 = vmul.f32 %v2769_v32, %v2717_v42 }
0x1fa5   :  { %v2775_v30 = vpop.permute.xlu1 %2774 }
0x1fa6   :  { %v2777_v33 = vmul.f32 %v2775_v30, %v2769_v32 }
0x1fa8   :  { %2779 = vrot.lane.b32.xlu2 %v2777_v33, %s8674_s28 }
0x2002   :  { %v2780_v35 = vpop.permute.xlu2 %2779 }
0x2003   :  { %v2782_v45 = vadd.f32 %v2780_v35, %v2772_v34  ;;  %v2141_v34 = vrot.slane %v2138_v61, 4 }
0x2005   :  { %7401 = vtanh.f32 %v2782_v45  ;;  %v2142_v35 = vsel %vm1252_vm2, 0.0, %v2141_v34 }
0x200b   :  { %v7402_v38 = vpop.eup %7401 }
0x200c   :  { %2785 = vrot.lane.b32.xlu0 %v7402_v38, %s8673_s14 }
0x207e   :  { %v2786_v39 = vpop.permute.xlu0 %2785 }
0x207f   :  { %v2788_v36 = vmul.f32 %v2786_v39, %v2769_v32 }
0x2081   :  { %2790 = vst [vmem:[#allocation1] ss:$2 sm:$0xff] %v2788_v36  ;;  %v2961_v43 = vrot.slane %v2788_v36, 3 }
0x2083   :  { %v2962_v49 = vsel %vm2920_vm8, %v2788_v36, %v2961_v43  ;;  %v2963_v51 = vsel %vm2922_vm1, %v2788_v36, %v2961_v43 }
0x2084   :  { %v2964_v1 = vrot.slane %v2963_v51, 1  ;;  %v3002_v52 = vperm.slane %v2962_v49, 0  ;;  %v900_v49 = vld [vmem:[%s11351_s5 + $0x18] sm:$0xff]  ;;  %v899_v51 = vld [vmem:[%s11351_s5 + $0x10] sm:$0xff] }
0x2085   :  { %3083 = vmatpush.msra.mxu0 %v900_v49 }
0x2086   :  { %v3003_v9 = vperm.slane %v2964_v1, 0  ;;  %v3033_v11 = vsel %vm2920_vm8, %v2956_v53, %v3002_v52  ;;  %v898_v1 = vld [vmem:[%s11351_s5 + $0x8] sm:$0xff]  ;;  %v897_v52 = vld [vmem:[%s11351_s5] sm:$0xff]  ;;  %s11377_s5 = sld [smem:[#allocation124_spill]] }
0x2087   :  { %3084 = vmatpush.msra.mxu0 %v899_v51 }
0x2088   :  { %v2791_v19 = vld.sshfl [vmem:[#allocation1] sm:$0xff pattern:$0x75316420]  ;;  %v3034_v55 = vsel %vm2920_vm8, %v2958_v54, %v3003_v9 }
0x2089   :  { %2792 = vrot.lane.b32.xlu1 %v2791_v19, %s8674_s28  ;;  %3085 = vmatpush.msra.mxu0 %v898_v1 }
0x208b   :  { %3086 = vmatpush.msra.mxu0 %v897_v52 }
0x20fb   :  { %v2793_v56 = vpop.permute.xlu1 %2792 }
0x20fc   :  { %6993 = vmatmul.msk.f32.vlgmr.msrb.gmra.mxu2 %vm1101_vm4, %v2793_v56 }
0x217f   :  { %v2813_v59 = vpop.f32.mrf.mxu2 }
0x2180   :  { %v2816_v60 = vadd.f32 %v2813_v59, %v2138_v61 }
0x2182   :  { %7403 = vtanh.f32 %v2816_v60  ;;  %v6994_v3 = vmul.f32 -1.442695, %v2816_v60 }
0x2184   :  { %7405 = vpow2.f32 %v6994_v3 }
0x2188   :  { %v7404_v0 = vpop.eup %7403 }
0x2189   :  { %2839 = vrot.lane.b32.xlu2 %v7404_v0, %s8673_s14 }
0x218a   :  { %v7406_v4 = vpop.eup %7405 }
0x218b   :  { %v2820_v63 = vadd.f32 1.0, %v7406_v4 }
0x218d   :  { %7407 = vrcp.f32 %v2820_v63  ;;  %v2832_v41 = vand.u32 2147483648, %v2820_v63  ;;  %vm2826_vm15 = vweird.f32 %v2820_v63  ;;  %v2830_v8 = vand.u32 2147483647, %v2820_v63 }
0x218f   :  { %v2833_v12 = vor.u32 1.1754944e-38, %v2832_v41  ;;  %vm2831_vm14 = vcmp.eq.f32.partialorder %v2830_v8, 8.507059e+37 }
0x2193   :  { %v7408_v7 = vpop.eup %7407 }
0x2194   :  { %v2822_v42 = vmul.f32 %v7408_v7, %v2820_v63  ;;  %vm2827_vm11 = vweird.f32 %v7408_v7 }
0x2195   :  { %vm2828_vm13 = vmor %vm2826_vm15, %vm2827_vm11 }
0x2196   :  { %v2823_v47 = vsub.f32 1.0, %v2822_v42  ;;  %v9703_v42 = vld [vmem:[%s11352_s1] ss:$0 sm:$0xff] }
0x2198   :  { %v2824_v44 = vmul.f32 %v7408_v7, %v2823_v47 }
0x219a   :  { %v2825_v50 = vadd.f32 %v7408_v7, %v2824_v44 }
0x219c   :  { %v2829_v10 = vsel %vm2828_vm13, %v7408_v7, %v2825_v50 }
0x219d   :  { %v2834_v13 = vsel %vm2831_vm14, %v2833_v12, %v2829_v10 }
0x219e   :  { %v2837_v16 = vmul.f32 %v2834_v13, %v2782_v45 }
0x21e3   :  { %v2840_v62 = vpop.permute.xlu2 %2839 }
0x21e4   :  { %v2842_v15 = vmul.f32 %v2840_v62, %v2834_v13 }
0x21e6   :  { %2844 = vrot.lane.b32.xlu0 %v2842_v15, %s8674_s28 }
0x2258   :  { %v2845_v17 = vpop.permute.xlu0 %2844 }
0x2259   :  { %v9673_v18 = vadd.f32 %v2845_v17, %v2837_v16 }
0x225b   :  { %7409 = vtanh.f32 %v9673_v18 }
0x2261   :  { %v7410_v48 = vpop.eup %7409 }
0x2262   :  { %2850 = vrot.lane.b32.xlu1 %v7410_v48, %s8673_s14 }
0x22d4   :  { %v2851_v20 = vpop.permute.xlu1 %2850 }
0x22d5   :  { %v2853_v21 = vmul.f32 %v2851_v20, %v2834_v13 }
0x22d7   :  { %2855 = vst [vmem:[#allocation1] ss:$2 sm:$0xff] %v2853_v21  ;;  %v2965_v22 = vrot.slane %v2853_v21, 3 }
0x22d9   :  { %v2966_v23 = vsel %vm2920_vm8, %v2853_v21, %v2965_v22  ;;  %v2967_v31 = vsel %vm2922_vm1, %v2853_v21, %v2965_v22  ;;  %v3109_v21 = vrot.slane %v9703_v42, 4 }
0x22da   :  { %v2968_v24 = vrot.slane %v2967_v31, 1  ;;  %v3006_v26 = vperm.slane %v2966_v23, 0 }
0x22dc   :  { %v3007_v27 = vperm.slane %v2968_v24, 0  ;;  %v9680_v28 = vsel %vm3016_vm3, %v3033_v11, %v3006_v26 }
0x22de   :  { %v2856_v30 = vld.sshfl [vmem:[#allocation1] sm:$0xff pattern:$0x75316420]  ;;  %v9684_v32 = vsel %vm3016_vm3, %v3034_v55, %v3007_v27 }
0x22df   :  { %3045 = vst [vmem:[#allocation1] ss:$2 sm:$0xff] %v9626_v6  ;;  %2857 = vrot.lane.b32.xlu2 %v2856_v30, %s8674_s28 }
0x22e0   :  { %3047 = vst [vmem:[#allocation1 + $0x1] ss:$2 sm:$0xff] %v11243_v29 }
0x22e7   :  { %v3056_v40 = vld.sshfl [vmem:[#allocation1] sm:$0xff pattern:$0x75316420] }
0x2339   :  { %v2858_v33 = vpop.permute.xlu2 %2857 }
0x233a   :  { %6995 = vmatmul.msk.f32.vlgmr.msra.gmra.mxu3 %vm1101_vm4, %v2858_v33 }
0x23bd   :  { %v2878_v45 = vpop.f32.mrf.mxu3 }
0x23be   :  { %v2881_v38 = vadd.f32 %v2878_v45, %v2142_v35 }
0x23c0   :  { %7411 = vtanh.f32 %v2881_v38  ;;  %v6996_v36 = vmul.f32 -1.442695, %v2881_v38 }
0x23c2   :  { %7413 = vpow2.f32 %v6996_v36 }
0x23c6   :  { %v7412_v39 = vpop.eup %7411 }
0x23c7   :  { %2904 = vrot.lane.b32.xlu0 %v7412_v39, %s8673_s14 }
0x23c8   :  { %v7414_v43 = vpop.eup %7413 }
0x23c9   :  { %v2885_v46 = vadd.f32 1.0, %v7414_v43 }
0x23cb   :  { %7415 = vrcp.f32 %v2885_v46  ;;  %v2897_v55 = vand.u32 2147483648, %v2885_v46  ;;  %vm2891_vm10 = vweird.f32 %v2885_v46  ;;  %v2895_v56 = vand.u32 2147483647, %v2885_v46 }
0x23cd   :  { %v2898_v58 = vor.u32 1.1754944e-38, %v2897_v55  ;;  %vm2896_vm15 = vcmp.eq.f32.partialorder %v2895_v56, 8.507059e+37 }
0x23cf   :  { %3059 = vrot.lane.b32.xlu0 %v3056_v40, %s8674_s28 }
0x23d1   :  { %v7416_v53 = vpop.eup %7415 }
0x23d2   :  { %v2887_v54 = vmul.f32 %v7416_v53, %v2885_v46  ;;  %vm2892_vm3 = vweird.f32 %v7416_v53 }
0x23d3   :  { %vm2893_vm11 = vmor %vm2891_vm10, %vm2892_vm3 }
0x23d4   :  { %v2888_v9 = vsub.f32 1.0, %v2887_v54 }
0x23d6   :  { %v2889_v11 = vmul.f32 %v7416_v53, %v2888_v9 }
0x23d8   :  { %v2890_v19 = vadd.f32 %v7416_v53, %v2889_v11 }
0x23da   :  { %v2894_v57 = vsel %vm2893_vm11, %v7416_v53, %v2890_v19 }
0x23db   :  { %v2899_v59 = vsel %vm2896_vm15, %v2898_v58, %v2894_v57 }
0x23dc   :  { %v2902_v3 = vmul.f32 %v2899_v59, %v9673_v18 }
0x2439   :  { %v2905_v61 = vpop.permute.xlu0 %2904 }
0x243a   :  { %v2907_v60 = vmul.f32 %v2905_v61, %v2899_v59 }
0x243c   :  { %2909 = vrot.lane.b32.xlu1 %v2907_v60, %s8674_s28 }
0x2441   :  { %v3060_v0 = vpop.permute.xlu0 %3059 }
0x2442   :  { %6997 = vmatmul.msk.f32.vlgmr.msra.gmra.mxu0 %vm1101_vm4, %v3060_v0 }
0x24ae   :  { %v2910_v4 = vpop.permute.xlu1 %2909 }
0x24af   :  { %v2912_v63 = vadd.f32 %v2910_v4, %v2902_v3 }
0x24b1   :  { %7417 = vtanh.f32 %v2912_v63 }
0x24b7   :  { %v7418_v7 = vpop.eup %7417 }
0x24b8   :  { %2915 = vrot.lane.b32.xlu2 %v7418_v7, %s8673_s14 }
0x24bf   :  { %v3088_v47 = vpop.f32.mrf.mxu0 }
0x24c0   :  { %v9706_v44 = vadd.f32 %v9703_v42, %v3088_v47  ;;  %v3100_v20 = vrot.slane %v3088_v47, 4 }
0x24c2   :  { %3141 = vrot.lane.b32.xlu0 %v9706_v44, %s8675_s12  ;;  %v9727_v22 = vadd.f32 %v3109_v21, %v3100_v20 }
0x2512   :  { %v2916_v50 = vpop.permute.xlu2 %2915 }
0x2513   :  { %v2918_v41 = vmul.f32 %v2916_v50, %v2899_v59 }
0x2515   :  { %v2970_v8 = vrot.slane %v2918_v41, 3 }
0x2517   :  { %v2971_v10 = vsel %vm2920_vm8, %v2918_v41, %v2970_v8  ;;  %v2972_v12 = vsel %vm2922_vm1, %v2918_v41, %v2970_v8 }
0x2518   :  { %v2973_v62 = vrot.slane %v2972_v12, 1  ;;  %v3010_v13 = vperm.slane %v2971_v10, 0 }
0x251a   :  { %v3011_v15 = vperm.slane %v2973_v62, 0  ;;  %v9714_v16 = vsel %vm1073_vm0, %v9680_v28, %v3010_v13 }
0x251b   :  { %3049 = vst [vmem:[#allocation1 + $0x10] ss:$2 sm:$0xff] %v9714_v16 }
0x251c   :  { %v9719_v17 = vsel %vm1073_vm0, %v9684_v32, %v3011_v15  ;;  %vm4746_vm0 = vcmask 93184  }
0x251d   :  { %3055 = vst [vmem:[#allocation1 + $0x21] ss:$2 sm:$0xff] %v9719_v17 }
0x2522   :  { %v3057_v18 = vld.sshfl [vmem:[#allocation1 + $0x10] sm:$0xff pattern:$0x75316420] }
0x2523   :  { %3061 = vrot.lane.b32.xlu1 %v3057_v18, %s8674_s28 }
0x2524   :  { %v3058_v48 = vld.sshfl [vmem:[#allocation1 + $0x20] sm:$0xff pattern:$0x75316420] }
0x2525   :  { %3063 = vrot.lane.b32.xlu2 %v3058_v48, %s8674_s28 }
0x252b   :  { %3143 = vrot.lane.b32.xlu1 %v9727_v22, %s8675_s12 }
0x252d   :  { %3159 = vrot.lane.b32.xlu2 %v9706_v44, %s8676_s4 }
0x2534   :  { %v9755_v28 = vpop.permute.xlu0 %3141 }
0x2535   :  { %v3177_v33 = vrot.slane %v9755_v28, 4 }
0x2537   :  { %v3178_v36 = vsel %vm1252_vm2, %v3177_v33, %v9706_v44 }
0x2538   :  { %v3182_v52 = vperm.slane %v3178_v36, %v9291_v2 }
0x253a   :  { %v3191_v4 = vrot.slane %v3182_v52, 4 }
0x257f   :  { %v3064_v31 = vpop.permute.xlu2 %3063 }
0x2587   :  { %v9763_v30 = vpop.permute.xlu2 %3159 }
0x2588   :  { %v3183_v9 = vrot.slane %v9763_v30, 4 }
0x2595   :  { %v3062_v23 = vpop.permute.xlu1 %3061 }
0x2596   :  { %6998 = vmatmul.msk.f32.gmra.mxu0 %vm1101_vm4, %v3062_v23 }
0x259d   :  { %v9753_v27 = vpop.permute.xlu1 %3143 }
0x259e   :  { %6999 = vmatmul.msk.f32.gmra.mxu0 %vm1101_vm4, %v3064_v31  ;;  %v3205_v35 = vrot.slane %v9753_v27, 4 }
0x25a0   :  { %v3206_v49 = vsel %vm1252_vm2, %v3205_v35, %v9727_v22 }
0x25a1   :  { %v3210_v11 = vperm.slane %v3206_v49, %v9291_v2 }
0x25a3   :  { %v3219_v50 = vrot.slane %v3210_v11, 4 }
0x2613   :  { %v9735_v24 = vpop.f32.mrf.mxu0 }
0x2614   :  { %v9739_v26 = vadd.f32 %v9703_v42, %v9735_v24 }
0x2616   :  { %3127 = vrot.lane.b32.xlu2 %v9739_v26, %s8677_s23  ;;  %3145 = vrot.lane.b32.xlu0 %v9739_v26, %s8675_s12 }
0x2617   :  { %3163 = vrot.lane.b32.xlu1 %v9739_v26, %s8676_s4 }
0x261b   :  { %v9796_v53 = vpop.f32.mrf.mxu0 }
0x261c   :  { %v3102_v60 = vrot.slane %v9796_v53, 4 }
0x261e   :  { %3125 = vrot.lane.b32.xlu2 %v9727_v22, %s8677_s23  ;;  %3161 = vrot.lane.b32.xlu0 %v9727_v22, %s8676_s4  ;;  %v9828_v15 = vadd.f32 %v9703_v42, %v3102_v60 }
0x261f   :  { %3123 = vrot.lane.b32.xlu1 %v9706_v44, %s8677_s23 }
0x2626   :  { %3531 = vrot.lane.b32.xlu0 %v9706_v44, %s8678_s27  ;;  %3545 = vrot.lane.b32.xlu2 %v9753_v27, %s8678_s27 }
0x2627   :  { %3543 = vrot.lane.b32.xlu1 %v9755_v28, %s8678_s27 }
0x262e   :  { %3549 = vrot.lane.b32.xlu2 %v9763_v30, %s8678_s27 }
0x262f   :  { %3533 = vrot.lane.b32.xlu1 %v9727_v22, %s8678_s27 }
0x2637   :  { %3535 = vrot.lane.b32.xlu1 %v9739_v26, %s8678_s27 }
0x2670   :  { %v9771_v32 = vpop.permute.xlu2 %3127 }
0x2678   :  { %v9803_v56 = vpop.permute.xlu2 %3125 }
0x2688   :  { %v9774_v34 = vpop.permute.xlu0 %3145 }
0x2689   :  { %v3233_v45 = vrot.slane %v9774_v34, 4  ;;  %v9778_v38 = vpop.permute.xlu1 %3163  ;;  %3547 = vrot.lane.b32.xlu0 %v9774_v34, %s8678_s27 }
0x268a   :  { %v3239_v39 = vrot.slane %v9778_v38, 4  ;;  %3553 = vrot.lane.b32.xlu2 %v9778_v38, %s8678_s27 }
0x268b   :  { %v3234_v40 = vsel %vm1252_vm2, %v3233_v45, %v9739_v26 }
0x268c   :  { %v3238_v43 = vperm.slane %v3234_v40, %v9291_v2  ;;  %v3240_v46 = vsel %vm1252_vm2, %v3239_v39, %v9771_v32 }
0x268d   :  { %v3244_v51 = vperm.slane %v3240_v46, %v9291_v2 }
0x268e   :  { %v3247_v1 = vrot.slane %v3238_v43, 4 }
0x268f   :  { %v3245_v54 = vrot.slane %v3244_v51, 4 }
0x2690   :  { %v3248_v19 = vsel %vm1252_vm2, %v3244_v51, %v3247_v1  ;;  %v9801_v55 = vpop.permute.xlu0 %3161 }
0x2691   :  { %v3246_v57 = vsel %vm1252_vm2, %v3245_v54, %v3238_v43  ;;  %v3256_v58 = vperm.slane %v3248_v19, %v9303_v14  ;;  %v3211_v61 = vrot.slane %v9801_v55, 4  ;;  %v9808_v59 = vpop.permute.xlu1 %3123  ;;  %3541 = vrot.lane.b32.xlu0 %v9771_v32, %s8678_s27  ;;  %v3101_v19 = vrot.slane %v9735_v24, 4 }
0x2692   :  { %v3252_v0 = vperm.slane %v3246_v57, %v9303_v14  ;;  %v3184_v3 = vsel %vm1252_vm2, %v3183_v9, %v9808_v59  ;;  %3539 = vrot.lane.b32.xlu2 %v9803_v56, %s8678_s27  ;;  %3537 = vrot.lane.b32.xlu1 %v9808_v59, %s8678_s27 }
0x2693   :  { %v3259_v63 = vrot.slane %v3256_v58, 4  ;;  %v3212_v7 = vsel %vm1252_vm2, %v3211_v61, %v9803_v56  ;;  %v3188_v47 = vperm.slane %v3184_v3, %v9291_v2 }
0x2694   :  { %v3257_v41 = vrot.slane %v3252_v0, 4  ;;  %v3216_v8 = vperm.slane %v3212_v7, %v9291_v2 }
0x2695   :  { %v3260_v10 = vsel %vm1252_vm2, 0.0, %v3259_v63  ;;  %v3399_v12 = vsel %vm1252_vm2, %v3259_v63, %v3252_v0  ;;  %v3189_v62 = vrot.slane %v3188_v47, 4  ;;  %v3192_v13 = vsel %vm1252_vm2, %v3188_v47, %v3191_v4 }
0x2696   :  { %v3403_v18 = vperm.slane %v3399_v12, %v9291_v2  ;;  %v3404_v48 = vrot.slane %v3260_v10, 4  ;;  %v3217_v20 = vrot.slane %v3216_v8, 4  ;;  %v3258_v23 = vsel %vm1252_vm2, 0.0, %v3257_v41 }
0x2697   :  { %v3220_v31 = vsel %vm1252_vm2, %v3216_v8, %v3219_v50  ;;  %v3190_v33 = vsel %vm1252_vm2, %v3189_v62, %v3182_v52  ;;  %v3200_v35 = vperm.slane %v3192_v13, %v9303_v14  ;;  %v9864_v8 = vadd.f32 %v9703_v42, %v3101_v19 }
0x2698   :  { %v3405_v45 = vsel %vm1252_vm2, %v3404_v48, %v3258_v23  ;;  %v3412_v39 = vrot.slane %v3403_v18, 4  ;;  %v3218_v40 = vsel %vm1252_vm2, %v3217_v20, %v3210_v11  ;;  %v3228_v36 = vperm.slane %v3220_v31, %v9303_v14 }
0x2699   :  { %v3409_v43 = vperm.slane %v3405_v45, %v9291_v2  ;;  %v3224_v46 = vperm.slane %v3218_v40, %v9303_v14  ;;  %v3196_v49 = vperm.slane %v3190_v33, %v9303_v14  ;;  %v3203_v51 = vrot.slane %v3200_v35, 4  ;;  %3551 = vrot.lane.b32.xlu0 %v9801_v55, %s8678_s27 }
0x269a   :  { %v3231_v1 = vrot.slane %v3228_v36, 4  ;;  %3133 = vrot.lane.b32.xlu2 %v9828_v15, %s8677_s23  ;;  %3169 = vrot.lane.b32.xlu1 %v9828_v15, %s8676_s4  ;;  %v9869_v10 = vadd.f32 %v3109_v21, %v9796_v53  ;;  %v3546_v36 = vpop.permute.xlu2 %3545 }
0x269b   :  { %v3410_v52 = vrot.slane %v3409_v43, 4  ;;  %v9848_v54 = vsel %vm1252_vm2, %v3409_v43, %v3412_v39  ;;  %v3229_v9 = vrot.slane %v3224_v46, 4  ;;  %v3201_v11 = vrot.slane %v3196_v49, 4 }
0x269c   :  { %v3232_v57 = vsel %vm1252_vm2, 0.0, %v3231_v1  ;;  %v3372_v58 = vsel %vm1252_vm2, %v3231_v1, %v3224_v46  ;;  %v3204_v61 = vsel %vm1252_vm2, 0.0, %v3203_v51  ;;  %v3345_v50 = vsel %vm1252_vm2, %v3203_v51, %v3196_v49  ;;  %v3544_v49 = vpop.permute.xlu1 %3543 }
0x269d   :  { %v3411_v60 = vsel %vm1252_vm2, %v3410_v52, %v3403_v18  ;;  %v3230_v0 = vsel %vm1252_vm2, 0.0, %v3229_v9  ;;  %v3376_v3 = vperm.slane %v3372_v58, %v9291_v2  ;;  %v3377_v4 = vrot.slane %v3232_v57, 4  ;;  %v3532_v52 = vpop.permute.xlu0 %3531 }
0x269e   :  { %v9858_v63 = vperm.slane %v3411_v60, %v9303_v14  ;;  %v3202_v7 = vsel %vm1252_vm2, 0.0, %v3201_v11  ;;  %v3350_v41 = vrot.slane %v3204_v61, 4  ;;  %v3349_v13 = vperm.slane %v3345_v50, %v9291_v2 }
0x269f   :  { %v3378_v24 = vsel %vm1252_vm2, %v3377_v4, %v3230_v0  ;;  %v3385_v47 = vrot.slane %v3376_v3, 4  ;;  %v3603_v11 = vrot.slane %v3544_v49, 4 }
0x26a0   :  { %v3509_v12 = vmul.f32 0.35355338, %v9858_v63  ;;  %v3382_v62 = vperm.slane %v3378_v24, %v9291_v2  ;;  %v3351_v18 = vsel %vm1252_vm2, %v3350_v41, %v3202_v7  ;;  %v3358_v21 = vrot.slane %v3349_v13, 4 }
0x26a1   :  { %3151 = vrot.lane.b32.xlu0 %v9828_v15, %s8675_s12  ;;  %v3355_v42 = vperm.slane %v3351_v18, %v9291_v2  ;;  %v3604_v0 = vsel %vm1252_vm2, %v3603_v11, %v3532_v52 }
0x26a2   :  { %4342 = vst [vmem:[#allocation1 + $0x10] ss:$2 sm:$0xff] %v3509_v12  ;;  %v3383_v48 = vrot.slane %v3382_v62, 4  ;;  %v9878_v20 = vsel %vm1252_vm2, %v3382_v62, %v3385_v47  ;;  %3165 = vrot.lane.b32.xlu2 %v9864_v8, %s8676_s4  ;;  %3149 = vrot.lane.b32.xlu1 %v9869_v10, %s8675_s12  ;;  %v3550_v43 = vpop.permute.xlu2 %3549  ;;  %v3608_v4 = vperm.slane %v3604_v0, %v9291_v2  ;;  %v3631_v12 = vrot.slane %v3546_v36, 4 }
0x26a3   :  { %v3356_v23 = vrot.slane %v3355_v42, 4  ;;  %v9890_v33 = vsel %vm1252_vm2, %v3355_v42, %v3358_v21  ;;  %v3609_v24 = vrot.slane %v3550_v43, 4 }
0x26a4   :  { %v3384_v53 = vsel %vm1252_vm2, %v3383_v48, %v3376_v3  ;;  %v3534_v1 = vpop.permute.xlu1 %3533  ;;  %v3617_v48 = vrot.slane %v3608_v4, 4 }
0x26a5   :  { %v9887_v31 = vperm.slane %v3384_v53, %v9303_v14  ;;  %v3357_v35 = vsel %vm1252_vm2, %v3356_v23, %v3349_v13  ;;  %v3632_v21 = vsel %vm1252_vm2, %v3631_v12, %v3534_v1 }
0x26a6   :  { %v9895_v39 = vperm.slane %v3357_v35, %v9303_v14 }
0x26a7   :  { %v3508_v45 = vmul.f32 0.35355338, %v9887_v31 }
0x26a8   :  { %v3507_v40 = vmul.f32 0.35355338, %v9895_v39 }
0x26a9   :  { %4340 = vst [vmem:[#allocation1 + $0x1] ss:$2 sm:$0xff] %v3508_v45  ;;  %3147 = vrot.lane.b32.xlu0 %v9864_v8, %s8675_s12 }
0x26aa   :  { %3131 = vrot.lane.b32.xlu2 %v9869_v10, %s8677_s23  ;;  %3129 = vrot.lane.b32.xlu1 %v9864_v8, %s8677_s23  ;;  %4338 = vst [vmem:[#allocation1] ss:$2 sm:$0xff] %v3507_v40 }
0x26ac   :  { %v3536_v57 = vpop.permute.xlu1 %3535 }
0x26b1   :  { %3167 = vrot.lane.b32.xlu0 %v9869_v10, %s8676_s4 }
0x26b2   :  { %3559 = vrot.lane.b32.xlu1 %v9828_v15, %s8678_s27 }
0x26b9   :  { %3555 = vrot.lane.b32.xlu0 %v9864_v8, %s8678_s27 }
0x26ba   :  { %3557 = vrot.lane.b32.xlu1 %v9869_v10, %s8678_s27 }
0x26e4   :  { %v3554_v46 = vpop.permute.xlu2 %3553 }
0x26e5   :  { %v3665_v7 = vrot.slane %v3554_v46, 4  ;;  %v3636_v46 = vperm.slane %v3632_v21, %v9291_v2 }
0x26ec   :  { %v3540_v51 = vpop.permute.xlu2 %3539 }
0x26f4   :  { %v9912_v9 = vpop.permute.xlu2 %3133 }
0x26fb   :  { %v3548_v19 = vpop.permute.xlu0 %3547 }
0x26fc   :  { %v3659_v58 = vrot.slane %v3548_v19, 4  ;;  %v9914_v61 = vpop.permute.xlu2 %3165 }
0x26fd   :  { %3573 = vrot.lane.b32.xlu2 %v9914_v61, %s8678_s27 }
0x26fe   :  { %v3660_v60 = vsel %vm1252_vm2, %v3659_v58, %v3536_v57 }
0x26ff   :  { %v3664_v3 = vperm.slane %v3660_v60, %v9291_v2 }
0x2701   :  { %v3673_v62 = vrot.slane %v3664_v3, 4 }
0x2703   :  { %v3542_v47 = vpop.permute.xlu0 %3541 }
0x2704   :  { %v3666_v50 = vsel %vm1252_vm2, %v3665_v7, %v3542_v47  ;;  %v3538_v41 = vpop.permute.xlu1 %3537 }
0x2705   :  { %v3670_v13 = vperm.slane %v3666_v50, %v9291_v2  ;;  %v3610_v18 = vsel %vm1252_vm2, %v3609_v24, %v3538_v41  ;;  %v3645_v50 = vrot.slane %v3636_v46, 4 }
0x2706   :  { %v3614_v42 = vperm.slane %v3610_v18, %v9291_v2 }
0x2707   :  { %v3671_v53 = vrot.slane %v3670_v13, 4  ;;  %v3674_v23 = vsel %vm1252_vm2, %v3670_v13, %v3673_v62 }
0x2708   :  { %v3682_v35 = vperm.slane %v3674_v23, %v9303_v14  ;;  %v3615_v45 = vrot.slane %v3614_v42, 4  ;;  %v3618_v40 = vsel %vm1252_vm2, %v3614_v42, %v3617_v48 }
0x2709   :  { %v3672_v36 = vsel %vm1252_vm2, %v3671_v53, %v3664_v3  ;;  %v3626_v43 = vperm.slane %v3618_v40, %v9303_v14 }
0x270a   :  { %v3678_v49 = vperm.slane %v3672_v36, %v9303_v14  ;;  %v3685_v52 = vrot.slane %v3682_v35, 4  ;;  %v3616_v11 = vsel %vm1252_vm2, %v3615_v45, %v3608_v4 }
0x270b   :  { %v3622_v1 = vperm.slane %v3616_v11, %v9303_v14  ;;  %v3629_v19 = vrot.slane %v3626_v43, 4  ;;  %v3552_v57 = vpop.permute.xlu0 %3551 }
0x270c   :  { %v3683_v58 = vrot.slane %v3678_v49, 4  ;;  %v3686_v60 = vsel %vm1252_vm2, 0.0, %v3685_v52  ;;  %v3637_v0 = vrot.slane %v3552_v57, 4  ;;  %v9937_v7 = vpop.permute.xlu1 %3169  ;;  %v3825_v62 = vsel %vm1252_vm2, %v3685_v52, %v3678_v49 }
0x270d   :  { %v3830_v3 = vrot.slane %v3686_v60, 4  ;;  %v3627_v24 = vrot.slane %v3622_v1, 4  ;;  %v3630_v47 = vsel %vm1252_vm2, 0.0, %v3629_v19  ;;  %v3771_v48 = vsel %vm1252_vm2, %v3629_v19, %v3622_v1 }
0x270e   :  { %v3684_v41 = vsel %vm1252_vm2, 0.0, %v3683_v58  ;;  %v3776_v12 = vrot.slane %v3630_v47, 4  ;;  %v3638_v4 = vsel %vm1252_vm2, %v3637_v0, %v3540_v51  ;;  %v3323_v23 = vrot.slane %v9937_v7, 4  ;;  %v9977_v0 = vld.sshfl [vmem:[#allocation1 + $0x10] sm:$0xff pattern:$0x75316420] }
0x270f   :  { %v3831_v13 = vsel %vm1252_vm2, %v3830_v3, %v3684_v41  ;;  %v3628_v18 = vsel %vm1252_vm2, 0.0, %v3627_v24  ;;  %v3642_v53 = vperm.slane %v3638_v4, %v9291_v2  ;;  %v9956_v51 = vperm.slane %v3825_v62, %v9291_v2  ;;  %v9987_v47 = vld.sshfl [vmem:[#allocation1] sm:$0xff pattern:$0x75316420] }
0x2710   :  { %v9947_v42 = vperm.slane %v3831_v13, %v9291_v2  ;;  %v3777_v21 = vsel %vm1252_vm2, %v3776_v12, %v3628_v18  ;;  %v9961_v43 = vperm.slane %v3771_v48, %v9291_v2  ;;  %v3324_v57 = vsel %vm1252_vm2, %v3323_v23, %v9912_v9 }
0x2711   :  { %v9953_v35 = vperm.slane %v3777_v21, %v9291_v2  ;;  %v3643_v40 = vrot.slane %v3642_v53, 4  ;;  %v3646_v36 = vsel %vm1252_vm2, %v3642_v53, %v3645_v50  ;;  %v3422_v60 = vrot.slane %v9858_v63, 4 }
0x2712   :  { %v3836_v45 = vrot.slane %v9947_v42, 4  ;;  %v3654_v52 = vperm.slane %v3646_v36, %v9303_v14  ;;  %v3328_v12 = vperm.slane %v3324_v57, %v9291_v2  ;;  %v3267_v21 = vrot.slane %v9914_v61, 4 }
0x2713   :  { %v3782_v49 = vrot.slane %v9953_v35, 4  ;;  %v9965_v11 = vpop.permute.xlu0 %3151  ;;  %v3644_v19 = vsel %vm1252_vm2, %v3643_v40, %v3636_v46  ;;  %v3423_v13 = vsel %vm1252_vm2, 0.0, %v3422_v60  ;;  %v3395_v60 = vrot.slane %v9887_v31, 4 }
0x2714   :  { %v3837_v1 = vsel %vm1252_vm2, %v3836_v45, %v9956_v51  ;;  %v9972_v58 = vpop.permute.xlu1 %3149  ;;  %3571 = vrot.lane.b32.xlu0 %v9965_v11, %s8678_s27  ;;  %v3650_v46 = vperm.slane %v3644_v19, %v9303_v14  ;;  %v3657_v41 = vrot.slane %v3654_v52, 4  ;;  %v3317_v4 = vrot.slane %v9965_v11, 4 }
0x2715   :  { %v9980_v3 = vperm.slane %v3837_v1, %v9303_v14  ;;  %v3783_v24 = vsel %vm1252_vm2, %v3782_v49, %v9961_v43  ;;  %3569 = vrot.lane.b32.xlu2 %v9972_v58, %s8678_s27  ;;  %v3329_v40 = vrot.slane %v3328_v12, 4  ;;  %v3512_v52 = vmul.f32 0.35355338, %v3423_v13 }
0x2716   :  { %v9990_v50 = vperm.slane %v3783_v24, %v9303_v14  ;;  %v3655_v63 = vrot.slane %v3650_v46, 4  ;;  %v3658_v62 = vsel %vm1252_vm2, 0.0, %v3657_v41  ;;  %v3318_v53 = vsel %vm1252_vm2, %v3317_v4, %v9828_v15 }
0x2717   :  { %4352 = vst [vmem:[#allocation1 + $0x10] ss:$2 sm:$0xff] %v9980_v3  ;;  %v3803_v48 = vrot.slane %v3658_v62, 4  ;;  %v3798_v23 = vsel %vm1252_vm2, %v3657_v41, %v3650_v46  ;;  %v3322_v36 = vperm.slane %v3318_v53, %v9291_v2 }
0x2718   :  { %4348 = vst [vmem:[#allocation1] ss:$2 sm:$0xff] %v9990_v50  ;;  %v3656_v18 = vsel %vm1252_vm2, 0.0, %v3655_v63  ;;  %v10024_v4 = vperm.slane %v3798_v23, %v9291_v2 }
0x2719   :  { %v3804_v45 = vsel %vm1252_vm2, %v3803_v48, %v3656_v18  ;;  %v3330_v24 = vsel %vm1252_vm2, %v3329_v40, %v3322_v36  ;;  %v3331_v46 = vrot.slane %v3322_v36, 4  ;;  %v3368_v18 = vrot.slane %v9895_v39, 4 }
0x271a   :  { %v10008_v1 = vperm.slane %v3804_v45, %v9291_v2  ;;  %v3336_v13 = vperm.slane %v3330_v24, %v9303_v14  ;;  %v3848_v36 = vrot.slane %v9980_v3, 4 }
0x271b   :  { %v10005_v49 = vpop.permute.xlu0 %3147  ;;  %v3332_v48 = vsel %vm1252_vm2, %v3328_v12, %v3331_v46  ;;  %v10045_v12 = vperm.slane %v9848_v54, %v9303_v14 }
0x271c   :  { %v3261_v19 = vrot.slane %v10005_v49, 4  ;;  %v10011_v57 = vpop.permute.xlu1 %3129  ;;  %3565 = vrot.lane.b32.xlu0 %v9912_v9, %s8678_s27  ;;  %3567 = vrot.lane.b32.xlu1 %v10005_v49, %s8678_s27  ;;  %v3809_v62 = vrot.slane %v10008_v1, 4  ;;  %v3340_v45 = vperm.slane %v3332_v48, %v9303_v14  ;;  %v10055_v48 = vpop.permute.xlu2 %3131 }
0x271d   :  { %v3268_v41 = vsel %vm1252_vm2, %v3267_v21, %v10011_v57  ;;  %3577 = vrot.lane.b32.xlu2 %v9937_v7, %s8678_s27  ;;  %v3289_v21 = vrot.slane %v9972_v58, 4 }
0x271e   :  { %v4354_v63 = vld.sshfl [vmem:[#allocation1 + $0x10] sm:$0xff pattern:$0x75316420]  ;;  %v3262_v31 = vsel %vm1252_vm2, %v3261_v19, %v9864_v8  ;;  %v3810_v23 = vsel %vm1252_vm2, %v3809_v62, %v10024_v4  ;;  %v3272_v40 = vperm.slane %v3268_v41, %v9291_v2  ;;  %v3341_v19 = vrot.slane %v3336_v13, 4 }
0x271f   :  { %4393 = vst [vmem:[#allocation1 + $0x10] ss:$2 sm:$0xff] %v3512_v52  ;;  %v3266_v53 = vperm.slane %v3262_v31, %v9291_v2  ;;  %7000 = vmatpush.xpose.msk.msrb.mxu1 %vm1335_vm5, %v4354_v63  ;;  %v10041_v39 = vperm.slane %v3810_v23, %v9303_v14  ;;  %v3343_v24 = vrot.slane %v3340_v45, 4  ;;  %v3396_v63 = vsel %vm1252_vm2, 0.0, %v3395_v60 }
0x2720   :  { %v3273_v46 = vrot.slane %v3272_v40, 4  ;;  %v3369_v62 = vsel %vm1252_vm2, 0.0, %v3368_v18  ;;  %v3290_v3 = vsel %vm1252_vm2, %v3289_v21, %v9869_v10  ;;  %v3849_v18 = vsel %vm1252_vm2, 0.0, %v3848_v36 }
0x2721   :  { %v3275_v52 = vrot.slane %v3266_v53, 4  ;;  %4350 = vst [vmem:[#allocation1 + $0x1] ss:$2 sm:$0xff] %v10041_v39  ;;  %v3344_v54 = vsel %vm1252_vm2, 0.0, %v3343_v24  ;;  %v3480_v23 = vsel %vm1252_vm2, %v3343_v24, %v3336_v13  ;;  %v3294_v24 = vperm.slane %v3290_v3, %v9291_v2 }
0x2722   :  { %v3274_v45 = vsel %vm1252_vm2, %v3273_v46, %v3266_v53  ;;  %v10067_v21 = vperm.slane %v3480_v23, %v9291_v2  ;;  %v3342_v53 = vsel %vm1252_vm2, 0.0, %v3341_v19  ;;  %v3511_v5 = vmul.f32 0.35355338, %v3396_v63 }
0x2723   :  { %v3276_v41 = vsel %vm1252_vm2, %v3272_v40, %v3275_v52  ;;  %v10053_v31 = vpop.permute.xlu0 %3167  ;;  %v3485_v40 = vrot.slane %v3344_v54, 4  ;;  %v3280_v52 = vperm.slane %v3274_v45, %v9303_v14  ;;  %v3510_v3 = vmul.f32 0.35355338, %v3369_v62 }
0x2724   :  { %v3284_v60 = vperm.slane %v3276_v41, %v9303_v14  ;;  %3575 = vrot.lane.b32.xlu0 %v10053_v31, %s8678_s27  ;;  %3561 = vrot.lane.b32.xlu1 %v10011_v57, %s8678_s27  ;;  %v3295_v41 = vrot.slane %v10053_v31, 4  ;;  %v3493_v54 = vrot.slane %v10067_v21, 4 }
0x2725   :  { %3563 = vrot.lane.b32.xlu2 %v10055_v48, %s8678_s27  ;;  %v3486_v36 = vsel %vm1252_vm2, %v3485_v40, %v3342_v53  ;;  %v3285_v23 = vrot.slane %v3280_v52, 4 }
0x2726   :  { %v10072_v13 = vld.sshfl [vmem:[#allocation1 + $0x10] sm:$0xff pattern:$0x75316420]  ;;  %v3287_v46 = vrot.slane %v3284_v60, 4  ;;  %v10080_v45 = vperm.slane %v3486_v36, %v9291_v2  ;;  %v3296_v19 = vsel %vm1252_vm2, %v3295_v41, %v10055_v48  ;;  %v3303_v36 = vrot.slane %v3294_v24, 4 }
0x2727   :  { %4403 = vst [vmem:[#allocation1 + $0x10] ss:$2 sm:$0xff] %v3849_v18  ;;  %v3300_v18 = vperm.slane %v3296_v19, %v9291_v2  ;;  %v3286_v6 = vsel %vm1252_vm2, 0.0, %v3285_v23  ;;  %v3515_v41 = vmul.f32 0.35355338, %v10045_v12 }
0x2728   :  { %v3288_v29 = vsel %vm1252_vm2, 0.0, %v3287_v46  ;;  %v3426_v37 = vsel %vm1252_vm2, %v3287_v46, %v3280_v52  ;;  %v4353_v40 = vld.sshfl [vmem:[#allocation1] sm:$0xff pattern:$0x75316420]  ;;  %v10092_v53 = vsel %vm1252_vm2, %v10080_v45, %v3493_v54 }
0x2729   :  { %v10087_v60 = vperm.slane %v3426_v37, %v9291_v2  ;;  %v3431_v63 = vrot.slane %v3288_v29, 4  ;;  %4389 = vst [vmem:[#allocation1] ss:$2 sm:$0xff] %v3510_v3  ;;  %v3301_v62 = vrot.slane %v3300_v18, 4  ;;  %7001 = vmatpush.xpose.msk.msrb.mxu1 %vm1335_vm5, %v4353_v40  ;;  %v3304_v29 = vsel %vm1252_vm2, %v3300_v18, %v3303_v36 }
0x272a   :  { %4391 = vst [vmem:[#allocation1 + $0x1] ss:$2 sm:$0xff] %v3511_v5  ;;  %v3838_v5 = vrot.slane %v9956_v51, 4 }
0x272b   :  { %v3432_v52 = vsel %vm1252_vm2, %v3431_v63, %v3286_v6  ;;  %v3439_v46 = vrot.slane %v10087_v60, 4  ;;  %v3302_v6 = vsel %vm1252_vm2, %v3301_v62, %v3294_v24 }
0x272c   :  { %v10099_v37 = vperm.slane %v3432_v52, %v9291_v2  ;;  %3949 = vrot.lane.b32.xlu0 %v9774_v34, %s8673_s14  ;;  %3937 = vrot.lane.b32.xlu1 %v9739_v26, %s8673_s14  ;;  %v3308_v19 = vperm.slane %v3302_v6, %v9303_v14  ;;  %v3312_v34 = vperm.slane %v3304_v29, %v9303_v14  ;;  %v3794_v26 = vrot.slane %v9990_v50, 4 }
0x272d   :  { %3945 = vrot.lane.b32.xlu2 %v9755_v28, %s8673_s14  ;;  %7002 = vmatmul.msk.f32.vlgmr.msrb.gmra.mxu1 %vm1335_vm5, %v9987_v47  ;;  %v3821_v28 = vrot.slane %v10041_v39, 4  ;;  %v3839_v3 = vsel %vm1252_vm2, %v9947_v42, %v3838_v5  ;;  %v3424_v29 = vrot.slane %v10045_v12, 4 }
0x272e   :  { %v4405_v54 = vld.sshfl [vmem:[#allocation1 + $0x10] sm:$0xff pattern:$0x75316420]  ;;  %v10113_v23 = vsel %vm1252_vm2, %v10099_v37, %v3439_v46  ;;  %v3313_v51 = vrot.slane %v3308_v19, 4  ;;  %v3315_v24 = vrot.slane %v3312_v34, 4  ;;  %v3795_v47 = vsel %vm1252_vm2, 0.0, %v3794_v26 }
0x272f   :  { %4444 = vst [vmem:[#allocation1 + $0x10] ss:$2 sm:$0xff] %v3515_v41  ;;  %7004 = vmatpush.xpose.msk.msra.mxu2 %vm1335_vm5, %v4405_v54  ;;  %v3822_v39 = vsel %vm1252_vm2, 0.0, %v3821_v28  ;;  %v3847_v42 = vperm.slane %v3839_v3, %v9303_v14  ;;  %v3425_v12 = vsel %vm1252_vm2, 0.0, %v3424_v29  ;;  %v3811_v34 = vrot.slane %v10024_v4, 4 }
0x2730   :  { %v3314_v63 = vsel %vm1252_vm2, 0.0, %v3313_v51  ;;  %v3316_v18 = vsel %vm1252_vm2, 0.0, %v3315_v24  ;;  %v3453_v40 = vsel %vm1252_vm2, %v3315_v24, %v3308_v19 }
0x2731   :  { %v4394_v36 = vld.sshfl [vmem:[#allocation1] sm:$0xff pattern:$0x75316420]  ;;  %v10129_v50 = vperm.slane %v3453_v40, %v9291_v2  ;;  %v3458_v52 = vrot.slane %v3316_v18, 4  ;;  %v3812_v26 = vsel %vm1252_vm2, %v10008_v1, %v3811_v34 }
0x2732   :  { %4399 = vst [vmem:[#allocation1] ss:$2 sm:$0xff] %v3795_v47 }
0x2733   :  { %4401 = vst [vmem:[#allocation1 + $0x1] ss:$2 sm:$0xff] %v3822_v39  ;;  %v3459_v46 = vsel %vm1252_vm2, %v3458_v52, %v3314_v63  ;;  %v3466_v62 = vrot.slane %v10129_v50, 4 }
0x2734   :  { %3947 = vrot.lane.b32.xlu0 %v9753_v27, %s8673_s14  ;;  %3955 = vrot.lane.b32.xlu1 %v9778_v38, %s8673_s14  ;;  %v10145_v6 = vperm.slane %v3459_v46, %v9291_v2  ;;  %v3367_v27 = vperm.slane %v9890_v33, %v9303_v14  ;;  %v3394_v38 = vperm.slane %v9878_v20, %v9303_v14  ;;  %v3518_v33 = vmul.f32 0.35355338, %v3425_v12 }
0x2735   :  { %3933 = vrot.lane.b32.xlu2 %v9706_v44, %s8673_s14  ;;  %7003 = vmatmul.msk.f32.gmra.mxu1 %vm1335_vm5, %v9977_v0  ;;  %v3784_v0 = vrot.slane %v9961_v43, 4  ;;  %v3491_v43 = vrot.slane %v10080_v45, 4  ;;  %v3820_v45 = vperm.slane %v3812_v26, %v9303_v14 }
0x2736   :  { %v10142_v41 = vld.sshfl [vmem:[#allocation1 + $0x10] sm:$0xff pattern:$0x75316420]  ;;  %v10155_v44 = vsel %vm1252_vm2, %v10145_v6, %v3466_v62  ;;  %v3513_v5 = vmul.f32 0.35355338, %v3367_v27  ;;  %v3397_v4 = vrot.slane %v3394_v38, 4  ;;  %v3556_v62 = vpop.permute.xlu0 %3555 }
0x2737   :  { %4454 = vst [vmem:[#allocation1 + $0x10] ss:$2 sm:$0xff] %v3847_v42  ;;  %v3514_v54 = vmul.f32 0.35355338, %v3394_v38  ;;  %v3492_v1 = vsel %vm1252_vm2, %v3491_v43, %v10067_v21  ;;  %v3370_v24 = vrot.slane %v3367_v27, 4  ;;  %v3464_v40 = vrot.slane %v10145_v6, 4 }
0x273a   :  { %v4404_v19 = vld.sshfl [vmem:[#allocation1] sm:$0xff pattern:$0x75316420] }
0x273b   :  { %4440 = vst [vmem:[#allocation1] ss:$2 sm:$0xff] %v3513_v5  ;;  %7005 = vmatpush.xpose.msk.msra.mxu2 %vm1335_vm5, %v4404_v19 }
0x273c   :  { %3935 = vrot.lane.b32.xlu0 %v9727_v22, %s8673_s14  ;;  %3943 = vrot.lane.b32.xlu1 %v9771_v32, %s8673_s14  ;;  %4442 = vst [vmem:[#allocation1 + $0x1] ss:$2 sm:$0xff] %v3514_v54  ;;  %v3785_v22 = vsel %vm1252_vm2, %v9953_v35, %v3784_v0  ;;  %v3850_v32 = vrot.slane %v3847_v42, 4  ;;  %v3560_v42 = vpop.permute.xlu1 %3559 }
0x273d   :  { %3951 = vrot.lane.b32.xlu2 %v9763_v30, %s8673_s14  ;;  %v3793_v30 = vperm.slane %v3785_v22, %v9303_v14 }
0x273e   :  { %v4456_v20 = vld.sshfl [vmem:[#allocation1 + $0x10] sm:$0xff pattern:$0x75316420]  ;;  %7006 = vmatmul.msk.f32.vlgmr.msra.gmra.mxu2 %vm1335_vm5, %v4394_v36  ;;  %v3851_v35 = vsel %vm1252_vm2, 0.0, %v3850_v32 }
0x273f   :  { %4495 = vst [vmem:[#allocation1 + $0x10] ss:$2 sm:$0xff] %v3518_v33  ;;  %7008 = vmatpush.xpose.msk.msrb.mxu3 %vm1335_vm5, %v4456_v20 }
0x2743   :  { %v4445_v28 = vld.sshfl [vmem:[#allocation1] sm:$0xff pattern:$0x75316420] }
0x2744   :  { %3953 = vrot.lane.b32.xlu0 %v9801_v55, %s8673_s14  ;;  %3939 = vrot.lane.b32.xlu1 %v9808_v59, %s8673_s14  ;;  %4450 = vst [vmem:[#allocation1] ss:$2 sm:$0xff] %v3793_v30  ;;  %v10188_v55 = vperm.slane %v3492_v1, %v9303_v14  ;;  %v3371_v59 = vsel %vm1252_vm2, 0.0, %v3370_v24  ;;  %v3558_v29 = vpop.permute.xlu1 %3557 }
0x2745   :  { %3941 = vrot.lane.b32.xlu2 %v9803_v56, %s8673_s14  ;;  %4452 = vst [vmem:[#allocation1 + $0x1] ss:$2 sm:$0xff] %v3820_v45  ;;  %v3398_v56 = vsel %vm1252_vm2, 0.0, %v3397_v4 }
0x2746   :  { %v4497_v51 = vld.sshfl [vmem:[#allocation1 + $0x10] sm:$0xff pattern:$0x75316420]  ;;  %7007 = vmatmul.msk.f32.gmra.mxu2 %vm1335_vm5, %v10072_v13  ;;  %v3517_v21 = vmul.f32 0.35355338, %v3398_v56 }
0x2747   :  { %4505 = vst [vmem:[#allocation1 + $0x10] ss:$2 sm:$0xff] %v3851_v35  ;;  %v3521_v3 = vmul.f32 0.35355338, %v10188_v55  ;;  %v3516_v13 = vmul.f32 0.35355338, %v3371_v59 }
0x274c   :  { %3961 = vrot.lane.b32.xlu0 %v9828_v15, %s8673_s14  ;;  %3957 = vrot.lane.b32.xlu1 %v9864_v8, %s8673_s14  ;;  %v4455_v18 = vld.sshfl [vmem:[#allocation1] sm:$0xff pattern:$0x75316420]  ;;  %v3796_v15 = vrot.slane %v3793_v30, 4  ;;  %v3823_v8 = vrot.slane %v3820_v45, 4 }
0x274d   :  { %3969 = vrot.lane.b32.xlu2 %v10005_v49, %s8673_s14  ;;  %4491 = vst [vmem:[#allocation1] ss:$2 sm:$0xff] %v3516_v13  ;;  %7009 = vmatpush.xpose.msk.msrb.mxu3 %vm1335_vm5, %v4455_v18  ;;  %v3437_v49 = vrot.slane %v10099_v37, 4 }
0x274e   :  { %v4507_v63 = vld.sshfl [vmem:[#allocation1 + $0x10] sm:$0xff pattern:$0x75316420]  ;;  %4493 = vst [vmem:[#allocation1 + $0x1] ss:$2 sm:$0xff] %v3517_v21  ;;  %v3797_v47 = vsel %vm1252_vm2, 0.0, %v3796_v15 }
0x274f   :  { %4546 = vst [vmem:[#allocation1 + $0x10] ss:$2 sm:$0xff] %v3521_v3  ;;  %7012 = vmatpush.xpose.msk.msra.mxu1 %vm1335_vm5, %v4507_v63  ;;  %v3824_v52 = vsel %vm1252_vm2, 0.0, %v3823_v8 }
0x2750   :  { %7010 = vmatmul.msk.f32.vlgmr.msrb.gmra.mxu3 %vm1335_vm5, %v4445_v28 }
0x2754   :  { %3971 = vrot.lane.b32.xlu0 %v9972_v58, %s8673_s14  ;;  %3977 = vrot.lane.b32.xlu1 %v10053_v31, %s8673_s14  ;;  %v3438_v58 = vsel %vm1252_vm2, %v3437_v49, %v10087_v60  ;;  %v3465_v31 = vsel %vm1252_vm2, %v3464_v40, %v10129_v50 }
0x2755   :  { %3959 = vrot.lane.b32.xlu2 %v9869_v10, %s8673_s14  ;;  %v4496_v36 = vld.sshfl [vmem:[#allocation1] sm:$0xff pattern:$0x75316420]  ;;  %v10219_v10 = vperm.slane %v3438_v58, %v9303_v14  ;;  %v10224_v37 = vperm.slane %v3465_v31, %v9303_v14 }
0x2756   :  { %4501 = vst [vmem:[#allocation1] ss:$2 sm:$0xff] %v3797_v47 }
0x2757   :  { %4503 = vst [vmem:[#allocation1 + $0x1] ss:$2 sm:$0xff] %v3824_v52  ;;  %v3519_v60 = vmul.f32 0.35355338, %v10219_v10  ;;  %v3520_v50 = vmul.f32 0.35355338, %v10224_v37 }
0x2758   :  { %7011 = vmatmul.msk.f32.gmra.mxu3 %vm1335_vm5, %v10142_v41 }
0x275c   :  { %3973 = vrot.lane.b32.xlu1 %v9965_v11, %s8673_s14  ;;  %v3574_v11 = vpop.permute.xlu2 %3573 }
0x275d   :  { %3975 = vrot.lane.b32.xlu2 %v9914_v61, %s8673_s14  ;;  %v3693_v45 = vrot.slane %v3574_v11, 4 }
0x275e   :  { %v4506_v39 = vld.sshfl [vmem:[#allocation1] sm:$0xff pattern:$0x75316420] }
0x275f   :  { %4542 = vst [vmem:[#allocation1] ss:$2 sm:$0xff] %v3519_v60  ;;  %7013 = vmatpush.xpose.msk.msra.mxu1 %vm1335_vm5, %v4506_v39 }
0x2760   :  { %4544 = vst [vmem:[#allocation1 + $0x1] ss:$2 sm:$0xff] %v3520_v50 }
0x2762   :  { %7014 = vmatmul.msk.f32.vlgmr.msra.gmra.mxu1 %vm1335_vm5, %v4496_v36 }
0x2764   :  { %3979 = vrot.lane.b32.xlu1 %v9937_v7, %s8673_s14 }
0x276a   :  { %7015 = vmatmul.msk.f32.gmra.mxu1 %vm1335_vm5, %v4497_v51 }
0x276c   :  { %3967 = vrot.lane.b32.xlu1 %v9912_v9, %s8673_s14 }
0x276f   :  { %v3570_v61 = vpop.permute.xlu2 %3569 }
0x2770   :  { %v3715_v19 = vrot.slane %v3570_v61, 4 }
0x2772   :  { %v3716_v26 = vsel %vm1252_vm2, %v3715_v19, %v3558_v29 }
0x2773   :  { %v3720_v1 = vperm.slane %v3716_v26, %v9291_v2 }
0x2775   :  { %v3729_v40 = vrot.slane %v3720_v1, 4 }
0x2777   :  { %v3578_v46 = vpop.permute.xlu2 %3577 }
0x2778   :  { %v3749_v12 = vrot.slane %v3578_v46, 4 }
0x277f   :  { %v3564_v6 = vpop.permute.xlu2 %3563 }
0x2786   :  { %v3572_v41 = vpop.permute.xlu0 %3571 }
0x2787   :  { %v3743_v27 = vrot.slane %v3572_v41, 4  ;;  %v10241_v34 = vpop.permute.xlu2 %3945 }
0x2789   :  { %v3744_v38 = vsel %vm1252_vm2, %v3743_v27, %v3560_v42 }
0x278a   :  { %v3748_v7 = vperm.slane %v3744_v38, %v9291_v2 }
0x278c   :  { %v3757_v0 = vrot.slane %v3748_v7, 4 }
0x278e   :  { %v3566_v5 = vpop.permute.xlu0 %3565  ;;  %v3568_v54 = vpop.permute.xlu1 %3567 }
0x278f   :  { %v3750_v9 = vsel %vm1252_vm2, %v3749_v12, %v3566_v5  ;;  %v3687_v33 = vrot.slane %v3568_v54, 4  ;;  %v10262_v31 = vpop.permute.xlu2 %3933 }
0x2790   :  { %v3754_v20 = vperm.slane %v3750_v9, %v9291_v2 }
0x2791   :  { %v3688_v43 = vsel %vm1252_vm2, %v3687_v33, %v3556_v62 }
0x2792   :  { %v3755_v22 = vrot.slane %v3754_v20, 4  ;;  %v3758_v32 = vsel %vm1252_vm2, %v3754_v20, %v3757_v0  ;;  %v3692_v51 = vperm.slane %v3688_v43, %v9291_v2  ;;  %v3503_v0 = vrot.slane %v10188_v55, 4  ;;  %v10281_v20 = vld.sshfl [vmem:[#allocation1 + $0x10] sm:$0xff pattern:$0x75316420] }
0x2793   :  { %v3766_v30 = vperm.slane %v3758_v32, %v9303_v14 }
0x2794   :  { %v3756_v4 = vsel %vm1252_vm2, %v3755_v22, %v3748_v7  ;;  %v3701_v15 = vrot.slane %v3692_v51, 4 }
0x2795   :  { %v3762_v28 = vperm.slane %v3756_v4, %v9303_v14  ;;  %v3769_v35 = vrot.slane %v3766_v30, 4 }
0x2796   :  { %v3576_v24 = vpop.permute.xlu0 %3575  ;;  %v3562_v56 = vpop.permute.xlu1 %3561 }
0x2797   :  { %v3767_v59 = vrot.slane %v3762_v28, 4  ;;  %v3770_v21 = vsel %vm1252_vm2, 0.0, %v3769_v35  ;;  %v3721_v3 = vrot.slane %v3576_v24, 4  ;;  %v3694_v63 = vsel %vm1252_vm2, %v3693_v45, %v3562_v56  ;;  %v10292_v45 = vpop.permute.xlu2 %3951 }
0x2798   :  { %v3911_v13 = vrot.slane %v3770_v21, 4  ;;  %v3698_v49 = vperm.slane %v3694_v63, %v9291_v2  ;;  %v3906_v47 = vsel %vm1252_vm2, %v3769_v35, %v3762_v28 }
0x2799   :  { %v3768_v18 = vsel %vm1252_vm2, 0.0, %v3767_v59  ;;  %v3722_v8 = vsel %vm1252_vm2, %v3721_v3, %v3564_v6  ;;  %v10268_v42 = vperm.slane %v3906_v47, %v9291_v2 }
0x279a   :  { %v3912_v36 = vsel %vm1252_vm2, %v3911_v13, %v3768_v18  ;;  %v3726_v52 = vperm.slane %v3722_v8, %v9291_v2  ;;  %v3699_v60 = vrot.slane %v3698_v49, 4  ;;  %v3702_v39 = vsel %vm1252_vm2, %v3698_v49, %v3701_v15 }
0x279b   :  { %v10260_v58 = vperm.slane %v3912_v36, %v9291_v2  ;;  %v3710_v61 = vperm.slane %v3702_v39, %v9303_v14  ;;  %v4547_v36 = vld.sshfl [vmem:[#allocation1] sm:$0xff pattern:$0x75316420]  ;;  %v3449_v39 = vrot.slane %v10219_v10, 4 }
0x279c   :  { %v3727_v50 = vrot.slane %v3726_v52, 4  ;;  %v3730_v11 = vsel %vm1252_vm2, %v3726_v52, %v3729_v40  ;;  %v3700_v29 = vsel %vm1252_vm2, %v3699_v60, %v3692_v51  ;;  %v3504_v51 = vsel %vm1252_vm2, 0.0, %v3503_v0 }
0x279d   :  { %v3917_v46 = vrot.slane %v10260_v58, 4  ;;  %v3738_v62 = vperm.slane %v3730_v11, %v9303_v14  ;;  %v3706_v6 = vperm.slane %v3700_v29, %v9303_v14  ;;  %v3713_v27 = vrot.slane %v3710_v61, 4 }
0x279e   :  { %v3728_v41 = vsel %vm1252_vm2, %v3727_v50, %v3720_v1  ;;  %v3950_v38 = vpop.permute.xlu0 %3949  ;;  %v3938_v7 = vpop.permute.xlu1 %3937  ;;  %v3524_v63 = vmul.f32 0.35355338, %v3504_v51  ;;  %v3476_v61 = vrot.slane %v10224_v37, 4  ;;  %v3450_v29 = vsel %vm1252_vm2, 0.0, %v3449_v39 }
0x279f   :  { %v3918_v12 = vsel %vm1252_vm2, %v3917_v46, %v10268_v42  ;;  %v3734_v5 = vperm.slane %v3728_v41, %v9303_v14  ;;  %v3741_v54 = vrot.slane %v3738_v62, 4  ;;  %v3711_v9 = vrot.slane %v3706_v6, 4  ;;  %v3942_v41 = vpop.permute.xlu2 %3941 }
0x27a0   :  { %v3924_v19 = vperm.slane %v3918_v12, %v9303_v14  ;;  %v3714_v33 = vsel %vm1252_vm2, 0.0, %v3713_v27  ;;  %v3852_v1 = vsel %vm1252_vm2, %v3713_v27, %v3706_v6  ;;  %v4061_v50 = vrot.slane %v3950_v38, 4 }
0x27a1   :  { %v3739_v22 = vrot.slane %v3734_v5, 4  ;;  %v3742_v32 = vsel %vm1252_vm2, 0.0, %v3741_v54  ;;  %v3712_v30 = vsel %vm1252_vm2, 0.0, %v3711_v9  ;;  %v3857_v4 = vrot.slane %v3714_v33, 4 }
0x27a2   :  { %4556 = vst [vmem:[#allocation1 + $0x10] ss:$2 sm:$0xff] %v3924_v19  ;;  %v3884_v43 = vrot.slane %v3742_v32, 4  ;;  %v3879_v28 = vsel %vm1252_vm2, %v3741_v54, %v3734_v5  ;;  %v10306_v18 = vperm.slane %v3852_v1, %v9291_v2  ;;  %v3929_v46 = vrot.slane %v3924_v19, 4 }
0x27a3   :  { %v3740_v26 = vsel %vm1252_vm2, 0.0, %v3739_v22  ;;  %v3858_v24 = vsel %vm1252_vm2, %v3857_v4, %v3712_v30  ;;  %v10302_v3 = vperm.slane %v3879_v28, %v9291_v2  ;;  %v4062_v6 = vsel %vm1252_vm2, %v4061_v50, %v3938_v7 }
0x27a4   :  { %v3885_v35 = vsel %vm1252_vm2, %v3884_v43, %v3740_v26  ;;  %v10297_v56 = vperm.slane %v3858_v24, %v9291_v2  ;;  %v3477_v10 = vsel %vm1252_vm2, 0.0, %v3476_v61  ;;  %v3930_v38 = vsel %vm1252_vm2, 0.0, %v3929_v46 }
0x27a5   :  { %v10290_v55 = vperm.slane %v3885_v35, %v9291_v2  ;;  %v3522_v54 = vmul.f32 0.35355338, %v3450_v29  ;;  %v4066_v19 = vperm.slane %v4062_v6, %v9291_v2  ;;  %v3502_v7 = vperm.slane %v10092_v53, %v9303_v14 }
0x27a6   :  { %v10299_v59 = vpop.permute.xlu0 %3947  ;;  %v3956_v21 = vpop.permute.xlu1 %3955  ;;  %v3863_v15 = vrot.slane %v10297_v56, 4  ;;  %v3523_v33 = vmul.f32 0.35355338, %v3477_v10  ;;  %v3919_v4 = vrot.slane %v10268_v42, 4  ;;  %v4011_v6 = vrot.slane %v10292_v45, 4 }
0x27a7   :  { %v3890_v13 = vrot.slane %v10290_v55, 4  ;;  %v4067_v27 = vrot.slane %v3956_v21, 4  ;;  %v4075_v26 = vrot.slane %v4066_v19, 4  ;;  %v3527_v30 = vmul.f32 0.35355338, %v3502_v7  ;;  %v3970_v24 = vpop.permute.xlu2 %3969 }
0x27a8   :  { %v3864_v47 = vsel %vm1252_vm2, %v3863_v15, %v10306_v18 }
0x27a9   :  { %v4558_v8 = vld.sshfl [vmem:[#allocation1 + $0x10] sm:$0xff pattern:$0x75316420]  ;;  %v3891_v49 = vsel %vm1252_vm2, %v3890_v13, %v10302_v3  ;;  %v3870_v52 = vperm.slane %v3864_v47, %v9303_v14  ;;  %v3920_v13 = vsel %vm1252_vm2, %v10260_v58, %v3919_v4  ;;  %v3892_v4 = vrot.slane %v10302_v3, 4 }
0x27aa   :  { %4597 = vst [vmem:[#allocation1 + $0x10] ss:$2 sm:$0xff] %v3524_v63  ;;  %v10312_v40 = vperm.slane %v3891_v49, %v9303_v14  ;;  %7016 = vmatpush.xpose.msk.msrb.mxu2 %vm1335_vm5, %v4558_v8  ;;  %v10318_v60 = vpop.f32.mrf.mxu1  ;;  %v4033_v63 = vrot.slane %v10299_v59, 4  ;;  %v4089_v49 = vrot.slane %v3970_v24, 4 }
0x27ab   :  { %v4743_v11 = vsel %vm1337_vm6, %v10318_v60, -inf  ;;  %4552 = vst [vmem:[#allocation1] ss:$2 sm:$0xff] %v3870_v52  ;;  %v3875_v28 = vrot.slane %v3870_v52, 4  ;;  %v3505_v52 = vrot.slane %v3502_v7, 4 }
0x27ac   :  { %4554 = vst [vmem:[#allocation1 + $0x1] ss:$2 sm:$0xff] %v10312_v40  ;;  %4744 = vmax.xlane.f32.xlu0 %v4743_v11  ;;  %v3902_v1 = vrot.slane %v10312_v40, 4  ;;  %v4005_v40 = vrot.slane %v10241_v34, 4  ;;  %v10359_v11 = vperm.slane %v3920_v13, %v9303_v14 }
0x27ad   :  { %v3876_v15 = vsel %vm1252_vm2, 0.0, %v3875_v28 }
0x27ae   :  { %v3944_v62 = vpop.permute.xlu1 %3943  ;;  %v3936_v12 = vpop.permute.xlu0 %3935  ;;  %v3903_v39 = vsel %vm1252_vm2, 0.0, %v3902_v1  ;;  %v4006_v61 = vsel %vm1252_vm2, %v4005_v40, %v10262_v31  ;;  %v3506_v31 = vsel %vm1252_vm2, 0.0, %v3505_v52 }
0x27af   :  { %v4068_v37 = vsel %vm1252_vm2, %v4067_v27, %v3944_v62  ;;  %v4034_v58 = vsel %vm1252_vm2, %v4033_v63, %v3936_v12  ;;  %v10372_v62 = vperm.slane %v10113_v23, %v9303_v14  ;;  %v10381_v12 = vperm.slane %v10155_v44, %v9303_v14 }
0x27b0   :  { %v4072_v32 = vperm.slane %v4068_v37, %v9291_v2  ;;  %v4010_v10 = vperm.slane %v4006_v61, %v9291_v2  ;;  %v3931_v63 = vrot.slane %v10359_v11, 4 }
0x27b1   :  { %v10329_v5 = vld.sshfl [vmem:[#allocation1 + $0x10] sm:$0xff pattern:$0x75316420]  ;;  %v3525_v44 = vmul.f32 0.35355338, %v10372_v62 }
0x27b2   :  { %4607 = vst [vmem:[#allocation1 + $0x10] ss:$2 sm:$0xff] %v3930_v38  ;;  %v10333_v9 = vpop.f32.mrf.mxu1  ;;  %v4073_v35 = vrot.slane %v4072_v32, 4  ;;  %v4076_v51 = vsel %vm1252_vm2, %v4072_v32, %v4075_v26  ;;  %v3526_v7 = vmul.f32 0.35355338, %v10381_v12  ;;  %v3865_v26 = vrot.slane %v10306_v18, 4 }
0x27b3   :  { %v4557_v0 = vld.sshfl [vmem:[#allocation1] sm:$0xff pattern:$0x75316420]  ;;  %v4747_v22 = vsel %vm4746_vm0, %v10333_v9, -inf  ;;  %v4084_v42 = vperm.slane %v4076_v51, %v9303_v14  ;;  %v3932_v61 = vsel %vm1252_vm2, 0.0, %v3931_v63 }
0x27b4   :  { %4593 = vst [vmem:[#allocation1] ss:$2 sm:$0xff] %v3522_v54  ;;  %4748 = vmax.xlane.f32.xlu1 %v4747_v22  ;;  %7017 = vmatpush.xpose.msk.msrb.mxu2 %vm1335_vm5, %v4557_v0  ;;  %v4074_v47 = vsel %vm1252_vm2, %v4073_v35, %v4066_v19  ;;  %v3530_v54 = vmul.f32 0.35355338, %v3506_v31  ;;  %v3866_v18 = vsel %vm1252_vm2, %v10297_v56, %v3865_v26 }
0x27b5   :  { %4595 = vst [vmem:[#allocation1 + $0x1] ss:$2 sm:$0xff] %v3523_v33  ;;  %v10364_v46 = vperm.slane %v4074_v47, %v9303_v14  ;;  %v10366_v34 = vrot.slane %v4084_v42, 4  ;;  %v3893_v42 = vsel %vm1252_vm2, %v10290_v55, %v3892_v4 }
0x27b6   :  { %v3940_v43 = vpop.permute.xlu1 %3939  ;;  %v3954_v21 = vpop.permute.xlu0 %3953  ;;  %v10429_v40 = vperm.slane %v3893_v42, %v9303_v14 }
0x27b7   :  { %7018 = vmatmul.msk.f32.vlgmr.msrb.gmra.mxu2 %vm1335_vm5, %v4547_v36  ;;  %v4039_v36 = vrot.slane %v3954_v21, 4  ;;  %v4012_v23 = vsel %vm1252_vm2, %v4011_v6, %v3940_v43  ;;  %v4085_v45 = vrot.slane %v10364_v46, 4  ;;  %v4019_v43 = vrot.slane %v4010_v10, 4 }
0x27b8   :  { %v4016_v22 = vperm.slane %v4012_v23, %v9291_v2 }
0x27b9   :  { %v4609_v53 = vld.sshfl [vmem:[#allocation1 + $0x10] sm:$0xff pattern:$0x75316420]  ;;  %v4040_v27 = vsel %vm1252_vm2, %v4039_v36, %v3942_v41  ;;  %v4088_v41 = vsel %vm1252_vm2, 0.0, %v10366_v34 }
0x27ba   :  { %4648 = vst [vmem:[#allocation1 + $0x10] ss:$2 sm:$0xff] %v3527_v30  ;;  %7020 = vmatpush.xpose.msk.msra.mxu3 %vm1335_vm5, %v4609_v53  ;;  %v4044_v37 = vperm.slane %v4040_v27, %v9291_v2  ;;  %v4232_v30 = vrot.slane %v4088_v41, 4  ;;  %v4086_v53 = vsel %vm1252_vm2, 0.0, %v4085_v45  ;;  %v4017_v1 = vrot.slane %v4016_v22, 4 }
0x27bb   :  { %v4020_v24 = vsel %vm1252_vm2, %v4016_v22, %v4019_v43  ;;  %v4227_v27 = vsel %vm1252_vm2, %v10366_v34, %v10364_v46 }
0x27bc   :  { %v4598_v8 = vld.sshfl [vmem:[#allocation1] sm:$0xff pattern:$0x75316420]  ;;  %v4045_v28 = vrot.slane %v4044_v37, 4  ;;  %v4233_v21 = vsel %vm1252_vm2, %v4232_v30, %v4086_v53  ;;  %v4028_v56 = vperm.slane %v4020_v24, %v9303_v14  ;;  %v4018_v36 = vsel %vm1252_vm2, %v4017_v1, %v4010_v10 }
0x27bd   :  { %4603 = vst [vmem:[#allocation1] ss:$2 sm:$0xff] %v3876_v15  ;;  %v10425_v47 = vperm.slane %v4233_v21, %v9291_v2  ;;  %v4024_v31 = vperm.slane %v4018_v36, %v9303_v14  ;;  %v10455_v45 = vperm.slane %v4227_v27, %v9291_v2 }
0x27be   :  { %v3958_v50 = vpop.permute.xlu1 %3957  ;;  %4605 = vst [vmem:[#allocation1 + $0x1] ss:$2 sm:$0xff] %v3903_v39  ;;  %v3962_v30 = vpop.permute.xlu0 %3961 }
0x27bf   :  { %v10356_v59 = vsel %vm1252_vm2, %v4089_v49, %v3958_v50  ;;  %7019 = vmatmul.msk.f32.gmra.mxu2 %vm1335_vm5, %v10281_v20  ;;  %v4038_v20 = vperm.slane %v4034_v58, %v9291_v2  ;;  %v10422_v49 = vperm.slane %v3866_v18, %v9303_v14  ;;  %v3451_v58 = vrot.slane %v10372_v62, 4 }
0x27c0   :  { %v4238_v62 = vrot.slane %v10425_v47, 4  ;;  %v4029_v34 = vrot.slane %v4024_v31, 4  ;;  %v3904_v18 = vrot.slane %v10429_v40, 4 }
0x27c1   :  { %v10374_v29 = vld.sshfl [vmem:[#allocation1 + $0x10] sm:$0xff pattern:$0x75316420]  ;;  %v10387_v38 = vpop.f32.mrf.mxu2  ;;  %v4047_v0 = vrot.slane %v4038_v20, 4  ;;  %v4046_v15 = vsel %vm1252_vm2, %v4045_v28, %v4038_v20  ;;  %v4031_v20 = vrot.slane %v4028_v56, 4  ;;  %v3452_v23 = vsel %vm1252_vm2, 0.0, %v3451_v58 }
0x27c2   :  { %4658 = vst [vmem:[#allocation1 + $0x10] ss:$2 sm:$0xff] %v10359_v11  ;;  %v4750_v19 = vsel %vm1337_vm6, %v10387_v38, -inf  ;;  %v10432_v39 = vperm.slane %v4046_v15, %v9303_v14  ;;  %v3478_v11 = vrot.slane %v10381_v12, 4  ;;  %v4030_v53 = vsel %vm1252_vm2, 0.0, %v4029_v34 }
0x27c3   :  { %4751 = vmax.xlane.f32.xlu1 %v4750_v19  ;;  %v4048_v35 = vsel %vm1252_vm2, %v4044_v37, %v4047_v0  ;;  %v4032_v41 = vsel %vm1252_vm2, 0.0, %v4031_v20  ;;  %v3877_v21 = vrot.slane %v10422_v49, 4 }
0x27c4   :  { %v4056_v3 = vperm.slane %v4048_v35, %v9303_v14  ;;  %v4057_v12 = vrot.slane %v10432_v39, 4  ;;  %v3479_v46 = vsel %vm1252_vm2, 0.0, %v3478_v11  ;;  %v4178_v26 = vrot.slane %v4032_v41, 4 }
0x27c5   :  { %v4608_v33 = vld.sshfl [vmem:[#allocation1] sm:$0xff pattern:$0x75316420]  ;;  %v3529_v22 = vmul.f32 0.35355338, %v3479_v46  ;;  %v3878_v58 = vsel %vm1252_vm2, 0.0, %v3877_v21 }
0x27c6   :  { %v10398_v32 = vpop.permute.xlu1 %3977  ;;  %4644 = vst [vmem:[#allocation1] ss:$2 sm:$0xff] %v3525_v44  ;;  %7021 = vmatpush.xpose.msk.msra.mxu3 %vm1335_vm5, %v4608_v33  ;;  %v10434_v50 = vrot.slane %v4056_v3, 4  ;;  %v4058_v33 = vsel %vm1252_vm2, 0.0, %v4057_v12  ;;  %v4179_v1 = vsel %vm1252_vm2, %v4178_v26, %v4030_v53 }
0x27c7   :  { %4646 = vst [vmem:[#allocation1 + $0x1] ss:$2 sm:$0xff] %v3526_v7  ;;  %v3528_v7 = vmul.f32 0.35355338, %v3452_v23  ;;  %v10483_v56 = vperm.slane %v4179_v1, %v9291_v2 }
0x27c8   :  { %v4060_v10 = vsel %vm1252_vm2, 0.0, %v10434_v50 }
0x27c9   :  { %v4660_v51 = vld.sshfl [vmem:[#allocation1 + $0x10] sm:$0xff pattern:$0x75316420]  ;;  %7022 = vmatmul.msk.f32.vlgmr.msra.gmra.mxu3 %vm1335_vm5, %v4598_v8  ;;  %v10411_v13 = vpop.f32.mrf.mxu2  ;;  %v4184_v41 = vrot.slane %v10483_v56, 4 }
0x27ca   :  { %4699 = vst [vmem:[#allocation1 + $0x10] ss:$2 sm:$0xff] %v3530_v54  ;;  %7024 = vmatpush.xpose.msk.msrb.mxu0 %vm1335_vm5, %v4660_v51  ;;  %v4753_v8 = vsel %vm4746_vm0, %v10411_v13, -inf  ;;  %v4239_v54 = vsel %vm1252_vm2, %v4238_v62, %v10455_v45  ;;  %v4173_v62 = vsel %vm1252_vm2, %v4031_v20, %v4024_v31 }
0x27cb   :  { %4754 = vmax.xlane.f32.xlu2 %v4753_v8  ;;  %v4245_v4 = vperm.slane %v4239_v54, %v9303_v14  ;;  %v4177_v20 = vperm.slane %v4173_v62, %v9291_v2 }
0x27cd   :  { %v4250_v8 = vrot.slane %v4245_v4, 4 }
0x27ce   :  { %v3974_v52 = vpop.permute.xlu1 %3973  ;;  %v4649_v55 = vld.sshfl [vmem:[#allocation1] sm:$0xff pattern:$0x75316420] }
0x27cf   :  { %4654 = vst [vmem:[#allocation1] ss:$2 sm:$0xff] %v10422_v49  ;;  %v4145_v37 = vrot.slane %v3974_v52, 4  ;;  %v4251_v34 = vsel %vm1252_vm2, 0.0, %v4250_v8 }
0x27d0   :  { %4656 = vst [vmem:[#allocation1 + $0x1] ss:$2 sm:$0xff] %v10429_v40  ;;  %v3905_v40 = vsel %vm1252_vm2, 0.0, %v3904_v18 }
0x27d1   :  { %v10440_v6 = vld.sshfl [vmem:[#allocation1 + $0x10] sm:$0xff pattern:$0x75316420]  ;;  %7023 = vmatmul.msk.f32.gmra.mxu3 %vm1335_vm5, %v10329_v5  ;;  %v4205_v5 = vrot.slane %v4060_v10, 4  ;;  %v4146_v28 = vsel %vm1252_vm2, %v4145_v37, %v3962_v30 }
0x27d2   :  { %4709 = vst [vmem:[#allocation1 + $0x10] ss:$2 sm:$0xff] %v3932_v61  ;;  %v4150_v24 = vperm.slane %v4146_v28, %v9291_v2  ;;  %v4200_v61 = vsel %vm1252_vm2, %v10434_v50, %v10432_v39  ;;  %v4240_v39 = vrot.slane %v10455_v45, 4 }
0x27d3   :  { %v10461_v44 = vpop.f32.mrf.mxu3  ;;  %v4206_v51 = vsel %vm1252_vm2, %v4205_v5, %v4058_v33  ;;  %v4204_v50 = vperm.slane %v4200_v61, %v9291_v2 }
0x27d4   :  { %v4756_v0 = vsel %vm1337_vm6, %v10461_v44, -inf  ;;  %v10478_v3 = vperm.slane %v4206_v51, %v9291_v2 }
0x27d5   :  { %4757 = vmax.xlane.f32.xlu2 %v4756_v0  ;;  %v4241_v0 = vsel %vm1252_vm2, %v10425_v47, %v4240_v39 }
0x27d6   :  { %v3980_v19 = vpop.permute.xlu1 %3979  ;;  %v4211_v27 = vrot.slane %v10478_v3, 4  ;;  %v4249_v53 = vperm.slane %v4241_v0, %v9303_v14 }
0x27d7   :  { %v4659_v43 = vld.sshfl [vmem:[#allocation1] sm:$0xff pattern:$0x75316420]  ;;  %v4151_v63 = vrot.slane %v3980_v19, 4 }
0x27d8   :  { %4695 = vst [vmem:[#allocation1] ss:$2 sm:$0xff] %v3528_v7  ;;  %7025 = vmatpush.xpose.msk.msrb.mxu0 %vm1335_vm5, %v4659_v43  ;;  %v4212_v19 = vsel %vm1252_vm2, %v4211_v27, %v4204_v50  ;;  %v4185_v7 = vsel %vm1252_vm2, %v4184_v41, %v4177_v20  ;;  %v4252_v18 = vrot.slane %v4249_v53, 4 }
0x27d9   :  { %v4711_v35 = vld.sshfl [vmem:[#allocation1 + $0x10] sm:$0xff pattern:$0x75316420]  ;;  %4697 = vst [vmem:[#allocation1 + $0x1] ss:$2 sm:$0xff] %v3529_v22  ;;  %v4191_v26 = vperm.slane %v4185_v7, %v9303_v14 }
0x27da   :  { %7028 = vmatpush.xpose.msk.msrb.mxu1 %vm1335_vm5, %v4711_v35  ;;  %4927 = vst [vmem:[#allocation1 + $0x10] ss:$2 sm:$0xff] %v4245_v4 }
0x27db   :  { %7026 = vmatmul.msk.f32.vlgmr.msrb.gmra.mxu0 %vm1335_vm5, %v4649_v55  ;;  %v10480_v42 = vpop.f32.mrf.mxu3  ;;  %v4159_v55 = vrot.slane %v4150_v24, 4  ;;  %v4196_v51 = vrot.slane %v4191_v26, 4 }
0x27dc   :  { %v4759_v36 = vsel %vm4746_vm0, %v10480_v42, -inf }
0x27dd   :  { %4760 = vmax.xlane.f32.xlu0 %v4759_v36 }
0x27de   :  { %v3968_v15 = vpop.permute.xlu1 %3967 }
0x27df   :  { %v4152_v52 = vsel %vm1252_vm2, %v4151_v63, %v3968_v15  ;;  %v10496_v12 = vpop.f32.mrf.mxu1  ;;  %v4186_v63 = vrot.slane %v4177_v20, 4  ;;  %v4197_v15 = vsel %vm1252_vm2, 0.0, %v4196_v51 }
0x27e0   :  { %v4156_v49 = vperm.slane %v4152_v52, %v9291_v2  ;;  %v4700_v11 = vld.sshfl [vmem:[#allocation1] sm:$0xff pattern:$0x75316420]  ;;  %v4762_v45 = vsel %vm1337_vm6, %v10496_v12, -inf }
0x27e1   :  { %4705 = vst [vmem:[#allocation1] ss:$2 sm:$0xff] %v3878_v58  ;;  %v4929_v46 = vld.sshfl [vmem:[#allocation1 + $0x10] sm:$0xff pattern:$0x75316420] }
0x27e2   :  { %v4157_v10 = vrot.slane %v4156_v49, 4  ;;  %v4160_v23 = vsel %vm1252_vm2, %v4156_v49, %v4159_v55  ;;  %4707 = vst [vmem:[#allocation1 + $0x1] ss:$2 sm:$0xff] %v3905_v40  ;;  %7032 = vmatpush.msk.msra.mxu2 %vm3021_vm12, %v4929_v46  ;;  %v4253_v55 = vsel %vm1252_vm2, 0.0, %v4252_v18  ;;  %v4213_v49 = vrot.slane %v4204_v50, 4 }
0x27e3   :  { %v4168_v37 = vperm.slane %v4160_v23, %v9303_v14  ;;  %7027 = vmatmul.msk.f32.gmra.mxu0 %vm1335_vm5, %v10374_v29  ;;  %4969 = vst [vmem:[#allocation1 + $0x10] ss:$2 sm:$0xff] %v4251_v34  ;;  %v4218_v29 = vperm.slane %v4212_v19, %v9303_v14 }
0x27e4   :  { %v4158_v31 = vsel %vm1252_vm2, %v4157_v10, %v4150_v24  ;;  %v4214_v27 = vsel %vm1252_vm2, %v10478_v3, %v4213_v49 }
0x27e5   :  { %v4164_v54 = vperm.slane %v4158_v31, %v9303_v14  ;;  %v4171_v5 = vrot.slane %v4168_v37, 4  ;;  %4763 = vmax.xlane.f32.xlu0 %v4762_v45  ;;  %v4223_v24 = vrot.slane %v4218_v29, 4  ;;  %v4222_v23 = vperm.slane %v4214_v27, %v9303_v14 }
0x27e7   :  { %v4172_v33 = vsel %vm1252_vm2, 0.0, %v4171_v5  ;;  %v4169_v22 = vrot.slane %v4164_v54, 4  ;;  %v10519_v4 = vpop.f32.mrf.mxu1  ;;  %v4224_v36 = vsel %vm1252_vm2, 0.0, %v4223_v24  ;;  %v4308_v40 = vsel %vm1252_vm2, %v4171_v5, %v4164_v54  ;;  %v10573_v24 = vpop.permute.xlu0 %3971 }
0x27e8   :  { %v4313_v30 = vrot.slane %v4172_v33, 4  ;;  %v4765_v28 = vsel %vm4746_vm0, %v10519_v4, -inf  ;;  %v4312_v61 = vperm.slane %v4308_v40, %v9291_v2  ;;  %v4225_v41 = vrot.slane %v4222_v23, 4 }
0x27e9   :  { %v4710_v43 = vld.sshfl [vmem:[#allocation1] sm:$0xff pattern:$0x75316420]  ;;  %v4170_v47 = vsel %vm1252_vm2, 0.0, %v4169_v22  ;;  %4766 = vmax.xlane.f32.xlu1 %v4765_v28  ;;  %v10565_v28 = vpop.permute.xlu2 %3959 }
0x27ea   :  { %4925 = vst [vmem:[#allocation1 + $0x1] ss:$2 sm:$0xff] %v4218_v29  ;;  %7029 = vmatpush.xpose.msk.msrb.mxu1 %vm1335_vm5, %v4710_v43  ;;  %v4971_v35 = vld.sshfl [vmem:[#allocation1 + $0x10] sm:$0xff pattern:$0x75316420]  ;;  %v4314_v1 = vsel %vm1252_vm2, %v4313_v30, %v4170_v47  ;;  %v4226_v50 = vsel %vm1252_vm2, 0.0, %v4225_v41 }
0x27eb   :  { %4923 = vst [vmem:[#allocation1] ss:$2 sm:$0xff] %v4191_v26  ;;  %7035 = vmatpush.msk.msrb.mxu3 %vm3021_vm12, %v4971_v35  ;;  %v4318_v21 = vperm.slane %v4314_v1, %v9291_v2  ;;  %v4321_v20 = vrot.slane %v4312_v61, 4 }
0x27ec   :  { %5011 = vst [vmem:[#allocation1 + $0x10] ss:$2 sm:$0xff] %v4249_v53 }
0x27ed   :  { %7030 = vmatmul.msk.f32.vlgmr.msrb.gmra.mxu1 %vm1335_vm5, %v4700_v11  ;;  %v4319_v58 = vrot.slane %v4318_v21, 4  ;;  %v4187_v11 = vsel %vm1252_vm2, %v10483_v56, %v4186_v63  ;;  %v4322_v5 = vsel %vm1252_vm2, %v4318_v21, %v4321_v20 }
0x27ee   :  { %v4195_v10 = vperm.slane %v4187_v11, %v9303_v14  ;;  %v4330_v19 = vperm.slane %v4322_v5, %v9303_v14 }
0x27ef   :  { %v4320_v62 = vsel %vm1252_vm2, %v4319_v58, %v4312_v61 }
0x27f0   :  { %v4326_v34 = vperm.slane %v4320_v62, %v9303_v14  ;;  %v4198_v56 = vrot.slane %v4195_v10, 4  ;;  %v4333_v45 = vrot.slane %v4330_v19, 4 }
0x27f1   :  { %v10571_v1 = vpop.permute.xlu2 %3975 }
0x27f2   :  { %v4928_v8 = vld.sshfl [vmem:[#allocation1] sm:$0xff pattern:$0x75316420]  ;;  %v4331_v37 = vrot.slane %v4326_v34, 4  ;;  %v4199_v3 = vsel %vm1252_vm2, 0.0, %v4198_v56  ;;  %v4334_v0 = vsel %vm1252_vm2, 0.0, %v4333_v45 }
0x27f3   :  { %4965 = vst [vmem:[#allocation1] ss:$2 sm:$0xff] %v4197_v15  ;;  %4954 = vmatpush.msra.mxu2 %v4928_v8  ;;  %v5013_v52 = vld.sshfl [vmem:[#allocation1 + $0x10] sm:$0xff pattern:$0x75316420] }
0x27f4   :  { %4967 = vst [vmem:[#allocation1 + $0x1] ss:$2 sm:$0xff] %v4224_v36  ;;  %7038 = vmatpush.msk.msra.mxu0 %vm3021_vm12, %v5013_v52  ;;  %v4332_v54 = vsel %vm1252_vm2, 0.0, %v4331_v37 }
0x27f5   :  { %7031 = vmatmul.msk.f32.gmra.mxu1 %vm1335_vm5, %v10440_v6  ;;  %5053 = vst [vmem:[#allocation1 + $0x10] ss:$2 sm:$0xff] %v4253_v55 }
0x27fb   :  { %v4970_v46 = vld.sshfl [vmem:[#allocation1] sm:$0xff pattern:$0x75316420] }
0x27fc   :  { %5007 = vst [vmem:[#allocation1] ss:$2 sm:$0xff] %v4195_v10  ;;  %4996 = vmatpush.msrb.mxu3 %v4970_v46  ;;  %v5055_v6 = vld.sshfl [vmem:[#allocation1 + $0x10] sm:$0xff pattern:$0x75316420] }
0x27fd   :  { %5009 = vst [vmem:[#allocation1 + $0x1] ss:$2 sm:$0xff] %v4222_v23  ;;  %7041 = vmatpush.msk.msra.mxu1 %vm3021_vm12, %v5055_v6 }
0x27fe   :  { %5095 = vst [vmem:[#allocation1 + $0x10] ss:$2 sm:$0xff] %v4326_v34 }
0x2804   :  { %v5012_v39 = vld.sshfl [vmem:[#allocation1] sm:$0xff pattern:$0x75316420] }
0x2805   :  { %5049 = vst [vmem:[#allocation1] ss:$2 sm:$0xff] %v4199_v3  ;;  %5038 = vmatpush.msra.mxu0 %v5012_v39  ;;  %v5097_v31 = vld.sshfl [vmem:[#allocation1 + $0x10] sm:$0xff pattern:$0x75316420] }
0x2806   :  { %5051 = vst [vmem:[#allocation1 + $0x1] ss:$2 sm:$0xff] %v4226_v50  ;;  %7044 = vmatpush.msk.msrb.mxu2 %vm3021_vm12, %v5097_v31 }
0x2807   :  { %5137 = vst [vmem:[#allocation1 + $0x10] ss:$2 sm:$0xff] %v4332_v54 }
0x280d   :  { %v5054_v7 = vld.sshfl [vmem:[#allocation1] sm:$0xff pattern:$0x75316420] }
0x280e   :  { %5080 = vmatpush.msra.mxu1 %v5054_v7  ;;  %v5139_v33 = vld.sshfl [vmem:[#allocation1 + $0x10] sm:$0xff pattern:$0x75316420] }
0x280f   :  { %7047 = vmatpush.msk.msra.mxu3 %vm3021_vm12, %v5139_v33  ;;  %5179 = vst [vmem:[#allocation1 + $0x10] ss:$2 sm:$0xff] %v4330_v19 }
0x2816   :  { %v5181_v22 = vld.sshfl [vmem:[#allocation1 + $0x10] sm:$0xff pattern:$0x75316420] }
0x2817   :  { %7050 = vmatpush.msk.msrb.mxu0 %vm3021_vm12, %v5181_v22  ;;  %5221 = vst [vmem:[#allocation1 + $0x10] ss:$2 sm:$0xff] %v4334_v0 }
0x281e   :  { %v5223_v29 = vld.sshfl [vmem:[#allocation1 + $0x10] sm:$0xff pattern:$0x75316420] }
0x281f   :  { %7053 = vmatpush.msk.msrb.mxu1 %vm3021_vm12, %v5223_v29  ;;  %v4745_v52 = vpop.xlane.xlu0 %4744 }
0x2820   :  { %v4792_v29 = vsub.f32 %v10318_v60, %v4745_v52 }
0x2827   :  { %v4749_v47 = vpop.xlane.xlu1 %4748 }
0x2828   :  { %v4793_v46 = vsub.f32 %v10333_v9, %v4749_v47 }
0x282a   :  { %v4810_v37 = vmul.f32 1.442695, %v4793_v46 }
0x2836   :  { %v4752_v21 = vpop.xlane.xlu1 %4751 }
0x2837   :  { %v4794_v15 = vsub.f32 %v10387_v38, %v4752_v21 }
0x2839   :  { %v4812_v49 = vmul.f32 1.442695, %v4794_v15 }
0x283a   :  { %v10557_v43 = vpop.f32.mrf.mxu2 }
0x283b   :  { %v4768_v26 = vsel %vm1337_vm6, %v10557_v43, -inf  ;;  %7419 = vpow2.f32 %v4812_v49 }
0x283c   :  { %4769 = vmax.xlane.f32.xlu2 %v4768_v26  ;;  %v4808_v26 = vmul.f32 1.442695, %v4792_v29 }
0x283e   :  { %v4755_v55 = vpop.xlane.xlu2 %4754 }
0x283f   :  { %v4795_v40 = vsub.f32 %v10411_v13, %v4755_v55 }
0x2841   :  { %v4814_v38 = vmul.f32 1.442695, %v4795_v40  ;;  %v10589_v62 = vpop.eup %7419 }
0x2842   :  { %v10561_v30 = vpop.f32.mrf.mxu2  ;;  %v4846_v23 = vsel %vm1337_vm6, %v10589_v62, 0.0 }
0x2843   :  { %v4771_v53 = vsel %vm4746_vm0, %v10561_v30, -inf  ;;  %7421 = vpow2.f32 %v4814_v38 }
0x2844   :  { %4772 = vmax.xlane.f32.xlu0 %v4771_v53 }
0x2848   :  { %v4758_v27 = vpop.xlane.xlu2 %4757 }
0x2849   :  { %v4796_v10 = vsub.f32 %v10461_v44, %v4758_v27  ;;  %v10599_v41 = vpop.eup %7421 }
0x284a   :  { %v4849_v3 = vsel %vm4746_vm0, %v10599_v41, 0.0 }
0x284b   :  { %v4816_v6 = vmul.f32 1.442695, %v4796_v10 }
0x284c   :  { %v10567_v35 = vpop.f32.mrf.mxu3 }
0x284d   :  { %v4774_v51 = vsel %vm1337_vm6, %v10567_v35, -inf  ;;  %7423 = vpow2.f32 %v4816_v6 }
0x284e   :  { %4775 = vmax.xlane.f32.xlu0 %v4774_v51  ;;  %7425 = vpow2.f32 %v4810_v37 }
0x2850   :  { %v4761_v61 = vpop.xlane.xlu0 %4760 }
0x2851   :  { %v4797_v9 = vsub.f32 %v10480_v42, %v4761_v61 }
0x2853   :  { %v10611_v54 = vpop.eup %7423 }
0x2854   :  { %v10575_v18 = vpop.f32.mrf.mxu3  ;;  %v10613_v5 = vpop.eup %7425  ;;  %v4852_v19 = vsel %vm1337_vm6, %v10611_v54, 0.0 }
0x2855   :  { %v4777_v63 = vsel %vm4746_vm0, %v10575_v18, -inf  ;;  %v4843_v7 = vsel %vm4746_vm0, %v10613_v5, 0.0 }
0x2856   :  { %4778 = vmax.xlane.f32.xlu2 %v4777_v63 }
0x2858   :  { %v10580_v8 = vpop.f32.mrf.mxu0  ;;  %v4764_v56 = vpop.xlane.xlu0 %4763 }
0x2859   :  { %v4780_v36 = vsel %vm1337_vm6, %v10580_v8, -inf  ;;  %v4798_v44 = vsub.f32 %v10496_v12, %v4764_v56  ;;  %v4818_v12 = vmul.f32 1.442695, %v4797_v9 }
0x285a   :  { %4781 = vmax.xlane.f32.xlu1 %v4780_v36 }
0x285b   :  { %v4820_v31 = vmul.f32 1.442695, %v4798_v44 }
0x285c   :  { %v4767_v20 = vpop.xlane.xlu1 %4766 }
0x285d   :  { %7427 = vpow2.f32 %v4820_v31  ;;  %v4799_v42 = vsub.f32 %v10519_v4, %v4767_v20  ;;  %v4094_v20 = vperm.slane %v10356_v59, %v9291_v2 }
0x285e   :  { %7429 = vpow2.f32 %v4818_v12 }
0x2860   :  { %v10585_v58 = vpop.f32.mrf.mxu0 }
0x2861   :  { %v4783_v11 = vsel %vm4746_vm0, %v10585_v58, -inf }
0x2862   :  { %4784 = vmax.xlane.f32.xlu0 %v4783_v11 }
0x2863   :  { %v10622_v33 = vpop.eup %7427 }
0x2864   :  { %v10624_v45 = vpop.eup %7429  ;;  %v4858_v4 = vsel %vm1337_vm6, %v10622_v33, 0.0 }
0x2865   :  { %v4855_v0 = vsel %vm4746_vm0, %v10624_v45, 0.0 }
0x286a   :  { %v10595_v13 = vpop.f32.mrf.mxu1  ;;  %4847 = vadd.xlane.f32.xlu0 %v4846_v23 }
0x286b   :  { %v4786_v34 = vsel %vm1337_vm6, %v10595_v13, -inf }
0x286c   :  { %4787 = vmax.xlane.f32.xlu2 %v4786_v34 }
0x2872   :  { %v10605_v39 = vpop.f32.mrf.mxu1  ;;  %4850 = vadd.xlane.f32.xlu0 %v4849_v3 }
0x2873   :  { %v4789_v50 = vsel %vm4746_vm0, %v10605_v39, -inf  ;;  %3963 = vrot.lane.b32.xlu1 %v10011_v57, %s8673_s14  ;;  %v4822_v57 = vmul.f32 1.442695, %v4799_v42  ;;  %v4095_v42 = vrot.slane %v10571_v1, 4 }
0x2874   :  { %4790 = vmax.xlane.f32.xlu2 %v4789_v50 }
0x2875   :  { %7431 = vpow2.f32 %v4822_v57 }
0x2876   :  { %7433 = vpow2.f32 %v4808_v26 }
0x287a   :  { %4853 = vadd.xlane.f32.xlu0 %v4852_v19  ;;  %v4117_v19 = vrot.slane %v10573_v24, 4 }
0x287b   :  { %3965 = vrot.lane.b32.xlu1 %v10055_v48, %s8673_s14  ;;  %v10630_v22 = vpop.eup %7431 }
0x287c   :  { %4844 = vadd.xlane.f32.xlu2 %v4843_v7  ;;  %v4861_v48 = vsel %vm4746_vm0, %v10630_v22, 0.0  ;;  %v10635_v53 = vpop.eup %7433  ;;  %v4118_v1 = vsel %vm1252_vm2, %v4117_v19, %v10565_v28 }
0x287d   :  { %v4840_v47 = vsel %vm1337_vm6, %v10635_v53, 0.0 }
0x2882   :  { %4859 = vadd.xlane.f32.xlu0 %v4858_v4 }
0x2884   :  { %4856 = vadd.xlane.f32.xlu2 %v4855_v0 }
0x288a   :  { %4862 = vadd.xlane.f32.xlu0 %v4861_v48 }
0x28a5   :  { %4841 = vadd.xlane.f32.xlu1 %v4840_v47 }
0x28af   :  { %v4770_v51 = vpop.xlane.xlu2 %4769 }
0x28b0   :  { %v4800_v21 = vsub.f32 %v10557_v43, %v4770_v51 }
0x28b2   :  { %v4824_v63 = vmul.f32 1.442695, %v4800_v21 }
0x28b4   :  { %7435 = vpow2.f32 %v4824_v63 }
0x28b7   :  { %v4773_v15 = vpop.xlane.xlu0 %4772 }
0x28b8   :  { %v4801_v49 = vsub.f32 %v10561_v30, %v4773_v15 }
0x28ba   :  { %v10640_v36 = vpop.eup %7435  ;;  %v4826_v11 = vmul.f32 1.442695, %v4801_v49 }
0x28bb   :  { %v4864_v55 = vsel %vm1337_vm6, %v10640_v36, 0.0 }
0x28bc   :  { %4865 = vadd.xlane.f32.xlu2 %v4864_v55 }
0x28c1   :  { %v4776_v60 = vpop.xlane.xlu0 %4775 }
0x28c2   :  { %v4802_v52 = vsub.f32 %v10567_v35, %v4776_v60  ;;  %v4123_v60 = vrot.slane %v10398_v32, 4 }
0x28c4   :  { %v4828_v40 = vmul.f32 1.442695, %v4802_v52 }
0x28c6   :  { %7437 = vpow2.f32 %v4828_v40 }
0x28c7   :  { %7439 = vpow2.f32 %v4826_v11 }
0x28c9   :  { %v4779_v43 = vpop.xlane.xlu2 %4778 }
0x28ca   :  { %v4803_v23 = vsub.f32 %v10575_v18, %v4779_v43 }
0x28cc   :  { %v10646_v61 = vpop.eup %7437  ;;  %v4830_v30 = vmul.f32 1.442695, %v4803_v23 }
0x28cd   :  { %v4782_v38 = vpop.xlane.xlu1 %4781  ;;  %v4870_v27 = vsel %vm1337_vm6, %v10646_v61, 0.0  ;;  %v10652_v35 = vpop.eup %7439 }
0x28ce   :  { %v4804_v10 = vsub.f32 %v10580_v8, %v4782_v38  ;;  %4871 = vadd.xlane.f32.xlu0 %v4870_v27  ;;  %v4867_v6 = vsel %vm4746_vm0, %v10652_v35, 0.0 }
0x28d0   :  { %v4832_v46 = vmul.f32 1.442695, %v4804_v10 }
0x28d2   :  { %7441 = vpow2.f32 %v4832_v46 }
0x28d3   :  { %7443 = vpow2.f32 %v4830_v30 }
0x28d5   :  { %v4785_v34 = vpop.xlane.xlu0 %4784 }
0x28d6   :  { %4868 = vadd.xlane.f32.xlu0 %v4867_v6  ;;  %v4805_v50 = vsub.f32 %v10585_v58, %v4785_v34  ;;  %v4103_v58 = vrot.slane %v4094_v20, 4 }
0x28d8   :  { %v10656_v56 = vpop.eup %7441  ;;  %v4834_v4 = vmul.f32 1.442695, %v4805_v50 }
0x28d9   :  { %v4876_v37 = vsel %vm1337_vm6, %v10656_v56, 0.0  ;;  %v10660_v44 = vpop.eup %7443 }
0x28da   :  { %4877 = vadd.xlane.f32.xlu1 %v4876_v37  ;;  %v4873_v9 = vsel %vm4746_vm0, %v10660_v44, 0.0 }
0x28dd   :  { %v4848_v8 = vpop.xlane.xlu0 %4847 }
0x28de   :  { %7445 = vrcp.f32 %v4848_v8 }
0x28df   :  { %v4788_v18 = vpop.xlane.xlu2 %4787 }
0x28e0   :  { %v4806_v3 = vsub.f32 %v10595_v13, %v4788_v18 }
0x28e2   :  { %v4836_v31 = vmul.f32 1.442695, %v4806_v3  ;;  %4874 = vadd.xlane.f32.xlu1 %v4873_v9 }
0x28e4   :  { %v7446_v12 = vpop.eup %7445  ;;  %7447 = vpow2.f32 %v4836_v31 }
0x28e5   :  { %v4906_v7 = vmul.f32 %v7446_v12, %v10589_v62  ;;  %v4851_v57 = vpop.xlane.xlu0 %4850  ;;  %v3964_v13 = vpop.permute.xlu1 %3963 }
0x28e6   :  { %7449 = vrcp.f32 %v4851_v57  ;;  %v4096_v0 = vsel %vm1252_vm2, %v4095_v42, %v3964_v13 }
0x28e7   :  { %v4791_v48 = vpop.xlane.xlu2 %4790  ;;  %v4100_v29 = vperm.slane %v4096_v0, %v9291_v2  ;;  %7036 = vmatmul.msk.f32.vlgmr.msrb.gmra.mxu3 %vm1337_vm6, %v4906_v7  ;;  %7451 = vpow2.f32 %v4834_v4 }
0x28e8   :  { %v4807_v59 = vsub.f32 %v10605_v39, %v4791_v48  ;;  %v4122_v39 = vperm.slane %v4118_v1, %v9291_v2 }
0x28e9   :  { %v4101_v24 = vrot.slane %v4100_v29, 4  ;;  %v4104_v62 = vsel %vm1252_vm2, %v4100_v29, %v4103_v58 }
0x28ea   :  { %v10678_v26 = vpop.eup %7447  ;;  %v4838_v47 = vmul.f32 1.442695, %v4807_v59  ;;  %v4112_v51 = vperm.slane %v4104_v62, %v9303_v14  ;;  %v4131_v46 = vrot.slane %v4122_v39, 4 }
0x28eb   :  { %v4102_v21 = vsel %vm1252_vm2, %v4101_v24, %v4094_v20  ;;  %v4882_v63 = vsel %vm1337_vm6, %v10678_v26, 0.0 }
0x28ec   :  { %v7450_v15 = vpop.eup %7449  ;;  %7453 = vpow2.f32 %v4838_v47  ;;  %v4108_v28 = vperm.slane %v4102_v21, %v9303_v14  ;;  %v4115_v55 = vrot.slane %v4112_v51, 4  ;;  %4883 = vadd.xlane.f32.xlu2 %v4882_v63 }
0x28ed   :  { %v4854_v52 = vpop.xlane.xlu0 %4853  ;;  %v3966_v49 = vpop.permute.xlu1 %3965  ;;  %v4907_v40 = vmul.f32 %v7450_v15, %v10599_v41 }
0x28ee   :  { %v4113_v11 = vrot.slane %v4108_v28, 4  ;;  %v4116_v43 = vsel %vm1252_vm2, 0.0, %v4115_v55  ;;  %7455 = vrcp.f32 %v4854_v52  ;;  %v4124_v10 = vsel %vm1252_vm2, %v4123_v60, %v3966_v49  ;;  %v10693_v23 = vpop.eup %7451 }
0x28ef   :  { %v4259_v38 = vrot.slane %v4116_v43, 4  ;;  %v10689_v27 = vpop.xlane.xlu2 %4844  ;;  %7037 = vmatmul.msk.f32.gmra.mxu3 %vm1337_vm6, %v4907_v40  ;;  %v4128_v30 = vperm.slane %v4124_v10, %v9291_v2  ;;  %v4254_v41 = vsel %vm1252_vm2, %v4115_v55, %v4108_v28  ;;  %v4879_v9 = vsel %vm4746_vm0, %v10693_v23, 0.0 }
0x28f0   :  { %v4114_v32 = vsel %vm1252_vm2, 0.0, %v4113_v11  ;;  %v4258_v20 = vperm.slane %v4254_v41, %v9291_v2 }
0x28f1   :  { %v4260_v34 = vsel %vm1252_vm2, %v4259_v38, %v4114_v32  ;;  %v4129_v8 = vrot.slane %v4128_v30, 4  ;;  %v4132_v18 = vsel %vm1252_vm2, %v4128_v30, %v4131_v46 }
0x28f2   :  { %v10699_v6 = vpop.eup %7453  ;;  %v4264_v37 = vperm.slane %v4260_v34, %v9291_v2  ;;  %v4140_v3 = vperm.slane %v4132_v18, %v9303_v14  ;;  %v4267_v46 = vrot.slane %v4258_v20, 4 }
0x28f3   :  { %v4885_v50 = vsel %vm4746_vm0, %v10699_v6, 0.0  ;;  %v4130_v42 = vsel %vm1252_vm2, %v4129_v8, %v4122_v39 }
0x28f4   :  { %v7456_v31 = vpop.eup %7455  ;;  %v4265_v12 = vrot.slane %v4264_v37, 4  ;;  %4880 = vadd.xlane.f32.xlu2 %v4879_v9  ;;  %4886 = vadd.xlane.f32.xlu0 %v4885_v50  ;;  %v4136_v7 = vperm.slane %v4130_v42, %v9303_v14  ;;  %v4143_v57 = vrot.slane %v4140_v3, 4  ;;  %v4268_v32 = vsel %vm1252_vm2, %v4264_v37, %v4267_v46 }
0x28f5   :  { %v4908_v19 = vmul.f32 %v7456_v31, %v10611_v54  ;;  %v4860_v13 = vpop.xlane.xlu0 %4859  ;;  %v4276_v30 = vperm.slane %v4268_v32, %v9303_v14 }
0x28f6   :  { %v4266_v4 = vsel %vm1252_vm2, %v4265_v12, %v4258_v20  ;;  %7457 = vrcp.f32 %v4860_v13  ;;  %v4141_v58 = vrot.slane %v4136_v7, 4  ;;  %v4144_v48 = vsel %vm1252_vm2, 0.0, %v4143_v57 }
0x28f7   :  { %v4272_v0 = vperm.slane %v4266_v4, %v9303_v14  ;;  %v4857_v29 = vpop.xlane.xlu2 %4856  ;;  %7039 = vmatmul.msk.f32.vlgmr.msra.gmra.mxu0 %vm1337_vm6, %v4908_v19  ;;  %v4281_v59 = vsel %vm1252_vm2, %v4143_v57, %v4136_v7  ;;  %v4286_v1 = vrot.slane %v4144_v48, 4 }
0x28f8   :  { %7459 = vrcp.f32 %v4857_v29  ;;  %v4142_v54 = vsel %vm1252_vm2, 0.0, %v4141_v58  ;;  %v4285_v24 = vperm.slane %v4281_v59, %v9291_v2 }
0x28f9   :  { %5091 = vst [vmem:[#allocation1] ss:$2 sm:$0xff] %v4272_v0  ;;  %v4287_v62 = vsel %vm1252_vm2, %v4286_v1, %v4142_v54  ;;  %v4277_v11 = vrot.slane %v4272_v0, 4 }
0x28fa   :  { %v4291_v47 = vperm.slane %v4287_v62, %v9291_v2  ;;  %v4294_v51 = vrot.slane %v4285_v24, 4 }
0x28fc   :  { %v7458_v21 = vpop.eup %7457  ;;  %v4292_v63 = vrot.slane %v4291_v47, 4  ;;  %v4295_v15 = vsel %vm1252_vm2, %v4291_v47, %v4294_v51 }
0x28fd   :  { %v4910_v39 = vmul.f32 %v7458_v21, %v10622_v33  ;;  %v4863_v28 = vpop.xlane.xlu0 %4862  ;;  %v4278_v33 = vsel %vm1252_vm2, 0.0, %v4277_v11  ;;  %v4303_v41 = vperm.slane %v4295_v15, %v9303_v14 }
0x28fe   :  { %v7460_v55 = vpop.eup %7459  ;;  %7461 = vrcp.f32 %v4863_v28  ;;  %v4293_v60 = vsel %vm1252_vm2, %v4292_v63, %v4285_v24 }
0x28ff   :  { %v4909_v52 = vmul.f32 %v7460_v55, %v10624_v45  ;;  %7042 = vmatmul.msk.f32.vlgmr.msra.gmra.mxu1 %vm1337_vm6, %v4910_v39  ;;  %v4299_v49 = vperm.slane %v4293_v60, %v9303_v14  ;;  %v4306_v8 = vrot.slane %v4303_v41, 4 }
0x2901   :  { %7040 = vmatmul.msk.f32.gmra.mxu0 %vm1337_vm6, %v4909_v52  ;;  %5093 = vst [vmem:[#allocation1 + $0x1] ss:$2 sm:$0xff] %v4299_v49  ;;  %v4304_v38 = vrot.slane %v4299_v49, 4  ;;  %v4307_v50 = vsel %vm1252_vm2, 0.0, %v4306_v8 }
0x2903   :  { %v4305_v45 = vsel %vm1252_vm2, 0.0, %v4304_v38 }
0x2904   :  { %v7462_v40 = vpop.eup %7461 }
0x2905   :  { %v4911_v43 = vmul.f32 %v7462_v40, %v10630_v22  ;;  %v4279_v22 = vrot.slane %v4276_v30, 4 }
0x2907   :  { %7043 = vmatmul.msk.f32.gmra.mxu1 %vm1337_vm6, %v4911_v43  ;;  %v4280_v3 = vsel %vm1252_vm2, 0.0, %v4279_v22 }
0x2908   :  { %v5096_v10 = vld.sshfl [vmem:[#allocation1] sm:$0xff pattern:$0x75316420] }
0x2909   :  { %5122 = vmatpush.msrb.mxu2 %v5096_v10  ;;  %5133 = vst [vmem:[#allocation1] ss:$2 sm:$0xff] %v4278_v33 }
0x290a   :  { %5135 = vst [vmem:[#allocation1 + $0x1] ss:$2 sm:$0xff] %v4305_v45 }
0x2911   :  { %v5138_v34 = vld.sshfl [vmem:[#allocation1] sm:$0xff pattern:$0x75316420] }
0x2912   :  { %5164 = vmatpush.msra.mxu3 %v5138_v34  ;;  %5175 = vst [vmem:[#allocation1] ss:$2 sm:$0xff] %v4276_v30 }
0x2913   :  { %5177 = vst [vmem:[#allocation1 + $0x1] ss:$2 sm:$0xff] %v4303_v41 }
0x2918   :  { %v4842_v18 = vpop.xlane.xlu1 %4841 }
0x2919   :  { %7463 = vrcp.f32 %v4842_v18 }
0x291a   :  { %v5180_v9 = vld.sshfl [vmem:[#allocation1] sm:$0xff pattern:$0x75316420]  ;;  %7465 = vrcp.f32 %v10689_v27 }
0x291b   :  { %5206 = vmatpush.msrb.mxu0 %v5180_v9  ;;  %5217 = vst [vmem:[#allocation1] ss:$2 sm:$0xff] %v4280_v3 }
0x291c   :  { %5219 = vst [vmem:[#allocation1 + $0x1] ss:$2 sm:$0xff] %v4307_v50 }
0x291f   :  { %v7464_v37 = vpop.eup %7463 }
0x2920   :  { %v4904_v31 = vmul.f32 %v7464_v37, %v10635_v53  ;;  %v7466_v12 = vpop.eup %7465 }
0x2921   :  { %v4905_v42 = vmul.f32 %v7466_v12, %v10613_v5 }
0x2922   :  { %7033 = vmatmul.msk.f32.vlgmr.msra.gmra.mxu2 %vm1337_vm6, %v4904_v31 }
0x2923   :  { %v5222_v20 = vld.sshfl [vmem:[#allocation1] sm:$0xff pattern:$0x75316420] }
0x2924   :  { %5248 = vmatpush.msrb.mxu1 %v5222_v20 }
0x292a   :  { %7034 = vmatmul.msk.f32.gmra.mxu2 %vm1337_vm6, %v4905_v42 }
0x292f   :  { %v4866_v19 = vpop.xlane.xlu2 %4865 }
0x2930   :  { %7467 = vrcp.f32 %v4866_v19 }
0x2936   :  { %v7468_v7 = vpop.eup %7467 }
0x2937   :  { %v4912_v57 = vmul.f32 %v7468_v7, %v10640_v36 }
0x2939   :  { %7045 = vmatmul.msk.f32.vlgmr.msrb.gmra.mxu2 %vm1337_vm6, %v4912_v57 }
0x2941   :  { %v4872_v13 = vpop.xlane.xlu0 %4871 }
0x2942   :  { %7469 = vrcp.f32 %v4872_v13 }
0x2948   :  { %v7470_v27 = vpop.eup %7469 }
0x2949   :  { %v4914_v53 = vmul.f32 %v7470_v27, %v10646_v61  ;;  %v4869_v4 = vpop.xlane.xlu0 %4868 }
0x294a   :  { %7471 = vrcp.f32 %v4869_v4 }
0x294b   :  { %7048 = vmatmul.msk.f32.vlgmr.msra.gmra.mxu3 %vm1337_vm6, %v4914_v53 }
0x294d   :  { %v4878_v0 = vpop.xlane.xlu1 %4877 }
0x294e   :  { %7473 = vrcp.f32 %v4878_v0 }
0x2950   :  { %v7472_v5 = vpop.eup %7471 }
0x2951   :  { %v4913_v58 = vmul.f32 %v7472_v5, %v10652_v35 }
0x2953   :  { %7046 = vmatmul.msk.f32.gmra.mxu2 %vm1337_vm6, %v4913_v58 }
0x2954   :  { %v7474_v48 = vpop.eup %7473 }
0x2955   :  { %v4916_v36 = vmul.f32 %v7474_v48, %v10656_v56  ;;  %v4875_v29 = vpop.xlane.xlu1 %4874 }
0x2956   :  { %7475 = vrcp.f32 %v4875_v29 }
0x2957   :  { %7051 = vmatmul.msk.f32.vlgmr.msrb.gmra.mxu0 %vm1337_vm6, %v4916_v36 }
0x295c   :  { %v7476_v59 = vpop.eup %7475 }
0x295d   :  { %v4915_v61 = vmul.f32 %v7476_v59, %v10660_v44 }
0x295f   :  { %v4884_v1 = vpop.xlane.xlu2 %4883  ;;  %7049 = vmatmul.msk.f32.gmra.mxu3 %vm1337_vm6, %v4915_v61 }
0x2960   :  { %7477 = vrcp.f32 %v4884_v1 }
0x2966   :  { %v7478_v54 = vpop.eup %7477 }
0x2967   :  { %v4918_v24 = vmul.f32 %v7478_v54, %v10678_v26  ;;  %v4881_v35 = vpop.xlane.xlu2 %4880  ;;  %v4887_v62 = vpop.xlane.xlu0 %4886 }
0x2968   :  { %7479 = vrcp.f32 %v4881_v35 }
0x2969   :  { %7481 = vrcp.f32 %v4887_v62  ;;  %7054 = vmatmul.msk.f32.vlgmr.msrb.gmra.mxu1 %vm1337_vm6, %v4918_v24 }
0x296a   :  { %v4998_v15 = vpop.f32.mrf.mxu3 }
0x296b   :  { %v5270_v26 = vrot.slane %v4998_v15, 4 }
0x296e   :  { %v7480_v56 = vpop.eup %7479 }
0x296f   :  { %v7482_v47 = vpop.eup %7481  ;;  %v4917_v51 = vmul.f32 %v7480_v56, %v10693_v23 }
0x2970   :  { %v4919_v21 = vmul.f32 %v7482_v47, %v10699_v6 }
0x2971   :  { %7052 = vmatmul.msk.f32.gmra.mxu0 %vm1337_vm6, %v4917_v51 }
0x2972   :  { %7055 = vmatmul.msk.f32.gmra.mxu1 %vm1337_vm6, %v4919_v21 }
0x2974   :  { %v5040_v28 = vpop.f32.mrf.mxu0 }
0x2975   :  { %v5256_v52 = vrot.slane %v5040_v28, 4 }
0x297c   :  { %v5082_v44 = vpop.f32.mrf.mxu1 }
0x297d   :  { %v5268_v63 = vrot.slane %v5082_v44, 4  ;;  %v5271_v55 = vsel %vm1252_vm2, %v5082_v44, %v5270_v26 }
0x297e   :  { %v5279_v23 = vperm.slane %v5271_v55, %v9291_v2 }
0x297f   :  { %v5269_v39 = vsel %vm1252_vm2, %v5268_v63, %v4998_v15 }
0x2980   :  { %v5275_v60 = vperm.slane %v5269_v39, %v9291_v2  ;;  %v5292_v33 = vrot.slane %v5279_v23, 4 }
0x2982   :  { %v5280_v11 = vrot.slane %v5275_v60, 4 }
0x29a5   :  { %v4956_v49 = vpop.f32.mrf.mxu2 }
0x29a6   :  { %v5257_v6 = vsel %vm1252_vm2, %v5256_v52, %v4956_v49  ;;  %v5258_v40 = vrot.slane %v4956_v49, 4  ;;  %v5085_v49 = vpop.f32.mrf.mxu1 }
0x29a7   :  { %v5263_v43 = vperm.slane %v5257_v6, %v9291_v2 }
0x29a8   :  { %v5259_v38 = vsel %vm1252_vm2, %v5040_v28, %v5258_v40  ;;  %v5318_v40 = vrot.slane %v5085_v49, 4 }
0x29a9   :  { %v5267_v10 = vperm.slane %v5259_v38, %v9291_v2  ;;  %v5281_v46 = vsel %vm1252_vm2, %v5280_v11, %v5263_v43  ;;  %v5282_v45 = vrot.slane %v5263_v43, 4  ;;  %v5001_v43 = vpop.f32.mrf.mxu3 }
0x29aa   :  { %v5287_v32 = vperm.slane %v5281_v46, %v9303_v14  ;;  %v5319_v38 = vsel %vm1252_vm2, %v5318_v40, %v5001_v43 }
0x29ab   :  { %v5283_v30 = vsel %vm1252_vm2, %v5275_v60, %v5282_v45  ;;  %v5293_v41 = vsel %vm1252_vm2, %v5292_v33, %v5267_v10  ;;  %v5294_v34 = vrot.slane %v5267_v10, 4  ;;  %v5043_v60 = vpop.f32.mrf.mxu0  ;;  %v5323_v10 = vperm.slane %v5319_v38, %v9291_v2 }
0x29ac   :  { %v5291_v22 = vperm.slane %v5283_v30, %v9303_v14  ;;  %v5299_v8 = vperm.slane %v5293_v41, %v9303_v14  ;;  %v5304_v9 = vrot.slane %v5287_v32, 4 }
0x29ad   :  { %v5295_v18 = vsel %vm1252_vm2, %v5279_v23, %v5294_v34  ;;  %v4959_v52 = vpop.f32.mrf.mxu2  ;;  %v5312_v23 = vrot.slane %v5043_v60, 4 }
0x29ae   :  { %v5303_v3 = vperm.slane %v5295_v18, %v9303_v14  ;;  %v5306_v50 = vrot.slane %v5291_v22, 4  ;;  %v5308_v31 = vrot.slane %v5299_v8, 4  ;;  %v5305_v7 = vsel %vm1252_vm2, 0.0, %v5304_v9 }
0x29af   :  { %v5313_v6 = vsel %vm1252_vm2, %v5312_v23, %v4959_v52 }
0x29b0   :  { %v5307_v37 = vsel %vm1252_vm2, 0.0, %v5306_v50  ;;  %v5310_v20 = vrot.slane %v5303_v3, 4  ;;  %v5424_v12 = vsel %vm1252_vm2, %v5306_v50, %v5287_v32  ;;  %v5309_v0 = vsel %vm1252_vm2, 0.0, %v5308_v31 }
0x29b1   :  { %v5428_v42 = vperm.slane %v5424_v12, %v9291_v2  ;;  %v5429_v19 = vrot.slane %v5307_v37, 4  ;;  %v5317_v11 = vperm.slane %v5313_v6, %v9291_v2  ;;  %v5324_v32 = vrot.slane %v5323_v10, 4 }
0x29b2   :  { %v5311_v57 = vsel %vm1252_vm2, 0.0, %v5310_v20  ;;  %v5435_v13 = vsel %vm1252_vm2, %v5310_v20, %v5299_v8 }
0x29b3   :  { %v5430_v27 = vsel %vm1252_vm2, %v5429_v19, %v5305_v7  ;;  %v5440_v53 = vrot.slane %v5311_v57, 4  ;;  %v5439_v4 = vperm.slane %v5435_v13, %v9291_v2  ;;  %v5448_v58 = vrot.slane %v5428_v42, 4 }
0x29b4   :  { %v5434_v5 = vperm.slane %v5430_v27, %v9291_v2  ;;  %v5326_v33 = vrot.slane %v5317_v11, 4  ;;  %v5325_v30 = vsel %vm1252_vm2, %v5324_v32, %v5317_v11 }
0x29b5   :  { %v5441_v48 = vsel %vm1252_vm2, %v5440_v53, %v5309_v0  ;;  %v5460_v36 = vrot.slane %v5439_v4, 4  ;;  %v5331_v34 = vperm.slane %v5325_v30, %v9303_v14 }
0x29b6   :  { %v5445_v29 = vperm.slane %v5441_v48, %v9291_v2  ;;  %v5449_v59 = vsel %vm1252_vm2, %v5434_v5, %v5448_v58  ;;  %v5446_v61 = vrot.slane %v5434_v5, 4  ;;  %v5327_v46 = vsel %vm1252_vm2, %v5323_v10, %v5326_v33 }
0x29b7   :  { %v5457_v1 = vperm.slane %v5449_v59, %v9303_v14  ;;  %v5335_v45 = vperm.slane %v5327_v46, %v9303_v14  ;;  %v5336_v50 = vrot.slane %v5331_v34, 4 }
0x29b8   :  { %v5461_v54 = vsel %vm1252_vm2, %v5445_v29, %v5460_v36  ;;  %v5447_v24 = vsel %vm1252_vm2, %v5446_v61, %v5428_v42  ;;  %v5458_v35 = vrot.slane %v5445_v29, 4 }
0x29b9   :  { %v5469_v62 = vperm.slane %v5461_v54, %v9303_v14  ;;  %v5476_v56 = vrot.slane %v5457_v1, 4  ;;  %v5453_v47 = vperm.slane %v5447_v24, %v9303_v14  ;;  %v5338_v41 = vrot.slane %v5335_v45, 4 }
0x29ba   :  { %v5459_v51 = vsel %vm1252_vm2, %v5458_v35, %v5439_v4  ;;  %v5337_v19 = vsel %vm1252_vm2, 0.0, %v5336_v50 }
0x29bb   :  { %v5477_v21 = vsel %vm1252_vm2, %v5469_v62, %v5476_v56  ;;  %v5474_v44 = vrot.slane %v5469_v62, 4  ;;  %v5465_v63 = vperm.slane %v5459_v51, %v9303_v14  ;;  %v5472_v15 = vrot.slane %v5453_v47, 4 }
0x29bc   :  { %5613 = vrot.lane.b32.xlu0 %v5477_v21, %s8663_s10  ;;  %v5124_v22 = vpop.f32.mrf.mxu2  ;;  %v5339_v18 = vsel %vm1252_vm2, 0.0, %v5338_v41  ;;  %v5478_v20 = vsel %vm1252_vm2, %v5338_v41, %v5331_v34 }
0x29bd   :  { %v5475_v26 = vsel %vm1252_vm2, %v5474_v44, %v5457_v1  ;;  %v5470_v39 = vrot.slane %v5465_v63, 4  ;;  %v5473_v28 = vsel %vm1252_vm2, %v5465_v63, %v5472_v15  ;;  %v5342_v3 = vrot.slane %v5124_v22, 4 }
0x29be   :  { %5601 = vrot.lane.b32.xlu2 %v5475_v26, %s8662_s6  ;;  %5589 = vrot.lane.b32.xlu1 %v5473_v28, %s8617_s16  ;;  %v5483_v37 = vrot.slane %v5339_v18, 4  ;;  %v5482_v57 = vperm.slane %v5478_v20, %v9291_v2 }
0x29bf   :  { %v10801_v55 = vsel %vm1252_vm2, %v5470_v39, %v5453_v47 }
0x29c0   :  { %v5484_v13 = vsel %vm1252_vm2, %v5483_v37, %v5337_v19  ;;  %v5502_v59 = vrot.slane %v5482_v57, 4 }
0x29c1   :  { %v5488_v36 = vperm.slane %v5484_v13, %v9291_v2 }
0x29c3   :  { %v5500_v51 = vrot.slane %v5488_v36, 4  ;;  %v5503_v39 = vsel %vm1252_vm2, %v5488_v36, %v5502_v59  ;;  %v896_v36 = vld [vmem:[%s11353_s21 + $0x18] sm:$0xff] }
0x29c4   :  { %v5511_v20 = vperm.slane %v5503_v39, %v9303_v14  ;;  %5652 = vmatpush.msra.mxu2 %v896_v36 }
0x29c5   :  { %v5501_v43 = vsel %vm1252_vm2, %v5500_v51, %v5482_v57 }
0x29c6   :  { %v5530_v59 = vrot.slane %v5511_v20, 4 }
0x29ce   :  { %v5166_v12 = vpop.f32.mrf.mxu3 }
0x29cf   :  { %v5354_v27 = vrot.slane %v5166_v12, 4 }
0x29d4   :  { %v5208_v8 = vpop.f32.mrf.mxu0 }
0x29d5   :  { %v5340_v9 = vrot.slane %v5208_v8, 4  ;;  %v5343_v31 = vsel %vm1252_vm2, %v5208_v8, %v5342_v3 }
0x29d6   :  { %v5351_v7 = vperm.slane %v5343_v31, %v9291_v2  ;;  %v5127_v38 = vpop.f32.mrf.mxu2 }
0x29d7   :  { %v5341_v42 = vsel %vm1252_vm2, %v5340_v9, %v5124_v22 }
0x29d8   :  { %v5347_v53 = vperm.slane %v5341_v42, %v9291_v2  ;;  %v5378_v58 = vrot.slane %v5351_v7, 4 }
0x29da   :  { %v5366_v61 = vrot.slane %v5347_v53, 4 }
0x29e2   :  { %v5169_v33 = vpop.f32.mrf.mxu3 }
0x29e6   :  { %v5250_v4 = vpop.f32.mrf.mxu1 }
0x29e7   :  { %v5352_v0 = vrot.slane %v5250_v4, 4  ;;  %v5355_v5 = vsel %vm1252_vm2, %v5250_v4, %v5354_v27 }
0x29e8   :  { %v5363_v48 = vperm.slane %v5355_v5, %v9291_v2 }
0x29e9   :  { %v5353_v29 = vsel %vm1252_vm2, %v5352_v0, %v5166_v12 }
0x29ea   :  { %v5359_v1 = vperm.slane %v5353_v29, %v9291_v2  ;;  %v5376_v54 = vrot.slane %v5363_v48, 4  ;;  %v5379_v24 = vsel %vm1252_vm2, %v5363_v48, %v5378_v58 }
0x29eb   :  { %v5387_v35 = vperm.slane %v5379_v24, %v9303_v14 }
0x29ec   :  { %v5364_v62 = vrot.slane %v5359_v1, 4  ;;  %v5367_v56 = vsel %vm1252_vm2, %v5359_v1, %v5366_v61  ;;  %v5377_v47 = vsel %vm1252_vm2, %v5376_v54, %v5351_v7  ;;  %v5507_v7 = vperm.slane %v5501_v43, %v9303_v14 }
0x29ed   :  { %v5375_v21 = vperm.slane %v5367_v56, %v9303_v14  ;;  %v5383_v44 = vperm.slane %v5377_v47, %v9303_v14  ;;  %v5394_v63 = vrot.slane %v5387_v35, 4 }
0x29ee   :  { %v5365_v15 = vsel %vm1252_vm2, %v5364_v62, %v5347_v53  ;;  %v5211_v26 = vpop.f32.mrf.mxu0  ;;  %v5526_v1 = vrot.slane %v5507_v7, 4 }
0x29ef   :  { %v5371_v28 = vperm.slane %v5365_v15, %v9303_v14  ;;  %v5390_v60 = vrot.slane %v5375_v21, 4  ;;  %v5392_v52 = vrot.slane %v5383_v44, 4  ;;  %v5395_v23 = vsel %vm1252_vm2, 0.0, %v5394_v63  ;;  %v5253_v49 = vpop.f32.mrf.mxu1 }
0x29f0   :  { %v5537_v6 = vrot.slane %v5395_v23, 4  ;;  %v5396_v40 = vrot.slane %v5211_v26, 4  ;;  %v5402_v11 = vrot.slane %v5253_v49, 4  ;;  %v5532_v32 = vsel %vm1252_vm2, %v5394_v63, %v5383_v44 }
0x29f1   :  { %v5388_v10 = vrot.slane %v5371_v28, 4  ;;  %v5391_v46 = vsel %vm1252_vm2, 0.0, %v5390_v60  ;;  %v5393_v45 = vsel %vm1252_vm2, 0.0, %v5392_v52  ;;  %v5489_v9 = vsel %vm1252_vm2, %v5390_v60, %v5371_v28 }
0x29f2   :  { %v5494_v30 = vrot.slane %v5391_v46, 4  ;;  %v5538_v41 = vsel %vm1252_vm2, %v5537_v6, %v5393_v45  ;;  %v5397_v34 = vsel %vm1252_vm2, %v5396_v40, %v5127_v38  ;;  %v5403_v22 = vsel %vm1252_vm2, %v5402_v11, %v5169_v33 }
0x29f3   :  { %v5401_v8 = vperm.slane %v5397_v34, %v9291_v2  ;;  %v5407_v18 = vperm.slane %v5403_v22, %v9291_v2  ;;  %v5389_v3 = vsel %vm1252_vm2, 0.0, %v5388_v10  ;;  %v5536_v50 = vperm.slane %v5532_v32, %v9291_v2 }
0x29f4   :  { %v5493_v37 = vperm.slane %v5489_v9, %v9291_v2  ;;  %v5495_v31 = vsel %vm1252_vm2, %v5494_v30, %v5389_v3  ;;  %v5542_v13 = vperm.slane %v5538_v41, %v9291_v2  ;;  %v895_v9 = vld [vmem:[%s11353_s21 + $0x10] sm:$0xff] }
0x29f5   :  { %v5410_v12 = vrot.slane %v5401_v8, 4  ;;  %v5408_v42 = vrot.slane %v5407_v18, 4  ;;  %v5499_v19 = vperm.slane %v5495_v31, %v9291_v2  ;;  %v5556_v48 = vrot.slane %v5536_v50, 4  ;;  %5653 = vmatpush.msra.mxu2 %v895_v9 }
0x29f6   :  { %v5514_v57 = vrot.slane %v5493_v37, 4  ;;  %v5554_v62 = vrot.slane %v5542_v13, 4 }
0x29f7   :  { %v5409_v27 = vsel %vm1252_vm2, %v5408_v42, %v5401_v8  ;;  %v5411_v53 = vsel %vm1252_vm2, %v5407_v18, %v5410_v12  ;;  %v5512_v4 = vrot.slane %v5499_v19, 4  ;;  %v5557_v63 = vsel %vm1252_vm2, %v5542_v13, %v5556_v48 }
0x29f8   :  { %v5415_v0 = vperm.slane %v5409_v27, %v9303_v14  ;;  %v5419_v5 = vperm.slane %v5411_v53, %v9303_v14  ;;  %v5515_v58 = vsel %vm1252_vm2, %v5499_v19, %v5514_v57  ;;  %v5555_v52 = vsel %vm1252_vm2, %v5554_v62, %v5536_v50  ;;  %v894_v50 = vld [vmem:[%s11353_s21 + $0x8] sm:$0xff] }
0x29f9   :  { %v5523_v29 = vperm.slane %v5515_v58, %v9303_v14  ;;  %v5513_v61 = vsel %vm1252_vm2, %v5512_v4, %v5493_v37  ;;  %v5565_v6 = vperm.slane %v5557_v63, %v9303_v14  ;;  %v5561_v43 = vperm.slane %v5555_v52, %v9303_v14  ;;  %v893_v37 = vld [vmem:[%s11353_s21] sm:$0xff]  ;;  %5654 = vmatpush.msra.mxu2 %v894_v50 }
0x29fa   :  { %v5420_v54 = vrot.slane %v5415_v0, 4  ;;  %v5422_v24 = vrot.slane %v5419_v5, 4  ;;  %v5519_v35 = vperm.slane %v5513_v61, %v9303_v14 }
0x29fb   :  { %v5531_v56 = vsel %vm1252_vm2, %v5523_v29, %v5530_v59  ;;  %v5528_v47 = vrot.slane %v5523_v29, 4  ;;  %v5584_v46 = vrot.slane %v5565_v6, 4  ;;  %v5580_v34 = vrot.slane %v5561_v43, 4  ;;  %5655 = vmatpush.msra.mxu2 %v893_v37 }
0x29fc   :  { %v5423_v51 = vsel %vm1252_vm2, 0.0, %v5422_v24  ;;  %5615 = vrot.lane.b32.xlu0 %v5531_v56, %s8663_s10  ;;  %v5527_v21 = vsel %vm1252_vm2, %v5519_v35, %v5526_v1  ;;  %v5524_v44 = vrot.slane %v5519_v35, 4  ;;  %v5543_v39 = vsel %vm1252_vm2, %v5422_v24, %v5415_v0  ;;  %v7263_v24 = vld [vmem:[%s11355_s15] ss:$0 sm:$0xff] }
0x29fd   :  { %v5548_v15 = vrot.slane %v5423_v51, 4  ;;  %v5529_v26 = vsel %vm1252_vm2, %v5528_v47, %v5511_v20  ;;  %5591 = vrot.lane.b32.xlu2 %v5527_v21, %s8617_s16  ;;  %v5421_v28 = vsel %vm1252_vm2, 0.0, %v5420_v54  ;;  %v5547_v60 = vperm.slane %v5543_v39, %v9291_v2 }
0x29fe   :  { %5603 = vrot.lane.b32.xlu1 %v5529_v26, %s8662_s6  ;;  %v5525_v23 = vsel %vm1252_vm2, %v5524_v44, %v5507_v7  ;;  %v5678_v35 = vrot.slane %v7263_v24, 4 }
0x29ff   :  { %v5549_v49 = vsel %vm1252_vm2, %v5548_v15, %v5421_v28  ;;  %v5568_v11 = vrot.slane %v5547_v60, 4 }
0x2a00   :  { %v5553_v40 = vperm.slane %v5549_v49, %v9291_v2 }
0x2a02   :  { %v5569_v38 = vsel %vm1252_vm2, %v5553_v40, %v5568_v11  ;;  %v5566_v33 = vrot.slane %v5553_v40, 4  ;;  %v913_v40 = vld [vmem:[%s11356_s3 + $0x10] sm:$0xff]  ;;  %v912_v11 = vld [vmem:[%s11356_s3 + $0x8] sm:$0xff] }
0x2a03   :  { %v5577_v10 = vperm.slane %v5569_v38, %v9303_v14  ;;  %v7264_v38 = vld [vmem:[%s11357_s7] ss:$0 sm:$0xff] }
0x2a04   :  { %v5567_v45 = vsel %vm1252_vm2, %v5566_v33, %v5547_v60  ;;  %v5750_v33 = vrot.slane %v7264_v38, 4 }
0x2a05   :  { %v5585_v32 = vsel %vm1252_vm2, %v5577_v10, %v5584_v46  ;;  %v5582_v30 = vrot.slane %v5577_v10, 4  ;;  %v5573_v41 = vperm.slane %v5567_v45, %v9303_v14 }
0x2a06   :  { %5617 = vrot.lane.b32.xlu0 %v5585_v32, %s8663_s10  ;;  %s11360_s10 = sld [smem:[#allocation91_spill]] }
0x2a07   :  { %v5583_v22 = vsel %vm1252_vm2, %v5582_v30, %v5565_v6  ;;  %v5581_v8 = vsel %vm1252_vm2, %v5573_v41, %v5580_v34  ;;  %v5578_v18 = vrot.slane %v5573_v41, 4  ;;  %v914_v6 = vld [vmem:[%s11356_s3 + $0x18] sm:$0xff] }
0x2a08   :  { %5605 = vrot.lane.b32.xlu1 %v5583_v22, %s8662_s6  ;;  %5593 = vrot.lane.b32.xlu2 %v5581_v8, %s8617_s16  ;;  %s11354_s16 = sld [smem:[#allocation99_spill]] }
0x2a09   :  { %v5579_v3 = vsel %vm1252_vm2, %v5578_v18, %v5561_v43  ;;  %5802 = vmatpush.msra.mxu0 %v914_v6  ;;  %v911_v43 = vld [vmem:[%s11356_s3] sm:$0xff]  ;;  %s11359_s6 = sld [smem:[#allocation92_spill]] }
0x2a0b   :  { %5803 = vmatpush.msra.mxu0 %v913_v40 }
0x2a0d   :  { %5804 = vmatpush.msra.mxu0 %v912_v11  ;;  %v922_v11 = vld [vmem:[%s11361_s0 + $0x18] sm:$0xff] }
0x2a0e   :  { %v918_v59 = vld [vmem:[%s11354_s16 + $0x18] sm:$0xff]  ;;  %v917_v61 = vld [vmem:[%s11354_s16 + $0x10] sm:$0xff]  ;;  %v916_v1 = vld [vmem:[%s11354_s16 + $0x8] sm:$0xff]  ;;  %6066 = vmatpush.msrb.mxu2 %v922_v11 }
0x2a0f   :  { %5724 = vmatpush.msrb.mxu3 %v918_v59  ;;  %v915_v54 = vld [vmem:[%s11354_s16] sm:$0xff]  ;;  %5805 = vmatpush.msra.mxu0 %v911_v43  ;;  %v921_v43 = vld [vmem:[%s11361_s0 + $0x10] sm:$0xff] }
0x2a10   :  { %6067 = vmatpush.msrb.mxu2 %v921_v43 }
0x2a11   :  { %5725 = vmatpush.msrb.mxu3 %v917_v61 }
0x2a13   :  { %5726 = vmatpush.msrb.mxu3 %v916_v1 }
0x2a15   :  { %5727 = vmatpush.msrb.mxu3 %v915_v54 }
0x2a18   :  { %v5602_v20 = vpop.permute.xlu2 %5601 }
0x2a2e   :  { %v5614_v42 = vpop.permute.xlu0 %5613 }
0x2a30   :  { %v5590_v31 = vpop.permute.xlu1 %5589 }
0x2a31   :  { %v5622_v12 = vsel %vm1335_vm5, %v10801_v55, %v5590_v31 }
0x2a32   :  { %v5625_v19 = vsel %vm1339_vm7, %v5622_v12, %v5602_v20 }
0x2a33   :  { %v5628_v7 = vsel %vm1343_vm9, %v5625_v19, %v5614_v42 }
0x2a34   :  { %7056 = vmatmul.msk.f32.vlgmr.msra.gmra.mxu2 %vm1101_vm4, %v5628_v7 }
0x2a57   :  { %v5592_v57 = vpop.permute.xlu2 %5591 }
0x2a58   :  { %v5623_v13 = vsel %vm1335_vm5, %v5525_v23, %v5592_v57 }
0x2a62   :  { %v5594_v0 = vpop.permute.xlu2 %5593 }
0x2a63   :  { %v5624_v5 = vsel %vm1335_vm5, %v5579_v3, %v5594_v0 }
0x2a6e   :  { %v5616_v53 = vpop.permute.xlu0 %5615 }
0x2a70   :  { %v5604_v27 = vpop.permute.xlu1 %5603 }
0x2a71   :  { %v5626_v4 = vsel %vm1339_vm7, %v5623_v13, %v5604_v27  ;;  %v910_v13 = vld [vmem:[%s11358_s17 + $0x18] sm:$0xff]  ;;  %v909_v27 = vld [vmem:[%s11358_s17 + $0x10] sm:$0xff] }
0x2a72   :  { %v5629_v55 = vsel %vm1343_vm9, %v5626_v4, %v5616_v53  ;;  %5874 = vmatpush.msra.mxu1 %v910_v13  ;;  %v908_v53 = vld [vmem:[%s11358_s17 + $0x8] sm:$0xff]  ;;  %v907_v4 = vld [vmem:[%s11358_s17] sm:$0xff] }
0x2a73   :  { %7057 = vmatmul.msk.f32.gmra.mxu2 %vm1101_vm4, %v5629_v55  ;;  %v7265_v55 = vld [vmem:[%s11359_s6] ss:$0 sm:$0xff] }
0x2a74   :  { %5875 = vmatpush.msra.mxu1 %v909_v27  ;;  %v5828_v0 = vrot.slane %v7265_v55, 4 }
0x2a76   :  { %5876 = vmatpush.msra.mxu1 %v908_v53 }
0x2a78   :  { %v5618_v48 = vpop.permute.xlu0 %5617  ;;  %5877 = vmatpush.msra.mxu1 %v907_v4 }
0x2a7a   :  { %v5606_v58 = vpop.permute.xlu1 %5605 }
0x2a7b   :  { %v5627_v36 = vsel %vm1339_vm7, %v5624_v5, %v5606_v58 }
0x2a7c   :  { %v5630_v29 = vsel %vm1343_vm9, %v5627_v36, %v5618_v48 }
0x2a7d   :  { %7058 = vmatmul.msk.f32.gmra.mxu2 %vm1101_vm4, %v5630_v29 }
0x2ab7   :  { %v5657_v62 = vpop.f32.mrf.mxu2 }
0x2ab8   :  { %v5669_v56 = vrot.slane %v5657_v62, 4  ;;  %v10911_v47 = vadd.f32 %v7263_v24, %v5657_v62 }
0x2aba   :  { %v10913_v51 = vadd.f32 %v5678_v35, %v5669_v56  ;;  %5692 = vst [vmem:[#allocation1] ss:$2 sm:$0xff] %v10911_v47 }
0x2abc   :  { %5694 = vst [vmem:[#allocation1 + $0x1] ss:$2 sm:$0xff] %v10913_v51 }
0x2ac3   :  { %v5703_v21 = vld.sshfl [vmem:[#allocation1] sm:$0xff pattern:$0x75316420] }
0x2ac4   :  { %7059 = vmatmul.msk.f32.vlgmr.msrb.gmra.mxu3 %vm1101_vm4, %v5703_v21 }
0x2af6   :  { %v5660_v44 = vpop.f32.mrf.mxu2 }
0x2af7   :  { %v5670_v63 = vrot.slane %v5660_v44, 4  ;;  %v10918_v15 = vadd.f32 %v7263_v24, %v5660_v44 }
0x2af9   :  { %v10920_v26 = vadd.f32 %v7263_v24, %v5670_v63  ;;  %5696 = vst [vmem:[#allocation1 + $0x10] ss:$2 sm:$0xff] %v10918_v15  ;;  %v10967_v63 = vld [vmem:[%s11360_s10] ss:$0 sm:$0xff] }
0x2afb   :  { %5698 = vst [vmem:[#allocation1 + $0x11] ss:$2 sm:$0xff] %v10920_v26 }
0x2b00   :  { %v5663_v39 = vpop.f32.mrf.mxu2 }
0x2b01   :  { %v5671_v28 = vrot.slane %v5663_v39, 4  ;;  %v10924_v60 = vadd.f32 %v5678_v35, %v5663_v39  ;;  %v5900_v39 = vrot.slane %v10967_v63, 4 }
0x2b02   :  { %v5704_v52 = vld.sshfl [vmem:[#allocation1 + $0x10] sm:$0xff pattern:$0x75316420] }
0x2b03   :  { %v10926_v23 = vadd.f32 %v7263_v24, %v5671_v28  ;;  %5700 = vst [vmem:[#allocation1 + $0x20] ss:$2 sm:$0xff] %v10924_v60  ;;  %7060 = vmatmul.msk.f32.gmra.mxu3 %vm1101_vm4, %v5704_v52 }
0x2b05   :  { %5702 = vst [vmem:[#allocation1 + $0x21] ss:$2 sm:$0xff] %v10926_v23 }
0x2b0c   :  { %v5705_v49 = vld.sshfl [vmem:[#allocation1 + $0x20] sm:$0xff pattern:$0x75316420] }
0x2b0d   :  { %7061 = vmatmul.msk.f32.gmra.mxu3 %vm1101_vm4, %v5705_v49 }
0x2b47   :  { %v5729_v10 = vpop.f32.mrf.mxu3 }
0x2b48   :  { %v5741_v46 = vrot.slane %v5729_v10, 4  ;;  %v5752_v45 = vadd.f32 %v7264_v38, %v5729_v10  ;;  %v919_v10 = vld [vmem:[%s11361_s0] sm:$0xff] }
0x2b4a   :  { %v5753_v32 = vadd.f32 %v5750_v33, %v5741_v46  ;;  %v5758_v30 = vmax.f32 %v5752_v45, 0.0 }
0x2b4c   :  { %v5759_v41 = vmax.f32 %v5753_v32, 0.0  ;;  %5770 = vst [vmem:[#allocation1] ss:$2 sm:$0xff] %v5758_v30 }
0x2b4e   :  { %5772 = vst [vmem:[#allocation1 + $0x1] ss:$2 sm:$0xff] %v5759_v41 }
0x2b55   :  { %v5781_v34 = vld.sshfl [vmem:[#allocation1] sm:$0xff pattern:$0x75316420] }
0x2b56   :  { %7062 = vmatmul.msk.f32.vlgmr.msra.gmra.mxu0 %vm1101_vm4, %v5781_v34 }
0x2b86   :  { %v5732_v22 = vpop.f32.mrf.mxu3 }
0x2b87   :  { %v5742_v8 = vrot.slane %v5732_v22, 4  ;;  %v5754_v18 = vadd.f32 %v7264_v38, %v5732_v22 }
0x2b89   :  { %v5755_v3 = vadd.f32 %v7264_v38, %v5742_v8  ;;  %v5760_v9 = vmax.f32 %v5754_v18, 0.0 }
0x2b8b   :  { %v5761_v50 = vmax.f32 %v5755_v3, 0.0  ;;  %5774 = vst [vmem:[#allocation1 + $0x10] ss:$2 sm:$0xff] %v5760_v9 }
0x2b8d   :  { %5776 = vst [vmem:[#allocation1 + $0x11] ss:$2 sm:$0xff] %v5761_v50 }
0x2b90   :  { %v5735_v37 = vpop.f32.mrf.mxu3 }
0x2b91   :  { %v5743_v31 = vrot.slane %v5735_v37, 4  ;;  %v5756_v20 = vadd.f32 %v5750_v33, %v5735_v37  ;;  %v920_v33 = vld [vmem:[%s11361_s0 + $0x8] sm:$0xff] }
0x2b92   :  { %6068 = vmatpush.msrb.mxu2 %v920_v33 }
0x2b93   :  { %v5757_v12 = vadd.f32 %v7264_v38, %v5743_v31  ;;  %v5762_v42 = vmax.f32 %v5756_v20, 0.0 }
0x2b94   :  { %v5782_v19 = vld.sshfl [vmem:[#allocation1 + $0x10] sm:$0xff pattern:$0x75316420]  ;;  %6069 = vmatpush.msrb.mxu2 %v919_v10 }
0x2b95   :  { %v5763_v7 = vmax.f32 %v5757_v12, 0.0  ;;  %5778 = vst [vmem:[#allocation1 + $0x20] ss:$2 sm:$0xff] %v5762_v42  ;;  %7063 = vmatmul.msk.f32.gmra.mxu0 %vm1101_vm4, %v5782_v19 }
0x2b97   :  { %5780 = vst [vmem:[#allocation1 + $0x21] ss:$2 sm:$0xff] %v5763_v7 }
0x2b9e   :  { %v5783_v57 = vld.sshfl [vmem:[#allocation1 + $0x20] sm:$0xff pattern:$0x75316420] }
0x2b9f   :  { %7064 = vmatmul.msk.f32.gmra.mxu0 %vm1101_vm4, %v5783_v57 }
0x2bd3   :  { %v5807_v5 = vpop.f32.mrf.mxu0 }
0x2bd4   :  { %v5819_v58 = vrot.slane %v5807_v5, 4  ;;  %v10945_v48 = vadd.f32 %v7265_v55, %v5807_v5 }
0x2bd6   :  { %v10947_v36 = vadd.f32 %v5828_v0, %v5819_v58  ;;  %5842 = vst [vmem:[#allocation1] ss:$2 sm:$0xff] %v10945_v48 }
0x2bd8   :  { %5844 = vst [vmem:[#allocation1 + $0x1] ss:$2 sm:$0xff] %v10947_v36 }
0x2bdf   :  { %v5853_v29 = vld.sshfl [vmem:[#allocation1] sm:$0xff pattern:$0x75316420] }
0x2be0   :  { %7065 = vmatmul.msk.f32.vlgmr.msra.gmra.mxu1 %vm1101_vm4, %v5853_v29 }
0x2c12   :  { %v5810_v59 = vpop.f32.mrf.mxu0 }
0x2c13   :  { %v5820_v61 = vrot.slane %v5810_v59, 4  ;;  %v10952_v1 = vadd.f32 %v7265_v55, %v5810_v59 }
0x2c15   :  { %v10954_v54 = vadd.f32 %v7265_v55, %v5820_v61  ;;  %5846 = vst [vmem:[#allocation1 + $0x10] ss:$2 sm:$0xff] %v10952_v1 }
0x2c17   :  { %5848 = vst [vmem:[#allocation1 + $0x11] ss:$2 sm:$0xff] %v10954_v54 }
0x2c1c   :  { %v5813_v24 = vpop.f32.mrf.mxu0 }
0x2c1d   :  { %v5821_v35 = vrot.slane %v5813_v24, 4  ;;  %v10958_v62 = vadd.f32 %v5828_v0, %v5813_v24 }
0x2c1e   :  { %v5854_v56 = vld.sshfl [vmem:[#allocation1 + $0x10] sm:$0xff pattern:$0x75316420] }
0x2c1f   :  { %v10960_v21 = vadd.f32 %v7265_v55, %v5821_v35  ;;  %5850 = vst [vmem:[#allocation1 + $0x20] ss:$2 sm:$0xff] %v10958_v62  ;;  %7066 = vmatmul.msk.f32.gmra.mxu1 %vm1101_vm4, %v5854_v56 }
0x2c21   :  { %5852 = vst [vmem:[#allocation1 + $0x21] ss:$2 sm:$0xff] %v10960_v21 }
0x2c28   :  { %v5855_v44 = vld.sshfl [vmem:[#allocation1 + $0x20] sm:$0xff pattern:$0x75316420] }
0x2c29   :  { %7067 = vmatmul.msk.f32.gmra.mxu1 %vm1101_vm4, %v5855_v44 }
0x2c5d   :  { %v5879_v28 = vpop.f32.mrf.mxu1 }
0x2c5e   :  { %v5891_v52 = vrot.slane %v5879_v28, 4  ;;  %v5902_v49 = vadd.f32 %v10967_v63, %v5879_v28 }
0x2c60   :  { %v5903_v6 = vadd.f32 %v5900_v39, %v5891_v52  ;;  %v7068_v40 = vmul.f32 -1.442695, %v5902_v49 }
0x2c62   :  { %7483 = vpow2.f32 %v7068_v40  ;;  %v7069_v38 = vmul.f32 -1.442695, %v5903_v6 }
0x2c64   :  { %7485 = vpow2.f32 %v7069_v38 }
0x2c68   :  { %v7484_v46 = vpop.eup %7483 }
0x2c69   :  { %v5926_v45 = vadd.f32 1.0, %v7484_v46 }
0x2c6a   :  { %v7486_v32 = vpop.eup %7485 }
0x2c6b   :  { %v5927_v30 = vadd.f32 1.0, %v7486_v32  ;;  %7487 = vrcp.f32 %v5926_v45  ;;  %v5943_v3 = vand.u32 2147483648, %v5926_v45  ;;  %v5941_v50 = vand.u32 2147483647, %v5926_v45 }
0x2c6c   :  { %vm5937_vm6 = vweird.f32 %v5926_v45 }
0x2c6d   :  { %7489 = vrcp.f32 %v5927_v30  ;;  %v5958_v31 = vand.u32 2147483648, %v5927_v30  ;;  %v5956_v42 = vand.u32 2147483647, %v5927_v30  ;;  %v5944_v19 = vor.u32 1.1754944e-38, %v5943_v3 }
0x2c6e   :  { %vm5942_vm8 = vcmp.eq.f32.partialorder %v5941_v50, 8.507059e+37  ;;  %vm5952_vm1 = vweird.f32 %v5927_v30 }
0x2c6f   :  { %v5959_v27 = vor.u32 1.1754944e-38, %v5958_v31  ;;  %vm5957_vm13 = vcmp.eq.f32.partialorder %v5956_v42, 8.507059e+37 }
0x2c71   :  { %v7488_v41 = vpop.eup %7487 }
0x2c72   :  { %v5933_v34 = vmul.f32 %v7488_v41, %v5926_v45  ;;  %vm5938_vm5 = vweird.f32 %v7488_v41 }
0x2c73   :  { %v7490_v22 = vpop.eup %7489  ;;  %vm5939_vm9 = vmor %vm5937_vm6, %vm5938_vm5 }
0x2c74   :  { %v5934_v8 = vsub.f32 1.0, %v5933_v34  ;;  %v5948_v18 = vmul.f32 %v7490_v22, %v5927_v30  ;;  %vm5953_vm7 = vweird.f32 %v7490_v22 }
0x2c75   :  { %vm5954_vm12 = vmor %vm5952_vm1, %vm5953_vm7 }
0x2c76   :  { %v5935_v9 = vmul.f32 %v7488_v41, %v5934_v8  ;;  %v5949_v37 = vsub.f32 1.0, %v5948_v18 }
0x2c78   :  { %v5936_v20 = vadd.f32 %v7488_v41, %v5935_v9  ;;  %v5950_v12 = vmul.f32 %v7490_v22, %v5949_v37 }
0x2c7a   :  { %v5940_v7 = vsel %vm5939_vm9, %v7488_v41, %v5936_v20  ;;  %v5951_v57 = vadd.f32 %v7490_v22, %v5950_v12 }
0x2c7b   :  { %v5945_v13 = vsel %vm5942_vm8, %v5944_v19, %v5940_v7 }
0x2c7c   :  { %v5955_v53 = vsel %vm5954_vm12, %v7490_v22, %v5951_v57  ;;  %v6022_v4 = vmul.f32 %v5945_v13, %v10945_v48 }
0x2c7d   :  { %v5960_v55 = vsel %vm5957_vm13, %v5959_v27, %v5955_v53 }
0x2c7e   :  { %v6023_v0 = vmul.f32 %v5960_v55, %v10947_v36  ;;  %6034 = vst [vmem:[#allocation1] ss:$2 sm:$0xff] %v6022_v4 }
0x2c80   :  { %6036 = vst [vmem:[#allocation1 + $0x1] ss:$2 sm:$0xff] %v6023_v0 }
0x2c87   :  { %v6045_v5 = vld.sshfl [vmem:[#allocation1] sm:$0xff pattern:$0x75316420] }
0x2c88   :  { %7074 = vmatmul.msk.f32.vlgmr.msrb.gmra.mxu2 %vm1101_vm4, %v6045_v5 }
0x2c9c   :  { %v5882_v58 = vpop.f32.mrf.mxu1 }
0x2c9d   :  { %v5892_v29 = vrot.slane %v5882_v58, 4  ;;  %v5904_v59 = vadd.f32 %v10967_v63, %v5882_v58 }
0x2c9f   :  { %v5905_v61 = vadd.f32 %v10967_v63, %v5892_v29  ;;  %v7070_v24 = vmul.f32 -1.442695, %v5904_v59 }
0x2ca1   :  { %7491 = vpow2.f32 %v7070_v24  ;;  %v7071_v35 = vmul.f32 -1.442695, %v5905_v61 }
0x2ca3   :  { %7493 = vpow2.f32 %v7071_v35 }
0x2ca6   :  { %v5885_v56 = vpop.f32.mrf.mxu1 }
0x2ca7   :  { %v7492_v48 = vpop.eup %7491  ;;  %v5893_v44 = vrot.slane %v5885_v56, 4  ;;  %v5906_v36 = vadd.f32 %v5900_v39, %v5885_v56 }
0x2ca8   :  { %v5928_v28 = vadd.f32 1.0, %v7492_v48 }
0x2ca9   :  { %v7494_v52 = vpop.eup %7493  ;;  %v5907_v49 = vadd.f32 %v10967_v63, %v5893_v44  ;;  %v7072_v6 = vmul.f32 -1.442695, %v5906_v36 }
0x2caa   :  { %v5929_v40 = vadd.f32 1.0, %v7494_v52  ;;  %7495 = vrcp.f32 %v5928_v28  ;;  %v5973_v39 = vand.u32 2147483648, %v5928_v28  ;;  %v5971_v63 = vand.u32 2147483647, %v5928_v28 }
0x2cab   :  { %7497 = vpow2.f32 %v7072_v6  ;;  %v7073_v11 = vmul.f32 -1.442695, %v5907_v49  ;;  %vm5967_vm3 = vweird.f32 %v5928_v28 }
0x2cac   :  { %7499 = vrcp.f32 %v5929_v40  ;;  %v5988_v8 = vand.u32 2147483648, %v5929_v40  ;;  %v5986_v9 = vand.u32 2147483647, %v5929_v40  ;;  %v5974_v50 = vor.u32 1.1754944e-38, %v5973_v39 }
0x2cad   :  { %7501 = vpow2.f32 %v7073_v11  ;;  %vm5972_vm15 = vcmp.eq.f32.partialorder %v5971_v63, 8.507059e+37  ;;  %vm5982_vm0 = vweird.f32 %v5929_v40  ;;  %v7267_v11 = vld [vmem:[%s11362_s20] ss:$0 sm:$0xff] }
0x2cae   :  { %v5989_v42 = vor.u32 1.1754944e-38, %v5988_v8  ;;  %vm5987_vm6 = vcmp.eq.f32.partialorder %v5986_v9, 8.507059e+37 }
0x2cb0   :  { %v7496_v43 = vpop.eup %7495 }
0x2cb1   :  { %v7498_v38 = vpop.eup %7497  ;;  %v5963_v33 = vmul.f32 %v7496_v43, %v5928_v28  ;;  %vm5968_vm14 = vweird.f32 %v7496_v43 }
0x2cb2   :  { %v7500_v10 = vpop.eup %7499  ;;  %v5930_v46 = vadd.f32 1.0, %v7498_v38  ;;  %vm5969_vm11 = vmor %vm5967_vm3, %vm5968_vm14 }
0x2cb3   :  { %v7502_v45 = vpop.eup %7501  ;;  %v5964_v32 = vsub.f32 1.0, %v5963_v33  ;;  %v5978_v30 = vmul.f32 %v7500_v10, %v5929_v40  ;;  %vm5983_vm10 = vweird.f32 %v7500_v10 }
0x2cb4   :  { %v5931_v41 = vadd.f32 1.0, %v7502_v45  ;;  %7503 = vrcp.f32 %v5930_v46  ;;  %vm5984_vm5 = vmor %vm5982_vm0, %vm5983_vm10  ;;  %v6003_v0 = vand.u32 2147483648, %v5930_v46  ;;  %v6001_v58 = vand.u32 2147483647, %v5930_v46 }
0x2cb5   :  { %v5965_v34 = vmul.f32 %v7496_v43, %v5964_v32  ;;  %v5979_v22 = vsub.f32 1.0, %v5978_v30  ;;  %vm5997_vm9 = vweird.f32 %v5930_v46  ;;  %vm6134_vm10 = vcmask 257024  }
0x2cb6   :  { %7505 = vrcp.f32 %v5931_v41  ;;  %v6018_v59 = vand.u32 2147483648, %v5931_v41  ;;  %v6004_v35 = vor.u32 1.1754944e-38, %v6003_v0  ;;  %vm6002_vm12 = vcmp.eq.f32.partialorder %v6001_v58, 8.507059e+37 }
0x2cb7   :  { %v5966_v18 = vadd.f32 %v7496_v43, %v5965_v34  ;;  %v5980_v3 = vmul.f32 %v7500_v10, %v5979_v22  ;;  %vm6012_vm13 = vweird.f32 %v5931_v41 }
0x2cb8   :  { %v6019_v44 = vor.u32 1.1754944e-38, %v6018_v59 }
0x2cb9   :  { %v5970_v37 = vsel %vm5969_vm11, %v7496_v43, %v5966_v18  ;;  %v5981_v31 = vadd.f32 %v7500_v10, %v5980_v3  ;;  %v6092_v43 = vrot.slane %v7267_v11, 4 }
0x2cba   :  { %v7504_v20 = vpop.eup %7503  ;;  %v5975_v12 = vsel %vm5972_vm15, %v5974_v50, %v5970_v37 }
0x2cbb   :  { %v5985_v19 = vsel %vm5984_vm5, %v7500_v10, %v5981_v31  ;;  %v6024_v7 = vmul.f32 %v5975_v12, %v10952_v1  ;;  %v5993_v57 = vmul.f32 %v7504_v20, %v5930_v46  ;;  %vm5998_vm7 = vweird.f32 %v7504_v20 }
0x2cbc   :  { %v7506_v13 = vpop.eup %7505  ;;  %v5990_v27 = vsel %vm5987_vm6, %v5989_v42, %v5985_v19  ;;  %v6016_v1 = vand.u32 2147483647, %v5931_v41  ;;  %vm5999_vm1 = vmor %vm5997_vm9, %vm5998_vm7  ;;  %v8679_v31 = vmov 839922192  }
0x2cbd   :  { %v6025_v53 = vmul.f32 %v5990_v27, %v10954_v54  ;;  %6038 = vst [vmem:[#allocation1 + $0x10] ss:$2 sm:$0xff] %v6024_v7  ;;  %v5994_v4 = vsub.f32 1.0, %v5993_v57  ;;  %v6008_v55 = vmul.f32 %v7506_v13, %v5931_v41  ;;  %vm6013_vm8 = vweird.f32 %v7506_v13 }
0x2cbe   :  { %vm6014_vm14 = vmor %vm6012_vm13, %vm6013_vm8  ;;  %vm6017_vm3 = vcmp.eq.f32.partialorder %v6016_v1, 8.507059e+37 }
0x2cbf   :  { %6040 = vst [vmem:[#allocation1 + $0x11] ss:$2 sm:$0xff] %v6025_v53  ;;  %v5995_v5 = vmul.f32 %v7504_v20, %v5994_v4  ;;  %v6009_v29 = vsub.f32 1.0, %v6008_v55  ;;  %v8680_v53 = vmov 1985246804  }
0x2cc0   :  { %v6157_v4 = vunpack.c.l.s4 %v8680_v53 }
0x2cc1   :  { %v5996_v61 = vadd.f32 %v7504_v20, %v5995_v5  ;;  %v6010_v24 = vmul.f32 %v7506_v13, %v6009_v29 }
0x2cc2   :  { %v11018_v29 = vunpack.c.0.s8 %v6157_v4 }
0x2cc3   :  { %v6000_v56 = vsel %vm5999_vm1, %v7504_v20, %v5996_v61  ;;  %v6011_v54 = vadd.f32 %v7506_v13, %v6010_v24  ;;  %v6153_v20 = vunpack.c.l.s4 %v8679_v31 }
0x2cc4   :  { %v6005_v48 = vsel %vm6002_vm12, %v6004_v35, %v6000_v56 }
0x2cc5   :  { %v6015_v36 = vsel %vm6014_vm14, %v7506_v13, %v6011_v54  ;;  %v6026_v28 = vmul.f32 %v6005_v48, %v10958_v62 }
0x2cc6   :  { %v6020_v52 = vsel %vm6017_vm3, %v6019_v44, %v6015_v36  ;;  %v6046_v49 = vld.sshfl [vmem:[#allocation1 + $0x10] sm:$0xff pattern:$0x75316420] }
0x2cc7   :  { %v6027_v6 = vmul.f32 %v6020_v52, %v10960_v21  ;;  %6042 = vst [vmem:[#allocation1 + $0x20] ss:$2 sm:$0xff] %v6026_v28  ;;  %7075 = vmatmul.msk.f32.gmra.mxu2 %vm1101_vm4, %v6046_v49  ;;  %v11363_v49 = vld [vmem:[#allocation147_spill] sm:$0xff] }
0x2cc9   :  { %6044 = vst [vmem:[#allocation1 + $0x21] ss:$2 sm:$0xff] %v6027_v6  ;;  %v11364_v6 = vrot.slane %v11363_v49, 4 }
0x2cd0   :  { %v6047_v40 = vld.sshfl [vmem:[#allocation1 + $0x20] sm:$0xff pattern:$0x75316420] }
0x2cd1   :  { %7076 = vmatmul.msk.f32.gmra.mxu2 %vm1101_vm4, %v6047_v40 }
0x2d0b   :  { %v6071_v38 = vpop.f32.mrf.mxu2 }
0x2d0c   :  { %v6083_v33 = vrot.slane %v6071_v38, 4  ;;  %v6094_v10 = vadd.f32 %v7267_v11, %v6071_v38 }
0x2d0e   :  { %v6100_v46 = vadd.f32 %v6094_v10, %v10911_v47  ;;  %v6095_v45 = vadd.f32 %v6092_v43, %v6083_v33 }
0x2d10   :  { %6112 = vst [vmem:[#allocation1] ss:$2 sm:$0xff] %v6100_v46  ;;  %v6101_v62 = vadd.f32 %v6095_v45, %v10913_v51 }
0x2d12   :  { %6114 = vst [vmem:[#allocation1 + $0x1] ss:$2 sm:$0xff] %v6101_v62 }
0x2d19   :  { %v6117_v50 = vld.sshfl [vmem:[#allocation1] sm:$0xff pattern:$0x75316420] }
0x2d1a   :  { %v6131_v37 = vsel %vm1101_vm4, %v6117_v50, 0.0 }
0x2d4a   :  { %v6074_v21 = vpop.f32.mrf.mxu2 }
0x2d4b   :  { %v6084_v32 = vrot.slane %v6074_v21, 4  ;;  %v6096_v30 = vadd.f32 %v7267_v11, %v6074_v21 }
0x2d4d   :  { %v6097_v39 = vadd.f32 %v7267_v11, %v6084_v32  ;;  %v6102_v41 = vadd.f32 %v6096_v30, %v10918_v15 }
0x2d4f   :  { %v10996_v34 = vadd.f32 %v6097_v39, %v10920_v26  ;;  %6116 = vst [vmem:[#allocation1 + $0x10] ss:$2 sm:$0xff] %v6102_v41 }
0x2d51   :  { %6120 = vst [vmem:[#allocation1 + $0x20] ss:$2 sm:$0xff] %v10996_v34 }
0x2d54   :  { %v6077_v63 = vpop.f32.mrf.mxu2 }
0x2d55   :  { %v6085_v47 = vrot.slane %v6077_v63, 4  ;;  %v6098_v22 = vadd.f32 %v6092_v43, %v6077_v63 }
0x2d56   :  { %v6118_v8 = vld.sshfl [vmem:[#allocation1 + $0x10] sm:$0xff pattern:$0x75316420] }
0x2d57   :  { %v6099_v18 = vadd.f32 %v7267_v11, %v6085_v47  ;;  %v11000_v51 = vadd.f32 %v6098_v22, %v10924_v60  ;;  %v6135_v3 = vsel %vm6134_vm10, %v6118_v8, 0.0  ;;  %v11007_v60 = vunpack.c.0.s8 %v6153_v20  ;;  %v11045_v47 = vld [vmem:[%s11365_s11] ss:$0 sm:$0xff] }
0x2d58   :  { %6136 = vadd.xlane.f32.xlu2 %v6135_v3  ;;  %v11048_v3 = vld [vmem:[%s11366_s18] ss:$0 sm:$0xff] }
0x2d59   :  { %v6105_v15 = vadd.f32 %v6099_v18, %v10926_v23  ;;  %6122 = vst [vmem:[#allocation1 + $0x21] ss:$2 sm:$0xff] %v11000_v51 }
0x2d5b   :  { %6124 = vst [vmem:[#allocation1 + $0x30] ss:$2 sm:$0xff] %v6105_v15 }
0x2d62   :  { %v6126_v26 = vld.sshfl [vmem:[#allocation1 + $0x30] sm:$0xff pattern:$0x75316420] }
0x2d63   :  { %v6141_v9 = vsel %vm6134_vm10, %v6126_v26, 0.0 }
0x2d64   :  { %6142 = vadd.xlane.f32.xlu1 %v6141_v9 }
0x2d6c   :  { %6132 = vadd.xlane.f32.xlu1 %v6131_v37 }
0x2dcb   :  { %v6137_v12 = vpop.xlane.xlu2 %6136 }
0x2dcc   :  { %v6145_v42 = vmul.f32 %v6137_v12, %v9433_v25 }
0x2dce   :  { %v6163_v23 = vperm.slane %v6145_v42, %v11007_v60 }
0x2dd0   :  { %v6184_v19 = vsub.f32 %v6102_v41, %v6163_v23 }
0x2dd2   :  { %v6190_v7 = vmul.f32 %v6184_v19, %v6184_v19 }
0x2dd4   :  { %6204 = vst [vmem:[#allocation1 + $0x10] ss:$2 sm:$0xff] %v6190_v7 }
0x2dd7   :  { %v6143_v57 = vpop.xlane.xlu1 %6142 }
0x2dd8   :  { %v6147_v13 = vmul.f32 %v6143_v57, %v9433_v25 }
0x2dda   :  { %v6175_v27 = vperm.slane %v6147_v13, %v11007_v60 }
0x2ddb   :  { %v6206_v55 = vld.sshfl [vmem:[#allocation1 + $0x10] sm:$0xff pattern:$0x75316420] }
0x2ddc   :  { %v11013_v0 = vsub.f32 %v6105_v15, %v6175_v27  ;;  %v6222_v5 = vsel %vm6134_vm10, %v6206_v55, 0.0 }
0x2ddd   :  { %6223 = vadd.xlane.f32.xlu0 %v6222_v5 }
0x2dde   :  { %v6193_v58 = vmul.f32 %v11013_v0, %v11013_v0 }
0x2ddf   :  { %v6133_v59 = vpop.xlane.xlu1 %6132 }
0x2de0   :  { %6212 = vst [vmem:[#allocation1 + $0x30] ss:$2 sm:$0xff] %v6193_v58  ;;  %v6144_v61 = vmul.f32 %v6133_v59, %v9433_v25 }
0x2de2   :  { %v6155_v24 = vperm.slane %v6144_v61, %v11007_v60  ;;  %v6159_v1 = vperm.slane %v6144_v61, %v11018_v29 }
0x2de4   :  { %v11023_v35 = vsub.f32 %v6100_v46, %v6155_v24  ;;  %v11025_v56 = vsub.f32 %v6101_v62, %v6159_v1 }
0x2de6   :  { %v6188_v54 = vmul.f32 %v11023_v35, %v11023_v35  ;;  %v6189_v48 = vmul.f32 %v11025_v56, %v11025_v56 }
0x2de7   :  { %v6214_v44 = vld.sshfl [vmem:[#allocation1 + $0x30] sm:$0xff pattern:$0x75316420] }
0x2de8   :  { %6200 = vst [vmem:[#allocation1] ss:$2 sm:$0xff] %v6188_v54  ;;  %v6228_v36 = vsel %vm6134_vm10, %v6214_v44, 0.0  ;;  %v6322_v54 = vrot.slane %v11045_v47, 4 }
0x2de9   :  { %6202 = vst [vmem:[#allocation1 + $0x1] ss:$2 sm:$0xff] %v6189_v48  ;;  %6229 = vadd.xlane.f32.xlu2 %v6228_v36  ;;  %v6333_v48 = vrot.slane %v11048_v3, 4 }
0x2df0   :  { %v6205_v28 = vld.sshfl [vmem:[#allocation1] sm:$0xff pattern:$0x75316420] }
0x2df1   :  { %6345 = vrot.lane.b32.xlu0 %v9714_v16, %s8674_s28  ;;  %v6219_v52 = vsel %vm1101_vm4, %v6205_v28, 0.0 }
0x2df2   :  { %6220 = vadd.xlane.f32.xlu1 %v6219_v52 }
0x2e01   :  { %6351 = vrot.lane.b32.xlu2 %v9719_v17, %s8674_s28 }
0x2e09   :  { %6343 = vrot.lane.b32.xlu2 %v11364_v6, %s8674_s28 }
0x2e50   :  { %v6224_v40 = vpop.xlane.xlu0 %6223 }
0x2e51   :  { %v6232_v11 = vmul.f32 %v6224_v40, %v9433_v25 }
0x2e53   :  { %v6236_v43 = vadd.f32 1e-05, %v6232_v11 }
0x2e55   :  { %7507 = vrsqrt.f32 %v6236_v43  ;;  %vm6255_vm15 = vweird.f32 %v6236_v43 }
0x2e5b   :  { %v7508_v38 = vpop.eup %7507 }
0x2e5c   :  { %v6250_v33 = vmul.f32 %v7508_v38, %v6236_v43  ;;  %v6230_v10 = vpop.xlane.xlu2 %6229  ;;  %vm6256_vm11 = vweird.f32 %v7508_v38 }
0x2e5d   :  { %v6234_v16 = vmul.f32 %v6230_v10, %v9433_v25  ;;  %vm6257_vm0 = vmor %vm6255_vm15, %vm6256_vm11 }
0x2e5e   :  { %v6251_v46 = vmul.f32 %v7508_v38, %v6250_v33 }
0x2e5f   :  { %v6238_v45 = vadd.f32 1e-05, %v6234_v16 }
0x2e60   :  { %v6252_v62 = vmul.f32 0.5, %v6251_v46 }
0x2e61   :  { %7509 = vrsqrt.f32 %v6238_v45  ;;  %vm6275_vm6 = vweird.f32 %v6238_v45 }
0x2e62   :  { %v6253_v17 = vsub.f32 1.5, %v6252_v62 }
0x2e63   :  { %v6346_v31 = vpop.permute.xlu0 %6345 }
0x2e64   :  { %v6254_v21 = vmul.f32 %v7508_v38, %v6253_v17  ;;  %v6352_v58 = vpop.permute.xlu2 %6351 }
0x2e65   :  { %v6221_v32 = vpop.xlane.xlu1 %6220 }
0x2e66   :  { %v6258_v30 = vsel %vm6257_vm0, %v7508_v38, %v6254_v21  ;;  %v6231_v39 = vmul.f32 %v6221_v32, %v9433_v25 }
0x2e67   :  { %v7510_v41 = vpop.eup %7509  ;;  %v6294_v63 = vperm.slane %v6258_v30, %v11007_v60 }
0x2e68   :  { %v6270_v22 = vmul.f32 %v7510_v41, %v6238_v45  ;;  %v6235_v8 = vadd.f32 1e-05, %v6231_v39  ;;  %vm6276_vm5 = vweird.f32 %v7510_v41 }
0x2e69   :  { %v6315_v18 = vmul.f32 %v6294_v63, %v6184_v19  ;;  %vm6277_vm7 = vmor %vm6275_vm6, %vm6276_vm5 }
0x2e6a   :  { %v6271_v15 = vmul.f32 %v7510_v41, %v6270_v22  ;;  %7511 = vrsqrt.f32 %v6235_v8  ;;  %vm6245_vm8 = vweird.f32 %v6235_v8 }
0x2e6b   :  { %v6326_v26 = vmul.f32 %v11045_v47, %v6315_v18 }
0x2e6c   :  { %v6272_v9 = vmul.f32 0.5, %v6271_v15  ;;  %v6344_v52 = vpop.permute.xlu2 %6343 }
0x2e6d   :  { %v6337_v50 = vadd.f32 %v11048_v3, %v6326_v26 }
0x2e6e   :  { %v6273_v37 = vsub.f32 1.5, %v6272_v9 }
0x2e6f   :  { %v6361_v20 = vadd.f32 %v6346_v31, %v6337_v50 }
0x2e70   :  { %v7512_v12 = vpop.eup %7511  ;;  %v6274_v42 = vmul.f32 %v7510_v41, %v6273_v37  ;;  %v942_v37 = vld [vmem:[#allocation2 + $0x18] sm:$0xff] }
0x2e71   :  { %6375 = vst [vmem:[#allocation1 + $0x10] ss:$2 sm:$0xff] %v6361_v20  ;;  %v6240_v23 = vmul.f32 %v7512_v12, %v6235_v8  ;;  %vm6246_vm9 = vweird.f32 %v7512_v12  ;;  %6547 = vmatpush.msra.mxu3 %v942_v37  ;;  %v933_v37 = vld [vmem:[%s11371_s2 + $0x10] sm:$0xff] }
0x2e72   :  { %v6278_v19 = vsel %vm6277_vm7, %v7510_v41, %v6274_v42  ;;  %vm6247_vm1 = vmor %vm6245_vm8, %vm6246_vm9 }
0x2e73   :  { %v6306_v7 = vperm.slane %v6278_v19, %v11007_v60  ;;  %v6241_v57 = vmul.f32 %v7512_v12, %v6240_v23 }
0x2e75   :  { %v6318_v13 = vmul.f32 %v6306_v7, %v11013_v0  ;;  %v6242_v27 = vmul.f32 0.5, %v6241_v57  ;;  %v939_v7 = vld [vmem:[#allocation2] sm:$0xff] }
0x2e77   :  { %v6329_v53 = vmul.f32 %v11045_v47, %v6318_v13  ;;  %v6243_v4 = vsub.f32 1.5, %v6242_v27 }
0x2e78   :  { %v6377_v55 = vld.sshfl [vmem:[#allocation1 + $0x10] sm:$0xff pattern:$0x75316420] }
0x2e79   :  { %v6340_v5 = vadd.f32 %v11048_v3, %v6329_v53  ;;  %v6244_v59 = vmul.f32 %v7512_v12, %v6243_v4  ;;  %v6393_v61 = vsel %vm6134_vm10, %v6377_v55, 0.0 }
0x2e7a   :  { %6394 = vadd.xlane.f32.xlu1 %v6393_v61 }
0x2e7b   :  { %v6364_v24 = vadd.f32 %v6352_v58, %v6340_v5  ;;  %v6248_v1 = vsel %vm6247_vm1, %v7512_v12, %v6244_v59  ;;  %v940_v12 = vld [vmem:[#allocation2 + $0x8] sm:$0xff]  ;;  %v938_v5 = vld [vmem:[%s11367_s29 + $0x18] sm:$0xff] }
0x2e7c   :  { %v6290_v0 = vperm.slane %v6248_v1, %v11018_v29  ;;  %v6286_v16 = vperm.slane %v6248_v1, %v11007_v60  ;;  %6585 = vmatpush.msrb.mxu0 %v938_v5 }
0x2e7d   :  { %6383 = vst [vmem:[#allocation1 + $0x30] ss:$2 sm:$0xff] %v6364_v24 }
0x2e7e   :  { %v6314_v44 = vmul.f32 %v6290_v0, %v11025_v56  ;;  %v7270_v0 = vld [vmem:[%s11368_s8] ss:$0 sm:$0xff] }
0x2e80   :  { %v6325_v36 = vmul.f32 %v6322_v54, %v6314_v44 }
0x2e82   :  { %v6336_v28 = vadd.f32 %v6333_v48, %v6325_v36 }
0x2e84   :  { %v11065_v6 = vadd.f32 %v6344_v52, %v6336_v28  ;;  %v6385_v40 = vld.sshfl [vmem:[#allocation1 + $0x30] sm:$0xff pattern:$0x75316420] }
0x2e85   :  { %v6399_v11 = vsel %vm6134_vm10, %v6385_v40, 0.0  ;;  %v7271_v40 = vld [vmem:[%s11369_s25] ss:$0 sm:$0xff] }
0x2e86   :  { %6373 = vst [vmem:[#allocation1 + $0x1] ss:$2 sm:$0xff] %v11065_v6  ;;  %6400 = vadd.xlane.f32.xlu0 %v6399_v11 }
0x2e93   :  { %6341 = vrot.lane.b32.xlu1 %v11363_v49, %s8674_s28  ;;  %v6313_v49 = vmul.f32 %v6286_v16, %v11023_v35 }
0x2e95   :  { %v6324_v39 = vmul.f32 %v11045_v47, %v6313_v49 }
0x2e97   :  { %v6335_v41 = vadd.f32 %v11048_v3, %v6324_v39  ;;  %v937_v39 = vld [vmem:[%s11367_s29 + $0x10] sm:$0xff] }
0x2e98   :  { %6586 = vmatpush.msrb.mxu0 %v937_v39 }
0x2eed   :  { %v6395_v43 = vpop.xlane.xlu1 %6394 }
0x2eee   :  { %v6403_v56 = vmul.f32 %v6395_v43, %v9433_v25 }
0x2ef0   :  { %v6421_v38 = vperm.slane %v6403_v56, %v11007_v60 }
0x2ef2   :  { %v11073_v33 = vsub.f32 %v6361_v20, %v6421_v38  ;;  %v941_v20 = vld [vmem:[#allocation2 + $0x10] sm:$0xff] }
0x2ef3   :  { %6548 = vmatpush.msra.mxu3 %v941_v20  ;;  %v931_v20 = vld [vmem:[%s11371_s2] sm:$0xff] }
0x2ef4   :  { %v6448_v10 = vmul.f32 %v11073_v33, %v11073_v33 }
0x2ef5   :  { %6549 = vmatpush.msra.mxu3 %v940_v12  ;;  %v7273_v12 = vld [vmem:[%s11372_s13] ss:$0 sm:$0xff] }
0x2ef6   :  { %6462 = vst [vmem:[#allocation1 + $0x10] ss:$2 sm:$0xff] %v6448_v10 }
0x2ef7   :  { %6550 = vmatpush.msra.mxu3 %v939_v7 }
0x2ef9   :  { %v6401_v46 = vpop.xlane.xlu0 %6400 }
0x2efa   :  { %v6405_v45 = vmul.f32 %v6401_v46, %v9433_v25 }
0x2efc   :  { %v6433_v62 = vperm.slane %v6405_v45, %v11007_v60 }
0x2efd   :  { %v6463_v17 = vld.sshfl [vmem:[#allocation1 + $0x10] sm:$0xff pattern:$0x75316420] }
0x2efe   :  { %v11081_v21 = vsub.f32 %v6364_v24, %v6433_v62  ;;  %v6473_v32 = vsel %vm6134_vm10, %v6463_v17, 0.0 }
0x2eff   :  { %6474 = vadd.xlane.f32.xlu2 %v6473_v32 }
0x2f00   :  { %v6451_v30 = vmul.f32 %v11081_v21, %v11081_v21 }
0x2f02   :  { %6469 = vst [vmem:[#allocation1 + $0x30] ss:$2 sm:$0xff] %v6451_v30 }
0x2f05   :  { %v6342_v63 = vpop.permute.xlu1 %6341 }
0x2f06   :  { %v6359_v22 = vadd.f32 %v6342_v63, %v6335_v41  ;;  %v936_v41 = vld [vmem:[%s11367_s29 + $0x8] sm:$0xff]  ;;  %v935_v63 = vld [vmem:[%s11367_s29] sm:$0xff] }
0x2f07   :  { %6587 = vmatpush.msrb.mxu0 %v936_v41 }
0x2f08   :  { %6371 = vst [vmem:[#allocation1] ss:$2 sm:$0xff] %v6359_v22 }
0x2f09   :  { %v6470_v8 = vld.sshfl [vmem:[#allocation1 + $0x30] sm:$0xff pattern:$0x75316420]  ;;  %6588 = vmatpush.msrb.mxu0 %v935_v63 }
0x2f0a   :  { %v6476_v35 = vsel %vm6134_vm10, %v6470_v8, 0.0 }
0x2f0b   :  { %6477 = vadd.xlane.f32.xlu1 %v6476_v35 }
0x2f0f   :  { %v6376_v18 = vld.sshfl [vmem:[#allocation1] sm:$0xff pattern:$0x75316420] }
0x2f10   :  { %v6390_v15 = vsel %vm1101_vm4, %v6376_v18, 0.0 }
0x2f11   :  { %6391 = vadd.xlane.f32.xlu0 %v6390_v15 }
0x2f72   :  { %v6475_v26 = vpop.xlane.xlu2 %6474 }
0x2f73   :  { %v6479_v9 = vmul.f32 %v6475_v26, %v9433_v25 }
0x2f75   :  { %v6481_v50 = vadd.f32 1e-05, %v6479_v9 }
0x2f77   :  { %7513 = vrsqrt.f32 %v6481_v50  ;;  %vm6489_vm13 = vweird.f32 %v6481_v50 }
0x2f7d   :  { %v7514_v31 = vpop.eup %7513 }
0x2f7e   :  { %v6484_v42 = vmul.f32 %v7514_v31, %v6481_v50  ;;  %v6478_v23 = vpop.xlane.xlu1 %6477  ;;  %vm6490_vm12 = vweird.f32 %v7514_v31  ;;  %v934_v50 = vld [vmem:[%s11371_s2 + $0x18] sm:$0xff] }
0x2f7f   :  { %v6480_v19 = vmul.f32 %v6478_v23, %v9433_v25  ;;  %vm6491_vm14 = vmor %vm6489_vm13, %vm6490_vm12  ;;  %6621 = vmatpush.msrb.mxu3 %v934_v50 }
0x2f80   :  { %v6485_v57 = vmul.f32 %v7514_v31, %v6484_v42 }
0x2f81   :  { %v6482_v13 = vadd.f32 1e-05, %v6480_v19  ;;  %6622 = vmatpush.msrb.mxu3 %v933_v37 }
0x2f82   :  { %v6486_v27 = vmul.f32 0.5, %v6485_v57 }
0x2f83   :  { %7515 = vrsqrt.f32 %v6482_v13  ;;  %vm6499_vm11 = vweird.f32 %v6482_v13 }
0x2f84   :  { %v6487_v53 = vsub.f32 1.5, %v6486_v27  ;;  %v6392_v4 = vpop.xlane.xlu0 %6391 }
0x2f85   :  { %v6402_v55 = vmul.f32 %v6392_v4, %v9433_v25 }
0x2f86   :  { %v6488_v58 = vmul.f32 %v7514_v31, %v6487_v53 }
0x2f87   :  { %v6413_v59 = vperm.slane %v6402_v55, %v11007_v60  ;;  %v6417_v61 = vperm.slane %v6402_v55, %v11018_v29 }
0x2f88   :  { %v6492_v24 = vsel %vm6491_vm14, %v7514_v31, %v6488_v58  ;;  %v932_v31 = vld [vmem:[%s11371_s2 + $0x8] sm:$0xff]  ;;  %v946_v58 = vld [vmem:[#allocation4 + $0x18] sm:$0xff] }
0x2f89   :  { %v7516_v1 = vpop.eup %7515  ;;  %v6508_v44 = vperm.slane %v6492_v24, %v11007_v60  ;;  %v6440_v36 = vsub.f32 %v6359_v22, %v6413_v59  ;;  %v6441_v28 = vsub.f32 %v11065_v6, %v6417_v61  ;;  %v7272_v22 = vld [vmem:[%s11370_s9] ss:$0 sm:$0xff]  ;;  %6623 = vmatpush.msrb.mxu3 %v932_v31  ;;  %v945_v59 = vld [vmem:[#allocation4 + $0x10] sm:$0xff]  ;;  %6697 = vmatpush.msra.mxu0 %v946_v58  ;;  %v944_v24 = vld [vmem:[#allocation4 + $0x8] sm:$0xff] }
0x2f8a   :  { %v6494_v52 = vmul.f32 %v7516_v1, %v6482_v13  ;;  %vm6500_vm3 = vweird.f32 %v7516_v1  ;;  %v7274_v13 = vld [vmem:[%s11373_s22] ss:$0 sm:$0xff] }
0x2f8b   :  { %v6515_v11 = vmul.f32 %v6508_v44, %v11073_v33  ;;  %v6446_v43 = vmul.f32 %v6440_v36, %v6440_v36  ;;  %v6447_v56 = vmul.f32 %v6441_v28, %v6441_v28  ;;  %vm6501_vm15 = vmor %vm6499_vm11, %vm6500_vm3  ;;  %6624 = vmatpush.msrb.mxu3 %v931_v20  ;;  %6698 = vmatpush.msra.mxu0 %v945_v59 }
0x2f8c   :  { %v6495_v38 = vmul.f32 %v7516_v1, %v6494_v52 }
0x2f8d   :  { %v6520_v10 = vmul.f32 %v7270_v0, %v6515_v11  ;;  %6458 = vst [vmem:[#allocation1] ss:$2 sm:$0xff] %v6446_v43  ;;  %6699 = vmatpush.msra.mxu0 %v944_v24 }
0x2f8e   :  { %v6496_v16 = vmul.f32 0.5, %v6495_v38  ;;  %6460 = vst [vmem:[#allocation1 + $0x1] ss:$2 sm:$0xff] %v6447_v56 }
0x2f8f   :  { %v11101_v46 = vadd.f32 %v7271_v40, %v6520_v10 }
0x2f90   :  { %v6497_v45 = vsub.f32 1.5, %v6496_v16 }
0x2f91   :  { %6529 = vst [vmem:[#allocation1] ss:$2 sm:$0xff] %v11101_v46 }
0x2f92   :  { %v6498_v6 = vmul.f32 %v7516_v1, %v6497_v45 }
0x2f94   :  { %v6502_v33 = vsel %vm6501_vm15, %v7516_v1, %v6498_v6  ;;  %v943_v1 = vld [vmem:[#allocation4] sm:$0xff] }
0x2f95   :  { %v6512_v62 = vperm.slane %v6502_v33, %v11007_v60  ;;  %6700 = vmatpush.msra.mxu0 %v943_v1 }
0x2f97   :  { %v6516_v49 = vmul.f32 %v6512_v62, %v11081_v21 }
0x2f99   :  { %v6521_v17 = vmul.f32 %v7270_v0, %v6516_v49 }
0x2f9b   :  { %v11106_v32 = vadd.f32 %v7271_v40, %v6521_v17 }
0x2f9d   :  { %6531 = vst [vmem:[#allocation1 + $0x1] ss:$2 sm:$0xff] %v11106_v32 }
0x2fa4   :  { %v6532_v30 = vld.sshfl [vmem:[#allocation1] sm:$0xff pattern:$0x75316420] }
0x2fa5   :  { %7077 = vmatmul.msk.f32.vlgmr.msra.gmra.mxu3 %vm1101_vm4, %v6532_v30 }
0x3028   :  { %v6552_v21 = vpop.f32.mrf.mxu3 }
0x3029   :  { %v6556_v8 = vrot.slane %v6552_v21, 4  ;;  %v6561_v35 = vadd.f32 %v7272_v22, %v6552_v21 }
0x302b   :  { %v6562_v18 = vadd.f32 %v7272_v22, %v6556_v8  ;;  %v6563_v15 = vmax.f32 %v6561_v35, 0.0 }
0x302d   :  { %v6564_v26 = vmax.f32 %v6562_v18, 0.0  ;;  %6567 = vst [vmem:[#allocation1] ss:$2 sm:$0xff] %v6563_v15  ;;  %v7275_v15 = vld [vmem:[%s11374_s24] ss:$0 sm:$0xff] }
0x302f   :  { %6569 = vst [vmem:[#allocation1 + $0x1] ss:$2 sm:$0xff] %v6564_v26 }
0x3036   :  { %v6570_v9 = vld.sshfl [vmem:[#allocation1] sm:$0xff pattern:$0x75316420] }
0x3037   :  { %7078 = vmatmul.msk.f32.vlgmr.msrb.gmra.mxu0 %vm1101_vm4, %v6570_v9 }
0x30b4   :  { %v6590_v42 = vpop.f32.mrf.mxu0 }
0x30b5   :  { %v6594_v23 = vrot.slane %v6590_v42, 4  ;;  %v6599_v19 = vadd.f32 %v7273_v12, %v6590_v42 }
0x30b7   :  { %v6600_v7 = vadd.f32 %v7273_v12, %v6594_v23  ;;  %6603 = vst [vmem:[#allocation1] ss:$2 sm:$0xff] %v6599_v19 }
0x30b9   :  { %6605 = vst [vmem:[#allocation1 + $0x1] ss:$2 sm:$0xff] %v6600_v7 }
0x30c0   :  { %v6606_v57 = vld.sshfl [vmem:[#allocation1] sm:$0xff pattern:$0x75316420] }
0x30c1   :  { %7079 = vmatmul.msk.f32.vlgmr.msrb.gmra.mxu3 %vm1101_vm4, %v6606_v57 }
0x3144   :  { %v6626_v27 = vpop.f32.mrf.mxu3 }
0x3145   :  { %v6630_v53 = vrot.slane %v6626_v27, 4  ;;  %v6635_v4 = vadd.f32 %v7274_v13, %v6626_v27 }
0x3147   :  { %v6636_v55 = vadd.f32 %v7274_v13, %v6630_v53  ;;  %v7080_v5 = vmul.f32 -1.442695, %v6635_v4 }
0x3149   :  { %7517 = vpow2.f32 %v7080_v5  ;;  %v7081_v61 = vmul.f32 -1.442695, %v6636_v55 }
0x314b   :  { %7519 = vpow2.f32 %v7081_v61 }
0x314f   :  { %v7518_v0 = vpop.eup %7517 }
0x3150   :  { %v6643_v44 = vadd.f32 1.0, %v7518_v0 }
0x3151   :  { %v7520_v36 = vpop.eup %7519 }
0x3152   :  { %v6644_v28 = vadd.f32 1.0, %v7520_v36  ;;  %7521 = vrcp.f32 %v6643_v44  ;;  %v6656_v38 = vand.u32 2147483648, %v6643_v44  ;;  %v6654_v16 = vand.u32 2147483647, %v6643_v44 }
0x3153   :  { %vm6650_vm5 = vweird.f32 %v6643_v44 }
0x3154   :  { %7523 = vrcp.f32 %v6644_v28  ;;  %v6671_v6 = vand.u32 2147483648, %v6644_v28  ;;  %v6669_v49 = vand.u32 2147483647, %v6644_v28  ;;  %v6657_v17 = vor.u32 1.1754944e-38, %v6656_v38 }
0x3155   :  { %vm6655_vm9 = vcmp.eq.f32.partialorder %v6654_v16, 8.507059e+37  ;;  %vm6665_vm8 = vweird.f32 %v6644_v28 }
0x3156   :  { %v6672_v63 = vor.u32 1.1754944e-38, %v6671_v6  ;;  %vm6670_vm12 = vcmp.eq.f32.partialorder %v6669_v49, 8.507059e+37 }
0x3158   :  { %v7522_v52 = vpop.eup %7521 }
0x3159   :  { %v6646_v40 = vmul.f32 %v7522_v52, %v6643_v44  ;;  %vm6651_vm0 = vweird.f32 %v7522_v52 }
0x315a   :  { %v7524_v11 = vpop.eup %7523  ;;  %vm6652_vm7 = vmor %vm6650_vm5, %vm6651_vm0  ;;  %vm6814_vm0 = vcmask 785408  }
0x315b   :  { %v6647_v43 = vsub.f32 1.0, %v6646_v40  ;;  %v6661_v56 = vmul.f32 %v7524_v11, %v6644_v28  ;;  %vm6666_vm6 = vweird.f32 %v7524_v11 }
0x315c   :  { %vm6667_vm1 = vmor %vm6665_vm8, %vm6666_vm6 }
0x315d   :  { %v6648_v10 = vmul.f32 %v7522_v52, %v6647_v43  ;;  %v6662_v45 = vsub.f32 1.0, %v6661_v56 }
0x315f   :  { %v6649_v33 = vadd.f32 %v7522_v52, %v6648_v10  ;;  %v6663_v62 = vmul.f32 %v7524_v11, %v6662_v45 }
0x3161   :  { %v6653_v30 = vsel %vm6652_vm7, %v7522_v52, %v6649_v33  ;;  %v6664_v39 = vadd.f32 %v7524_v11, %v6663_v62 }
0x3162   :  { %v6658_v41 = vsel %vm6655_vm9, %v6657_v17, %v6653_v30  ;;  %vm6839_vm9 = vcmask 91136  }
0x3163   :  { %v6668_v22 = vsel %vm6667_vm1, %v7524_v11, %v6664_v39  ;;  %v6675_v21 = vmul.f32 %v6658_v41, %v6599_v19 }
0x3164   :  { %v6673_v8 = vsel %vm6670_vm12, %v6672_v63, %v6668_v22 }
0x3165   :  { %v6676_v35 = vmul.f32 %v6673_v8, %v6600_v7  ;;  %6679 = vst [vmem:[#allocation1] ss:$2 sm:$0xff] %v6675_v21  ;;  %v7277_v21 = vld [vmem:[%s11376_s26] ss:$0 sm:$0xff] }
0x3167   :  { %6681 = vst [vmem:[#allocation1 + $0x1] ss:$2 sm:$0xff] %v6676_v35 }
0x316e   :  { %v6682_v18 = vld.sshfl [vmem:[#allocation1] sm:$0xff pattern:$0x75316420] }
0x316f   :  { %7082 = vmatmul.msk.f32.vlgmr.msra.gmra.mxu0 %vm1101_vm4, %v6682_v18 }
0x31ec   :  { %v6702_v26 = vpop.f32.mrf.mxu0 }
0x31ed   :  { %v6706_v9 = vrot.slane %v6702_v26, 4  ;;  %v6711_v50 = vadd.f32 %v7275_v15, %v6702_v26 }
0x31ef   :  { %v6712_v37 = vadd.f32 %v7275_v15, %v6706_v9  ;;  %v6713_v31 = vadd.f32 %v6711_v50, %v11101_v46 }
0x31f1   :  { %v6715_v20 = vsel %vm6134_vm10, %v6713_v31, 0.0  ;;  %v6714_v12 = vadd.f32 %v6712_v37, %v11106_v32  ;;  %v6125_v32 = vld.sshfl [vmem:[#allocation1 + $0x20] sm:$0xff pattern:$0x75316420] }
0x31f2   :  { %6716 = vadd.xlane.f32.xlu2 %v6715_v20  ;;  %v6138_v5 = vsel %vm1101_vm4, %v6125_v32, 0.0  ;;  %v993_v32 = vld [vmem:[%s11377_s5 + $0x78] sm:$0xff] }
0x31f3   :  { %v6718_v42 = vsel %vm6134_vm10, %v6714_v12, 0.0  ;;  %6819 = vmatpush.msrb.mxu1 %v993_v32 }
0x31f4   :  { %6719 = vadd.xlane.f32.xlu0 %v6718_v42 }
0x3265   :  { %v6717_v23 = vpop.xlane.xlu2 %6716 }
0x3266   :  { %v6721_v19 = vmul.f32 %v6717_v23, %v9433_v25 }
0x3267   :  { %v6720_v7 = vpop.xlane.xlu0 %6719 }
0x3268   :  { %v6723_v57 = vsub.f32 %v6713_v31, %v6721_v19  ;;  %v6722_v13 = vmul.f32 %v6720_v7, %v9433_v25 }
0x326a   :  { %v6724_v27 = vsub.f32 %v6714_v12, %v6722_v13  ;;  %v6725_v53 = vmul.f32 %v6723_v57, %v6723_v57 }
0x326c   :  { %v6727_v4 = vsel %vm6134_vm10, %v6725_v53, 0.0  ;;  %v6726_v46 = vmul.f32 %v6724_v27, %v6724_v27  ;;  %v11378_v53 = vld [vmem:[#allocation148_spill] sm:$0xff] }
0x326d   :  { %6728 = vadd.xlane.f32.xlu2 %v6727_v4  ;;  %v11379_v4 = vrot.slane %v11378_v53, 4 }
0x326e   :  { %v6730_v55 = vsel %vm6134_vm10, %v6726_v46, 0.0 }
0x326f   :  { %6731 = vadd.xlane.f32.xlu0 %v6730_v55 }
0x3277   :  { %6139 = vadd.xlane.f32.xlu0 %v6138_v5  ;;  %v992_v5 = vld [vmem:[%s11377_s5 + $0x70] sm:$0xff] }
0x3278   :  { %6820 = vmatpush.msrb.mxu1 %v992_v5 }
0x32e0   :  { %v6729_v58 = vpop.xlane.xlu2 %6728 }
0x32e1   :  { %v6733_v59 = vmul.f32 %v6729_v58, %v9433_v25  ;;  %v991_v58 = vld [vmem:[%s11377_s5 + $0x68] sm:$0xff] }
0x32e2   :  { %v6732_v61 = vpop.xlane.xlu0 %6731  ;;  %6821 = vmatpush.msrb.mxu1 %v991_v58 }
0x32e3   :  { %v6735_v24 = vadd.f32 1e-05, %v6733_v59  ;;  %v6734_v1 = vmul.f32 %v6732_v61, %v9433_v25  ;;  %v990_v59 = vld [vmem:[%s11377_s5 + $0x60] sm:$0xff]  ;;  %v989_v61 = vld [vmem:[%s11377_s5 + $0x58] sm:$0xff] }
0x32e4   :  { %6822 = vmatpush.msrb.mxu1 %v990_v59 }
0x32e5   :  { %7525 = vrsqrt.f32 %v6735_v24  ;;  %v6736_v0 = vadd.f32 1e-05, %v6734_v1  ;;  %vm6743_vm13 = vweird.f32 %v6735_v24  ;;  %v987_v1 = vld [vmem:[%s11377_s5 + $0x48] sm:$0xff] }
0x32e6   :  { %6823 = vmatpush.msrb.mxu1 %v989_v61 }
0x32e7   :  { %7527 = vrsqrt.f32 %v6736_v0  ;;  %vm6753_vm11 = vweird.f32 %v6736_v0 }
0x32ea   :  { %v6140_v44 = vpop.xlane.xlu0 %6139 }
0x32eb   :  { %v7526_v36 = vpop.eup %7525  ;;  %v6146_v28 = vmul.f32 %v6140_v44, %v9433_v25  ;;  %v985_v44 = vld [vmem:[%s11377_s5 + $0x38] sm:$0xff] }
0x32ec   :  { %v6738_v52 = vmul.f32 %v7526_v36, %v6735_v24  ;;  %vm6744_vm10 = vweird.f32 %v7526_v36  ;;  %v988_v24 = vld [vmem:[%s11377_s5 + $0x50] sm:$0xff] }
0x32ed   :  { %v7528_v40 = vpop.eup %7527  ;;  %v6167_v11 = vperm.slane %v6146_v28, %v11007_v60  ;;  %v6171_v43 = vperm.slane %v6146_v28, %v11018_v29  ;;  %vm6745_vm3 = vmor %vm6743_vm13, %vm6744_vm10  ;;  %6824 = vmatpush.msrb.mxu1 %v988_v24  ;;  %v983_v28 = vld [vmem:[%s11377_s5 + $0x28] sm:$0xff] }
0x32ee   :  { %v6739_v56 = vmul.f32 %v7526_v36, %v6738_v52  ;;  %v6748_v38 = vmul.f32 %v7528_v40, %v6736_v0  ;;  %vm6754_vm14 = vweird.f32 %v7528_v40  ;;  %v986_v0 = vld [vmem:[%s11377_s5 + $0x40] sm:$0xff] }
0x32ef   :  { %v11139_v10 = vsub.f32 %v10996_v34, %v6167_v11  ;;  %v11142_v16 = vsub.f32 %v11000_v51, %v6171_v43  ;;  %v7276_v51 = vld [vmem:[%s11375_s19] ss:$0 sm:$0xff]  ;;  %vm6755_vm15 = vmor %vm6753_vm11, %vm6754_vm14  ;;  %6825 = vmatpush.msrb.mxu1 %v987_v1  ;;  %v980_v11 = vld [vmem:[%s11377_s5 + $0x10] sm:$0xff] }
0x32f0   :  { %v6740_v45 = vmul.f32 0.5, %v6739_v56  ;;  %v6749_v6 = vmul.f32 %v7528_v40, %v6748_v38  ;;  %v982_v52 = vld [vmem:[%s11377_s5 + $0x20] sm:$0xff]  ;;  %v979_v43 = vld [vmem:[%s11377_s5 + $0x8] sm:$0xff] }
0x32f1   :  { %v6191_v33 = vmul.f32 %v11139_v10, %v11139_v10  ;;  %v6192_v62 = vmul.f32 %v11142_v16, %v11142_v16  ;;  %6826 = vmatpush.msrb.mxu1 %v986_v0  ;;  %v978_v56 = vld [vmem:[%s11377_s5] sm:$0xff] }
0x32f2   :  { %v6741_v49 = vsub.f32 1.5, %v6740_v45  ;;  %v6750_v17 = vmul.f32 0.5, %v6749_v6 }
0x32f3   :  { %6208 = vst [vmem:[#allocation1 + $0x20] ss:$2 sm:$0xff] %v6191_v33  ;;  %6827 = vmatpush.msrb.mxu1 %v985_v44 }
0x32f4   :  { %v6742_v30 = vmul.f32 %v7526_v36, %v6741_v49  ;;  %v6751_v34 = vsub.f32 1.5, %v6750_v17  ;;  %6210 = vst [vmem:[#allocation1 + $0x21] ss:$2 sm:$0xff] %v6192_v62 }
0x32f6   :  { %v6746_v39 = vsel %vm6745_vm3, %v7526_v36, %v6742_v30  ;;  %v6752_v41 = vmul.f32 %v7528_v40, %v6751_v34  ;;  %v984_v36 = vld [vmem:[%s11377_s5 + $0x30] sm:$0xff] }
0x32f7   :  { %v6757_v63 = vmul.f32 %v6746_v39, %v6723_v57  ;;  %6828 = vmatpush.msrb.mxu1 %v984_v36 }
0x32f8   :  { %v6756_v22 = vsel %vm6755_vm15, %v7528_v40, %v6752_v41  ;;  %v981_v40 = vld [vmem:[%s11377_s5 + $0x18] sm:$0xff] }
0x32f9   :  { %v6762_v8 = vmul.f32 %v7276_v51, %v6757_v63  ;;  %v6758_v35 = vmul.f32 %v6756_v22, %v6724_v27  ;;  %6829 = vmatpush.msrb.mxu1 %v983_v28 }
0x32fb   :  { %v6763_v18 = vmul.f32 %v7276_v51, %v6758_v35  ;;  %v6767_v15 = vadd.f32 %v7277_v21, %v6762_v8  ;;  %v6213_v46 = vld.sshfl [vmem:[#allocation1 + $0x20] sm:$0xff pattern:$0x75316420]  ;;  %6830 = vmatpush.msrb.mxu1 %v982_v52 }
0x32fc   :  { %v6225_v55 = vsel %vm1101_vm4, %v6213_v46, 0.0 }
0x32fd   :  { %v6772_v26 = vadd.f32 %v7277_v21, %v6763_v18  ;;  %v6771_v50 = vperm.slane %v6767_v15, %v9291_v2  ;;  %6831 = vmatpush.msrb.mxu1 %v981_v40 }
0x32ff   :  { %v6776_v9 = vperm.slane %v6772_v26, %v9291_v2  ;;  %v6779_v42 = vrot.slane %v6771_v50, 4  ;;  %6832 = vmatpush.msrb.mxu1 %v980_v11 }
0x3301   :  { %v6777_v37 = vrot.slane %v6776_v9, 4  ;;  %v6780_v19 = vsel %vm1252_vm2, %v6776_v9, %v6779_v42  ;;  %6833 = vmatpush.msrb.mxu1 %v979_v43 }
0x3302   :  { %v6788_v7 = vperm.slane %v6780_v19, %v9303_v14  ;;  %v7278_v19 = vld [vmem:[#allocation18] ss:$0 sm:$0xff] }
0x3303   :  { %v6778_v31 = vsel %vm1252_vm2, %v6777_v37, %v6771_v50  ;;  %6834 = vmatpush.msrb.mxu1 %v978_v56 }
0x3304   :  { %v6784_v20 = vperm.slane %v6778_v31, %v9303_v14  ;;  %v6791_v2 = vrot.slane %v6788_v7, 4 }
0x3306   :  { %v6789_v12 = vrot.slane %v6784_v20, 4  ;;  %v6792_v13 = vsel %vm1252_vm2, 0.0, %v6791_v2 }
0x3308   :  { %v6790_v23 = vsel %vm1252_vm2, 0.0, %v6789_v12  ;;  %vm6812_vm2 = vcmask 523264  }
0x3309   :  { %6794 = vst [vmem:[#allocation1] ss:$2 sm:$0xff] %v6790_v23 }
0x3310   :  { %v6795_v57 = vld.sshfl [vmem:[#allocation1] sm:$0xff pattern:$0x75316420] }
0x3311   :  { %6796 = vrot.lane.b32.xlu1 %v6795_v57, %s8674_s28  ;;  %6800 = vst [vmem:[#allocation1] ss:$2 sm:$0xff] %v6788_v7 }
0x3318   :  { %v6801_v27 = vld.sshfl [vmem:[#allocation1] sm:$0xff pattern:$0x75316420] }
0x3319   :  { %6347 = vrot.lane.b32.xlu1 %v11378_v53, %s8674_s28  ;;  %6802 = vrot.lane.b32.xlu2 %v6801_v27, %s8673_s14  ;;  %6806 = vst [vmem:[#allocation1] ss:$2 sm:$0xff] %v6792_v13 }
0x3320   :  { %v6807_v14 = vld.sshfl [vmem:[#allocation1] sm:$0xff pattern:$0x75316420] }
0x3321   :  { %6349 = vrot.lane.b32.xlu2 %v11379_v4, %s8674_s28  ;;  %6808 = vrot.lane.b32.xlu0 %v6807_v14, %s8678_s27 }
0x334b   :  { %6226 = vadd.xlane.f32.xlu0 %v6225_v55 }
0x3373   :  { %v6803_v6 = vpop.permute.xlu2 %6802 }
0x3383   :  { %v6797_v38 = vpop.permute.xlu1 %6796 }
0x3384   :  { %v6811_v45 = vsel %vm1101_vm4, %v6784_v20, %v6797_v38  ;;  %v6350_v20 = vpop.permute.xlu2 %6349 }
0x3385   :  { %v6813_v33 = vsel %vm6812_vm2, %v6811_v45, %v6803_v6 }
0x338b   :  { %v6348_v12 = vpop.permute.xlu1 %6347 }
0x3393   :  { %v6809_v62 = vpop.permute.xlu0 %6808 }
0x3394   :  { %v6815_v49 = vsel %vm6814_vm0, %v6813_v33, %v6809_v62 }
0x3395   :  { %6835 = vmatmul.f32.vlgmr.msrb.gmra.mxu1 %v6815_v49 }
0x33be   :  { %v6227_v17 = vpop.xlane.xlu0 %6226 }
0x33bf   :  { %v6233_v30 = vmul.f32 %v6227_v17, %v9433_v25 }
0x33c1   :  { %v6237_v34 = vadd.f32 1e-05, %v6233_v30 }
0x33c3   :  { %7529 = vrsqrt.f32 %v6237_v34  ;;  %vm6265_vm6 = vweird.f32 %v6237_v34 }
0x33c9   :  { %v7530_v51 = vpop.eup %7529 }
0x33ca   :  { %v6260_v39 = vmul.f32 %v7530_v51, %v6237_v34  ;;  %vm6266_vm5 = vweird.f32 %v7530_v51 }
0x33cb   :  { %vm6267_vm7 = vmor %vm6265_vm6, %vm6266_vm5 }
0x33cc   :  { %v6261_v41 = vmul.f32 %v7530_v51, %v6260_v39 }
0x33ce   :  { %v6262_v63 = vmul.f32 0.5, %v6261_v41 }
0x33d0   :  { %v6263_v22 = vsub.f32 1.5, %v6262_v63 }
0x33d2   :  { %v6264_v21 = vmul.f32 %v7530_v51, %v6263_v22 }
0x33d4   :  { %v6268_v8 = vsel %vm6267_vm7, %v7530_v51, %v6264_v21 }
0x33d5   :  { %v6298_v35 = vperm.slane %v6268_v8, %v11007_v60  ;;  %v6302_v18 = vperm.slane %v6268_v8, %v11018_v29 }
0x33d7   :  { %v6316_v15 = vmul.f32 %v6298_v35, %v11139_v10  ;;  %v6317_v26 = vmul.f32 %v6302_v18, %v11142_v16 }
0x33d9   :  { %v6327_v9 = vmul.f32 %v11045_v47, %v6316_v15  ;;  %v6328_v50 = vmul.f32 %v6322_v54, %v6317_v26 }
0x33db   :  { %v6338_v37 = vadd.f32 %v11048_v3, %v6327_v9  ;;  %v6339_v31 = vadd.f32 %v6333_v48, %v6328_v50 }
0x33dd   :  { %v6362_v42 = vadd.f32 %v6348_v12, %v6338_v37  ;;  %v6363_v23 = vadd.f32 %v6350_v20, %v6339_v31 }
0x33df   :  { %6379 = vst [vmem:[#allocation1 + $0x20] ss:$2 sm:$0xff] %v6362_v42 }
0x33e0   :  { %6381 = vst [vmem:[#allocation1 + $0x21] ss:$2 sm:$0xff] %v6363_v23 }
0x33e7   :  { %v6384_v10 = vld.sshfl [vmem:[#allocation1 + $0x20] sm:$0xff pattern:$0x75316420] }
0x33e8   :  { %v6396_v16 = vsel %vm1101_vm4, %v6384_v10, 0.0 }
0x33e9   :  { %6397 = vadd.xlane.f32.xlu1 %v6396_v16 }
0x3412   :  { %v6836_v7 = vpop.f32.mrf.mxu1 }
0x3413   :  { %v6837_v47 = vadd.f32 %v7278_v19, %v6836_v7 }
0x3415   :  { %6840 = vst.msk [vmem:[%s9089_s30] sm:$0x3] %vm6839_vm9, %v6837_v47 }
0x345c   :  { %v6398_v54 = vpop.xlane.xlu1 %6397 }
0x345d   :  { %v6404_v57 = vmul.f32 %v6398_v54, %v9433_v25 }
0x345f   :  { %v6425_v3 = vperm.slane %v6404_v57, %v11007_v60  ;;  %v6429_v48 = vperm.slane %v6404_v57, %v11018_v29 }
0x3461   :  { %v6443_v2 = vsub.f32 %v6362_v42, %v6425_v3  ;;  %v6444_v13 = vsub.f32 %v6363_v23, %v6429_v48 }
0x3463   :  { %v6449_v27 = vmul.f32 %v6443_v2, %v6443_v2  ;;  %v6450_v53 = vmul.f32 %v6444_v13, %v6444_v13 }
0x3465   :  { %6465 = vst [vmem:[#allocation1 + $0x20] ss:$2 sm:$0xff] %v6449_v27 }
0x3466   :  { %6467 = vst [vmem:[#allocation1 + $0x21] ss:$2 sm:$0xff] %v6450_v53 }
0x3467   :  { %6845 = vsyncpa [#allocation3], 1 }
0x3468   :  { %6846 = vsyncpa [#allocation5], 1 }
0x3469   :  { %6847 = vsyncpa [#allocation8], 1 }
0x346a   :  { %6848 = vsyncpa [#allocation11], 1 }
0x346b   :  { %6849 = vsyncpa [#allocation14], 1 }
0x346c   :  { %6850 = vsyncpa [#allocation17], 1 }
0x346d   :  { %6851 = vsyncpa [#allocation20], 1 }
0x346e   :  { %6852 = vsyncpa [#allocation23], 1 }
0x346f   :  { %6853 = vsyncpa [#allocation26], 1 }
0x3470   :  { %6854 = vsyncpa [#allocation29], 1 }
0x3471   :  { %6855 = vsyncpa [#allocation32], 1 }
0x3472   :  { %6856 = vsyncpa [#allocation35], 1 }
0x3473   :  { %6857 = vsyncpa [#allocation38], 1 }
0x3474   :  { %6858 = vsyncpa [#allocation41], 1 }
0x3475   :  { %6859 = vsyncpa [#allocation44], 1 }
0x3476   :  { %6860 = vsyncpa [#allocation47], 1 }
0x3477   :  { %6861 = vsyncpa [#allocation50], 1 }
0x3478   :  { %6862 = vsyncpa [#allocation53], 1 }
0x3479   :  { %6863 = vsyncpa [#allocation56], 1 }
0x347a   :  { %6864 = vsyncpa [#allocation59], 1 }
0x347b   :  { %6865 = vsyncpa [#allocation62], 1 }

</bundles_post_ra>
